<compile_context>
chip_gen: v7x
topology: tpu7x:2x2x1
jax: 0.10.0
libtpu: 0.0.40
codegen_flags: <defaults>
</compile_context>

<pallas_src>
import functools
import math

import jax
import jax.numpy as jnp
from jax.experimental import pallas as pl
from jax.experimental.pallas import tpu as pltpu


ACT_DTYPE = jnp.bfloat16                 # inter-layer activation / weight dtype
_VMEM_LIMIT = 40 * 1024 * 1024           # <= ~40 MiB: safe on v7x (64 MiB VMEM)
_BN_EPS = 1e-5


# ----------------------------- tiling helpers ------------------------------

def _pick_tile(extent, target=1024):
    """Largest 128-multiple tile that divides `extent`, is <= `target`, and
    yields >= 2 blocks whenever extent >= 256 (so v7x's 2 TensorCores both get
    work on the 'parallel' M axis).  Falls back to the full extent for small /
    non-128 sizes (full-extent blocks are always legal)."""
    if extent < 256 or extent % 128 != 0:
        return extent
    cap = min(target, extent // 2)
    cap = max(128, cap - (cap % 128))
    t = cap
    while extent % t:
        t -= 128
    return t


def _to_nchw(x_cm, shape):
    N, H, W = shape
    C = x_cm.shape[0]
    return x_cm.astype(jnp.float32).reshape(C, N, H, W).transpose(1, 0, 2, 3)


# ---------------- fused (chunked) BN+ReLU + conv matmul + BN-stats ----------

def _make_conv_kernel(n_chunks, offs, sizes, affine, relu):
    """Kernel: o = W @ act(scale * concat(chunks) + shift), plus per-tile
    per-channel sum / sum-of-squares of the (f32) output for the consumer BN.
    The concat never exists: chunks are separate VMEM tiles, W / scale / shift
    are fully VMEM-resident and sliced per chunk at static offsets."""
    def kernel(*refs):
        x_refs = refs[:n_chunks]
        w_ref = refs[n_chunks]
        if affine:
            s_ref, b_ref = refs[n_chunks + 1], refs[n_chunks + 2]
            o_ref, sum_ref, sq_ref = refs[n_chunks + 3:n_chunks + 6]
        else:
            o_ref, sum_ref, sq_ref = refs[n_chunks + 1:n_chunks + 4]

        acc = None
        for j in range(n_chunks):
            lo, hi = offs[j], offs[j] + sizes[j]
            x = x_refs[j][...]                              # (C_j, tm) bf16
            if affine:                                      # folded BatchNorm
                xf = x.astype(jnp.float32) * s_ref[lo:hi, :] + b_ref[lo:hi, :]
                if relu:
                    xf = jnp.maximum(xf, 0.0)
                x = xf.astype(jnp.bfloat16)
            elif relu:
                x = jnp.maximum(x, 0)
            part = jnp.dot(w_ref[:, lo:hi], x,              # bf16 MXU, f32 acc
                           preferred_element_type=jnp.float32)
            acc = part if acc is None else acc + part

        o_ref[...] = acc.astype(o_ref.dtype)
        # per-tile BN statistics of the output (train-mode stats for consumer)
        sum_ref[0] = jnp.sum(acc, axis=1, keepdims=True)
        sq_ref[0] = jnp.sum(acc * acc, axis=1, keepdims=True)
    return kernel


def fused_conv_matmul(chunks, w2d, scale=None, shift=None, *, relu=False):
    """out (Cout, M) = w2d (Cout, K) @ act(scale * concat(chunks) + shift).

    chunks: list of channel-major (C_j, M) bf16 arrays (sum C_j == K).
    Returns (out bf16, per-channel sum (Cout,), per-channel sumsq (Cout,))."""
    M = chunks[0].shape[1]
    sizes = [c.shape[0] for c in chunks]
    offs = [0]
    for s in sizes[:-1]:
        offs.append(offs[-1] + s)
    K = sum(sizes)
    Cout = w2d.shape[0]
    affine = scale is not None

    tm = _pick_tile(M)
    G = M // tm
    n = len(chunks)

    in_specs = [pl.BlockSpec((sizes[j], tm), lambda i: (0, i)) for j in range(n)]
    in_specs.append(pl.BlockSpec((Cout, K), lambda i: (0, 0)))   # W: VMEM-resident
    args = list(chunks) + [w2d]
    if affine:
        in_specs += [pl.BlockSpec((K, 1), lambda i: (0, 0)),
                     pl.BlockSpec((K, 1), lambda i: (0, 0))]
        args += [scale.reshape(K, 1).astype(jnp.float32),
                 shift.reshape(K, 1).astype(jnp.float32)]

    kern = _make_conv_kernel(n, offs, sizes, affine, relu)
    cost = pl.CostEstimate(
        flops=2 * Cout * K * M, transcendentals=0,
        bytes_accessed=2 * (K * M + Cout * K + Cout * M) + 8 * K + 8 * G * Cout)

    out, ssum, ssq = pl.pallas_call(
        kern,
        out_shape=(jax.ShapeDtypeStruct((Cout, M), ACT_DTYPE),
                   jax.ShapeDtypeStruct((G, Cout, 1), jnp.float32),
                   jax.ShapeDtypeStruct((G, Cout, 1), jnp.float32)),
        grid=(G,),
        in_specs=in_specs,
        out_specs=(pl.BlockSpec((Cout, tm), lambda i: (0, i)),
                   pl.BlockSpec((1, Cout, 1), lambda i: (i, 0, 0)),
                   pl.BlockSpec((1, Cout, 1), lambda i: (i, 0, 0))),
        compiler_params=pltpu.CompilerParams(
            dimension_semantics=("parallel",),
            vmem_limit_bytes=_VMEM_LIMIT),
        cost_estimate=cost,
    )(*args)
    return out, jnp.sum(ssum[:, :, 0], axis=0), jnp.sum(ssq[:, :, 0], axis=0)


# -------------------- BatchNorm folding from fused statistics ---------------

def fold_bn(stats, sizes, M, gamma, beta, eps=_BN_EPS):
    """Per-chunk train-mode BN folded to per-channel scale/shift, concatenated
    in chunk order (matches the chunked matmul's channel layout)."""
    scales, shifts = [], []
    off = 0
    for cj, (s, sq) in zip(sizes, stats):
        mean = s / M
        var = sq / M - mean * mean                 # biased (train-mode) variance
        sc = gamma[off:off + cj] * jax.lax.rsqrt(var + eps)
        sh = beta[off:off + cj] - mean * sc
        scales.append(sc)
        shifts.append(sh)
        off += cj
    if len(scales) == 1:
        return scales[0], shifts[0]
    return jnp.concatenate(scales), jnp.concatenate(shifts)


# ----------------------- standalone BN-apply kernels ------------------------

def _affine_kernel(x_ref, s_ref, b_ref, o_ref, *, relu):
    y = x_ref[...].astype(jnp.float32) * s_ref[...] + b_ref[...]
    if relu:
        y = jnp.maximum(y, 0.0)
    o_ref[...] = y.astype(o_ref.dtype)


def _affine_dual_kernel(x_ref, s_ref, b_ref, o_ref, r_ref):
    y = x_ref[...].astype(jnp.float32) * s_ref[...] + b_ref[...]
    o_ref[...] = y.astype(o_ref.dtype)           # norm output
    r_ref[...] = jnp.maximum(y, 0.0).astype(r_ref.dtype)   # relu output (fused)


def bn_apply(x_cm, scale, shift, *, mode):
    """mode: 'norm' (BN only), 'relu' (BN+ReLU), 'both' (returns (norm, relu))."""
    C, M = x_cm.shape
    tm = _pick_tile(M)
    grid = (M // tm,)
    in_specs = [pl.BlockSpec((C, tm), lambda i: (0, i)),
                pl.BlockSpec((C, 1), lambda i: (0, 0)),
                pl.BlockSpec((C, 1), lambda i: (0, 0))]
    cp = pltpu.CompilerParams(dimension_semantics=("parallel",),
                              vmem_limit_bytes=_VMEM_LIMIT)
    args = (x_cm, scale.reshape(C, 1).astype(jnp.float32),
            shift.reshape(C, 1).astype(jnp.float32))
    if mode == "both":
        return pl.pallas_call(
            _affine_dual_kernel,
            out_shape=(jax.ShapeDtypeStruct((C, M), ACT_DTYPE),
                       jax.ShapeDtypeStruct((C, M), ACT_DTYPE)),
            grid=grid, in_specs=in_specs,
            out_specs=(pl.BlockSpec((C, tm), lambda i: (0, i)),
                       pl.BlockSpec((C, tm), lambda i: (0, i))),
            compiler_params=cp,
        )(*args)
    kern = functools.partial(_affine_kernel, relu=(mode == "relu"))
    return pl.pallas_call(
        kern,
        out_shape=jax.ShapeDtypeStruct((C, M), ACT_DTYPE),
        grid=grid, in_specs=in_specs,
        out_specs=pl.BlockSpec((C, tm), lambda i: (0, i)),
        compiler_params=cp,
    )(*args)


# --------------------------------- pooling ----------------------------------

def _pool_kernel(x_ref, o_ref, sum_ref, sq_ref, *, op, inv):
    x = x_ref[...].astype(jnp.float32)            # (k*k, C, tm)
    if op == "max":
        y = jnp.max(x, axis=0)
    else:
        y = jnp.sum(x, axis=0) * inv
    o_ref[...] = y.astype(o_ref.dtype)
    # fused BN statistics of the pooled output (consumed by the next norm)
    sum_ref[0] = jnp.sum(y, axis=1, keepdims=True)
    sq_ref[0] = jnp.sum(y * y, axis=1, keepdims=True)


def pool2d(x_cm, shape, *, k, stride, pad, op):
    C = x_cm.shape[0]
    N, H, W = shape
    x4 = x_cm.reshape(C, N, H, W)
    if pad:
        pad_val = -jnp.inf if op == "max" else 0.0
        x4 = jnp.pad(x4, ((0, 0), (0, 0), (pad, pad), (pad, pad)),
                     constant_values=pad_val)
    Ho = (H + 2 * pad - k) // stride + 1
    Wo = (W + 2 * pad - k) // stride + 1
    # TODO(synk): gather the k*k window taps in-kernel (halo'd blocks) instead
    # of this k^2x XLA stack.
    wins = [x4[:, :, i:i + stride * Ho:stride, j:j + stride * Wo:stride]
            for i in range(k) for j in range(k)]
    stacked = jnp.stack(wins, axis=0).reshape(k * k, C, N * Ho * Wo)
    Mo = N * Ho * Wo
    tm = _pick_tile(Mo)
    G = Mo // tm
    kern = functools.partial(_pool_kernel, op=op, inv=1.0 / (k * k))
    out, ssum, ssq = pl.pallas_call(
        kern,
        out_shape=(jax.ShapeDtypeStruct((C, Mo), ACT_DTYPE),
                   jax.ShapeDtypeStruct((G, C, 1), jnp.float32),
                   jax.ShapeDtypeStruct((G, C, 1), jnp.float32)),
        grid=(G,),
        in_specs=[pl.BlockSpec((k * k, C, tm), lambda i: (0, 0, i))],
        out_specs=(pl.BlockSpec((C, tm), lambda i: (0, i)),
                   pl.BlockSpec((1, C, 1), lambda i: (i, 0, 0)),
                   pl.BlockSpec((1, C, 1), lambda i: (i, 0, 0))),
        compiler_params=pltpu.CompilerParams(
            dimension_semantics=("parallel",),
            vmem_limit_bytes=_VMEM_LIMIT),
    )(stacked)
    stats = (jnp.sum(ssum[:, :, 0], axis=0), jnp.sum(ssq[:, :, 0], axis=0))
    return out, stats, (N, Ho, Wo)


# ------------------------------- im2col (XLA) --------------------------------

def _im2col_cm(x_cm, shape, kh, kw, stride, pad):
    """(C, N*H*W) -> (C*kh*kw, N*Ho*Wo); rows ordered (c, dy, dx) to match the
    PyTorch (Cout, Cin, kh, kw) weight flattening.  The input is the ALREADY
    activated (post BN+ReLU) map, so zero padding here is exactly PyTorch's
    Conv2d padding semantics.
    TODO(synk): form taps in-kernel via halo'd blocks to avoid the k^2 blowup."""
    C = x_cm.shape[0]
    N, H, W = shape
    x4 = x_cm.reshape(C, N, H, W)
    xp = jnp.pad(x4, ((0, 0), (0, 0), (pad, pad), (pad, pad)))
    Ho = (H + 2 * pad - kh) // stride + 1
    Wo = (W + 2 * pad - kw) // stride + 1
    taps = [xp[:, :, i:i + stride * Ho:stride, j:j + stride * Wo:stride]
            for i in range(kh) for j in range(kw)]
    p = jnp.stack(taps, axis=1)                       # (C, kh*kw, N, Ho, Wo)
    return p.reshape(C * kh * kw, N * Ho * Wo), (N, Ho, Wo)


# --------------------------- parameter creation -----------------------------

def _conv_init(key, cout, cin, kh, kw):
    fan_in = cin * kh * kw
    std = math.sqrt(2.0 / fan_in)
    w = std * jax.random.normal(key, (cout, cin, kh, kw), jnp.float32)
    # stored as (Cout, Cin*kh*kw) bf16, rows ordered (cin, dy, dx) == im2col
    return w.reshape(cout, fan_in).astype(ACT_DTYPE)


def _bn_params(c):
    return {"gamma": jnp.ones((c,), jnp.float32),
            "beta": jnp.zeros((c,), jnp.float32)}


def init_encoder_params(key, *, in_channels=3, init_features=16, growth=8,
                        bn_size=4, block_config=(2, 2, 2, 2)):
    keys = iter(jax.random.split(key, 256))
    p = {"conv0": _conv_init(next(keys), init_features, in_channels, 7, 7),
         "norm0": _bn_params(init_features),
         "blocks": [], "transitions": []}
    num_feat = init_features
    for bi, nlayers in enumerate(block_config):
        layers = []
        for li in range(nlayers):
            cin = num_feat + li * growth
            layers.append({
                "norm1": _bn_params(cin),
                "conv1": _conv_init(next(keys), bn_size * growth, cin, 1, 1),
                "norm2": _bn_params(bn_size * growth),
                "conv2": _conv_init(next(keys), growth, bn_size * growth, 3, 3),
            })
        p["blocks"].append(layers)
        num_feat += nlayers * growth
        if bi != len(block_config) - 1:
            p["transitions"].append({
                "norm": _bn_params(num_feat),
                "conv": _conv_init(next(keys), num_feat // 2, num_feat, 1, 1),
            })
            num_feat //= 2
    p["norm5"] = _bn_params(num_feat)
    return p


# ------------------------------ forward pass --------------------------------

def dense_layer(lp, chunks, stats, M, shape):
    """norm1 -> relu1 -> conv1(1x1) -> norm2 -> relu2 -> conv2(3x3, pad 1).
    `chunks` is the never-concatenated channel-major feature list; `stats` are
    the per-chunk (sum, sumsq) emitted by their producers."""
    sizes = [c.shape[0] for c in chunks]
    s1, b1 = fold_bn(stats, sizes, M, lp["norm1"]["gamma"], lp["norm1"]["beta"])
    y, ysum, ysq = fused_conv_matmul(chunks, lp["conv1"], s1, b1, relu=True)

    s2, b2 = fold_bn([(ysum, ysq)], [y.shape[0]], M,
                     lp["norm2"]["gamma"], lp["norm2"]["beta"])
    a = bn_apply(y, s2, b2, mode="relu")       # BN+ReLU BEFORE zero padding
    patches, _ = _im2col_cm(a, shape, 3, 3, 1, 1)
    z, zsum, zsq = fused_conv_matmul([patches], lp["conv2"])
    return z, (zsum, zsq)


def transition(tp, chunks, stats, M, shape):
    sizes = [c.shape[0] for c in chunks]
    s, b = fold_bn(stats, sizes, M, tp["norm"]["gamma"], tp["norm"]["beta"])
    y, _, _ = fused_conv_matmul(chunks, tp["conv"], s, b, relu=True)
    return pool2d(y, shape, k=2, stride=2, pad=0, op="avg")


def encoder_forward(params, images):
    """Returns the list of all feature maps, exactly like Encoder.forward."""
    N, C, H, W = images.shape
    x_cm = images.transpose(1, 0, 2, 3).reshape(C, N * H * W).astype(ACT_DTYPE)
    shape = (N, H, W)
    fmaps = [images]                                            # input

    # conv0 (7x7, stride 2, pad 3) — per-channel output stats feed norm0
    patches, shape = _im2col_cm(x_cm, shape, 7, 7, 2, 3)
    x, xsum, xsq = fused_conv_matmul([patches], params["conv0"])
    M = x.shape[1]
    fmaps.append(_to_nchw(x, shape))                            # conv0

    s0, b0 = fold_bn([(xsum, xsq)], [x.shape[0]], M,
                     params["norm0"]["gamma"], params["norm0"]["beta"])
    norm0, relu0 = bn_apply(x, s0, b0, mode="both")
    fmaps.append(_to_nchw(norm0, shape))                        # norm0
    fmaps.append(_to_nchw(relu0, shape))                        # relu0

    p, pstats, shape = pool2d(relu0, shape, k=3, stride=2, pad=1, op="max")
    M = p.shape[1]
    fmaps.append(_to_nchw(p, shape))                            # pool0

    chunks, stats = [p], [pstats]
    block_cm = p
    for bi, bp in enumerate(params["blocks"]):
        for lp in bp:
            z, zst = dense_layer(lp, chunks, stats, M, shape)
            chunks.append(z)                  # chunk list — no HBM concat here
            stats.append(zst)
        block_cm = jnp.concatenate(chunks, axis=0)      # once per block (fmap)
        fmaps.append(_to_nchw(block_cm, shape))         # denseblock{bi+1}
        if bi < len(params["transitions"]):
            p, pstats, shape = transition(params["transitions"][bi],
                                          chunks, stats, M, shape)
            M = p.shape[1]
            fmaps.append(_to_nchw(p, shape))            # transition{bi+1}
            chunks, stats = [p], [pstats]

    sizes = [c.shape[0] for c in chunks]
    s5, b5 = fold_bn(stats, sizes, M,
                     params["norm5"]["gamma"], params["norm5"]["beta"])
    n5 = bn_apply(block_cm, s5, b5, mode="norm")
    fmaps.append(_to_nchw(n5, shape))                           # norm5
    return fmaps


# ---------------------------------- main ------------------------------------

if __name__ == "__main__":
    images = jax.random.normal(jax.random.PRNGKey(0), (2, 3, 64, 64),
                               jnp.float32)
    params = init_encoder_params(jax.random.PRNGKey(42))

    fwd = jax.jit(encoder_forward)
    fmaps = jax.block_until_ready(fwd(params, images))

    # 1 input + 12 feature modules (conv0, norm0, relu0, pool0, 4 blocks,
    # 3 transitions, norm5) = 13 feature maps
    assert len(fmaps) == 13, len(fmaps)
    assert fmaps[0].shape == (2, 3, 64, 64)
    assert fmaps[1].shape == (2, 16, 32, 32)
    assert fmaps[4].shape == (2, 16, 16, 16)
    assert fmaps[-1].shape == (2, 32, 2, 2)
    assert all(bool(jnp.all(jnp.isfinite(f))) for f in fmaps)
    print("KERNEL_OK")
</pallas_src>

<mosaic_0001>
module attributes {stable_mosaic.version = 11 : i64} {
  func.func @kernel(%arg0: i32, %arg1: memref<147x1024xbf16, #tpu.memory_space<vmem>>, %arg2: memref<16x147xbf16, #tpu.memory_space<vmem>>, %arg3: memref<16x1024xbf16, #tpu.memory_space<vmem>>, %arg4: memref<1x16x1xf32, #tpu.memory_space<vmem>>, %arg5: memref<1x16x1xf32, #tpu.memory_space<vmem>>) attributes {dimension_semantics = [#tpu.dimension_semantics<parallel>], iteration_bounds = array<i64: 2>, scalar_prefetch = 0 : i64, scratch_operands = 0 : i64, tpu.core_type = #tpu.core_type<tc>, window_params = [{transform_indices = @transform_0, window_bounds = array<i64: 147, 1024>}, {pipeline_mode = #tpu.pipeline_mode<synchronous>, transform_indices = @transform_1, window_bounds = array<i64: 16, 147>}, {transform_indices = @transform_2, window_bounds = array<i64: 16, 1024>}, {transform_indices = @transform_3, window_bounds = array<i64: 1, 16, 1>}, {transform_indices = @transform_4, window_bounds = array<i64: 1, 16, 1>}]} {
    %c0 = arith.constant 0 : index
    %c0_0 = arith.constant 0 : index
    %0 = vector.load %arg1[%c0, %c0_0] : memref<147x1024xbf16, #tpu.memory_space<vmem>>, vector<147x1024xbf16>
    %c0_1 = arith.constant 0 : index
    %c0_2 = arith.constant 0 : index
    %1 = vector.load %arg2[%c0_1, %c0_2] : memref<16x147xbf16, #tpu.memory_space<vmem>>, vector<16x147xbf16>
    %cst = arith.constant dense<0.000000e+00> : vector<16x1024xf32>
    %2 = tpu.matmul %1, %0, %cst {dimension_numbers = #tpu.dot_dimension_numbers<[1], [0], [0], [1], [0, 0, 1, 1], [], []>} : vector<16x147xbf16>, vector<147x1024xbf16>, vector<16x1024xf32> -> vector<16x1024xf32>
    %3 = arith.truncf %2 : vector<16x1024xf32> to vector<16x1024xbf16>
    %c0_3 = arith.constant 0 : index
    %c0_4 = arith.constant 0 : index
    %4 = vector.load %arg3[%c0_3, %c0_4] : memref<16x1024xbf16, #tpu.memory_space<vmem>>, vector<16x1024xbf16>
    tpu.vector_store %arg3[%c0_3, %c0_4], %3 {strides = array<i32>} : memref<16x1024xbf16, #tpu.memory_space<vmem>>, vector<16x1024xbf16>,
    %cst_5 = arith.constant dense<0.000000e+00> : vector<16xf32>
    %5 = vector.multi_reduction <add>, %2, %cst_5 [1] : vector<16x1024xf32> to vector<16xf32>
    %6 = vector.shape_cast %5 : vector<16xf32> to vector<16x1xf32>
    %c0_6 = arith.constant 0 : index
    %c0_7 = arith.constant 0 : index
    %c0_8 = arith.constant 0 : index
    %7 = vector.load %arg4[%c0_6, %c0_7, %c0_8] : memref<1x16x1xf32, #tpu.memory_space<vmem>>, vector<1x16x1xf32>
    %8 = vector.shape_cast %7 : vector<1x16x1xf32> to vector<16x1xf32>
    %9 = vector.shape_cast %6 : vector<16x1xf32> to vector<1x16x1xf32>
    tpu.vector_store %arg4[%c0_6, %c0_7, %c0_8], %9 {strides = array<i32>} : memref<1x16x1xf32, #tpu.memory_space<vmem>>, vector<1x16x1xf32>,
    %10 = arith.mulf %2, %2 : vector<16x1024xf32>
    %cst_9 = arith.constant dense<0.000000e+00> : vector<16xf32>
    %11 = vector.multi_reduction <add>, %10, %cst_9 [1] : vector<16x1024xf32> to vector<16xf32>
    %12 = vector.shape_cast %11 : vector<16xf32> to vector<16x1xf32>
    %c0_10 = arith.constant 0 : index
    %c0_11 = arith.constant 0 : index
    %c0_12 = arith.constant 0 : index
    %13 = vector.load %arg5[%c0_10, %c0_11, %c0_12] : memref<1x16x1xf32, #tpu.memory_space<vmem>>, vector<1x16x1xf32>
    %14 = vector.shape_cast %13 : vector<1x16x1xf32> to vector<16x1xf32>
    %15 = vector.shape_cast %12 : vector<16x1xf32> to vector<1x16x1xf32>
    tpu.vector_store %arg5[%c0_10, %c0_11, %c0_12], %15 {strides = array<i32>} : memref<1x16x1xf32, #tpu.memory_space<vmem>>, vector<1x16x1xf32>,
    return
  }
  func.func @transform_0(%arg0: i32) -> (i32, i32) {
    %c0_i32 = arith.constant 0 : i32
    %c0_i32_0 = arith.constant 0 : i32
    return %c0_i32, %arg0 : i32, i32
  }
  func.func @transform_1(%arg0: i32) -> (i32, i32) {
    %c0_i32 = arith.constant 0 : i32
    %c0_i32_0 = arith.constant 0 : i32
    %c0_i32_1 = arith.constant 0 : i32
    return %c0_i32, %c0_i32_0 : i32, i32
  }
  func.func @transform_2(%arg0: i32) -> (i32, i32) {
    %c0_i32 = arith.constant 0 : i32
    %c0_i32_0 = arith.constant 0 : i32
    return %c0_i32, %arg0 : i32, i32
  }
  func.func @transform_3(%arg0: i32) -> (i32, i32, i32) {
    %c0_i32 = arith.constant 0 : i32
    %c0_i32_0 = arith.constant 0 : i32
    %c0_i32_1 = arith.constant 0 : i32
    return %arg0, %c0_i32, %c0_i32_0 : i32, i32, i32
  }
  func.func @transform_4(%arg0: i32) -> (i32, i32, i32) {
    %c0_i32 = arith.constant 0 : i32
    %c0_i32_0 = arith.constant 0 : i32
    %c0_i32_1 = arith.constant 0 : i32
    return %arg0, %c0_i32, %c0_i32_0 : i32, i32, i32
  }
}

module attributes {stable_mosaic.version = 11 : i64} {
  func.func @_affine_dual_kernel(%arg0: i32, %arg1: memref<16x1024xbf16, #tpu.memory_space<vmem>>, %arg2: memref<16x1xf32, #tpu.memory_space<vmem>>, %arg3: memref<16x1xf32, #tpu.memory_space<vmem>>, %arg4: memref<16x1024xbf16, #tpu.memory_space<vmem>>, %arg5: memref<16x1024xbf16, #tpu.memory_space<vmem>>) attributes {dimension_semantics = [#tpu.dimension_semantics<parallel>], iteration_bounds = array<i64: 2>, scalar_prefetch = 0 : i64, scratch_operands = 0 : i64, tpu.core_type = #tpu.core_type<tc>, window_params = [{transform_indices = @transform_0, window_bounds = array<i64: 16, 1024>}, {pipeline_mode = #tpu.pipeline_mode<synchronous>, transform_indices = @transform_1, window_bounds = array<i64: 16, 1>}, {pipeline_mode = #tpu.pipeline_mode<synchronous>, transform_indices = @transform_2, window_bounds = array<i64: 16, 1>}, {transform_indices = @transform_3, window_bounds = array<i64: 16, 1024>}, {transform_indices = @transform_4, window_bounds = array<i64: 16, 1024>}]} {
    %c0 = arith.constant 0 : index
    %c0_0 = arith.constant 0 : index
    %0 = vector.load %arg1[%c0, %c0_0] : memref<16x1024xbf16, #tpu.memory_space<vmem>>, vector<16x1024xbf16>
    %1 = arith.extf %0 : vector<16x1024xbf16> to vector<16x1024xf32>
    %c0_1 = arith.constant 0 : index
    %c0_2 = arith.constant 0 : index
    %2 = vector.load %arg2[%c0_1, %c0_2] : memref<16x1xf32, #tpu.memory_space<vmem>>, vector<16x1xf32>
    %3 = vector.broadcast %2 : vector<16x1xf32> to vector<16x1024xf32>
    %4 = arith.mulf %1, %3 : vector<16x1024xf32>
    %c0_3 = arith.constant 0 : index
    %c0_4 = arith.constant 0 : index
    %5 = vector.load %arg3[%c0_3, %c0_4] : memref<16x1xf32, #tpu.memory_space<vmem>>, vector<16x1xf32>
    %6 = vector.broadcast %5 : vector<16x1xf32> to vector<16x1024xf32>
    %7 = arith.addf %4, %6 : vector<16x1024xf32>
    %8 = arith.truncf %7 : vector<16x1024xf32> to vector<16x1024xbf16>
    %c0_5 = arith.constant 0 : index
    %c0_6 = arith.constant 0 : index
    %9 = vector.load %arg4[%c0_5, %c0_6] : memref<16x1024xbf16, #tpu.memory_space<vmem>>, vector<16x1024xbf16>
    tpu.vector_store %arg4[%c0_5, %c0_6], %8 {strides = array<i32>} : memref<16x1024xbf16, #tpu.memory_space<vmem>>, vector<16x1024xbf16>,
    %cst = arith.constant 0.000000e+00 : f32
    %10 = vector.broadcast %cst : f32 to vector<16x1024xf32>
    %11 = arith.maximumf %7, %10 : vector<16x1024xf32>
    %12 = arith.truncf %11 : vector<16x1024xf32> to vector<16x1024xbf16>
    %c0_7 = arith.constant 0 : index
    %c0_8 = arith.constant 0 : index
    %13 = vector.load %arg5[%c0_7, %c0_8] : memref<16x1024xbf16, #tpu.memory_space<vmem>>, vector<16x1024xbf16>
    tpu.vector_store %arg5[%c0_7, %c0_8], %12 {strides = array<i32>} : memref<16x1024xbf16, #tpu.memory_space<vmem>>, vector<16x1024xbf16>,
    return
  }
  func.func @transform_0(%arg0: i32) -> (i32, i32) {
    %c0_i32 = arith.constant 0 : i32
    %c0_i32_0 = arith.constant 0 : i32
    return %c0_i32, %arg0 : i32, i32
  }
  func.func @transform_1(%arg0: i32) -> (i32, i32) {
    %c0_i32 = arith.constant 0 : i32
    %c0_i32_0 = arith.constant 0 : i32
    %c0_i32_1 = arith.constant 0 : i32
    return %c0_i32, %c0_i32_0 : i32, i32
  }
  func.func @transform_2(%arg0: i32) -> (i32, i32) {
    %c0_i32 = arith.constant 0 : i32
    %c0_i32_0 = arith.constant 0 : i32
    %c0_i32_1 = arith.constant 0 : i32
    return %c0_i32, %c0_i32_0 : i32, i32
  }
  func.func @transform_3(%arg0: i32) -> (i32, i32) {
    %c0_i32 = arith.constant 0 : i32
    %c0_i32_0 = arith.constant 0 : i32
    return %c0_i32, %arg0 : i32, i32
  }
  func.func @transform_4(%arg0: i32) -> (i32, i32) {
    %c0_i32 = arith.constant 0 : i32
    %c0_i32_0 = arith.constant 0 : i32
    return %c0_i32, %arg0 : i32, i32
  }
}

module attributes {stable_mosaic.version = 11 : i64} {
  func.func @_pool_kernel(%arg0: i32, %arg1: memref<9x16x256xbf16, #tpu.memory_space<vmem>>, %arg2: memref<16x256xbf16, #tpu.memory_space<vmem>>, %arg3: memref<1x16x1xf32, #tpu.memory_space<vmem>>, %arg4: memref<1x16x1xf32, #tpu.memory_space<vmem>>) attributes {dimension_semantics = [#tpu.dimension_semantics<parallel>], iteration_bounds = array<i64: 2>, scalar_prefetch = 0 : i64, scratch_operands = 0 : i64, tpu.core_type = #tpu.core_type<tc>, window_params = [{transform_indices = @transform_0, window_bounds = array<i64: 9, 16, 256>}, {transform_indices = @transform_1, window_bounds = array<i64: 16, 256>}, {transform_indices = @transform_2, window_bounds = array<i64: 1, 16, 1>}, {transform_indices = @transform_3, window_bounds = array<i64: 1, 16, 1>}]} {
    %c0 = arith.constant 0 : index
    %c0_0 = arith.constant 0 : index
    %c0_1 = arith.constant 0 : index
    %0 = vector.load %arg1[%c0, %c0_0, %c0_1] : memref<9x16x256xbf16, #tpu.memory_space<vmem>>, vector<9x16x256xbf16>
    %1 = arith.extf %0 : vector<9x16x256xbf16> to vector<9x16x256xf32>
    %cst = arith.constant dense<0xFF800000> : vector<16x256xf32>
    %2 = vector.multi_reduction <maximumf>, %1, %cst [0] : vector<9x16x256xf32> to vector<16x256xf32>
    %3 = arith.truncf %2 : vector<16x256xf32> to vector<16x256xbf16>
    %c0_2 = arith.constant 0 : index
    %c0_3 = arith.constant 0 : index
    %4 = vector.load %arg2[%c0_2, %c0_3] : memref<16x256xbf16, #tpu.memory_space<vmem>>, vector<16x256xbf16>
    tpu.vector_store %arg2[%c0_2, %c0_3], %3 {strides = array<i32>} : memref<16x256xbf16, #tpu.memory_space<vmem>>, vector<16x256xbf16>,
    %cst_4 = arith.constant dense<0.000000e+00> : vector<16xf32>
    %5 = vector.multi_reduction <add>, %2, %cst_4 [1] : vector<16x256xf32> to vector<16xf32>
    %6 = vector.shape_cast %5 : vector<16xf32> to vector<16x1xf32>
    %c0_5 = arith.constant 0 : index
    %c0_6 = arith.constant 0 : index
    %c0_7 = arith.constant 0 : index
    %7 = vector.load %arg3[%c0_5, %c0_6, %c0_7] : memref<1x16x1xf32, #tpu.memory_space<vmem>>, vector<1x16x1xf32>
    %8 = vector.shape_cast %7 : vector<1x16x1xf32> to vector<16x1xf32>
    %9 = vector.shape_cast %6 : vector<16x1xf32> to vector<1x16x1xf32>
    tpu.vector_store %arg3[%c0_5, %c0_6, %c0_7], %9 {strides = array<i32>} : memref<1x16x1xf32, #tpu.memory_space<vmem>>, vector<1x16x1xf32>,
    %10 = arith.mulf %2, %2 : vector<16x256xf32>
    %cst_8 = arith.constant dense<0.000000e+00> : vector<16xf32>
    %11 = vector.multi_reduction <add>, %10, %cst_8 [1] : vector<16x256xf32> to vector<16xf32>
    %12 = vector.shape_cast %11 : vector<16xf32> to vector<16x1xf32>
    %c0_9 = arith.constant 0 : index
    %c0_10 = arith.constant 0 : index
    %c0_11 = arith.constant 0 : index
    %13 = vector.load %arg4[%c0_9, %c0_10, %c0_11] : memref<1x16x1xf32, #tpu.memory_space<vmem>>, vector<1x16x1xf32>
    %14 = vector.shape_cast %13 : vector<1x16x1xf32> to vector<16x1xf32>
    %15 = vector.shape_cast %12 : vector<16x1xf32> to vector<1x16x1xf32>
    tpu.vector_store %arg4[%c0_9, %c0_10, %c0_11], %15 {strides = array<i32>} : memref<1x16x1xf32, #tpu.memory_space<vmem>>, vector<1x16x1xf32>,
    return
  }
  func.func @transform_0(%arg0: i32) -> (i32, i32, i32) {
    %c0_i32 = arith.constant 0 : i32
    %c0_i32_0 = arith.constant 0 : i32
    %c0_i32_1 = arith.constant 0 : i32
    return %c0_i32, %c0_i32_0, %arg0 : i32, i32, i32
  }
  func.func @transform_1(%arg0: i32) -> (i32, i32) {
    %c0_i32 = arith.constant 0 : i32
    %c0_i32_0 = arith.constant 0 : i32
    return %c0_i32, %arg0 : i32, i32
  }
  func.func @transform_2(%arg0: i32) -> (i32, i32, i32) {
    %c0_i32 = arith.constant 0 : i32
    %c0_i32_0 = arith.constant 0 : i32
    %c0_i32_1 = arith.constant 0 : i32
    return %arg0, %c0_i32, %c0_i32_0 : i32, i32, i32
  }
  func.func @transform_3(%arg0: i32) -> (i32, i32, i32) {
    %c0_i32 = arith.constant 0 : i32
    %c0_i32_0 = arith.constant 0 : i32
    %c0_i32_1 = arith.constant 0 : i32
    return %arg0, %c0_i32, %c0_i32_0 : i32, i32, i32
  }
}

module attributes {stable_mosaic.version = 11 : i64} {
  func.func @kernel(%arg0: i32, %arg1: memref<16x256xbf16, #tpu.memory_space<vmem>>, %arg2: memref<32x16xbf16, #tpu.memory_space<vmem>>, %arg3: memref<16x1xf32, #tpu.memory_space<vmem>>, %arg4: memref<16x1xf32, #tpu.memory_space<vmem>>, %arg5: memref<32x256xbf16, #tpu.memory_space<vmem>>, %arg6: memref<1x32x1xf32, #tpu.memory_space<vmem>>, %arg7: memref<1x32x1xf32, #tpu.memory_space<vmem>>) attributes {dimension_semantics = [#tpu.dimension_semantics<parallel>], iteration_bounds = array<i64: 2>, scalar_prefetch = 0 : i64, scratch_operands = 0 : i64, tpu.core_type = #tpu.core_type<tc>, window_params = [{transform_indices = @transform_0, window_bounds = array<i64: 16, 256>}, {pipeline_mode = #tpu.pipeline_mode<synchronous>, transform_indices = @transform_1, window_bounds = array<i64: 32, 16>}, {pipeline_mode = #tpu.pipeline_mode<synchronous>, transform_indices = @transform_2, window_bounds = array<i64: 16, 1>}, {pipeline_mode = #tpu.pipeline_mode<synchronous>, transform_indices = @transform_3, window_bounds = array<i64: 16, 1>}, {transform_indices = @transform_4, window_bounds = array<i64: 32, 256>}, {transform_indices = @transform_5, window_bounds = array<i64: 1, 32, 1>}, {transform_indices = @transform_6, window_bounds = array<i64: 1, 32, 1>}]} {
    %c0 = arith.constant 0 : index
    %c0_0 = arith.constant 0 : index
    %0 = vector.load %arg1[%c0, %c0_0] : memref<16x256xbf16, #tpu.memory_space<vmem>>, vector<16x256xbf16>
    %1 = arith.extf %0 : vector<16x256xbf16> to vector<16x256xf32>
    %c0_1 = arith.constant 0 : index
    %c0_2 = arith.constant 0 : index
    %2 = vector.load %arg3[%c0_1, %c0_2] : memref<16x1xf32, #tpu.memory_space<vmem>>, vector<16x1xf32>
    %3 = vector.broadcast %2 : vector<16x1xf32> to vector<16x256xf32>
    %4 = arith.mulf %1, %3 : vector<16x256xf32>
    %c0_3 = arith.constant 0 : index
    %c0_4 = arith.constant 0 : index
    %5 = vector.load %arg4[%c0_3, %c0_4] : memref<16x1xf32, #tpu.memory_space<vmem>>, vector<16x1xf32>
    %6 = vector.broadcast %5 : vector<16x1xf32> to vector<16x256xf32>
    %7 = arith.addf %4, %6 : vector<16x256xf32>
    %cst = arith.constant 0.000000e+00 : f32
    %8 = vector.broadcast %cst : f32 to vector<16x256xf32>
    %9 = arith.maximumf %7, %8 : vector<16x256xf32>
    %10 = arith.truncf %9 : vector<16x256xf32> to vector<16x256xbf16>
    %c0_5 = arith.constant 0 : index
    %c0_6 = arith.constant 0 : index
    %11 = vector.load %arg2[%c0_5, %c0_6] : memref<32x16xbf16, #tpu.memory_space<vmem>>, vector<32x16xbf16>
    %cst_7 = arith.constant dense<0.000000e+00> : vector<32x256xf32>
    %12 = tpu.matmul %11, %10, %cst_7 {dimension_numbers = #tpu.dot_dimension_numbers<[1], [0], [0], [1], [0, 0, 1, 1], [], []>} : vector<32x16xbf16>, vector<16x256xbf16>, vector<32x256xf32> -> vector<32x256xf32>
    %13 = arith.truncf %12 : vector<32x256xf32> to vector<32x256xbf16>
    %c0_8 = arith.constant 0 : index
    %c0_9 = arith.constant 0 : index
    %14 = vector.load %arg5[%c0_8, %c0_9] : memref<32x256xbf16, #tpu.memory_space<vmem>>, vector<32x256xbf16>
    tpu.vector_store %arg5[%c0_8, %c0_9], %13 {strides = array<i32>} : memref<32x256xbf16, #tpu.memory_space<vmem>>, vector<32x256xbf16>,
    %cst_10 = arith.constant dense<0.000000e+00> : vector<32xf32>
    %15 = vector.multi_reduction <add>, %12, %cst_10 [1] : vector<32x256xf32> to vector<32xf32>
    %16 = vector.shape_cast %15 : vector<32xf32> to vector<32x1xf32>
    %c0_11 = arith.constant 0 : index
    %c0_12 = arith.constant 0 : index
    %c0_13 = arith.constant 0 : index
    %17 = vector.load %arg6[%c0_11, %c0_12, %c0_13] : memref<1x32x1xf32, #tpu.memory_space<vmem>>, vector<1x32x1xf32>
    %18 = vector.shape_cast %17 : vector<1x32x1xf32> to vector<32x1xf32>
    %19 = vector.shape_cast %16 : vector<32x1xf32> to vector<1x32x1xf32>
    tpu.vector_store %arg6[%c0_11, %c0_12, %c0_13], %19 {strides = array<i32>} : memref<1x32x1xf32, #tpu.memory_space<vmem>>, vector<1x32x1xf32>,
    %20 = arith.mulf %12, %12 : vector<32x256xf32>
    %cst_14 = arith.constant dense<0.000000e+00> : vector<32xf32>
    %21 = vector.multi_reduction <add>, %20, %cst_14 [1] : vector<32x256xf32> to vector<32xf32>
    %22 = vector.shape_cast %21 : vector<32xf32> to vector<32x1xf32>
    %c0_15 = arith.constant 0 : index
    %c0_16 = arith.constant 0 : index
    %c0_17 = arith.constant 0 : index
    %23 = vector.load %arg7[%c0_15, %c0_16, %c0_17] : memref<1x32x1xf32, #tpu.memory_space<vmem>>, vector<1x32x1xf32>
    %24 = vector.shape_cast %23 : vector<1x32x1xf32> to vector<32x1xf32>
    %25 = vector.shape_cast %22 : vector<32x1xf32> to vector<1x32x1xf32>
    tpu.vector_store %arg7[%c0_15, %c0_16, %c0_17], %25 {strides = array<i32>} : memref<1x32x1xf32, #tpu.memory_space<vmem>>, vector<1x32x1xf32>,
    return
  }
  func.func @transform_0(%arg0: i32) -> (i32, i32) {
    %c0_i32 = arith.constant 0 : i32
    %c0_i32_0 = arith.constant 0 : i32
    return %c0_i32, %arg0 : i32, i32
  }
  func.func @transform_1(%arg0: i32) -> (i32, i32) {
    %c0_i32 = arith.constant 0 : i32
    %c0_i32_0 = arith.constant 0 : i32
    %c0_i32_1 = arith.constant 0 : i32
    return %c0_i32, %c0_i32_0 : i32, i32
  }
  func.func @transform_2(%arg0: i32) -> (i32, i32) {
    %c0_i32 = arith.constant 0 : i32
    %c0_i32_0 = arith.constant 0 : i32
    %c0_i32_1 = arith.constant 0 : i32
    return %c0_i32, %c0_i32_0 : i32, i32
  }
  func.func @transform_3(%arg0: i32) -> (i32, i32) {
    %c0_i32 = arith.constant 0 : i32
    %c0_i32_0 = arith.constant 0 : i32
    %c0_i32_1 = arith.constant 0 : i32
    return %c0_i32, %c0_i32_0 : i32, i32
  }
  func.func @transform_4(%arg0: i32) -> (i32, i32) {
    %c0_i32 = arith.constant 0 : i32
    %c0_i32_0 = arith.constant 0 : i32
    return %c0_i32, %arg0 : i32, i32
  }
  func.func @transform_5(%arg0: i32) -> (i32, i32, i32) {
    %c0_i32 = arith.constant 0 : i32
    %c0_i32_0 = arith.constant 0 : i32
    %c0_i32_1 = arith.constant 0 : i32
    return %arg0, %c0_i32, %c0_i32_0 : i32, i32, i32
  }
  func.func @transform_6(%arg0: i32) -> (i32, i32, i32) {
    %c0_i32 = arith.constant 0 : i32
    %c0_i32_0 = arith.constant 0 : i32
    %c0_i32_1 = arith.constant 0 : i32
    return %arg0, %c0_i32, %c0_i32_0 : i32, i32, i32
  }
}

module attributes {stable_mosaic.version = 11 : i64} {
  func.func @_affine_kernel(%arg0: i32, %arg1: memref<32x256xbf16, #tpu.memory_space<vmem>>, %arg2: memref<32x1xf32, #tpu.memory_space<vmem>>, %arg3: memref<32x1xf32, #tpu.memory_space<vmem>>, %arg4: memref<32x256xbf16, #tpu.memory_space<vmem>>) attributes {dimension_semantics = [#tpu.dimension_semantics<parallel>], iteration_bounds = array<i64: 2>, scalar_prefetch = 0 : i64, scratch_operands = 0 : i64, tpu.core_type = #tpu.core_type<tc>, window_params = [{transform_indices = @transform_0, window_bounds = array<i64: 32, 256>}, {pipeline_mode = #tpu.pipeline_mode<synchronous>, transform_indices = @transform_1, window_bounds = array<i64: 32, 1>}, {pipeline_mode = #tpu.pipeline_mode<synchronous>, transform_indices = @transform_2, window_bounds = array<i64: 32, 1>}, {transform_indices = @transform_3, window_bounds = array<i64: 32, 256>}]} {
    %c0 = arith.constant 0 : index
    %c0_0 = arith.constant 0 : index
    %0 = vector.load %arg1[%c0, %c0_0] : memref<32x256xbf16, #tpu.memory_space<vmem>>, vector<32x256xbf16>
    %1 = arith.extf %0 : vector<32x256xbf16> to vector<32x256xf32>
    %c0_1 = arith.constant 0 : index
    %c0_2 = arith.constant 0 : index
    %2 = vector.load %arg2[%c0_1, %c0_2] : memref<32x1xf32, #tpu.memory_space<vmem>>, vector<32x1xf32>
    %3 = vector.broadcast %2 : vector<32x1xf32> to vector<32x256xf32>
    %4 = arith.mulf %1, %3 : vector<32x256xf32>
    %c0_3 = arith.constant 0 : index
    %c0_4 = arith.constant 0 : index
    %5 = vector.load %arg3[%c0_3, %c0_4] : memref<32x1xf32, #tpu.memory_space<vmem>>, vector<32x1xf32>
    %6 = vector.broadcast %5 : vector<32x1xf32> to vector<32x256xf32>
    %7 = arith.addf %4, %6 : vector<32x256xf32>
    %cst = arith.constant 0.000000e+00 : f32
    %8 = vector.broadcast %cst : f32 to vector<32x256xf32>
    %9 = arith.maximumf %7, %8 : vector<32x256xf32>
    %10 = arith.truncf %9 : vector<32x256xf32> to vector<32x256xbf16>
    %c0_5 = arith.constant 0 : index
    %c0_6 = arith.constant 0 : index
    %11 = vector.load %arg4[%c0_5, %c0_6] : memref<32x256xbf16, #tpu.memory_space<vmem>>, vector<32x256xbf16>
    tpu.vector_store %arg4[%c0_5, %c0_6], %10 {strides = array<i32>} : memref<32x256xbf16, #tpu.memory_space<vmem>>, vector<32x256xbf16>,
    return
  }
  func.func @transform_0(%arg0: i32) -> (i32, i32) {
    %c0_i32 = arith.constant 0 : i32
    %c0_i32_0 = arith.constant 0 : i32
    return %c0_i32, %arg0 : i32, i32
  }
  func.func @transform_1(%arg0: i32) -> (i32, i32) {
    %c0_i32 = arith.constant 0 : i32
    %c0_i32_0 = arith.constant 0 : i32
    %c0_i32_1 = arith.constant 0 : i32
    return %c0_i32, %c0_i32_0 : i32, i32
  }
  func.func @transform_2(%arg0: i32) -> (i32, i32) {
    %c0_i32 = arith.constant 0 : i32
    %c0_i32_0 = arith.constant 0 : i32
    %c0_i32_1 = arith.constant 0 : i32
    return %c0_i32, %c0_i32_0 : i32, i32
  }
  func.func @transform_3(%arg0: i32) -> (i32, i32) {
    %c0_i32 = arith.constant 0 : i32
    %c0_i32_0 = arith.constant 0 : i32
    return %c0_i32, %arg0 : i32, i32
  }
}

module attributes {stable_mosaic.version = 11 : i64} {
  func.func @kernel(%arg0: i32, %arg1: memref<288x256xbf16, #tpu.memory_space<vmem>>, %arg2: memref<8x288xbf16, #tpu.memory_space<vmem>>, %arg3: memref<8x256xbf16, #tpu.memory_space<vmem>>, %arg4: memref<1x8x1xf32, #tpu.memory_space<vmem>>, %arg5: memref<1x8x1xf32, #tpu.memory_space<vmem>>) attributes {dimension_semantics = [#tpu.dimension_semantics<parallel>], iteration_bounds = array<i64: 2>, scalar_prefetch = 0 : i64, scratch_operands = 0 : i64, tpu.core_type = #tpu.core_type<tc>, window_params = [{transform_indices = @transform_0, window_bounds = array<i64: 288, 256>}, {pipeline_mode = #tpu.pipeline_mode<synchronous>, transform_indices = @transform_1, window_bounds = array<i64: 8, 288>}, {transform_indices = @transform_2, window_bounds = array<i64: 8, 256>}, {transform_indices = @transform_3, window_bounds = array<i64: 1, 8, 1>}, {transform_indices = @transform_4, window_bounds = array<i64: 1, 8, 1>}]} {
    %c0 = arith.constant 0 : index
    %c0_0 = arith.constant 0 : index
    %0 = vector.load %arg1[%c0, %c0_0] : memref<288x256xbf16, #tpu.memory_space<vmem>>, vector<288x256xbf16>
    %c0_1 = arith.constant 0 : index
    %c0_2 = arith.constant 0 : index
    %1 = vector.load %arg2[%c0_1, %c0_2] : memref<8x288xbf16, #tpu.memory_space<vmem>>, vector<8x288xbf16>
    %cst = arith.constant dense<0.000000e+00> : vector<8x256xf32>
    %2 = tpu.matmul %1, %0, %cst {dimension_numbers = #tpu.dot_dimension_numbers<[1], [0], [0], [1], [0, 0, 1, 1], [], []>} : vector<8x288xbf16>, vector<288x256xbf16>, vector<8x256xf32> -> vector<8x256xf32>
    %3 = arith.truncf %2 : vector<8x256xf32> to vector<8x256xbf16>
    %c0_3 = arith.constant 0 : index
    %c0_4 = arith.constant 0 : index
    %4 = vector.load %arg3[%c0_3, %c0_4] : memref<8x256xbf16, #tpu.memory_space<vmem>>, vector<8x256xbf16>
    tpu.vector_store %arg3[%c0_3, %c0_4], %3 {strides = array<i32>} : memref<8x256xbf16, #tpu.memory_space<vmem>>, vector<8x256xbf16>,
    %cst_5 = arith.constant dense<0.000000e+00> : vector<8xf32>
    %5 = vector.multi_reduction <add>, %2, %cst_5 [1] : vector<8x256xf32> to vector<8xf32>
    %6 = vector.shape_cast %5 : vector<8xf32> to vector<8x1xf32>
    %c0_6 = arith.constant 0 : index
    %c0_7 = arith.constant 0 : index
    %c0_8 = arith.constant 0 : index
    %7 = vector.load %arg4[%c0_6, %c0_7, %c0_8] : memref<1x8x1xf32, #tpu.memory_space<vmem>>, vector<1x8x1xf32>
    %8 = vector.shape_cast %7 : vector<1x8x1xf32> to vector<8x1xf32>
    %9 = vector.shape_cast %6 : vector<8x1xf32> to vector<1x8x1xf32>
    tpu.vector_store %arg4[%c0_6, %c0_7, %c0_8], %9 {strides = array<i32>} : memref<1x8x1xf32, #tpu.memory_space<vmem>>, vector<1x8x1xf32>,
    %10 = arith.mulf %2, %2 : vector<8x256xf32>
    %cst_9 = arith.constant dense<0.000000e+00> : vector<8xf32>
    %11 = vector.multi_reduction <add>, %10, %cst_9 [1] : vector<8x256xf32> to vector<8xf32>
    %12 = vector.shape_cast %11 : vector<8xf32> to vector<8x1xf32>
    %c0_10 = arith.constant 0 : index
    %c0_11 = arith.constant 0 : index
    %c0_12 = arith.constant 0 : index
    %13 = vector.load %arg5[%c0_10, %c0_11, %c0_12] : memref<1x8x1xf32, #tpu.memory_space<vmem>>, vector<1x8x1xf32>
    %14 = vector.shape_cast %13 : vector<1x8x1xf32> to vector<8x1xf32>
    %15 = vector.shape_cast %12 : vector<8x1xf32> to vector<1x8x1xf32>
    tpu.vector_store %arg5[%c0_10, %c0_11, %c0_12], %15 {strides = array<i32>} : memref<1x8x1xf32, #tpu.memory_space<vmem>>, vector<1x8x1xf32>,
    return
  }
  func.func @transform_0(%arg0: i32) -> (i32, i32) {
    %c0_i32 = arith.constant 0 : i32
    %c0_i32_0 = arith.constant 0 : i32
    return %c0_i32, %arg0 : i32, i32
  }
  func.func @transform_1(%arg0: i32) -> (i32, i32) {
    %c0_i32 = arith.constant 0 : i32
    %c0_i32_0 = arith.constant 0 : i32
    %c0_i32_1 = arith.constant 0 : i32
    return %c0_i32, %c0_i32_0 : i32, i32
  }
  func.func @transform_2(%arg0: i32) -> (i32, i32) {
    %c0_i32 = arith.constant 0 : i32
    %c0_i32_0 = arith.constant 0 : i32
    return %c0_i32, %arg0 : i32, i32
  }
  func.func @transform_3(%arg0: i32) -> (i32, i32, i32) {
    %c0_i32 = arith.constant 0 : i32
    %c0_i32_0 = arith.constant 0 : i32
    %c0_i32_1 = arith.constant 0 : i32
    return %arg0, %c0_i32, %c0_i32_0 : i32, i32, i32
  }
  func.func @transform_4(%arg0: i32) -> (i32, i32, i32) {
    %c0_i32 = arith.constant 0 : i32
    %c0_i32_0 = arith.constant 0 : i32
    %c0_i32_1 = arith.constant 0 : i32
    return %arg0, %c0_i32, %c0_i32_0 : i32, i32, i32
  }
}

module attributes {stable_mosaic.version = 11 : i64} {
  func.func @kernel(%arg0: i32, %arg1: memref<16x256xbf16, #tpu.memory_space<vmem>>, %arg2: memref<8x256xbf16, #tpu.memory_space<vmem>>, %arg3: memref<32x24xbf16, #tpu.memory_space<vmem>>, %arg4: memref<24x1xf32, #tpu.memory_space<vmem>>, %arg5: memref<24x1xf32, #tpu.memory_space<vmem>>, %arg6: memref<32x256xbf16, #tpu.memory_space<vmem>>, %arg7: memref<1x32x1xf32, #tpu.memory_space<vmem>>, %arg8: memref<1x32x1xf32, #tpu.memory_space<vmem>>) attributes {dimension_semantics = [#tpu.dimension_semantics<parallel>], iteration_bounds = array<i64: 2>, scalar_prefetch = 0 : i64, scratch_operands = 0 : i64, tpu.core_type = #tpu.core_type<tc>, window_params = [{transform_indices = @transform_0, window_bounds = array<i64: 16, 256>}, {transform_indices = @transform_1, window_bounds = array<i64: 8, 256>}, {pipeline_mode = #tpu.pipeline_mode<synchronous>, transform_indices = @transform_2, window_bounds = array<i64: 32, 24>}, {pipeline_mode = #tpu.pipeline_mode<synchronous>, transform_indices = @transform_3, window_bounds = array<i64: 24, 1>}, {pipeline_mode = #tpu.pipeline_mode<synchronous>, transform_indices = @transform_4, window_bounds = array<i64: 24, 1>}, {transform_indices = @transform_5, window_bounds = array<i64: 32, 256>}, {transform_indices = @transform_6, window_bounds = array<i64: 1, 32, 1>}, {transform_indices = @transform_7, window_bounds = array<i64: 1, 32, 1>}]} {
    %c0 = arith.constant 0 : index
    %c0_0 = arith.constant 0 : index
    %0 = vector.load %arg1[%c0, %c0_0] : memref<16x256xbf16, #tpu.memory_space<vmem>>, vector<16x256xbf16>
    %1 = arith.extf %0 : vector<16x256xbf16> to vector<16x256xf32>
    %c0_1 = arith.constant 0 : index
    %c0_2 = arith.constant 0 : index
    %2 = vector.load %arg4[%c0_1, %c0_2] : memref<24x1xf32, #tpu.memory_space<vmem>>, vector<16x1xf32>
    %3 = vector.broadcast %2 : vector<16x1xf32> to vector<16x256xf32>
    %4 = arith.mulf %1, %3 : vector<16x256xf32>
    %c0_3 = arith.constant 0 : index
    %c0_4 = arith.constant 0 : index
    %5 = vector.load %arg5[%c0_3, %c0_4] : memref<24x1xf32, #tpu.memory_space<vmem>>, vector<16x1xf32>
    %6 = vector.broadcast %5 : vector<16x1xf32> to vector<16x256xf32>
    %7 = arith.addf %4, %6 : vector<16x256xf32>
    %cst = arith.constant 0.000000e+00 : f32
    %8 = vector.broadcast %cst : f32 to vector<16x256xf32>
    %9 = arith.maximumf %7, %8 : vector<16x256xf32>
    %10 = arith.truncf %9 : vector<16x256xf32> to vector<16x256xbf16>
    %c0_5 = arith.constant 0 : index
    %c0_6 = arith.constant 0 : index
    %11 = vector.load %arg3[%c0_5, %c0_6] : memref<32x24xbf16, #tpu.memory_space<vmem>>, vector<32x16xbf16>
    %cst_7 = arith.constant dense<0.000000e+00> : vector<32x256xf32>
    %12 = tpu.matmul %11, %10, %cst_7 {dimension_numbers = #tpu.dot_dimension_numbers<[1], [0], [0], [1], [0, 0, 1, 1], [], []>} : vector<32x16xbf16>, vector<16x256xbf16>, vector<32x256xf32> -> vector<32x256xf32>
    %c0_8 = arith.constant 0 : index
    %c0_9 = arith.constant 0 : index
    %13 = vector.load %arg2[%c0_8, %c0_9] : memref<8x256xbf16, #tpu.memory_space<vmem>>, vector<8x256xbf16>
    %14 = arith.extf %13 : vector<8x256xbf16> to vector<8x256xf32>
    %c16 = arith.constant 16 : index
    %c0_10 = arith.constant 0 : index
    %15 = vector.load %arg4[%c16, %c0_10] : memref<24x1xf32, #tpu.memory_space<vmem>>, vector<8x1xf32>
    %16 = vector.broadcast %15 : vector<8x1xf32> to vector<8x256xf32>
    %17 = arith.mulf %14, %16 : vector<8x256xf32>
    %c16_11 = arith.constant 16 : index
    %c0_12 = arith.constant 0 : index
    %18 = vector.load %arg5[%c16_11, %c0_12] : memref<24x1xf32, #tpu.memory_space<vmem>>, vector<8x1xf32>
    %19 = vector.broadcast %18 : vector<8x1xf32> to vector<8x256xf32>
    %20 = arith.addf %17, %19 : vector<8x256xf32>
    %cst_13 = arith.constant 0.000000e+00 : f32
    %21 = vector.broadcast %cst_13 : f32 to vector<8x256xf32>
    %22 = arith.maximumf %20, %21 : vector<8x256xf32>
    %23 = arith.truncf %22 : vector<8x256xf32> to vector<8x256xbf16>
    %c0_14 = arith.constant 0 : index
    %c16_15 = arith.constant 16 : index
    %24 = vector.load %arg3[%c0_14, %c16_15] : memref<32x24xbf16, #tpu.memory_space<vmem>>, vector<32x8xbf16>
    %cst_16 = arith.constant dense<0.000000e+00> : vector<32x256xf32>
    %25 = tpu.matmul %24, %23, %cst_16 {dimension_numbers = #tpu.dot_dimension_numbers<[1], [0], [0], [1], [0, 0, 1, 1], [], []>} : vector<32x8xbf16>, vector<8x256xbf16>, vector<32x256xf32> -> vector<32x256xf32>
    %26 = arith.addf %12, %25 : vector<32x256xf32>
    %27 = arith.truncf %26 : vector<32x256xf32> to vector<32x256xbf16>
    %c0_17 = arith.constant 0 : index
    %c0_18 = arith.constant 0 : index
    %28 = vector.load %arg6[%c0_17, %c0_18] : memref<32x256xbf16, #tpu.memory_space<vmem>>, vector<32x256xbf16>
    tpu.vector_store %arg6[%c0_17, %c0_18], %27 {strides = array<i32>} : memref<32x256xbf16, #tpu.memory_space<vmem>>, vector<32x256xbf16>,
    %cst_19 = arith.constant dense<0.000000e+00> : vector<32xf32>
    %29 = vector.multi_reduction <add>, %26, %cst_19 [1] : vector<32x256xf32> to vector<32xf32>
    %30 = vector.shape_cast %29 : vector<32xf32> to vector<32x1xf32>
    %c0_20 = arith.constant 0 : index
    %c0_21 = arith.constant 0 : index
    %c0_22 = arith.constant 0 : index
    %31 = vector.load %arg7[%c0_20, %c0_21, %c0_22] : memref<1x32x1xf32, #tpu.memory_space<vmem>>, vector<1x32x1xf32>
    %32 = vector.shape_cast %31 : vector<1x32x1xf32> to vector<32x1xf32>
    %33 = vector.shape_cast %30 : vector<32x1xf32> to vector<1x32x1xf32>
    tpu.vector_store %arg7[%c0_20, %c0_21, %c0_22], %33 {strides = array<i32>} : memref<1x32x1xf32, #tpu.memory_space<vmem>>, vector<1x32x1xf32>,
    %34 = arith.mulf %26, %26 : vector<32x256xf32>
    %cst_23 = arith.constant dense<0.000000e+00> : vector<32xf32>
    %35 = vector.multi_reduction <add>, %34, %cst_23 [1] : vector<32x256xf32> to vector<32xf32>
    %36 = vector.shape_cast %35 : vector<32xf32> to vector<32x1xf32>
    %c0_24 = arith.constant 0 : index
    %c0_25 = arith.constant 0 : index
    %c0_26 = arith.constant 0 : index
    %37 = vector.load %arg8[%c0_24, %c0_25, %c0_26] : memref<1x32x1xf32, #tpu.memory_space<vmem>>, vector<1x32x1xf32>
    %38 = vector.shape_cast %37 : vector<1x32x1xf32> to vector<32x1xf32>
    %39 = vector.shape_cast %36 : vector<32x1xf32> to vector<1x32x1xf32>
    tpu.vector_store %arg8[%c0_24, %c0_25, %c0_26], %39 {strides = array<i32>} : memref<1x32x1xf32, #tpu.memory_space<vmem>>, vector<1x32x1xf32>,
    return
  }
  func.func @transform_0(%arg0: i32) -> (i32, i32) {
    %c0_i32 = arith.constant 0 : i32
    %c0_i32_0 = arith.constant 0 : i32
    return %c0_i32, %arg0 : i32, i32
  }
  func.func @transform_1(%arg0: i32) -> (i32, i32) {
    %c0_i32 = arith.constant 0 : i32
    %c0_i32_0 = arith.constant 0 : i32
    return %c0_i32, %arg0 : i32, i32
  }
  func.func @transform_2(%arg0: i32) -> (i32, i32) {
    %c0_i32 = arith.constant 0 : i32
    %c0_i32_0 = arith.constant 0 : i32
    %c0_i32_1 = arith.constant 0 : i32
    return %c0_i32, %c0_i32_0 : i32, i32
  }
  func.func @transform_3(%arg0: i32) -> (i32, i32) {
    %c0_i32 = arith.constant 0 : i32
    %c0_i32_0 = arith.constant 0 : i32
    %c0_i32_1 = arith.constant 0 : i32
    return %c0_i32, %c0_i32_0 : i32, i32
  }
  func.func @transform_4(%arg0: i32) -> (i32, i32) {
    %c0_i32 = arith.constant 0 : i32
    %c0_i32_0 = arith.constant 0 : i32
    %c0_i32_1 = arith.constant 0 : i32
    return %c0_i32, %c0_i32_0 : i32, i32
  }
  func.func @transform_5(%arg0: i32) -> (i32, i32) {
    %c0_i32 = arith.constant 0 : i32
    %c0_i32_0 = arith.constant 0 : i32
    return %c0_i32, %arg0 : i32, i32
  }
  func.func @transform_6(%arg0: i32) -> (i32, i32, i32) {
    %c0_i32 = arith.constant 0 : i32
    %c0_i32_0 = arith.constant 0 : i32
    %c0_i32_1 = arith.constant 0 : i32
    return %arg0, %c0_i32, %c0_i32_0 : i32, i32, i32
  }
  func.func @transform_7(%arg0: i32) -> (i32, i32, i32) {
    %c0_i32 = arith.constant 0 : i32
    %c0_i32_0 = arith.constant 0 : i32
    %c0_i32_1 = arith.constant 0 : i32
    return %arg0, %c0_i32, %c0_i32_0 : i32, i32, i32
  }
}

module attributes {stable_mosaic.version = 11 : i64} {
  func.func @kernel(%arg0: i32, %arg1: memref<16x256xbf16, #tpu.memory_space<vmem>>, %arg2: memref<8x256xbf16, #tpu.memory_space<vmem>>, %arg3: memref<8x256xbf16, #tpu.memory_space<vmem>>, %arg4: memref<16x32xbf16, #tpu.memory_space<vmem>>, %arg5: memref<32x1xf32, #tpu.memory_space<vmem>>, %arg6: memref<32x1xf32, #tpu.memory_space<vmem>>, %arg7: memref<16x256xbf16, #tpu.memory_space<vmem>>, %arg8: memref<1x16x1xf32, #tpu.memory_space<vmem>>, %arg9: memref<1x16x1xf32, #tpu.memory_space<vmem>>) attributes {dimension_semantics = [#tpu.dimension_semantics<parallel>], iteration_bounds = array<i64: 2>, scalar_prefetch = 0 : i64, scratch_operands = 0 : i64, tpu.core_type = #tpu.core_type<tc>, window_params = [{transform_indices = @transform_0, window_bounds = array<i64: 16, 256>}, {transform_indices = @transform_1, window_bounds = array<i64: 8, 256>}, {transform_indices = @transform_2, window_bounds = array<i64: 8, 256>}, {pipeline_mode = #tpu.pipeline_mode<synchronous>, transform_indices = @transform_3, window_bounds = array<i64: 16, 32>}, {pipeline_mode = #tpu.pipeline_mode<synchronous>, transform_indices = @transform_4, window_bounds = array<i64: 32, 1>}, {pipeline_mode = #tpu.pipeline_mode<synchronous>, transform_indices = @transform_5, window_bounds = array<i64: 32, 1>}, {transform_indices = @transform_6, window_bounds = array<i64: 16, 256>}, {transform_indices = @transform_7, window_bounds = array<i64: 1, 16, 1>}, {transform_indices = @transform_8, window_bounds = array<i64: 1, 16, 1>}]} {
    %c0 = arith.constant 0 : index
    %c0_0 = arith.constant 0 : index
    %0 = vector.load %arg1[%c0, %c0_0] : memref<16x256xbf16, #tpu.memory_space<vmem>>, vector<16x256xbf16>
    %1 = arith.extf %0 : vector<16x256xbf16> to vector<16x256xf32>
    %c0_1 = arith.constant 0 : index
    %c0_2 = arith.constant 0 : index
    %2 = vector.load %arg5[%c0_1, %c0_2] : memref<32x1xf32, #tpu.memory_space<vmem>>, vector<16x1xf32>
    %3 = vector.broadcast %2 : vector<16x1xf32> to vector<16x256xf32>
    %4 = arith.mulf %1, %3 : vector<16x256xf32>
    %c0_3 = arith.constant 0 : index
    %c0_4 = arith.constant 0 : index
    %5 = vector.load %arg6[%c0_3, %c0_4] : memref<32x1xf32, #tpu.memory_space<vmem>>, vector<16x1xf32>
    %6 = vector.broadcast %5 : vector<16x1xf32> to vector<16x256xf32>
    %7 = arith.addf %4, %6 : vector<16x256xf32>
    %cst = arith.constant 0.000000e+00 : f32
    %8 = vector.broadcast %cst : f32 to vector<16x256xf32>
    %9 = arith.maximumf %7, %8 : vector<16x256xf32>
    %10 = arith.truncf %9 : vector<16x256xf32> to vector<16x256xbf16>
    %c0_5 = arith.constant 0 : index
    %c0_6 = arith.constant 0 : index
    %11 = vector.load %arg4[%c0_5, %c0_6] : memref<16x32xbf16, #tpu.memory_space<vmem>>, vector<16x16xbf16>
    %cst_7 = arith.constant dense<0.000000e+00> : vector<16x256xf32>
    %12 = tpu.matmul %11, %10, %cst_7 {dimension_numbers = #tpu.dot_dimension_numbers<[1], [0], [0], [1], [0, 0, 1, 1], [], []>} : vector<16x16xbf16>, vector<16x256xbf16>, vector<16x256xf32> -> vector<16x256xf32>
    %c0_8 = arith.constant 0 : index
    %c0_9 = arith.constant 0 : index
    %13 = vector.load %arg2[%c0_8, %c0_9] : memref<8x256xbf16, #tpu.memory_space<vmem>>, vector<8x256xbf16>
    %14 = arith.extf %13 : vector<8x256xbf16> to vector<8x256xf32>
    %c16 = arith.constant 16 : index
    %c0_10 = arith.constant 0 : index
    %15 = vector.load %arg5[%c16, %c0_10] : memref<32x1xf32, #tpu.memory_space<vmem>>, vector<8x1xf32>
    %16 = vector.broadcast %15 : vector<8x1xf32> to vector<8x256xf32>
    %17 = arith.mulf %14, %16 : vector<8x256xf32>
    %c16_11 = arith.constant 16 : index
    %c0_12 = arith.constant 0 : index
    %18 = vector.load %arg6[%c16_11, %c0_12] : memref<32x1xf32, #tpu.memory_space<vmem>>, vector<8x1xf32>
    %19 = vector.broadcast %18 : vector<8x1xf32> to vector<8x256xf32>
    %20 = arith.addf %17, %19 : vector<8x256xf32>
    %cst_13 = arith.constant 0.000000e+00 : f32
    %21 = vector.broadcast %cst_13 : f32 to vector<8x256xf32>
    %22 = arith.maximumf %20, %21 : vector<8x256xf32>
    %23 = arith.truncf %22 : vector<8x256xf32> to vector<8x256xbf16>
    %c0_14 = arith.constant 0 : index
    %c16_15 = arith.constant 16 : index
    %24 = vector.load %arg4[%c0_14, %c16_15] : memref<16x32xbf16, #tpu.memory_space<vmem>>, vector<16x8xbf16>
    %cst_16 = arith.constant dense<0.000000e+00> : vector<16x256xf32>
    %25 = tpu.matmul %24, %23, %cst_16 {dimension_numbers = #tpu.dot_dimension_numbers<[1], [0], [0], [1], [0, 0, 1, 1], [], []>} : vector<16x8xbf16>, vector<8x256xbf16>, vector<16x256xf32> -> vector<16x256xf32>
    %26 = arith.addf %12, %25 : vector<16x256xf32>
    %c0_17 = arith.constant 0 : index
    %c0_18 = arith.constant 0 : index
    %27 = vector.load %arg3[%c0_17, %c0_18] : memref<8x256xbf16, #tpu.memory_space<vmem>>, vector<8x256xbf16>
    %28 = arith.extf %27 : vector<8x256xbf16> to vector<8x256xf32>
    %c24 = arith.constant 24 : index
    %c0_19 = arith.constant 0 : index
    %29 = vector.load %arg5[%c24, %c0_19] : memref<32x1xf32, #tpu.memory_space<vmem>>, vector<8x1xf32>
    %30 = vector.broadcast %29 : vector<8x1xf32> to vector<8x256xf32>
    %31 = arith.mulf %28, %30 : vector<8x256xf32>
    %c24_20 = arith.constant 24 : index
    %c0_21 = arith.constant 0 : index
    %32 = vector.load %arg6[%c24_20, %c0_21] : memref<32x1xf32, #tpu.memory_space<vmem>>, vector<8x1xf32>
    %33 = vector.broadcast %32 : vector<8x1xf32> to vector<8x256xf32>
    %34 = arith.addf %31, %33 : vector<8x256xf32>
    %cst_22 = arith.constant 0.000000e+00 : f32
    %35 = vector.broadcast %cst_22 : f32 to vector<8x256xf32>
    %36 = arith.maximumf %34, %35 : vector<8x256xf32>
    %37 = arith.truncf %36 : vector<8x256xf32> to vector<8x256xbf16>
    %c0_23 = arith.constant 0 : index
    %c24_24 = arith.constant 24 : index
    %38 = vector.load %arg4[%c0_23, %c24_24] : memref<16x32xbf16, #tpu.memory_space<vmem>>, vector<16x8xbf16>
    %cst_25 = arith.constant dense<0.000000e+00> : vector<16x256xf32>
    %39 = tpu.matmul %38, %37, %cst_25 {dimension_numbers = #tpu.dot_dimension_numbers<[1], [0], [0], [1], [0, 0, 1, 1], [], []>} : vector<16x8xbf16>, vector<8x256xbf16>, vector<16x256xf32> -> vector<16x256xf32>
    %40 = arith.addf %26, %39 : vector<16x256xf32>
    %41 = arith.truncf %40 : vector<16x256xf32> to vector<16x256xbf16>
    %c0_26 = arith.constant 0 : index
    %c0_27 = arith.constant 0 : index
    %42 = vector.load %arg7[%c0_26, %c0_27] : memref<16x256xbf16, #tpu.memory_space<vmem>>, vector<16x256xbf16>
    tpu.vector_store %arg7[%c0_26, %c0_27], %41 {strides = array<i32>} : memref<16x256xbf16, #tpu.memory_space<vmem>>, vector<16x256xbf16>,
    %cst_28 = arith.constant dense<0.000000e+00> : vector<16xf32>
    %43 = vector.multi_reduction <add>, %40, %cst_28 [1] : vector<16x256xf32> to vector<16xf32>
    %44 = vector.shape_cast %43 : vector<16xf32> to vector<16x1xf32>
    %c0_29 = arith.constant 0 : index
    %c0_30 = arith.constant 0 : index
    %c0_31 = arith.constant 0 : index
    %45 = vector.load %arg8[%c0_29, %c0_30, %c0_31] : memref<1x16x1xf32, #tpu.memory_space<vmem>>, vector<1x16x1xf32>
    %46 = vector.shape_cast %45 : vector<1x16x1xf32> to vector<16x1xf32>
    %47 = vector.shape_cast %44 : vector<16x1xf32> to vector<1x16x1xf32>
    tpu.vector_store %arg8[%c0_29, %c0_30, %c0_31], %47 {strides = array<i32>} : memref<1x16x1xf32, #tpu.memory_space<vmem>>, vector<1x16x1xf32>,
    %48 = arith.mulf %40, %40 : vector<16x256xf32>
    %cst_32 = arith.constant dense<0.000000e+00> : vector<16xf32>
    %49 = vector.multi_reduction <add>, %48, %cst_32 [1] : vector<16x256xf32> to vector<16xf32>
    %50 = vector.shape_cast %49 : vector<16xf32> to vector<16x1xf32>
    %c0_33 = arith.constant 0 : index
    %c0_34 = arith.constant 0 : index
    %c0_35 = arith.constant 0 : index
    %51 = vector.load %arg9[%c0_33, %c0_34, %c0_35] : memref<1x16x1xf32, #tpu.memory_space<vmem>>, vector<1x16x1xf32>
    %52 = vector.shape_cast %51 : vector<1x16x1xf32> to vector<16x1xf32>
    %53 = vector.shape_cast %50 : vector<16x1xf32> to vector<1x16x1xf32>
    tpu.vector_store %arg9[%c0_33, %c0_34, %c0_35], %53 {strides = array<i32>} : memref<1x16x1xf32, #tpu.memory_space<vmem>>, vector<1x16x1xf32>,
    return
  }
  func.func @transform_0(%arg0: i32) -> (i32, i32) {
    %c0_i32 = arith.constant 0 : i32
    %c0_i32_0 = arith.constant 0 : i32
    return %c0_i32, %arg0 : i32, i32
  }
  func.func @transform_1(%arg0: i32) -> (i32, i32) {
    %c0_i32 = arith.constant 0 : i32
    %c0_i32_0 = arith.constant 0 : i32
    return %c0_i32, %arg0 : i32, i32
  }
  func.func @transform_2(%arg0: i32) -> (i32, i32) {
    %c0_i32 = arith.constant 0 : i32
    %c0_i32_0 = arith.constant 0 : i32
    return %c0_i32, %arg0 : i32, i32
  }
  func.func @transform_3(%arg0: i32) -> (i32, i32) {
    %c0_i32 = arith.constant 0 : i32
    %c0_i32_0 = arith.constant 0 : i32
    %c0_i32_1 = arith.constant 0 : i32
    return %c0_i32, %c0_i32_0 : i32, i32
  }
  func.func @transform_4(%arg0: i32) -> (i32, i32) {
    %c0_i32 = arith.constant 0 : i32
    %c0_i32_0 = arith.constant 0 : i32
    %c0_i32_1 = arith.constant 0 : i32
    return %c0_i32, %c0_i32_0 : i32, i32
  }
  func.func @transform_5(%arg0: i32) -> (i32, i32) {
    %c0_i32 = arith.constant 0 : i32
    %c0_i32_0 = arith.constant 0 : i32
    %c0_i32_1 = arith.constant 0 : i32
    return %c0_i32, %c0_i32_0 : i32, i32
  }
  func.func @transform_6(%arg0: i32) -> (i32, i32) {
    %c0_i32 = arith.constant 0 : i32
    %c0_i32_0 = arith.constant 0 : i32
    return %c0_i32, %arg0 : i32, i32
  }
  func.func @transform_7(%arg0: i32) -> (i32, i32, i32) {
    %c0_i32 = arith.constant 0 : i32
    %c0_i32_0 = arith.constant 0 : i32
    %c0_i32_1 = arith.constant 0 : i32
    return %arg0, %c0_i32, %c0_i32_0 : i32, i32, i32
  }
  func.func @transform_8(%arg0: i32) -> (i32, i32, i32) {
    %c0_i32 = arith.constant 0 : i32
    %c0_i32_0 = arith.constant 0 : i32
    %c0_i32_1 = arith.constant 0 : i32
    return %arg0, %c0_i32, %c0_i32_0 : i32, i32, i32
  }
}

module attributes {stable_mosaic.version = 11 : i64} {
  func.func @_pool_kernel(%arg0: i32, %arg1: memref<4x16x128xbf16, #tpu.memory_space<vmem>>, %arg2: memref<16x128xbf16, #tpu.memory_space<vmem>>, %arg3: memref<1x16x1xf32, #tpu.memory_space<vmem>>, %arg4: memref<1x16x1xf32, #tpu.memory_space<vmem>>) attributes {dimension_semantics = [#tpu.dimension_semantics<parallel>], iteration_bounds = array<i64: 1>, scalar_prefetch = 0 : i64, scratch_operands = 0 : i64, tpu.core_type = #tpu.core_type<tc>, window_params = [{transform_indices = @transform_0, window_bounds = array<i64: 4, 16, 128>}, {transform_indices = @transform_1, window_bounds = array<i64: 16, 128>}, {transform_indices = @transform_2, window_bounds = array<i64: 1, 16, 1>}, {transform_indices = @transform_3, window_bounds = array<i64: 1, 16, 1>}]} {
    %c0 = arith.constant 0 : index
    %c0_0 = arith.constant 0 : index
    %c0_1 = arith.constant 0 : index
    %0 = vector.load %arg1[%c0, %c0_0, %c0_1] : memref<4x16x128xbf16, #tpu.memory_space<vmem>>, vector<4x16x128xbf16>
    %1 = arith.extf %0 : vector<4x16x128xbf16> to vector<4x16x128xf32>
    %cst = arith.constant dense<0.000000e+00> : vector<16x128xf32>
    %2 = vector.multi_reduction <add>, %1, %cst [0] : vector<4x16x128xf32> to vector<16x128xf32>
    %cst_2 = arith.constant 2.500000e-01 : f32
    %3 = vector.broadcast %cst_2 : f32 to vector<16x128xf32>
    %4 = arith.mulf %2, %3 : vector<16x128xf32>
    %5 = arith.truncf %4 : vector<16x128xf32> to vector<16x128xbf16>
    %c0_3 = arith.constant 0 : index
    %c0_4 = arith.constant 0 : index
    %6 = vector.load %arg2[%c0_3, %c0_4] : memref<16x128xbf16, #tpu.memory_space<vmem>>, vector<16x128xbf16>
    tpu.vector_store %arg2[%c0_3, %c0_4], %5 {strides = array<i32>} : memref<16x128xbf16, #tpu.memory_space<vmem>>, vector<16x128xbf16>,
    %cst_5 = arith.constant dense<0.000000e+00> : vector<16xf32>
    %7 = vector.multi_reduction <add>, %4, %cst_5 [1] : vector<16x128xf32> to vector<16xf32>
    %8 = vector.shape_cast %7 : vector<16xf32> to vector<16x1xf32>
    %c0_6 = arith.constant 0 : index
    %c0_7 = arith.constant 0 : index
    %c0_8 = arith.constant 0 : index
    %9 = vector.load %arg3[%c0_6, %c0_7, %c0_8] : memref<1x16x1xf32, #tpu.memory_space<vmem>>, vector<1x16x1xf32>
    %10 = vector.shape_cast %9 : vector<1x16x1xf32> to vector<16x1xf32>
    %11 = vector.shape_cast %8 : vector<16x1xf32> to vector<1x16x1xf32>
    tpu.vector_store %arg3[%c0_6, %c0_7, %c0_8], %11 {strides = array<i32>} : memref<1x16x1xf32, #tpu.memory_space<vmem>>, vector<1x16x1xf32>,
    %12 = arith.mulf %4, %4 : vector<16x128xf32>
    %cst_9 = arith.constant dense<0.000000e+00> : vector<16xf32>
    %13 = vector.multi_reduction <add>, %12, %cst_9 [1] : vector<16x128xf32> to vector<16xf32>
    %14 = vector.shape_cast %13 : vector<16xf32> to vector<16x1xf32>
    %c0_10 = arith.constant 0 : index
    %c0_11 = arith.constant 0 : index
    %c0_12 = arith.constant 0 : index
    %15 = vector.load %arg4[%c0_10, %c0_11, %c0_12] : memref<1x16x1xf32, #tpu.memory_space<vmem>>, vector<1x16x1xf32>
    %16 = vector.shape_cast %15 : vector<1x16x1xf32> to vector<16x1xf32>
    %17 = vector.shape_cast %14 : vector<16x1xf32> to vector<1x16x1xf32>
    tpu.vector_store %arg4[%c0_10, %c0_11, %c0_12], %17 {strides = array<i32>} : memref<1x16x1xf32, #tpu.memory_space<vmem>>, vector<1x16x1xf32>,
    return
  }
  func.func @transform_0(%arg0: i32) -> (i32, i32, i32) {
    %c0_i32 = arith.constant 0 : i32
    %c0_i32_0 = arith.constant 0 : i32
    %c0_i32_1 = arith.constant 0 : i32
    return %c0_i32, %c0_i32_0, %arg0 : i32, i32, i32
  }
  func.func @transform_1(%arg0: i32) -> (i32, i32) {
    %c0_i32 = arith.constant 0 : i32
    %c0_i32_0 = arith.constant 0 : i32
    return %c0_i32, %arg0 : i32, i32
  }
  func.func @transform_2(%arg0: i32) -> (i32, i32, i32) {
    %c0_i32 = arith.constant 0 : i32
    %c0_i32_0 = arith.constant 0 : i32
    %c0_i32_1 = arith.constant 0 : i32
    return %arg0, %c0_i32, %c0_i32_0 : i32, i32, i32
  }
  func.func @transform_3(%arg0: i32) -> (i32, i32, i32) {
    %c0_i32 = arith.constant 0 : i32
    %c0_i32_0 = arith.constant 0 : i32
    %c0_i32_1 = arith.constant 0 : i32
    return %arg0, %c0_i32, %c0_i32_0 : i32, i32, i32
  }
}

module attributes {stable_mosaic.version = 11 : i64} {
  func.func @kernel(%arg0: i32, %arg1: memref<16x128xbf16, #tpu.memory_space<vmem>>, %arg2: memref<32x16xbf16, #tpu.memory_space<vmem>>, %arg3: memref<16x1xf32, #tpu.memory_space<vmem>>, %arg4: memref<16x1xf32, #tpu.memory_space<vmem>>, %arg5: memref<32x128xbf16, #tpu.memory_space<vmem>>, %arg6: memref<1x32x1xf32, #tpu.memory_space<vmem>>, %arg7: memref<1x32x1xf32, #tpu.memory_space<vmem>>) attributes {dimension_semantics = [#tpu.dimension_semantics<parallel>], iteration_bounds = array<i64: 1>, scalar_prefetch = 0 : i64, scratch_operands = 0 : i64, tpu.core_type = #tpu.core_type<tc>, window_params = [{transform_indices = @transform_0, window_bounds = array<i64: 16, 128>}, {pipeline_mode = #tpu.pipeline_mode<synchronous>, transform_indices = @transform_1, window_bounds = array<i64: 32, 16>}, {pipeline_mode = #tpu.pipeline_mode<synchronous>, transform_indices = @transform_2, window_bounds = array<i64: 16, 1>}, {pipeline_mode = #tpu.pipeline_mode<synchronous>, transform_indices = @transform_3, window_bounds = array<i64: 16, 1>}, {transform_indices = @transform_4, window_bounds = array<i64: 32, 128>}, {transform_indices = @transform_5, window_bounds = array<i64: 1, 32, 1>}, {transform_indices = @transform_6, window_bounds = array<i64: 1, 32, 1>}]} {
    %c0 = arith.constant 0 : index
    %c0_0 = arith.constant 0 : index
    %0 = vector.load %arg1[%c0, %c0_0] : memref<16x128xbf16, #tpu.memory_space<vmem>>, vector<16x128xbf16>
    %1 = arith.extf %0 : vector<16x128xbf16> to vector<16x128xf32>
    %c0_1 = arith.constant 0 : index
    %c0_2 = arith.constant 0 : index
    %2 = vector.load %arg3[%c0_1, %c0_2] : memref<16x1xf32, #tpu.memory_space<vmem>>, vector<16x1xf32>
    %3 = vector.broadcast %2 : vector<16x1xf32> to vector<16x128xf32>
    %4 = arith.mulf %1, %3 : vector<16x128xf32>
    %c0_3 = arith.constant 0 : index
    %c0_4 = arith.constant 0 : index
    %5 = vector.load %arg4[%c0_3, %c0_4] : memref<16x1xf32, #tpu.memory_space<vmem>>, vector<16x1xf32>
    %6 = vector.broadcast %5 : vector<16x1xf32> to vector<16x128xf32>
    %7 = arith.addf %4, %6 : vector<16x128xf32>
    %cst = arith.constant 0.000000e+00 : f32
    %8 = vector.broadcast %cst : f32 to vector<16x128xf32>
    %9 = arith.maximumf %7, %8 : vector<16x128xf32>
    %10 = arith.truncf %9 : vector<16x128xf32> to vector<16x128xbf16>
    %c0_5 = arith.constant 0 : index
    %c0_6 = arith.constant 0 : index
    %11 = vector.load %arg2[%c0_5, %c0_6] : memref<32x16xbf16, #tpu.memory_space<vmem>>, vector<32x16xbf16>
    %cst_7 = arith.constant dense<0.000000e+00> : vector<32x128xf32>
    %12 = tpu.matmul %11, %10, %cst_7 {dimension_numbers = #tpu.dot_dimension_numbers<[1], [0], [0], [1], [0, 0, 1, 1], [], []>} : vector<32x16xbf16>, vector<16x128xbf16>, vector<32x128xf32> -> vector<32x128xf32>
    %13 = arith.truncf %12 : vector<32x128xf32> to vector<32x128xbf16>
    %c0_8 = arith.constant 0 : index
    %c0_9 = arith.constant 0 : index
    %14 = vector.load %arg5[%c0_8, %c0_9] : memref<32x128xbf16, #tpu.memory_space<vmem>>, vector<32x128xbf16>
    tpu.vector_store %arg5[%c0_8, %c0_9], %13 {strides = array<i32>} : memref<32x128xbf16, #tpu.memory_space<vmem>>, vector<32x128xbf16>,
    %cst_10 = arith.constant dense<0.000000e+00> : vector<32xf32>
    %15 = vector.multi_reduction <add>, %12, %cst_10 [1] : vector<32x128xf32> to vector<32xf32>
    %16 = vector.shape_cast %15 : vector<32xf32> to vector<32x1xf32>
    %c0_11 = arith.constant 0 : index
    %c0_12 = arith.constant 0 : index
    %c0_13 = arith.constant 0 : index
    %17 = vector.load %arg6[%c0_11, %c0_12, %c0_13] : memref<1x32x1xf32, #tpu.memory_space<vmem>>, vector<1x32x1xf32>
    %18 = vector.shape_cast %17 : vector<1x32x1xf32> to vector<32x1xf32>
    %19 = vector.shape_cast %16 : vector<32x1xf32> to vector<1x32x1xf32>
    tpu.vector_store %arg6[%c0_11, %c0_12, %c0_13], %19 {strides = array<i32>} : memref<1x32x1xf32, #tpu.memory_space<vmem>>, vector<1x32x1xf32>,
    %20 = arith.mulf %12, %12 : vector<32x128xf32>
    %cst_14 = arith.constant dense<0.000000e+00> : vector<32xf32>
    %21 = vector.multi_reduction <add>, %20, %cst_14 [1] : vector<32x128xf32> to vector<32xf32>
    %22 = vector.shape_cast %21 : vector<32xf32> to vector<32x1xf32>
    %c0_15 = arith.constant 0 : index
    %c0_16 = arith.constant 0 : index
    %c0_17 = arith.constant 0 : index
    %23 = vector.load %arg7[%c0_15, %c0_16, %c0_17] : memref<1x32x1xf32, #tpu.memory_space<vmem>>, vector<1x32x1xf32>
    %24 = vector.shape_cast %23 : vector<1x32x1xf32> to vector<32x1xf32>
    %25 = vector.shape_cast %22 : vector<32x1xf32> to vector<1x32x1xf32>
    tpu.vector_store %arg7[%c0_15, %c0_16, %c0_17], %25 {strides = array<i32>} : memref<1x32x1xf32, #tpu.memory_space<vmem>>, vector<1x32x1xf32>,
    return
  }
  func.func @transform_0(%arg0: i32) -> (i32, i32) {
    %c0_i32 = arith.constant 0 : i32
    %c0_i32_0 = arith.constant 0 : i32
    return %c0_i32, %arg0 : i32, i32
  }
  func.func @transform_1(%arg0: i32) -> (i32, i32) {
    %c0_i32 = arith.constant 0 : i32
    %c0_i32_0 = arith.constant 0 : i32
    %c0_i32_1 = arith.constant 0 : i32
    return %c0_i32, %c0_i32_0 : i32, i32
  }
  func.func @transform_2(%arg0: i32) -> (i32, i32) {
    %c0_i32 = arith.constant 0 : i32
    %c0_i32_0 = arith.constant 0 : i32
    %c0_i32_1 = arith.constant 0 : i32
    return %c0_i32, %c0_i32_0 : i32, i32
  }
  func.func @transform_3(%arg0: i32) -> (i32, i32) {
    %c0_i32 = arith.constant 0 : i32
    %c0_i32_0 = arith.constant 0 : i32
    %c0_i32_1 = arith.constant 0 : i32
    return %c0_i32, %c0_i32_0 : i32, i32
  }
  func.func @transform_4(%arg0: i32) -> (i32, i32) {
    %c0_i32 = arith.constant 0 : i32
    %c0_i32_0 = arith.constant 0 : i32
    return %c0_i32, %arg0 : i32, i32
  }
  func.func @transform_5(%arg0: i32) -> (i32, i32, i32) {
    %c0_i32 = arith.constant 0 : i32
    %c0_i32_0 = arith.constant 0 : i32
    %c0_i32_1 = arith.constant 0 : i32
    return %arg0, %c0_i32, %c0_i32_0 : i32, i32, i32
  }
  func.func @transform_6(%arg0: i32) -> (i32, i32, i32) {
    %c0_i32 = arith.constant 0 : i32
    %c0_i32_0 = arith.constant 0 : i32
    %c0_i32_1 = arith.constant 0 : i32
    return %arg0, %c0_i32, %c0_i32_0 : i32, i32, i32
  }
}

module attributes {stable_mosaic.version = 11 : i64} {
  func.func @_affine_kernel(%arg0: i32, %arg1: memref<32x128xbf16, #tpu.memory_space<vmem>>, %arg2: memref<32x1xf32, #tpu.memory_space<vmem>>, %arg3: memref<32x1xf32, #tpu.memory_space<vmem>>, %arg4: memref<32x128xbf16, #tpu.memory_space<vmem>>) attributes {dimension_semantics = [#tpu.dimension_semantics<parallel>], iteration_bounds = array<i64: 1>, scalar_prefetch = 0 : i64, scratch_operands = 0 : i64, tpu.core_type = #tpu.core_type<tc>, window_params = [{transform_indices = @transform_0, window_bounds = array<i64: 32, 128>}, {pipeline_mode = #tpu.pipeline_mode<synchronous>, transform_indices = @transform_1, window_bounds = array<i64: 32, 1>}, {pipeline_mode = #tpu.pipeline_mode<synchronous>, transform_indices = @transform_2, window_bounds = array<i64: 32, 1>}, {transform_indices = @transform_3, window_bounds = array<i64: 32, 128>}]} {
    %c0 = arith.constant 0 : index
    %c0_0 = arith.constant 0 : index
    %0 = vector.load %arg1[%c0, %c0_0] : memref<32x128xbf16, #tpu.memory_space<vmem>>, vector<32x128xbf16>
    %1 = arith.extf %0 : vector<32x128xbf16> to vector<32x128xf32>
    %c0_1 = arith.constant 0 : index
    %c0_2 = arith.constant 0 : index
    %2 = vector.load %arg2[%c0_1, %c0_2] : memref<32x1xf32, #tpu.memory_space<vmem>>, vector<32x1xf32>
    %3 = vector.broadcast %2 : vector<32x1xf32> to vector<32x128xf32>
    %4 = arith.mulf %1, %3 : vector<32x128xf32>
    %c0_3 = arith.constant 0 : index
    %c0_4 = arith.constant 0 : index
    %5 = vector.load %arg3[%c0_3, %c0_4] : memref<32x1xf32, #tpu.memory_space<vmem>>, vector<32x1xf32>
    %6 = vector.broadcast %5 : vector<32x1xf32> to vector<32x128xf32>
    %7 = arith.addf %4, %6 : vector<32x128xf32>
    %cst = arith.constant 0.000000e+00 : f32
    %8 = vector.broadcast %cst : f32 to vector<32x128xf32>
    %9 = arith.maximumf %7, %8 : vector<32x128xf32>
    %10 = arith.truncf %9 : vector<32x128xf32> to vector<32x128xbf16>
    %c0_5 = arith.constant 0 : index
    %c0_6 = arith.constant 0 : index
    %11 = vector.load %arg4[%c0_5, %c0_6] : memref<32x128xbf16, #tpu.memory_space<vmem>>, vector<32x128xbf16>
    tpu.vector_store %arg4[%c0_5, %c0_6], %10 {strides = array<i32>} : memref<32x128xbf16, #tpu.memory_space<vmem>>, vector<32x128xbf16>,
    return
  }
  func.func @transform_0(%arg0: i32) -> (i32, i32) {
    %c0_i32 = arith.constant 0 : i32
    %c0_i32_0 = arith.constant 0 : i32
    return %c0_i32, %arg0 : i32, i32
  }
  func.func @transform_1(%arg0: i32) -> (i32, i32) {
    %c0_i32 = arith.constant 0 : i32
    %c0_i32_0 = arith.constant 0 : i32
    %c0_i32_1 = arith.constant 0 : i32
    return %c0_i32, %c0_i32_0 : i32, i32
  }
  func.func @transform_2(%arg0: i32) -> (i32, i32) {
    %c0_i32 = arith.constant 0 : i32
    %c0_i32_0 = arith.constant 0 : i32
    %c0_i32_1 = arith.constant 0 : i32
    return %c0_i32, %c0_i32_0 : i32, i32
  }
  func.func @transform_3(%arg0: i32) -> (i32, i32) {
    %c0_i32 = arith.constant 0 : i32
    %c0_i32_0 = arith.constant 0 : i32
    return %c0_i32, %arg0 : i32, i32
  }
}

module attributes {stable_mosaic.version = 11 : i64} {
  func.func @kernel(%arg0: i32, %arg1: memref<288x128xbf16, #tpu.memory_space<vmem>>, %arg2: memref<8x288xbf16, #tpu.memory_space<vmem>>, %arg3: memref<8x128xbf16, #tpu.memory_space<vmem>>, %arg4: memref<1x8x1xf32, #tpu.memory_space<vmem>>, %arg5: memref<1x8x1xf32, #tpu.memory_space<vmem>>) attributes {dimension_semantics = [#tpu.dimension_semantics<parallel>], iteration_bounds = array<i64: 1>, scalar_prefetch = 0 : i64, scratch_operands = 0 : i64, tpu.core_type = #tpu.core_type<tc>, window_params = [{transform_indices = @transform_0, window_bounds = array<i64: 288, 128>}, {pipeline_mode = #tpu.pipeline_mode<synchronous>, transform_indices = @transform_1, window_bounds = array<i64: 8, 288>}, {transform_indices = @transform_2, window_bounds = array<i64: 8, 128>}, {transform_indices = @transform_3, window_bounds = array<i64: 1, 8, 1>}, {transform_indices = @transform_4, window_bounds = array<i64: 1, 8, 1>}]} {
    %c0 = arith.constant 0 : index
    %c0_0 = arith.constant 0 : index
    %0 = vector.load %arg1[%c0, %c0_0] : memref<288x128xbf16, #tpu.memory_space<vmem>>, vector<288x128xbf16>
    %c0_1 = arith.constant 0 : index
    %c0_2 = arith.constant 0 : index
    %1 = vector.load %arg2[%c0_1, %c0_2] : memref<8x288xbf16, #tpu.memory_space<vmem>>, vector<8x288xbf16>
    %cst = arith.constant dense<0.000000e+00> : vector<8x128xf32>
    %2 = tpu.matmul %1, %0, %cst {dimension_numbers = #tpu.dot_dimension_numbers<[1], [0], [0], [1], [0, 0, 1, 1], [], []>} : vector<8x288xbf16>, vector<288x128xbf16>, vector<8x128xf32> -> vector<8x128xf32>
    %3 = arith.truncf %2 : vector<8x128xf32> to vector<8x128xbf16>
    %c0_3 = arith.constant 0 : index
    %c0_4 = arith.constant 0 : index
    %4 = vector.load %arg3[%c0_3, %c0_4] : memref<8x128xbf16, #tpu.memory_space<vmem>>, vector<8x128xbf16>
    tpu.vector_store %arg3[%c0_3, %c0_4], %3 {strides = array<i32>} : memref<8x128xbf16, #tpu.memory_space<vmem>>, vector<8x128xbf16>,
    %cst_5 = arith.constant dense<0.000000e+00> : vector<8xf32>
    %5 = vector.multi_reduction <add>, %2, %cst_5 [1] : vector<8x128xf32> to vector<8xf32>
    %6 = vector.shape_cast %5 : vector<8xf32> to vector<8x1xf32>
    %c0_6 = arith.constant 0 : index
    %c0_7 = arith.constant 0 : index
    %c0_8 = arith.constant 0 : index
    %7 = vector.load %arg4[%c0_6, %c0_7, %c0_8] : memref<1x8x1xf32, #tpu.memory_space<vmem>>, vector<1x8x1xf32>
    %8 = vector.shape_cast %7 : vector<1x8x1xf32> to vector<8x1xf32>
    %9 = vector.shape_cast %6 : vector<8x1xf32> to vector<1x8x1xf32>
    tpu.vector_store %arg4[%c0_6, %c0_7, %c0_8], %9 {strides = array<i32>} : memref<1x8x1xf32, #tpu.memory_space<vmem>>, vector<1x8x1xf32>,
    %10 = arith.mulf %2, %2 : vector<8x128xf32>
    %cst_9 = arith.constant dense<0.000000e+00> : vector<8xf32>
    %11 = vector.multi_reduction <add>, %10, %cst_9 [1] : vector<8x128xf32> to vector<8xf32>
    %12 = vector.shape_cast %11 : vector<8xf32> to vector<8x1xf32>
    %c0_10 = arith.constant 0 : index
    %c0_11 = arith.constant 0 : index
    %c0_12 = arith.constant 0 : index
    %13 = vector.load %arg5[%c0_10, %c0_11, %c0_12] : memref<1x8x1xf32, #tpu.memory_space<vmem>>, vector<1x8x1xf32>
    %14 = vector.shape_cast %13 : vector<1x8x1xf32> to vector<8x1xf32>
    %15 = vector.shape_cast %12 : vector<8x1xf32> to vector<1x8x1xf32>
    tpu.vector_store %arg5[%c0_10, %c0_11, %c0_12], %15 {strides = array<i32>} : memref<1x8x1xf32, #tpu.memory_space<vmem>>, vector<1x8x1xf32>,
    return
  }
  func.func @transform_0(%arg0: i32) -> (i32, i32) {
    %c0_i32 = arith.constant 0 : i32
    %c0_i32_0 = arith.constant 0 : i32
    return %c0_i32, %arg0 : i32, i32
  }
  func.func @transform_1(%arg0: i32) -> (i32, i32) {
    %c0_i32 = arith.constant 0 : i32
    %c0_i32_0 = arith.constant 0 : i32
    %c0_i32_1 = arith.constant 0 : i32
    return %c0_i32, %c0_i32_0 : i32, i32
  }
  func.func @transform_2(%arg0: i32) -> (i32, i32) {
    %c0_i32 = arith.constant 0 : i32
    %c0_i32_0 = arith.constant 0 : i32
    return %c0_i32, %arg0 : i32, i32
  }
  func.func @transform_3(%arg0: i32) -> (i32, i32, i32) {
    %c0_i32 = arith.constant 0 : i32
    %c0_i32_0 = arith.constant 0 : i32
    %c0_i32_1 = arith.constant 0 : i32
    return %arg0, %c0_i32, %c0_i32_0 : i32, i32, i32
  }
  func.func @transform_4(%arg0: i32) -> (i32, i32, i32) {
    %c0_i32 = arith.constant 0 : i32
    %c0_i32_0 = arith.constant 0 : i32
    %c0_i32_1 = arith.constant 0 : i32
    return %arg0, %c0_i32, %c0_i32_0 : i32, i32, i32
  }
}

module attributes {stable_mosaic.version = 11 : i64} {
  func.func @kernel(%arg0: i32, %arg1: memref<16x128xbf16, #tpu.memory_space<vmem>>, %arg2: memref<8x128xbf16, #tpu.memory_space<vmem>>, %arg3: memref<32x24xbf16, #tpu.memory_space<vmem>>, %arg4: memref<24x1xf32, #tpu.memory_space<vmem>>, %arg5: memref<24x1xf32, #tpu.memory_space<vmem>>, %arg6: memref<32x128xbf16, #tpu.memory_space<vmem>>, %arg7: memref<1x32x1xf32, #tpu.memory_space<vmem>>, %arg8: memref<1x32x1xf32, #tpu.memory_space<vmem>>) attributes {dimension_semantics = [#tpu.dimension_semantics<parallel>], iteration_bounds = array<i64: 1>, scalar_prefetch = 0 : i64, scratch_operands = 0 : i64, tpu.core_type = #tpu.core_type<tc>, window_params = [{transform_indices = @transform_0, window_bounds = array<i64: 16, 128>}, {transform_indices = @transform_1, window_bounds = array<i64: 8, 128>}, {pipeline_mode = #tpu.pipeline_mode<synchronous>, transform_indices = @transform_2, window_bounds = array<i64: 32, 24>}, {pipeline_mode = #tpu.pipeline_mode<synchronous>, transform_indices = @transform_3, window_bounds = array<i64: 24, 1>}, {pipeline_mode = #tpu.pipeline_mode<synchronous>, transform_indices = @transform_4, window_bounds = array<i64: 24, 1>}, {transform_indices = @transform_5, window_bounds = array<i64: 32, 128>}, {transform_indices = @transform_6, window_bounds = array<i64: 1, 32, 1>}, {transform_indices = @transform_7, window_bounds = array<i64: 1, 32, 1>}]} {
    %c0 = arith.constant 0 : index
    %c0_0 = arith.constant 0 : index
    %0 = vector.load %arg1[%c0, %c0_0] : memref<16x128xbf16, #tpu.memory_space<vmem>>, vector<16x128xbf16>
    %1 = arith.extf %0 : vector<16x128xbf16> to vector<16x128xf32>
    %c0_1 = arith.constant 0 : index
    %c0_2 = arith.constant 0 : index
    %2 = vector.load %arg4[%c0_1, %c0_2] : memref<24x1xf32, #tpu.memory_space<vmem>>, vector<16x1xf32>
    %3 = vector.broadcast %2 : vector<16x1xf32> to vector<16x128xf32>
    %4 = arith.mulf %1, %3 : vector<16x128xf32>
    %c0_3 = arith.constant 0 : index
    %c0_4 = arith.constant 0 : index
    %5 = vector.load %arg5[%c0_3, %c0_4] : memref<24x1xf32, #tpu.memory_space<vmem>>, vector<16x1xf32>
    %6 = vector.broadcast %5 : vector<16x1xf32> to vector<16x128xf32>
    %7 = arith.addf %4, %6 : vector<16x128xf32>
    %cst = arith.constant 0.000000e+00 : f32
    %8 = vector.broadcast %cst : f32 to vector<16x128xf32>
    %9 = arith.maximumf %7, %8 : vector<16x128xf32>
    %10 = arith.truncf %9 : vector<16x128xf32> to vector<16x128xbf16>
    %c0_5 = arith.constant 0 : index
    %c0_6 = arith.constant 0 : index
    %11 = vector.load %arg3[%c0_5, %c0_6] : memref<32x24xbf16, #tpu.memory_space<vmem>>, vector<32x16xbf16>
    %cst_7 = arith.constant dense<0.000000e+00> : vector<32x128xf32>
    %12 = tpu.matmul %11, %10, %cst_7 {dimension_numbers = #tpu.dot_dimension_numbers<[1], [0], [0], [1], [0, 0, 1, 1], [], []>} : vector<32x16xbf16>, vector<16x128xbf16>, vector<32x128xf32> -> vector<32x128xf32>
    %c0_8 = arith.constant 0 : index
    %c0_9 = arith.constant 0 : index
    %13 = vector.load %arg2[%c0_8, %c0_9] : memref<8x128xbf16, #tpu.memory_space<vmem>>, vector<8x128xbf16>
    %14 = arith.extf %13 : vector<8x128xbf16> to vector<8x128xf32>
    %c16 = arith.constant 16 : index
    %c0_10 = arith.constant 0 : index
    %15 = vector.load %arg4[%c16, %c0_10] : memref<24x1xf32, #tpu.memory_space<vmem>>, vector<8x1xf32>
    %16 = vector.broadcast %15 : vector<8x1xf32> to vector<8x128xf32>
    %17 = arith.mulf %14, %16 : vector<8x128xf32>
    %c16_11 = arith.constant 16 : index
    %c0_12 = arith.constant 0 : index
    %18 = vector.load %arg5[%c16_11, %c0_12] : memref<24x1xf32, #tpu.memory_space<vmem>>, vector<8x1xf32>
    %19 = vector.broadcast %18 : vector<8x1xf32> to vector<8x128xf32>
    %20 = arith.addf %17, %19 : vector<8x128xf32>
    %cst_13 = arith.constant 0.000000e+00 : f32
    %21 = vector.broadcast %cst_13 : f32 to vector<8x128xf32>
    %22 = arith.maximumf %20, %21 : vector<8x128xf32>
    %23 = arith.truncf %22 : vector<8x128xf32> to vector<8x128xbf16>
    %c0_14 = arith.constant 0 : index
    %c16_15 = arith.constant 16 : index
    %24 = vector.load %arg3[%c0_14, %c16_15] : memref<32x24xbf16, #tpu.memory_space<vmem>>, vector<32x8xbf16>
    %cst_16 = arith.constant dense<0.000000e+00> : vector<32x128xf32>
    %25 = tpu.matmul %24, %23, %cst_16 {dimension_numbers = #tpu.dot_dimension_numbers<[1], [0], [0], [1], [0, 0, 1, 1], [], []>} : vector<32x8xbf16>, vector<8x128xbf16>, vector<32x128xf32> -> vector<32x128xf32>
    %26 = arith.addf %12, %25 : vector<32x128xf32>
    %27 = arith.truncf %26 : vector<32x128xf32> to vector<32x128xbf16>
    %c0_17 = arith.constant 0 : index
    %c0_18 = arith.constant 0 : index
    %28 = vector.load %arg6[%c0_17, %c0_18] : memref<32x128xbf16, #tpu.memory_space<vmem>>, vector<32x128xbf16>
    tpu.vector_store %arg6[%c0_17, %c0_18], %27 {strides = array<i32>} : memref<32x128xbf16, #tpu.memory_space<vmem>>, vector<32x128xbf16>,
    %cst_19 = arith.constant dense<0.000000e+00> : vector<32xf32>
    %29 = vector.multi_reduction <add>, %26, %cst_19 [1] : vector<32x128xf32> to vector<32xf32>
    %30 = vector.shape_cast %29 : vector<32xf32> to vector<32x1xf32>
    %c0_20 = arith.constant 0 : index
    %c0_21 = arith.constant 0 : index
    %c0_22 = arith.constant 0 : index
    %31 = vector.load %arg7[%c0_20, %c0_21, %c0_22] : memref<1x32x1xf32, #tpu.memory_space<vmem>>, vector<1x32x1xf32>
    %32 = vector.shape_cast %31 : vector<1x32x1xf32> to vector<32x1xf32>
    %33 = vector.shape_cast %30 : vector<32x1xf32> to vector<1x32x1xf32>
    tpu.vector_store %arg7[%c0_20, %c0_21, %c0_22], %33 {strides = array<i32>} : memref<1x32x1xf32, #tpu.memory_space<vmem>>, vector<1x32x1xf32>,
    %34 = arith.mulf %26, %26 : vector<32x128xf32>
    %cst_23 = arith.constant dense<0.000000e+00> : vector<32xf32>
    %35 = vector.multi_reduction <add>, %34, %cst_23 [1] : vector<32x128xf32> to vector<32xf32>
    %36 = vector.shape_cast %35 : vector<32xf32> to vector<32x1xf32>
    %c0_24 = arith.constant 0 : index
    %c0_25 = arith.constant 0 : index
    %c0_26 = arith.constant 0 : index
    %37 = vector.load %arg8[%c0_24, %c0_25, %c0_26] : memref<1x32x1xf32, #tpu.memory_space<vmem>>, vector<1x32x1xf32>
    %38 = vector.shape_cast %37 : vector<1x32x1xf32> to vector<32x1xf32>
    %39 = vector.shape_cast %36 : vector<32x1xf32> to vector<1x32x1xf32>
    tpu.vector_store %arg8[%c0_24, %c0_25, %c0_26], %39 {strides = array<i32>} : memref<1x32x1xf32, #tpu.memory_space<vmem>>, vector<1x32x1xf32>,
    return
  }
  func.func @transform_0(%arg0: i32) -> (i32, i32) {
    %c0_i32 = arith.constant 0 : i32
    %c0_i32_0 = arith.constant 0 : i32
    return %c0_i32, %arg0 : i32, i32
  }
  func.func @transform_1(%arg0: i32) -> (i32, i32) {
    %c0_i32 = arith.constant 0 : i32
    %c0_i32_0 = arith.constant 0 : i32
    return %c0_i32, %arg0 : i32, i32
  }
  func.func @transform_2(%arg0: i32) -> (i32, i32) {
    %c0_i32 = arith.constant 0 : i32
    %c0_i32_0 = arith.constant 0 : i32
    %c0_i32_1 = arith.constant 0 : i32
    return %c0_i32, %c0_i32_0 : i32, i32
  }
  func.func @transform_3(%arg0: i32) -> (i32, i32) {
    %c0_i32 = arith.constant 0 : i32
    %c0_i32_0 = arith.constant 0 : i32
    %c0_i32_1 = arith.constant 0 : i32
    return %c0_i32, %c0_i32_0 : i32, i32
  }
  func.func @transform_4(%arg0: i32) -> (i32, i32) {
    %c0_i32 = arith.constant 0 : i32
    %c0_i32_0 = arith.constant 0 : i32
    %c0_i32_1 = arith.constant 0 : i32
    return %c0_i32, %c0_i32_0 : i32, i32
  }
  func.func @transform_5(%arg0: i32) -> (i32, i32) {
    %c0_i32 = arith.constant 0 : i32
    %c0_i32_0 = arith.constant 0 : i32
    return %c0_i32, %arg0 : i32, i32
  }
  func.func @transform_6(%arg0: i32) -> (i32, i32, i32) {
    %c0_i32 = arith.constant 0 : i32
    %c0_i32_0 = arith.constant 0 : i32
    %c0_i32_1 = arith.constant 0 : i32
    return %arg0, %c0_i32, %c0_i32_0 : i32, i32, i32
  }
  func.func @transform_7(%arg0: i32) -> (i32, i32, i32) {
    %c0_i32 = arith.constant 0 : i32
    %c0_i32_0 = arith.constant 0 : i32
    %c0_i32_1 = arith.constant 0 : i32
    return %arg0, %c0_i32, %c0_i32_0 : i32, i32, i32
  }
}

module attributes {stable_mosaic.version = 11 : i64} {
  func.func @kernel(%arg0: i32, %arg1: memref<16x128xbf16, #tpu.memory_space<vmem>>, %arg2: memref<8x128xbf16, #tpu.memory_space<vmem>>, %arg3: memref<8x128xbf16, #tpu.memory_space<vmem>>, %arg4: memref<16x32xbf16, #tpu.memory_space<vmem>>, %arg5: memref<32x1xf32, #tpu.memory_space<vmem>>, %arg6: memref<32x1xf32, #tpu.memory_space<vmem>>, %arg7: memref<16x128xbf16, #tpu.memory_space<vmem>>, %arg8: memref<1x16x1xf32, #tpu.memory_space<vmem>>, %arg9: memref<1x16x1xf32, #tpu.memory_space<vmem>>) attributes {dimension_semantics = [#tpu.dimension_semantics<parallel>], iteration_bounds = array<i64: 1>, scalar_prefetch = 0 : i64, scratch_operands = 0 : i64, tpu.core_type = #tpu.core_type<tc>, window_params = [{transform_indices = @transform_0, window_bounds = array<i64: 16, 128>}, {transform_indices = @transform_1, window_bounds = array<i64: 8, 128>}, {transform_indices = @transform_2, window_bounds = array<i64: 8, 128>}, {pipeline_mode = #tpu.pipeline_mode<synchronous>, transform_indices = @transform_3, window_bounds = array<i64: 16, 32>}, {pipeline_mode = #tpu.pipeline_mode<synchronous>, transform_indices = @transform_4, window_bounds = array<i64: 32, 1>}, {pipeline_mode = #tpu.pipeline_mode<synchronous>, transform_indices = @transform_5, window_bounds = array<i64: 32, 1>}, {transform_indices = @transform_6, window_bounds = array<i64: 16, 128>}, {transform_indices = @transform_7, window_bounds = array<i64: 1, 16, 1>}, {transform_indices = @transform_8, window_bounds = array<i64: 1, 16, 1>}]} {
    %c0 = arith.constant 0 : index
    %c0_0 = arith.constant 0 : index
    %0 = vector.load %arg1[%c0, %c0_0] : memref<16x128xbf16, #tpu.memory_space<vmem>>, vector<16x128xbf16>
    %1 = arith.extf %0 : vector<16x128xbf16> to vector<16x128xf32>
    %c0_1 = arith.constant 0 : index
    %c0_2 = arith.constant 0 : index
    %2 = vector.load %arg5[%c0_1, %c0_2] : memref<32x1xf32, #tpu.memory_space<vmem>>, vector<16x1xf32>
    %3 = vector.broadcast %2 : vector<16x1xf32> to vector<16x128xf32>
    %4 = arith.mulf %1, %3 : vector<16x128xf32>
    %c0_3 = arith.constant 0 : index
    %c0_4 = arith.constant 0 : index
    %5 = vector.load %arg6[%c0_3, %c0_4] : memref<32x1xf32, #tpu.memory_space<vmem>>, vector<16x1xf32>
    %6 = vector.broadcast %5 : vector<16x1xf32> to vector<16x128xf32>
    %7 = arith.addf %4, %6 : vector<16x128xf32>
    %cst = arith.constant 0.000000e+00 : f32
    %8 = vector.broadcast %cst : f32 to vector<16x128xf32>
    %9 = arith.maximumf %7, %8 : vector<16x128xf32>
    %10 = arith.truncf %9 : vector<16x128xf32> to vector<16x128xbf16>
    %c0_5 = arith.constant 0 : index
    %c0_6 = arith.constant 0 : index
    %11 = vector.load %arg4[%c0_5, %c0_6] : memref<16x32xbf16, #tpu.memory_space<vmem>>, vector<16x16xbf16>
    %cst_7 = arith.constant dense<0.000000e+00> : vector<16x128xf32>
    %12 = tpu.matmul %11, %10, %cst_7 {dimension_numbers = #tpu.dot_dimension_numbers<[1], [0], [0], [1], [0, 0, 1, 1], [], []>} : vector<16x16xbf16>, vector<16x128xbf16>, vector<16x128xf32> -> vector<16x128xf32>
    %c0_8 = arith.constant 0 : index
    %c0_9 = arith.constant 0 : index
    %13 = vector.load %arg2[%c0_8, %c0_9] : memref<8x128xbf16, #tpu.memory_space<vmem>>, vector<8x128xbf16>
    %14 = arith.extf %13 : vector<8x128xbf16> to vector<8x128xf32>
    %c16 = arith.constant 16 : index
    %c0_10 = arith.constant 0 : index
    %15 = vector.load %arg5[%c16, %c0_10] : memref<32x1xf32, #tpu.memory_space<vmem>>, vector<8x1xf32>
    %16 = vector.broadcast %15 : vector<8x1xf32> to vector<8x128xf32>
    %17 = arith.mulf %14, %16 : vector<8x128xf32>
    %c16_11 = arith.constant 16 : index
    %c0_12 = arith.constant 0 : index
    %18 = vector.load %arg6[%c16_11, %c0_12] : memref<32x1xf32, #tpu.memory_space<vmem>>, vector<8x1xf32>
    %19 = vector.broadcast %18 : vector<8x1xf32> to vector<8x128xf32>
    %20 = arith.addf %17, %19 : vector<8x128xf32>
    %cst_13 = arith.constant 0.000000e+00 : f32
    %21 = vector.broadcast %cst_13 : f32 to vector<8x128xf32>
    %22 = arith.maximumf %20, %21 : vector<8x128xf32>
    %23 = arith.truncf %22 : vector<8x128xf32> to vector<8x128xbf16>
    %c0_14 = arith.constant 0 : index
    %c16_15 = arith.constant 16 : index
    %24 = vector.load %arg4[%c0_14, %c16_15] : memref<16x32xbf16, #tpu.memory_space<vmem>>, vector<16x8xbf16>
    %cst_16 = arith.constant dense<0.000000e+00> : vector<16x128xf32>
    %25 = tpu.matmul %24, %23, %cst_16 {dimension_numbers = #tpu.dot_dimension_numbers<[1], [0], [0], [1], [0, 0, 1, 1], [], []>} : vector<16x8xbf16>, vector<8x128xbf16>, vector<16x128xf32> -> vector<16x128xf32>
    %26 = arith.addf %12, %25 : vector<16x128xf32>
    %c0_17 = arith.constant 0 : index
    %c0_18 = arith.constant 0 : index
    %27 = vector.load %arg3[%c0_17, %c0_18] : memref<8x128xbf16, #tpu.memory_space<vmem>>, vector<8x128xbf16>
    %28 = arith.extf %27 : vector<8x128xbf16> to vector<8x128xf32>
    %c24 = arith.constant 24 : index
    %c0_19 = arith.constant 0 : index
    %29 = vector.load %arg5[%c24, %c0_19] : memref<32x1xf32, #tpu.memory_space<vmem>>, vector<8x1xf32>
    %30 = vector.broadcast %29 : vector<8x1xf32> to vector<8x128xf32>
    %31 = arith.mulf %28, %30 : vector<8x128xf32>
    %c24_20 = arith.constant 24 : index
    %c0_21 = arith.constant 0 : index
    %32 = vector.load %arg6[%c24_20, %c0_21] : memref<32x1xf32, #tpu.memory_space<vmem>>, vector<8x1xf32>
    %33 = vector.broadcast %32 : vector<8x1xf32> to vector<8x128xf32>
    %34 = arith.addf %31, %33 : vector<8x128xf32>
    %cst_22 = arith.constant 0.000000e+00 : f32
    %35 = vector.broadcast %cst_22 : f32 to vector<8x128xf32>
    %36 = arith.maximumf %34, %35 : vector<8x128xf32>
    %37 = arith.truncf %36 : vector<8x128xf32> to vector<8x128xbf16>
    %c0_23 = arith.constant 0 : index
    %c24_24 = arith.constant 24 : index
    %38 = vector.load %arg4[%c0_23, %c24_24] : memref<16x32xbf16, #tpu.memory_space<vmem>>, vector<16x8xbf16>
    %cst_25 = arith.constant dense<0.000000e+00> : vector<16x128xf32>
    %39 = tpu.matmul %38, %37, %cst_25 {dimension_numbers = #tpu.dot_dimension_numbers<[1], [0], [0], [1], [0, 0, 1, 1], [], []>} : vector<16x8xbf16>, vector<8x128xbf16>, vector<16x128xf32> -> vector<16x128xf32>
    %40 = arith.addf %26, %39 : vector<16x128xf32>
    %41 = arith.truncf %40 : vector<16x128xf32> to vector<16x128xbf16>
    %c0_26 = arith.constant 0 : index
    %c0_27 = arith.constant 0 : index
    %42 = vector.load %arg7[%c0_26, %c0_27] : memref<16x128xbf16, #tpu.memory_space<vmem>>, vector<16x128xbf16>
    tpu.vector_store %arg7[%c0_26, %c0_27], %41 {strides = array<i32>} : memref<16x128xbf16, #tpu.memory_space<vmem>>, vector<16x128xbf16>,
    %cst_28 = arith.constant dense<0.000000e+00> : vector<16xf32>
    %43 = vector.multi_reduction <add>, %40, %cst_28 [1] : vector<16x128xf32> to vector<16xf32>
    %44 = vector.shape_cast %43 : vector<16xf32> to vector<16x1xf32>
    %c0_29 = arith.constant 0 : index
    %c0_30 = arith.constant 0 : index
    %c0_31 = arith.constant 0 : index
    %45 = vector.load %arg8[%c0_29, %c0_30, %c0_31] : memref<1x16x1xf32, #tpu.memory_space<vmem>>, vector<1x16x1xf32>
    %46 = vector.shape_cast %45 : vector<1x16x1xf32> to vector<16x1xf32>
    %47 = vector.shape_cast %44 : vector<16x1xf32> to vector<1x16x1xf32>
    tpu.vector_store %arg8[%c0_29, %c0_30, %c0_31], %47 {strides = array<i32>} : memref<1x16x1xf32, #tpu.memory_space<vmem>>, vector<1x16x1xf32>,
    %48 = arith.mulf %40, %40 : vector<16x128xf32>
    %cst_32 = arith.constant dense<0.000000e+00> : vector<16xf32>
    %49 = vector.multi_reduction <add>, %48, %cst_32 [1] : vector<16x128xf32> to vector<16xf32>
    %50 = vector.shape_cast %49 : vector<16xf32> to vector<16x1xf32>
    %c0_33 = arith.constant 0 : index
    %c0_34 = arith.constant 0 : index
    %c0_35 = arith.constant 0 : index
    %51 = vector.load %arg9[%c0_33, %c0_34, %c0_35] : memref<1x16x1xf32, #tpu.memory_space<vmem>>, vector<1x16x1xf32>
    %52 = vector.shape_cast %51 : vector<1x16x1xf32> to vector<16x1xf32>
    %53 = vector.shape_cast %50 : vector<16x1xf32> to vector<1x16x1xf32>
    tpu.vector_store %arg9[%c0_33, %c0_34, %c0_35], %53 {strides = array<i32>} : memref<1x16x1xf32, #tpu.memory_space<vmem>>, vector<1x16x1xf32>,
    return
  }
  func.func @transform_0(%arg0: i32) -> (i32, i32) {
    %c0_i32 = arith.constant 0 : i32
    %c0_i32_0 = arith.constant 0 : i32
    return %c0_i32, %arg0 : i32, i32
  }
  func.func @transform_1(%arg0: i32) -> (i32, i32) {
    %c0_i32 = arith.constant 0 : i32
    %c0_i32_0 = arith.constant 0 : i32
    return %c0_i32, %arg0 : i32, i32
  }
  func.func @transform_2(%arg0: i32) -> (i32, i32) {
    %c0_i32 = arith.constant 0 : i32
    %c0_i32_0 = arith.constant 0 : i32
    return %c0_i32, %arg0 : i32, i32
  }
  func.func @transform_3(%arg0: i32) -> (i32, i32) {
    %c0_i32 = arith.constant 0 : i32
    %c0_i32_0 = arith.constant 0 : i32
    %c0_i32_1 = arith.constant 0 : i32
    return %c0_i32, %c0_i32_0 : i32, i32
  }
  func.func @transform_4(%arg0: i32) -> (i32, i32) {
    %c0_i32 = arith.constant 0 : i32
    %c0_i32_0 = arith.constant 0 : i32
    %c0_i32_1 = arith.constant 0 : i32
    return %c0_i32, %c0_i32_0 : i32, i32
  }
  func.func @transform_5(%arg0: i32) -> (i32, i32) {
    %c0_i32 = arith.constant 0 : i32
    %c0_i32_0 = arith.constant 0 : i32
    %c0_i32_1 = arith.constant 0 : i32
    return %c0_i32, %c0_i32_0 : i32, i32
  }
  func.func @transform_6(%arg0: i32) -> (i32, i32) {
    %c0_i32 = arith.constant 0 : i32
    %c0_i32_0 = arith.constant 0 : i32
    return %c0_i32, %arg0 : i32, i32
  }
  func.func @transform_7(%arg0: i32) -> (i32, i32, i32) {
    %c0_i32 = arith.constant 0 : i32
    %c0_i32_0 = arith.constant 0 : i32
    %c0_i32_1 = arith.constant 0 : i32
    return %arg0, %c0_i32, %c0_i32_0 : i32, i32, i32
  }
  func.func @transform_8(%arg0: i32) -> (i32, i32, i32) {
    %c0_i32 = arith.constant 0 : i32
    %c0_i32_0 = arith.constant 0 : i32
    %c0_i32_1 = arith.constant 0 : i32
    return %arg0, %c0_i32, %c0_i32_0 : i32, i32, i32
  }
}

module attributes {stable_mosaic.version = 11 : i64} {
  func.func @_pool_kernel(%arg0: i32, %arg1: memref<4x16x32xbf16, #tpu.memory_space<vmem>>, %arg2: memref<16x32xbf16, #tpu.memory_space<vmem>>, %arg3: memref<1x16x1xf32, #tpu.memory_space<vmem>>, %arg4: memref<1x16x1xf32, #tpu.memory_space<vmem>>) attributes {dimension_semantics = [#tpu.dimension_semantics<parallel>], iteration_bounds = array<i64: 1>, scalar_prefetch = 0 : i64, scratch_operands = 0 : i64, tpu.core_type = #tpu.core_type<tc>, window_params = [{transform_indices = @transform_0, window_bounds = array<i64: 4, 16, 32>}, {transform_indices = @transform_1, window_bounds = array<i64: 16, 32>}, {transform_indices = @transform_2, window_bounds = array<i64: 1, 16, 1>}, {transform_indices = @transform_3, window_bounds = array<i64: 1, 16, 1>}]} {
    %c0 = arith.constant 0 : index
    %c0_0 = arith.constant 0 : index
    %c0_1 = arith.constant 0 : index
    %0 = vector.load %arg1[%c0, %c0_0, %c0_1] : memref<4x16x32xbf16, #tpu.memory_space<vmem>>, vector<4x16x32xbf16>
    %1 = arith.extf %0 : vector<4x16x32xbf16> to vector<4x16x32xf32>
    %cst = arith.constant dense<0.000000e+00> : vector<16x32xf32>
    %2 = vector.multi_reduction <add>, %1, %cst [0] : vector<4x16x32xf32> to vector<16x32xf32>
    %cst_2 = arith.constant 2.500000e-01 : f32
    %3 = vector.broadcast %cst_2 : f32 to vector<16x32xf32>
    %4 = arith.mulf %2, %3 : vector<16x32xf32>
    %5 = arith.truncf %4 : vector<16x32xf32> to vector<16x32xbf16>
    %c0_3 = arith.constant 0 : index
    %c0_4 = arith.constant 0 : index
    %6 = vector.load %arg2[%c0_3, %c0_4] : memref<16x32xbf16, #tpu.memory_space<vmem>>, vector<16x32xbf16>
    tpu.vector_store %arg2[%c0_3, %c0_4], %5 {strides = array<i32>} : memref<16x32xbf16, #tpu.memory_space<vmem>>, vector<16x32xbf16>,
    %cst_5 = arith.constant dense<0.000000e+00> : vector<16xf32>
    %7 = vector.multi_reduction <add>, %4, %cst_5 [1] : vector<16x32xf32> to vector<16xf32>
    %8 = vector.shape_cast %7 : vector<16xf32> to vector<16x1xf32>
    %c0_6 = arith.constant 0 : index
    %c0_7 = arith.constant 0 : index
    %c0_8 = arith.constant 0 : index
    %9 = vector.load %arg3[%c0_6, %c0_7, %c0_8] : memref<1x16x1xf32, #tpu.memory_space<vmem>>, vector<1x16x1xf32>
    %10 = vector.shape_cast %9 : vector<1x16x1xf32> to vector<16x1xf32>
    %11 = vector.shape_cast %8 : vector<16x1xf32> to vector<1x16x1xf32>
    tpu.vector_store %arg3[%c0_6, %c0_7, %c0_8], %11 {strides = array<i32>} : memref<1x16x1xf32, #tpu.memory_space<vmem>>, vector<1x16x1xf32>,
    %12 = arith.mulf %4, %4 : vector<16x32xf32>
    %cst_9 = arith.constant dense<0.000000e+00> : vector<16xf32>
    %13 = vector.multi_reduction <add>, %12, %cst_9 [1] : vector<16x32xf32> to vector<16xf32>
    %14 = vector.shape_cast %13 : vector<16xf32> to vector<16x1xf32>
    %c0_10 = arith.constant 0 : index
    %c0_11 = arith.constant 0 : index
    %c0_12 = arith.constant 0 : index
    %15 = vector.load %arg4[%c0_10, %c0_11, %c0_12] : memref<1x16x1xf32, #tpu.memory_space<vmem>>, vector<1x16x1xf32>
    %16 = vector.shape_cast %15 : vector<1x16x1xf32> to vector<16x1xf32>
    %17 = vector.shape_cast %14 : vector<16x1xf32> to vector<1x16x1xf32>
    tpu.vector_store %arg4[%c0_10, %c0_11, %c0_12], %17 {strides = array<i32>} : memref<1x16x1xf32, #tpu.memory_space<vmem>>, vector<1x16x1xf32>,
    return
  }
  func.func @transform_0(%arg0: i32) -> (i32, i32, i32) {
    %c0_i32 = arith.constant 0 : i32
    %c0_i32_0 = arith.constant 0 : i32
    %c0_i32_1 = arith.constant 0 : i32
    return %c0_i32, %c0_i32_0, %arg0 : i32, i32, i32
  }
  func.func @transform_1(%arg0: i32) -> (i32, i32) {
    %c0_i32 = arith.constant 0 : i32
    %c0_i32_0 = arith.constant 0 : i32
    return %c0_i32, %arg0 : i32, i32
  }
  func.func @transform_2(%arg0: i32) -> (i32, i32, i32) {
    %c0_i32 = arith.constant 0 : i32
    %c0_i32_0 = arith.constant 0 : i32
    %c0_i32_1 = arith.constant 0 : i32
    return %arg0, %c0_i32, %c0_i32_0 : i32, i32, i32
  }
  func.func @transform_3(%arg0: i32) -> (i32, i32, i32) {
    %c0_i32 = arith.constant 0 : i32
    %c0_i32_0 = arith.constant 0 : i32
    %c0_i32_1 = arith.constant 0 : i32
    return %arg0, %c0_i32, %c0_i32_0 : i32, i32, i32
  }
}

module attributes {stable_mosaic.version = 11 : i64} {
  func.func @kernel(%arg0: i32, %arg1: memref<16x32xbf16, #tpu.memory_space<vmem>>, %arg2: memref<32x16xbf16, #tpu.memory_space<vmem>>, %arg3: memref<16x1xf32, #tpu.memory_space<vmem>>, %arg4: memref<16x1xf32, #tpu.memory_space<vmem>>, %arg5: memref<32x32xbf16, #tpu.memory_space<vmem>>, %arg6: memref<1x32x1xf32, #tpu.memory_space<vmem>>, %arg7: memref<1x32x1xf32, #tpu.memory_space<vmem>>) attributes {dimension_semantics = [#tpu.dimension_semantics<parallel>], iteration_bounds = array<i64: 1>, scalar_prefetch = 0 : i64, scratch_operands = 0 : i64, tpu.core_type = #tpu.core_type<tc>, window_params = [{transform_indices = @transform_0, window_bounds = array<i64: 16, 32>}, {pipeline_mode = #tpu.pipeline_mode<synchronous>, transform_indices = @transform_1, window_bounds = array<i64: 32, 16>}, {pipeline_mode = #tpu.pipeline_mode<synchronous>, transform_indices = @transform_2, window_bounds = array<i64: 16, 1>}, {pipeline_mode = #tpu.pipeline_mode<synchronous>, transform_indices = @transform_3, window_bounds = array<i64: 16, 1>}, {transform_indices = @transform_4, window_bounds = array<i64: 32, 32>}, {transform_indices = @transform_5, window_bounds = array<i64: 1, 32, 1>}, {transform_indices = @transform_6, window_bounds = array<i64: 1, 32, 1>}]} {
    %c0 = arith.constant 0 : index
    %c0_0 = arith.constant 0 : index
    %0 = vector.load %arg1[%c0, %c0_0] : memref<16x32xbf16, #tpu.memory_space<vmem>>, vector<16x32xbf16>
    %1 = arith.extf %0 : vector<16x32xbf16> to vector<16x32xf32>
    %c0_1 = arith.constant 0 : index
    %c0_2 = arith.constant 0 : index
    %2 = vector.load %arg3[%c0_1, %c0_2] : memref<16x1xf32, #tpu.memory_space<vmem>>, vector<16x1xf32>
    %3 = vector.broadcast %2 : vector<16x1xf32> to vector<16x32xf32>
    %4 = arith.mulf %1, %3 : vector<16x32xf32>
    %c0_3 = arith.constant 0 : index
    %c0_4 = arith.constant 0 : index
    %5 = vector.load %arg4[%c0_3, %c0_4] : memref<16x1xf32, #tpu.memory_space<vmem>>, vector<16x1xf32>
    %6 = vector.broadcast %5 : vector<16x1xf32> to vector<16x32xf32>
    %7 = arith.addf %4, %6 : vector<16x32xf32>
    %cst = arith.constant 0.000000e+00 : f32
    %8 = vector.broadcast %cst : f32 to vector<16x32xf32>
    %9 = arith.maximumf %7, %8 : vector<16x32xf32>
    %10 = arith.truncf %9 : vector<16x32xf32> to vector<16x32xbf16>
    %c0_5 = arith.constant 0 : index
    %c0_6 = arith.constant 0 : index
    %11 = vector.load %arg2[%c0_5, %c0_6] : memref<32x16xbf16, #tpu.memory_space<vmem>>, vector<32x16xbf16>
    %cst_7 = arith.constant dense<0.000000e+00> : vector<32x32xf32>
    %12 = tpu.matmul %11, %10, %cst_7 {dimension_numbers = #tpu.dot_dimension_numbers<[1], [0], [0], [1], [0, 0, 1, 1], [], []>} : vector<32x16xbf16>, vector<16x32xbf16>, vector<32x32xf32> -> vector<32x32xf32>
    %13 = arith.truncf %12 : vector<32x32xf32> to vector<32x32xbf16>
    %c0_8 = arith.constant 0 : index
    %c0_9 = arith.constant 0 : index
    %14 = vector.load %arg5[%c0_8, %c0_9] : memref<32x32xbf16, #tpu.memory_space<vmem>>, vector<32x32xbf16>
    tpu.vector_store %arg5[%c0_8, %c0_9], %13 {strides = array<i32>} : memref<32x32xbf16, #tpu.memory_space<vmem>>, vector<32x32xbf16>,
    %cst_10 = arith.constant dense<0.000000e+00> : vector<32xf32>
    %15 = vector.multi_reduction <add>, %12, %cst_10 [1] : vector<32x32xf32> to vector<32xf32>
    %16 = vector.shape_cast %15 : vector<32xf32> to vector<32x1xf32>
    %c0_11 = arith.constant 0 : index
    %c0_12 = arith.constant 0 : index
    %c0_13 = arith.constant 0 : index
    %17 = vector.load %arg6[%c0_11, %c0_12, %c0_13] : memref<1x32x1xf32, #tpu.memory_space<vmem>>, vector<1x32x1xf32>
    %18 = vector.shape_cast %17 : vector<1x32x1xf32> to vector<32x1xf32>
    %19 = vector.shape_cast %16 : vector<32x1xf32> to vector<1x32x1xf32>
    tpu.vector_store %arg6[%c0_11, %c0_12, %c0_13], %19 {strides = array<i32>} : memref<1x32x1xf32, #tpu.memory_space<vmem>>, vector<1x32x1xf32>,
    %20 = arith.mulf %12, %12 : vector<32x32xf32>
    %cst_14 = arith.constant dense<0.000000e+00> : vector<32xf32>
    %21 = vector.multi_reduction <add>, %20, %cst_14 [1] : vector<32x32xf32> to vector<32xf32>
    %22 = vector.shape_cast %21 : vector<32xf32> to vector<32x1xf32>
    %c0_15 = arith.constant 0 : index
    %c0_16 = arith.constant 0 : index
    %c0_17 = arith.constant 0 : index
    %23 = vector.load %arg7[%c0_15, %c0_16, %c0_17] : memref<1x32x1xf32, #tpu.memory_space<vmem>>, vector<1x32x1xf32>
    %24 = vector.shape_cast %23 : vector<1x32x1xf32> to vector<32x1xf32>
    %25 = vector.shape_cast %22 : vector<32x1xf32> to vector<1x32x1xf32>
    tpu.vector_store %arg7[%c0_15, %c0_16, %c0_17], %25 {strides = array<i32>} : memref<1x32x1xf32, #tpu.memory_space<vmem>>, vector<1x32x1xf32>,
    return
  }
  func.func @transform_0(%arg0: i32) -> (i32, i32) {
    %c0_i32 = arith.constant 0 : i32
    %c0_i32_0 = arith.constant 0 : i32
    return %c0_i32, %arg0 : i32, i32
  }
  func.func @transform_1(%arg0: i32) -> (i32, i32) {
    %c0_i32 = arith.constant 0 : i32
    %c0_i32_0 = arith.constant 0 : i32
    %c0_i32_1 = arith.constant 0 : i32
    return %c0_i32, %c0_i32_0 : i32, i32
  }
  func.func @transform_2(%arg0: i32) -> (i32, i32) {
    %c0_i32 = arith.constant 0 : i32
    %c0_i32_0 = arith.constant 0 : i32
    %c0_i32_1 = arith.constant 0 : i32
    return %c0_i32, %c0_i32_0 : i32, i32
  }
  func.func @transform_3(%arg0: i32) -> (i32, i32) {
    %c0_i32 = arith.constant 0 : i32
    %c0_i32_0 = arith.constant 0 : i32
    %c0_i32_1 = arith.constant 0 : i32
    return %c0_i32, %c0_i32_0 : i32, i32
  }
  func.func @transform_4(%arg0: i32) -> (i32, i32) {
    %c0_i32 = arith.constant 0 : i32
    %c0_i32_0 = arith.constant 0 : i32
    return %c0_i32, %arg0 : i32, i32
  }
  func.func @transform_5(%arg0: i32) -> (i32, i32, i32) {
    %c0_i32 = arith.constant 0 : i32
    %c0_i32_0 = arith.constant 0 : i32
    %c0_i32_1 = arith.constant 0 : i32
    return %arg0, %c0_i32, %c0_i32_0 : i32, i32, i32
  }
  func.func @transform_6(%arg0: i32) -> (i32, i32, i32) {
    %c0_i32 = arith.constant 0 : i32
    %c0_i32_0 = arith.constant 0 : i32
    %c0_i32_1 = arith.constant 0 : i32
    return %arg0, %c0_i32, %c0_i32_0 : i32, i32, i32
  }
}

module attributes {stable_mosaic.version = 11 : i64} {
  func.func @_affine_kernel(%arg0: i32, %arg1: memref<32x32xbf16, #tpu.memory_space<vmem>>, %arg2: memref<32x1xf32, #tpu.memory_space<vmem>>, %arg3: memref<32x1xf32, #tpu.memory_space<vmem>>, %arg4: memref<32x32xbf16, #tpu.memory_space<vmem>>) attributes {dimension_semantics = [#tpu.dimension_semantics<parallel>], iteration_bounds = array<i64: 1>, scalar_prefetch = 0 : i64, scratch_operands = 0 : i64, tpu.core_type = #tpu.core_type<tc>, window_params = [{transform_indices = @transform_0, window_bounds = array<i64: 32, 32>}, {pipeline_mode = #tpu.pipeline_mode<synchronous>, transform_indices = @transform_1, window_bounds = array<i64: 32, 1>}, {pipeline_mode = #tpu.pipeline_mode<synchronous>, transform_indices = @transform_2, window_bounds = array<i64: 32, 1>}, {transform_indices = @transform_3, window_bounds = array<i64: 32, 32>}]} {
    %c0 = arith.constant 0 : index
    %c0_0 = arith.constant 0 : index
    %0 = vector.load %arg1[%c0, %c0_0] : memref<32x32xbf16, #tpu.memory_space<vmem>>, vector<32x32xbf16>
    %1 = arith.extf %0 : vector<32x32xbf16> to vector<32x32xf32>
    %c0_1 = arith.constant 0 : index
    %c0_2 = arith.constant 0 : index
    %2 = vector.load %arg2[%c0_1, %c0_2] : memref<32x1xf32, #tpu.memory_space<vmem>>, vector<32x1xf32>
    %3 = vector.broadcast %2 : vector<32x1xf32> to vector<32x32xf32>
    %4 = arith.mulf %1, %3 : vector<32x32xf32>
    %c0_3 = arith.constant 0 : index
    %c0_4 = arith.constant 0 : index
    %5 = vector.load %arg3[%c0_3, %c0_4] : memref<32x1xf32, #tpu.memory_space<vmem>>, vector<32x1xf32>
    %6 = vector.broadcast %5 : vector<32x1xf32> to vector<32x32xf32>
    %7 = arith.addf %4, %6 : vector<32x32xf32>
    %cst = arith.constant 0.000000e+00 : f32
    %8 = vector.broadcast %cst : f32 to vector<32x32xf32>
    %9 = arith.maximumf %7, %8 : vector<32x32xf32>
    %10 = arith.truncf %9 : vector<32x32xf32> to vector<32x32xbf16>
    %c0_5 = arith.constant 0 : index
    %c0_6 = arith.constant 0 : index
    %11 = vector.load %arg4[%c0_5, %c0_6] : memref<32x32xbf16, #tpu.memory_space<vmem>>, vector<32x32xbf16>
    tpu.vector_store %arg4[%c0_5, %c0_6], %10 {strides = array<i32>} : memref<32x32xbf16, #tpu.memory_space<vmem>>, vector<32x32xbf16>,
    return
  }
  func.func @transform_0(%arg0: i32) -> (i32, i32) {
    %c0_i32 = arith.constant 0 : i32
    %c0_i32_0 = arith.constant 0 : i32
    return %c0_i32, %arg0 : i32, i32
  }
  func.func @transform_1(%arg0: i32) -> (i32, i32) {
    %c0_i32 = arith.constant 0 : i32
    %c0_i32_0 = arith.constant 0 : i32
    %c0_i32_1 = arith.constant 0 : i32
    return %c0_i32, %c0_i32_0 : i32, i32
  }
  func.func @transform_2(%arg0: i32) -> (i32, i32) {
    %c0_i32 = arith.constant 0 : i32
    %c0_i32_0 = arith.constant 0 : i32
    %c0_i32_1 = arith.constant 0 : i32
    return %c0_i32, %c0_i32_0 : i32, i32
  }
  func.func @transform_3(%arg0: i32) -> (i32, i32) {
    %c0_i32 = arith.constant 0 : i32
    %c0_i32_0 = arith.constant 0 : i32
    return %c0_i32, %arg0 : i32, i32
  }
}

module attributes {stable_mosaic.version = 11 : i64} {
  func.func @kernel(%arg0: i32, %arg1: memref<288x32xbf16, #tpu.memory_space<vmem>>, %arg2: memref<8x288xbf16, #tpu.memory_space<vmem>>, %arg3: memref<8x32xbf16, #tpu.memory_space<vmem>>, %arg4: memref<1x8x1xf32, #tpu.memory_space<vmem>>, %arg5: memref<1x8x1xf32, #tpu.memory_space<vmem>>) attributes {dimension_semantics = [#tpu.dimension_semantics<parallel>], iteration_bounds = array<i64: 1>, scalar_prefetch = 0 : i64, scratch_operands = 0 : i64, tpu.core_type = #tpu.core_type<tc>, window_params = [{transform_indices = @transform_0, window_bounds = array<i64: 288, 32>}, {pipeline_mode = #tpu.pipeline_mode<synchronous>, transform_indices = @transform_1, window_bounds = array<i64: 8, 288>}, {transform_indices = @transform_2, window_bounds = array<i64: 8, 32>}, {transform_indices = @transform_3, window_bounds = array<i64: 1, 8, 1>}, {transform_indices = @transform_4, window_bounds = array<i64: 1, 8, 1>}]} {
    %c0 = arith.constant 0 : index
    %c0_0 = arith.constant 0 : index
    %0 = vector.load %arg1[%c0, %c0_0] : memref<288x32xbf16, #tpu.memory_space<vmem>>, vector<288x32xbf16>
    %c0_1 = arith.constant 0 : index
    %c0_2 = arith.constant 0 : index
    %1 = vector.load %arg2[%c0_1, %c0_2] : memref<8x288xbf16, #tpu.memory_space<vmem>>, vector<8x288xbf16>
    %cst = arith.constant dense<0.000000e+00> : vector<8x32xf32>
    %2 = tpu.matmul %1, %0, %cst {dimension_numbers = #tpu.dot_dimension_numbers<[1], [0], [0], [1], [0, 0, 1, 1], [], []>} : vector<8x288xbf16>, vector<288x32xbf16>, vector<8x32xf32> -> vector<8x32xf32>
    %3 = arith.truncf %2 : vector<8x32xf32> to vector<8x32xbf16>
    %c0_3 = arith.constant 0 : index
    %c0_4 = arith.constant 0 : index
    %4 = vector.load %arg3[%c0_3, %c0_4] : memref<8x32xbf16, #tpu.memory_space<vmem>>, vector<8x32xbf16>
    tpu.vector_store %arg3[%c0_3, %c0_4], %3 {strides = array<i32>} : memref<8x32xbf16, #tpu.memory_space<vmem>>, vector<8x32xbf16>,
    %cst_5 = arith.constant dense<0.000000e+00> : vector<8xf32>
    %5 = vector.multi_reduction <add>, %2, %cst_5 [1] : vector<8x32xf32> to vector<8xf32>
    %6 = vector.shape_cast %5 : vector<8xf32> to vector<8x1xf32>
    %c0_6 = arith.constant 0 : index
    %c0_7 = arith.constant 0 : index
    %c0_8 = arith.constant 0 : index
    %7 = vector.load %arg4[%c0_6, %c0_7, %c0_8] : memref<1x8x1xf32, #tpu.memory_space<vmem>>, vector<1x8x1xf32>
    %8 = vector.shape_cast %7 : vector<1x8x1xf32> to vector<8x1xf32>
    %9 = vector.shape_cast %6 : vector<8x1xf32> to vector<1x8x1xf32>
    tpu.vector_store %arg4[%c0_6, %c0_7, %c0_8], %9 {strides = array<i32>} : memref<1x8x1xf32, #tpu.memory_space<vmem>>, vector<1x8x1xf32>,
    %10 = arith.mulf %2, %2 : vector<8x32xf32>
    %cst_9 = arith.constant dense<0.000000e+00> : vector<8xf32>
    %11 = vector.multi_reduction <add>, %10, %cst_9 [1] : vector<8x32xf32> to vector<8xf32>
    %12 = vector.shape_cast %11 : vector<8xf32> to vector<8x1xf32>
    %c0_10 = arith.constant 0 : index
    %c0_11 = arith.constant 0 : index
    %c0_12 = arith.constant 0 : index
    %13 = vector.load %arg5[%c0_10, %c0_11, %c0_12] : memref<1x8x1xf32, #tpu.memory_space<vmem>>, vector<1x8x1xf32>
    %14 = vector.shape_cast %13 : vector<1x8x1xf32> to vector<8x1xf32>
    %15 = vector.shape_cast %12 : vector<8x1xf32> to vector<1x8x1xf32>
    tpu.vector_store %arg5[%c0_10, %c0_11, %c0_12], %15 {strides = array<i32>} : memref<1x8x1xf32, #tpu.memory_space<vmem>>, vector<1x8x1xf32>,
    return
  }
  func.func @transform_0(%arg0: i32) -> (i32, i32) {
    %c0_i32 = arith.constant 0 : i32
    %c0_i32_0 = arith.constant 0 : i32
    return %c0_i32, %arg0 : i32, i32
  }
  func.func @transform_1(%arg0: i32) -> (i32, i32) {
    %c0_i32 = arith.constant 0 : i32
    %c0_i32_0 = arith.constant 0 : i32
    %c0_i32_1 = arith.constant 0 : i32
    return %c0_i32, %c0_i32_0 : i32, i32
  }
  func.func @transform_2(%arg0: i32) -> (i32, i32) {
    %c0_i32 = arith.constant 0 : i32
    %c0_i32_0 = arith.constant 0 : i32
    return %c0_i32, %arg0 : i32, i32
  }
  func.func @transform_3(%arg0: i32) -> (i32, i32, i32) {
    %c0_i32 = arith.constant 0 : i32
    %c0_i32_0 = arith.constant 0 : i32
    %c0_i32_1 = arith.constant 0 : i32
    return %arg0, %c0_i32, %c0_i32_0 : i32, i32, i32
  }
  func.func @transform_4(%arg0: i32) -> (i32, i32, i32) {
    %c0_i32 = arith.constant 0 : i32
    %c0_i32_0 = arith.constant 0 : i32
    %c0_i32_1 = arith.constant 0 : i32
    return %arg0, %c0_i32, %c0_i32_0 : i32, i32, i32
  }
}

module attributes {stable_mosaic.version = 11 : i64} {
  func.func @kernel(%arg0: i32, %arg1: memref<16x32xbf16, #tpu.memory_space<vmem>>, %arg2: memref<8x32xbf16, #tpu.memory_space<vmem>>, %arg3: memref<32x24xbf16, #tpu.memory_space<vmem>>, %arg4: memref<24x1xf32, #tpu.memory_space<vmem>>, %arg5: memref<24x1xf32, #tpu.memory_space<vmem>>, %arg6: memref<32x32xbf16, #tpu.memory_space<vmem>>, %arg7: memref<1x32x1xf32, #tpu.memory_space<vmem>>, %arg8: memref<1x32x1xf32, #tpu.memory_space<vmem>>) attributes {dimension_semantics = [#tpu.dimension_semantics<parallel>], iteration_bounds = array<i64: 1>, scalar_prefetch = 0 : i64, scratch_operands = 0 : i64, tpu.core_type = #tpu.core_type<tc>, window_params = [{transform_indices = @transform_0, window_bounds = array<i64: 16, 32>}, {transform_indices = @transform_1, window_bounds = array<i64: 8, 32>}, {pipeline_mode = #tpu.pipeline_mode<synchronous>, transform_indices = @transform_2, window_bounds = array<i64: 32, 24>}, {pipeline_mode = #tpu.pipeline_mode<synchronous>, transform_indices = @transform_3, window_bounds = array<i64: 24, 1>}, {pipeline_mode = #tpu.pipeline_mode<synchronous>, transform_indices = @transform_4, window_bounds = array<i64: 24, 1>}, {transform_indices = @transform_5, window_bounds = array<i64: 32, 32>}, {transform_indices = @transform_6, window_bounds = array<i64: 1, 32, 1>}, {transform_indices = @transform_7, window_bounds = array<i64: 1, 32, 1>}]} {
    %c0 = arith.constant 0 : index
    %c0_0 = arith.constant 0 : index
    %0 = vector.load %arg1[%c0, %c0_0] : memref<16x32xbf16, #tpu.memory_space<vmem>>, vector<16x32xbf16>
    %1 = arith.extf %0 : vector<16x32xbf16> to vector<16x32xf32>
    %c0_1 = arith.constant 0 : index
    %c0_2 = arith.constant 0 : index
    %2 = vector.load %arg4[%c0_1, %c0_2] : memref<24x1xf32, #tpu.memory_space<vmem>>, vector<16x1xf32>
    %3 = vector.broadcast %2 : vector<16x1xf32> to vector<16x32xf32>
    %4 = arith.mulf %1, %3 : vector<16x32xf32>
    %c0_3 = arith.constant 0 : index
    %c0_4 = arith.constant 0 : index
    %5 = vector.load %arg5[%c0_3, %c0_4] : memref<24x1xf32, #tpu.memory_space<vmem>>, vector<16x1xf32>
    %6 = vector.broadcast %5 : vector<16x1xf32> to vector<16x32xf32>
    %7 = arith.addf %4, %6 : vector<16x32xf32>
    %cst = arith.constant 0.000000e+00 : f32
    %8 = vector.broadcast %cst : f32 to vector<16x32xf32>
    %9 = arith.maximumf %7, %8 : vector<16x32xf32>
    %10 = arith.truncf %9 : vector<16x32xf32> to vector<16x32xbf16>
    %c0_5 = arith.constant 0 : index
    %c0_6 = arith.constant 0 : index
    %11 = vector.load %arg3[%c0_5, %c0_6] : memref<32x24xbf16, #tpu.memory_space<vmem>>, vector<32x16xbf16>
    %cst_7 = arith.constant dense<0.000000e+00> : vector<32x32xf32>
    %12 = tpu.matmul %11, %10, %cst_7 {dimension_numbers = #tpu.dot_dimension_numbers<[1], [0], [0], [1], [0, 0, 1, 1], [], []>} : vector<32x16xbf16>, vector<16x32xbf16>, vector<32x32xf32> -> vector<32x32xf32>
    %c0_8 = arith.constant 0 : index
    %c0_9 = arith.constant 0 : index
    %13 = vector.load %arg2[%c0_8, %c0_9] : memref<8x32xbf16, #tpu.memory_space<vmem>>, vector<8x32xbf16>
    %14 = arith.extf %13 : vector<8x32xbf16> to vector<8x32xf32>
    %c16 = arith.constant 16 : index
    %c0_10 = arith.constant 0 : index
    %15 = vector.load %arg4[%c16, %c0_10] : memref<24x1xf32, #tpu.memory_space<vmem>>, vector<8x1xf32>
    %16 = vector.broadcast %15 : vector<8x1xf32> to vector<8x32xf32>
    %17 = arith.mulf %14, %16 : vector<8x32xf32>
    %c16_11 = arith.constant 16 : index
    %c0_12 = arith.constant 0 : index
    %18 = vector.load %arg5[%c16_11, %c0_12] : memref<24x1xf32, #tpu.memory_space<vmem>>, vector<8x1xf32>
    %19 = vector.broadcast %18 : vector<8x1xf32> to vector<8x32xf32>
    %20 = arith.addf %17, %19 : vector<8x32xf32>
    %cst_13 = arith.constant 0.000000e+00 : f32
    %21 = vector.broadcast %cst_13 : f32 to vector<8x32xf32>
    %22 = arith.maximumf %20, %21 : vector<8x32xf32>
    %23 = arith.truncf %22 : vector<8x32xf32> to vector<8x32xbf16>
    %c0_14 = arith.constant 0 : index
    %c16_15 = arith.constant 16 : index
    %24 = vector.load %arg3[%c0_14, %c16_15] : memref<32x24xbf16, #tpu.memory_space<vmem>>, vector<32x8xbf16>
    %cst_16 = arith.constant dense<0.000000e+00> : vector<32x32xf32>
    %25 = tpu.matmul %24, %23, %cst_16 {dimension_numbers = #tpu.dot_dimension_numbers<[1], [0], [0], [1], [0, 0, 1, 1], [], []>} : vector<32x8xbf16>, vector<8x32xbf16>, vector<32x32xf32> -> vector<32x32xf32>
    %26 = arith.addf %12, %25 : vector<32x32xf32>
    %27 = arith.truncf %26 : vector<32x32xf32> to vector<32x32xbf16>
    %c0_17 = arith.constant 0 : index
    %c0_18 = arith.constant 0 : index
    %28 = vector.load %arg6[%c0_17, %c0_18] : memref<32x32xbf16, #tpu.memory_space<vmem>>, vector<32x32xbf16>
    tpu.vector_store %arg6[%c0_17, %c0_18], %27 {strides = array<i32>} : memref<32x32xbf16, #tpu.memory_space<vmem>>, vector<32x32xbf16>,
    %cst_19 = arith.constant dense<0.000000e+00> : vector<32xf32>
    %29 = vector.multi_reduction <add>, %26, %cst_19 [1] : vector<32x32xf32> to vector<32xf32>
    %30 = vector.shape_cast %29 : vector<32xf32> to vector<32x1xf32>
    %c0_20 = arith.constant 0 : index
    %c0_21 = arith.constant 0 : index
    %c0_22 = arith.constant 0 : index
    %31 = vector.load %arg7[%c0_20, %c0_21, %c0_22] : memref<1x32x1xf32, #tpu.memory_space<vmem>>, vector<1x32x1xf32>
    %32 = vector.shape_cast %31 : vector<1x32x1xf32> to vector<32x1xf32>
    %33 = vector.shape_cast %30 : vector<32x1xf32> to vector<1x32x1xf32>
    tpu.vector_store %arg7[%c0_20, %c0_21, %c0_22], %33 {strides = array<i32>} : memref<1x32x1xf32, #tpu.memory_space<vmem>>, vector<1x32x1xf32>,
    %34 = arith.mulf %26, %26 : vector<32x32xf32>
    %cst_23 = arith.constant dense<0.000000e+00> : vector<32xf32>
    %35 = vector.multi_reduction <add>, %34, %cst_23 [1] : vector<32x32xf32> to vector<32xf32>
    %36 = vector.shape_cast %35 : vector<32xf32> to vector<32x1xf32>
    %c0_24 = arith.constant 0 : index
    %c0_25 = arith.constant 0 : index
    %c0_26 = arith.constant 0 : index
    %37 = vector.load %arg8[%c0_24, %c0_25, %c0_26] : memref<1x32x1xf32, #tpu.memory_space<vmem>>, vector<1x32x1xf32>
    %38 = vector.shape_cast %37 : vector<1x32x1xf32> to vector<32x1xf32>
    %39 = vector.shape_cast %36 : vector<32x1xf32> to vector<1x32x1xf32>
    tpu.vector_store %arg8[%c0_24, %c0_25, %c0_26], %39 {strides = array<i32>} : memref<1x32x1xf32, #tpu.memory_space<vmem>>, vector<1x32x1xf32>,
    return
  }
  func.func @transform_0(%arg0: i32) -> (i32, i32) {
    %c0_i32 = arith.constant 0 : i32
    %c0_i32_0 = arith.constant 0 : i32
    return %c0_i32, %arg0 : i32, i32
  }
  func.func @transform_1(%arg0: i32) -> (i32, i32) {
    %c0_i32 = arith.constant 0 : i32
    %c0_i32_0 = arith.constant 0 : i32
    return %c0_i32, %arg0 : i32, i32
  }
  func.func @transform_2(%arg0: i32) -> (i32, i32) {
    %c0_i32 = arith.constant 0 : i32
    %c0_i32_0 = arith.constant 0 : i32
    %c0_i32_1 = arith.constant 0 : i32
    return %c0_i32, %c0_i32_0 : i32, i32
  }
  func.func @transform_3(%arg0: i32) -> (i32, i32) {
    %c0_i32 = arith.constant 0 : i32
    %c0_i32_0 = arith.constant 0 : i32
    %c0_i32_1 = arith.constant 0 : i32
    return %c0_i32, %c0_i32_0 : i32, i32
  }
  func.func @transform_4(%arg0: i32) -> (i32, i32) {
    %c0_i32 = arith.constant 0 : i32
    %c0_i32_0 = arith.constant 0 : i32
    %c0_i32_1 = arith.constant 0 : i32
    return %c0_i32, %c0_i32_0 : i32, i32
  }
  func.func @transform_5(%arg0: i32) -> (i32, i32) {
    %c0_i32 = arith.constant 0 : i32
    %c0_i32_0 = arith.constant 0 : i32
    return %c0_i32, %arg0 : i32, i32
  }
  func.func @transform_6(%arg0: i32) -> (i32, i32, i32) {
    %c0_i32 = arith.constant 0 : i32
    %c0_i32_0 = arith.constant 0 : i32
    %c0_i32_1 = arith.constant 0 : i32
    return %arg0, %c0_i32, %c0_i32_0 : i32, i32, i32
  }
  func.func @transform_7(%arg0: i32) -> (i32, i32, i32) {
    %c0_i32 = arith.constant 0 : i32
    %c0_i32_0 = arith.constant 0 : i32
    %c0_i32_1 = arith.constant 0 : i32
    return %arg0, %c0_i32, %c0_i32_0 : i32, i32, i32
  }
}

module attributes {stable_mosaic.version = 11 : i64} {
  func.func @kernel(%arg0: i32, %arg1: memref<16x32xbf16, #tpu.memory_space<vmem>>, %arg2: memref<8x32xbf16, #tpu.memory_space<vmem>>, %arg3: memref<8x32xbf16, #tpu.memory_space<vmem>>, %arg4: memref<16x32xbf16, #tpu.memory_space<vmem>>, %arg5: memref<32x1xf32, #tpu.memory_space<vmem>>, %arg6: memref<32x1xf32, #tpu.memory_space<vmem>>, %arg7: memref<16x32xbf16, #tpu.memory_space<vmem>>, %arg8: memref<1x16x1xf32, #tpu.memory_space<vmem>>, %arg9: memref<1x16x1xf32, #tpu.memory_space<vmem>>) attributes {dimension_semantics = [#tpu.dimension_semantics<parallel>], iteration_bounds = array<i64: 1>, scalar_prefetch = 0 : i64, scratch_operands = 0 : i64, tpu.core_type = #tpu.core_type<tc>, window_params = [{transform_indices = @transform_0, window_bounds = array<i64: 16, 32>}, {transform_indices = @transform_1, window_bounds = array<i64: 8, 32>}, {transform_indices = @transform_2, window_bounds = array<i64: 8, 32>}, {pipeline_mode = #tpu.pipeline_mode<synchronous>, transform_indices = @transform_3, window_bounds = array<i64: 16, 32>}, {pipeline_mode = #tpu.pipeline_mode<synchronous>, transform_indices = @transform_4, window_bounds = array<i64: 32, 1>}, {pipeline_mode = #tpu.pipeline_mode<synchronous>, transform_indices = @transform_5, window_bounds = array<i64: 32, 1>}, {transform_indices = @transform_6, window_bounds = array<i64: 16, 32>}, {transform_indices = @transform_7, window_bounds = array<i64: 1, 16, 1>}, {transform_indices = @transform_8, window_bounds = array<i64: 1, 16, 1>}]} {
    %c0 = arith.constant 0 : index
    %c0_0 = arith.constant 0 : index
    %0 = vector.load %arg1[%c0, %c0_0] : memref<16x32xbf16, #tpu.memory_space<vmem>>, vector<16x32xbf16>
    %1 = arith.extf %0 : vector<16x32xbf16> to vector<16x32xf32>
    %c0_1 = arith.constant 0 : index
    %c0_2 = arith.constant 0 : index
    %2 = vector.load %arg5[%c0_1, %c0_2] : memref<32x1xf32, #tpu.memory_space<vmem>>, vector<16x1xf32>
    %3 = vector.broadcast %2 : vector<16x1xf32> to vector<16x32xf32>
    %4 = arith.mulf %1, %3 : vector<16x32xf32>
    %c0_3 = arith.constant 0 : index
    %c0_4 = arith.constant 0 : index
    %5 = vector.load %arg6[%c0_3, %c0_4] : memref<32x1xf32, #tpu.memory_space<vmem>>, vector<16x1xf32>
    %6 = vector.broadcast %5 : vector<16x1xf32> to vector<16x32xf32>
    %7 = arith.addf %4, %6 : vector<16x32xf32>
    %cst = arith.constant 0.000000e+00 : f32
    %8 = vector.broadcast %cst : f32 to vector<16x32xf32>
    %9 = arith.maximumf %7, %8 : vector<16x32xf32>
    %10 = arith.truncf %9 : vector<16x32xf32> to vector<16x32xbf16>
    %c0_5 = arith.constant 0 : index
    %c0_6 = arith.constant 0 : index
    %11 = vector.load %arg4[%c0_5, %c0_6] : memref<16x32xbf16, #tpu.memory_space<vmem>>, vector<16x16xbf16>
    %cst_7 = arith.constant dense<0.000000e+00> : vector<16x32xf32>
    %12 = tpu.matmul %11, %10, %cst_7 {dimension_numbers = #tpu.dot_dimension_numbers<[1], [0], [0], [1], [0, 0, 1, 1], [], []>} : vector<16x16xbf16>, vector<16x32xbf16>, vector<16x32xf32> -> vector<16x32xf32>
    %c0_8 = arith.constant 0 : index
    %c0_9 = arith.constant 0 : index
    %13 = vector.load %arg2[%c0_8, %c0_9] : memref<8x32xbf16, #tpu.memory_space<vmem>>, vector<8x32xbf16>
    %14 = arith.extf %13 : vector<8x32xbf16> to vector<8x32xf32>
    %c16 = arith.constant 16 : index
    %c0_10 = arith.constant 0 : index
    %15 = vector.load %arg5[%c16, %c0_10] : memref<32x1xf32, #tpu.memory_space<vmem>>, vector<8x1xf32>
    %16 = vector.broadcast %15 : vector<8x1xf32> to vector<8x32xf32>
    %17 = arith.mulf %14, %16 : vector<8x32xf32>
    %c16_11 = arith.constant 16 : index
    %c0_12 = arith.constant 0 : index
    %18 = vector.load %arg6[%c16_11, %c0_12] : memref<32x1xf32, #tpu.memory_space<vmem>>, vector<8x1xf32>
    %19 = vector.broadcast %18 : vector<8x1xf32> to vector<8x32xf32>
    %20 = arith.addf %17, %19 : vector<8x32xf32>
    %cst_13 = arith.constant 0.000000e+00 : f32
    %21 = vector.broadcast %cst_13 : f32 to vector<8x32xf32>
    %22 = arith.maximumf %20, %21 : vector<8x32xf32>
    %23 = arith.truncf %22 : vector<8x32xf32> to vector<8x32xbf16>
    %c0_14 = arith.constant 0 : index
    %c16_15 = arith.constant 16 : index
    %24 = vector.load %arg4[%c0_14, %c16_15] : memref<16x32xbf16, #tpu.memory_space<vmem>>, vector<16x8xbf16>
    %cst_16 = arith.constant dense<0.000000e+00> : vector<16x32xf32>
    %25 = tpu.matmul %24, %23, %cst_16 {dimension_numbers = #tpu.dot_dimension_numbers<[1], [0], [0], [1], [0, 0, 1, 1], [], []>} : vector<16x8xbf16>, vector<8x32xbf16>, vector<16x32xf32> -> vector<16x32xf32>
    %26 = arith.addf %12, %25 : vector<16x32xf32>
    %c0_17 = arith.constant 0 : index
    %c0_18 = arith.constant 0 : index
    %27 = vector.load %arg3[%c0_17, %c0_18] : memref<8x32xbf16, #tpu.memory_space<vmem>>, vector<8x32xbf16>
    %28 = arith.extf %27 : vector<8x32xbf16> to vector<8x32xf32>
    %c24 = arith.constant 24 : index
    %c0_19 = arith.constant 0 : index
    %29 = vector.load %arg5[%c24, %c0_19] : memref<32x1xf32, #tpu.memory_space<vmem>>, vector<8x1xf32>
    %30 = vector.broadcast %29 : vector<8x1xf32> to vector<8x32xf32>
    %31 = arith.mulf %28, %30 : vector<8x32xf32>
    %c24_20 = arith.constant 24 : index
    %c0_21 = arith.constant 0 : index
    %32 = vector.load %arg6[%c24_20, %c0_21] : memref<32x1xf32, #tpu.memory_space<vmem>>, vector<8x1xf32>
    %33 = vector.broadcast %32 : vector<8x1xf32> to vector<8x32xf32>
    %34 = arith.addf %31, %33 : vector<8x32xf32>
    %cst_22 = arith.constant 0.000000e+00 : f32
    %35 = vector.broadcast %cst_22 : f32 to vector<8x32xf32>
    %36 = arith.maximumf %34, %35 : vector<8x32xf32>
    %37 = arith.truncf %36 : vector<8x32xf32> to vector<8x32xbf16>
    %c0_23 = arith.constant 0 : index
    %c24_24 = arith.constant 24 : index
    %38 = vector.load %arg4[%c0_23, %c24_24] : memref<16x32xbf16, #tpu.memory_space<vmem>>, vector<16x8xbf16>
    %cst_25 = arith.constant dense<0.000000e+00> : vector<16x32xf32>
    %39 = tpu.matmul %38, %37, %cst_25 {dimension_numbers = #tpu.dot_dimension_numbers<[1], [0], [0], [1], [0, 0, 1, 1], [], []>} : vector<16x8xbf16>, vector<8x32xbf16>, vector<16x32xf32> -> vector<16x32xf32>
    %40 = arith.addf %26, %39 : vector<16x32xf32>
    %41 = arith.truncf %40 : vector<16x32xf32> to vector<16x32xbf16>
    %c0_26 = arith.constant 0 : index
    %c0_27 = arith.constant 0 : index
    %42 = vector.load %arg7[%c0_26, %c0_27] : memref<16x32xbf16, #tpu.memory_space<vmem>>, vector<16x32xbf16>
    tpu.vector_store %arg7[%c0_26, %c0_27], %41 {strides = array<i32>} : memref<16x32xbf16, #tpu.memory_space<vmem>>, vector<16x32xbf16>,
    %cst_28 = arith.constant dense<0.000000e+00> : vector<16xf32>
    %43 = vector.multi_reduction <add>, %40, %cst_28 [1] : vector<16x32xf32> to vector<16xf32>
    %44 = vector.shape_cast %43 : vector<16xf32> to vector<16x1xf32>
    %c0_29 = arith.constant 0 : index
    %c0_30 = arith.constant 0 : index
    %c0_31 = arith.constant 0 : index
    %45 = vector.load %arg8[%c0_29, %c0_30, %c0_31] : memref<1x16x1xf32, #tpu.memory_space<vmem>>, vector<1x16x1xf32>
    %46 = vector.shape_cast %45 : vector<1x16x1xf32> to vector<16x1xf32>
    %47 = vector.shape_cast %44 : vector<16x1xf32> to vector<1x16x1xf32>
    tpu.vector_store %arg8[%c0_29, %c0_30, %c0_31], %47 {strides = array<i32>} : memref<1x16x1xf32, #tpu.memory_space<vmem>>, vector<1x16x1xf32>,
    %48 = arith.mulf %40, %40 : vector<16x32xf32>
    %cst_32 = arith.constant dense<0.000000e+00> : vector<16xf32>
    %49 = vector.multi_reduction <add>, %48, %cst_32 [1] : vector<16x32xf32> to vector<16xf32>
    %50 = vector.shape_cast %49 : vector<16xf32> to vector<16x1xf32>
    %c0_33 = arith.constant 0 : index
    %c0_34 = arith.constant 0 : index
    %c0_35 = arith.constant 0 : index
    %51 = vector.load %arg9[%c0_33, %c0_34, %c0_35] : memref<1x16x1xf32, #tpu.memory_space<vmem>>, vector<1x16x1xf32>
    %52 = vector.shape_cast %51 : vector<1x16x1xf32> to vector<16x1xf32>
    %53 = vector.shape_cast %50 : vector<16x1xf32> to vector<1x16x1xf32>
    tpu.vector_store %arg9[%c0_33, %c0_34, %c0_35], %53 {strides = array<i32>} : memref<1x16x1xf32, #tpu.memory_space<vmem>>, vector<1x16x1xf32>,
    return
  }
  func.func @transform_0(%arg0: i32) -> (i32, i32) {
    %c0_i32 = arith.constant 0 : i32
    %c0_i32_0 = arith.constant 0 : i32
    return %c0_i32, %arg0 : i32, i32
  }
  func.func @transform_1(%arg0: i32) -> (i32, i32) {
    %c0_i32 = arith.constant 0 : i32
    %c0_i32_0 = arith.constant 0 : i32
    return %c0_i32, %arg0 : i32, i32
  }
  func.func @transform_2(%arg0: i32) -> (i32, i32) {
    %c0_i32 = arith.constant 0 : i32
    %c0_i32_0 = arith.constant 0 : i32
    return %c0_i32, %arg0 : i32, i32
  }
  func.func @transform_3(%arg0: i32) -> (i32, i32) {
    %c0_i32 = arith.constant 0 : i32
    %c0_i32_0 = arith.constant 0 : i32
    %c0_i32_1 = arith.constant 0 : i32
    return %c0_i32, %c0_i32_0 : i32, i32
  }
  func.func @transform_4(%arg0: i32) -> (i32, i32) {
    %c0_i32 = arith.constant 0 : i32
    %c0_i32_0 = arith.constant 0 : i32
    %c0_i32_1 = arith.constant 0 : i32
    return %c0_i32, %c0_i32_0 : i32, i32
  }
  func.func @transform_5(%arg0: i32) -> (i32, i32) {
    %c0_i32 = arith.constant 0 : i32
    %c0_i32_0 = arith.constant 0 : i32
    %c0_i32_1 = arith.constant 0 : i32
    return %c0_i32, %c0_i32_0 : i32, i32
  }
  func.func @transform_6(%arg0: i32) -> (i32, i32) {
    %c0_i32 = arith.constant 0 : i32
    %c0_i32_0 = arith.constant 0 : i32
    return %c0_i32, %arg0 : i32, i32
  }
  func.func @transform_7(%arg0: i32) -> (i32, i32, i32) {
    %c0_i32 = arith.constant 0 : i32
    %c0_i32_0 = arith.constant 0 : i32
    %c0_i32_1 = arith.constant 0 : i32
    return %arg0, %c0_i32, %c0_i32_0 : i32, i32, i32
  }
  func.func @transform_8(%arg0: i32) -> (i32, i32, i32) {
    %c0_i32 = arith.constant 0 : i32
    %c0_i32_0 = arith.constant 0 : i32
    %c0_i32_1 = arith.constant 0 : i32
    return %arg0, %c0_i32, %c0_i32_0 : i32, i32, i32
  }
}

module attributes {stable_mosaic.version = 11 : i64} {
  func.func @_pool_kernel(%arg0: i32, %arg1: memref<4x16x8xbf16, #tpu.memory_space<vmem>>, %arg2: memref<16x8xbf16, #tpu.memory_space<vmem>>, %arg3: memref<1x16x1xf32, #tpu.memory_space<vmem>>, %arg4: memref<1x16x1xf32, #tpu.memory_space<vmem>>) attributes {dimension_semantics = [#tpu.dimension_semantics<parallel>], iteration_bounds = array<i64: 1>, scalar_prefetch = 0 : i64, scratch_operands = 0 : i64, tpu.core_type = #tpu.core_type<tc>, window_params = [{transform_indices = @transform_0, window_bounds = array<i64: 4, 16, 8>}, {transform_indices = @transform_1, window_bounds = array<i64: 16, 8>}, {transform_indices = @transform_2, window_bounds = array<i64: 1, 16, 1>}, {transform_indices = @transform_3, window_bounds = array<i64: 1, 16, 1>}]} {
    %c0 = arith.constant 0 : index
    %c0_0 = arith.constant 0 : index
    %c0_1 = arith.constant 0 : index
    %0 = vector.load %arg1[%c0, %c0_0, %c0_1] : memref<4x16x8xbf16, #tpu.memory_space<vmem>>, vector<4x16x8xbf16>
    %1 = arith.extf %0 : vector<4x16x8xbf16> to vector<4x16x8xf32>
    %cst = arith.constant dense<0.000000e+00> : vector<16x8xf32>
    %2 = vector.multi_reduction <add>, %1, %cst [0] : vector<4x16x8xf32> to vector<16x8xf32>
    %cst_2 = arith.constant 2.500000e-01 : f32
    %3 = vector.broadcast %cst_2 : f32 to vector<16x8xf32>
    %4 = arith.mulf %2, %3 : vector<16x8xf32>
    %5 = arith.truncf %4 : vector<16x8xf32> to vector<16x8xbf16>
    %c0_3 = arith.constant 0 : index
    %c0_4 = arith.constant 0 : index
    %6 = vector.load %arg2[%c0_3, %c0_4] : memref<16x8xbf16, #tpu.memory_space<vmem>>, vector<16x8xbf16>
    tpu.vector_store %arg2[%c0_3, %c0_4], %5 {strides = array<i32>} : memref<16x8xbf16, #tpu.memory_space<vmem>>, vector<16x8xbf16>,
    %cst_5 = arith.constant dense<0.000000e+00> : vector<16xf32>
    %7 = vector.multi_reduction <add>, %4, %cst_5 [1] : vector<16x8xf32> to vector<16xf32>
    %8 = vector.shape_cast %7 : vector<16xf32> to vector<16x1xf32>
    %c0_6 = arith.constant 0 : index
    %c0_7 = arith.constant 0 : index
    %c0_8 = arith.constant 0 : index
    %9 = vector.load %arg3[%c0_6, %c0_7, %c0_8] : memref<1x16x1xf32, #tpu.memory_space<vmem>>, vector<1x16x1xf32>
    %10 = vector.shape_cast %9 : vector<1x16x1xf32> to vector<16x1xf32>
    %11 = vector.shape_cast %8 : vector<16x1xf32> to vector<1x16x1xf32>
    tpu.vector_store %arg3[%c0_6, %c0_7, %c0_8], %11 {strides = array<i32>} : memref<1x16x1xf32, #tpu.memory_space<vmem>>, vector<1x16x1xf32>,
    %12 = arith.mulf %4, %4 : vector<16x8xf32>
    %cst_9 = arith.constant dense<0.000000e+00> : vector<16xf32>
    %13 = vector.multi_reduction <add>, %12, %cst_9 [1] : vector<16x8xf32> to vector<16xf32>
    %14 = vector.shape_cast %13 : vector<16xf32> to vector<16x1xf32>
    %c0_10 = arith.constant 0 : index
    %c0_11 = arith.constant 0 : index
    %c0_12 = arith.constant 0 : index
    %15 = vector.load %arg4[%c0_10, %c0_11, %c0_12] : memref<1x16x1xf32, #tpu.memory_space<vmem>>, vector<1x16x1xf32>
    %16 = vector.shape_cast %15 : vector<1x16x1xf32> to vector<16x1xf32>
    %17 = vector.shape_cast %14 : vector<16x1xf32> to vector<1x16x1xf32>
    tpu.vector_store %arg4[%c0_10, %c0_11, %c0_12], %17 {strides = array<i32>} : memref<1x16x1xf32, #tpu.memory_space<vmem>>, vector<1x16x1xf32>,
    return
  }
  func.func @transform_0(%arg0: i32) -> (i32, i32, i32) {
    %c0_i32 = arith.constant 0 : i32
    %c0_i32_0 = arith.constant 0 : i32
    %c0_i32_1 = arith.constant 0 : i32
    return %c0_i32, %c0_i32_0, %arg0 : i32, i32, i32
  }
  func.func @transform_1(%arg0: i32) -> (i32, i32) {
    %c0_i32 = arith.constant 0 : i32
    %c0_i32_0 = arith.constant 0 : i32
    return %c0_i32, %arg0 : i32, i32
  }
  func.func @transform_2(%arg0: i32) -> (i32, i32, i32) {
    %c0_i32 = arith.constant 0 : i32
    %c0_i32_0 = arith.constant 0 : i32
    %c0_i32_1 = arith.constant 0 : i32
    return %arg0, %c0_i32, %c0_i32_0 : i32, i32, i32
  }
  func.func @transform_3(%arg0: i32) -> (i32, i32, i32) {
    %c0_i32 = arith.constant 0 : i32
    %c0_i32_0 = arith.constant 0 : i32
    %c0_i32_1 = arith.constant 0 : i32
    return %arg0, %c0_i32, %c0_i32_0 : i32, i32, i32
  }
}

module attributes {stable_mosaic.version = 11 : i64} {
  func.func @kernel(%arg0: i32, %arg1: memref<16x8xbf16, #tpu.memory_space<vmem>>, %arg2: memref<32x16xbf16, #tpu.memory_space<vmem>>, %arg3: memref<16x1xf32, #tpu.memory_space<vmem>>, %arg4: memref<16x1xf32, #tpu.memory_space<vmem>>, %arg5: memref<32x8xbf16, #tpu.memory_space<vmem>>, %arg6: memref<1x32x1xf32, #tpu.memory_space<vmem>>, %arg7: memref<1x32x1xf32, #tpu.memory_space<vmem>>) attributes {dimension_semantics = [#tpu.dimension_semantics<parallel>], iteration_bounds = array<i64: 1>, scalar_prefetch = 0 : i64, scratch_operands = 0 : i64, tpu.core_type = #tpu.core_type<tc>, window_params = [{transform_indices = @transform_0, window_bounds = array<i64: 16, 8>}, {pipeline_mode = #tpu.pipeline_mode<synchronous>, transform_indices = @transform_1, window_bounds = array<i64: 32, 16>}, {pipeline_mode = #tpu.pipeline_mode<synchronous>, transform_indices = @transform_2, window_bounds = array<i64: 16, 1>}, {pipeline_mode = #tpu.pipeline_mode<synchronous>, transform_indices = @transform_3, window_bounds = array<i64: 16, 1>}, {transform_indices = @transform_4, window_bounds = array<i64: 32, 8>}, {transform_indices = @transform_5, window_bounds = array<i64: 1, 32, 1>}, {transform_indices = @transform_6, window_bounds = array<i64: 1, 32, 1>}]} {
    %c0 = arith.constant 0 : index
    %c0_0 = arith.constant 0 : index
    %0 = vector.load %arg1[%c0, %c0_0] : memref<16x8xbf16, #tpu.memory_space<vmem>>, vector<16x8xbf16>
    %1 = arith.extf %0 : vector<16x8xbf16> to vector<16x8xf32>
    %c0_1 = arith.constant 0 : index
    %c0_2 = arith.constant 0 : index
    %2 = vector.load %arg3[%c0_1, %c0_2] : memref<16x1xf32, #tpu.memory_space<vmem>>, vector<16x1xf32>
    %3 = vector.broadcast %2 : vector<16x1xf32> to vector<16x8xf32>
    %4 = arith.mulf %1, %3 : vector<16x8xf32>
    %c0_3 = arith.constant 0 : index
    %c0_4 = arith.constant 0 : index
    %5 = vector.load %arg4[%c0_3, %c0_4] : memref<16x1xf32, #tpu.memory_space<vmem>>, vector<16x1xf32>
    %6 = vector.broadcast %5 : vector<16x1xf32> to vector<16x8xf32>
    %7 = arith.addf %4, %6 : vector<16x8xf32>
    %cst = arith.constant 0.000000e+00 : f32
    %8 = vector.broadcast %cst : f32 to vector<16x8xf32>
    %9 = arith.maximumf %7, %8 : vector<16x8xf32>
    %10 = arith.truncf %9 : vector<16x8xf32> to vector<16x8xbf16>
    %c0_5 = arith.constant 0 : index
    %c0_6 = arith.constant 0 : index
    %11 = vector.load %arg2[%c0_5, %c0_6] : memref<32x16xbf16, #tpu.memory_space<vmem>>, vector<32x16xbf16>
    %cst_7 = arith.constant dense<0.000000e+00> : vector<32x8xf32>
    %12 = tpu.matmul %11, %10, %cst_7 {dimension_numbers = #tpu.dot_dimension_numbers<[1], [0], [0], [1], [0, 0, 1, 1], [], []>} : vector<32x16xbf16>, vector<16x8xbf16>, vector<32x8xf32> -> vector<32x8xf32>
    %13 = arith.truncf %12 : vector<32x8xf32> to vector<32x8xbf16>
    %c0_8 = arith.constant 0 : index
    %c0_9 = arith.constant 0 : index
    %14 = vector.load %arg5[%c0_8, %c0_9] : memref<32x8xbf16, #tpu.memory_space<vmem>>, vector<32x8xbf16>
    tpu.vector_store %arg5[%c0_8, %c0_9], %13 {strides = array<i32>} : memref<32x8xbf16, #tpu.memory_space<vmem>>, vector<32x8xbf16>,
    %cst_10 = arith.constant dense<0.000000e+00> : vector<32xf32>
    %15 = vector.multi_reduction <add>, %12, %cst_10 [1] : vector<32x8xf32> to vector<32xf32>
    %16 = vector.shape_cast %15 : vector<32xf32> to vector<32x1xf32>
    %c0_11 = arith.constant 0 : index
    %c0_12 = arith.constant 0 : index
    %c0_13 = arith.constant 0 : index
    %17 = vector.load %arg6[%c0_11, %c0_12, %c0_13] : memref<1x32x1xf32, #tpu.memory_space<vmem>>, vector<1x32x1xf32>
    %18 = vector.shape_cast %17 : vector<1x32x1xf32> to vector<32x1xf32>
    %19 = vector.shape_cast %16 : vector<32x1xf32> to vector<1x32x1xf32>
    tpu.vector_store %arg6[%c0_11, %c0_12, %c0_13], %19 {strides = array<i32>} : memref<1x32x1xf32, #tpu.memory_space<vmem>>, vector<1x32x1xf32>,
    %20 = arith.mulf %12, %12 : vector<32x8xf32>
    %cst_14 = arith.constant dense<0.000000e+00> : vector<32xf32>
    %21 = vector.multi_reduction <add>, %20, %cst_14 [1] : vector<32x8xf32> to vector<32xf32>
    %22 = vector.shape_cast %21 : vector<32xf32> to vector<32x1xf32>
    %c0_15 = arith.constant 0 : index
    %c0_16 = arith.constant 0 : index
    %c0_17 = arith.constant 0 : index
    %23 = vector.load %arg7[%c0_15, %c0_16, %c0_17] : memref<1x32x1xf32, #tpu.memory_space<vmem>>, vector<1x32x1xf32>
    %24 = vector.shape_cast %23 : vector<1x32x1xf32> to vector<32x1xf32>
    %25 = vector.shape_cast %22 : vector<32x1xf32> to vector<1x32x1xf32>
    tpu.vector_store %arg7[%c0_15, %c0_16, %c0_17], %25 {strides = array<i32>} : memref<1x32x1xf32, #tpu.memory_space<vmem>>, vector<1x32x1xf32>,
    return
  }
  func.func @transform_0(%arg0: i32) -> (i32, i32) {
    %c0_i32 = arith.constant 0 : i32
    %c0_i32_0 = arith.constant 0 : i32
    return %c0_i32, %arg0 : i32, i32
  }
  func.func @transform_1(%arg0: i32) -> (i32, i32) {
    %c0_i32 = arith.constant 0 : i32
    %c0_i32_0 = arith.constant 0 : i32
    %c0_i32_1 = arith.constant 0 : i32
    return %c0_i32, %c0_i32_0 : i32, i32
  }
  func.func @transform_2(%arg0: i32) -> (i32, i32) {
    %c0_i32 = arith.constant 0 : i32
    %c0_i32_0 = arith.constant 0 : i32
    %c0_i32_1 = arith.constant 0 : i32
    return %c0_i32, %c0_i32_0 : i32, i32
  }
  func.func @transform_3(%arg0: i32) -> (i32, i32) {
    %c0_i32 = arith.constant 0 : i32
    %c0_i32_0 = arith.constant 0 : i32
    %c0_i32_1 = arith.constant 0 : i32
    return %c0_i32, %c0_i32_0 : i32, i32
  }
  func.func @transform_4(%arg0: i32) -> (i32, i32) {
    %c0_i32 = arith.constant 0 : i32
    %c0_i32_0 = arith.constant 0 : i32
    return %c0_i32, %arg0 : i32, i32
  }
  func.func @transform_5(%arg0: i32) -> (i32, i32, i32) {
    %c0_i32 = arith.constant 0 : i32
    %c0_i32_0 = arith.constant 0 : i32
    %c0_i32_1 = arith.constant 0 : i32
    return %arg0, %c0_i32, %c0_i32_0 : i32, i32, i32
  }
  func.func @transform_6(%arg0: i32) -> (i32, i32, i32) {
    %c0_i32 = arith.constant 0 : i32
    %c0_i32_0 = arith.constant 0 : i32
    %c0_i32_1 = arith.constant 0 : i32
    return %arg0, %c0_i32, %c0_i32_0 : i32, i32, i32
  }
}

module attributes {stable_mosaic.version = 11 : i64} {
  func.func @_affine_kernel(%arg0: i32, %arg1: memref<32x8xbf16, #tpu.memory_space<vmem>>, %arg2: memref<32x1xf32, #tpu.memory_space<vmem>>, %arg3: memref<32x1xf32, #tpu.memory_space<vmem>>, %arg4: memref<32x8xbf16, #tpu.memory_space<vmem>>) attributes {dimension_semantics = [#tpu.dimension_semantics<parallel>], iteration_bounds = array<i64: 1>, scalar_prefetch = 0 : i64, scratch_operands = 0 : i64, tpu.core_type = #tpu.core_type<tc>, window_params = [{transform_indices = @transform_0, window_bounds = array<i64: 32, 8>}, {pipeline_mode = #tpu.pipeline_mode<synchronous>, transform_indices = @transform_1, window_bounds = array<i64: 32, 1>}, {pipeline_mode = #tpu.pipeline_mode<synchronous>, transform_indices = @transform_2, window_bounds = array<i64: 32, 1>}, {transform_indices = @transform_3, window_bounds = array<i64: 32, 8>}]} {
    %c0 = arith.constant 0 : index
    %c0_0 = arith.constant 0 : index
    %0 = vector.load %arg1[%c0, %c0_0] : memref<32x8xbf16, #tpu.memory_space<vmem>>, vector<32x8xbf16>
    %1 = arith.extf %0 : vector<32x8xbf16> to vector<32x8xf32>
    %c0_1 = arith.constant 0 : index
    %c0_2 = arith.constant 0 : index
    %2 = vector.load %arg2[%c0_1, %c0_2] : memref<32x1xf32, #tpu.memory_space<vmem>>, vector<32x1xf32>
    %3 = vector.broadcast %2 : vector<32x1xf32> to vector<32x8xf32>
    %4 = arith.mulf %1, %3 : vector<32x8xf32>
    %c0_3 = arith.constant 0 : index
    %c0_4 = arith.constant 0 : index
    %5 = vector.load %arg3[%c0_3, %c0_4] : memref<32x1xf32, #tpu.memory_space<vmem>>, vector<32x1xf32>
    %6 = vector.broadcast %5 : vector<32x1xf32> to vector<32x8xf32>
    %7 = arith.addf %4, %6 : vector<32x8xf32>
    %cst = arith.constant 0.000000e+00 : f32
    %8 = vector.broadcast %cst : f32 to vector<32x8xf32>
    %9 = arith.maximumf %7, %8 : vector<32x8xf32>
    %10 = arith.truncf %9 : vector<32x8xf32> to vector<32x8xbf16>
    %c0_5 = arith.constant 0 : index
    %c0_6 = arith.constant 0 : index
    %11 = vector.load %arg4[%c0_5, %c0_6] : memref<32x8xbf16, #tpu.memory_space<vmem>>, vector<32x8xbf16>
    tpu.vector_store %arg4[%c0_5, %c0_6], %10 {strides = array<i32>} : memref<32x8xbf16, #tpu.memory_space<vmem>>, vector<32x8xbf16>,
    return
  }
  func.func @transform_0(%arg0: i32) -> (i32, i32) {
    %c0_i32 = arith.constant 0 : i32
    %c0_i32_0 = arith.constant 0 : i32
    return %c0_i32, %arg0 : i32, i32
  }
  func.func @transform_1(%arg0: i32) -> (i32, i32) {
    %c0_i32 = arith.constant 0 : i32
    %c0_i32_0 = arith.constant 0 : i32
    %c0_i32_1 = arith.constant 0 : i32
    return %c0_i32, %c0_i32_0 : i32, i32
  }
  func.func @transform_2(%arg0: i32) -> (i32, i32) {
    %c0_i32 = arith.constant 0 : i32
    %c0_i32_0 = arith.constant 0 : i32
    %c0_i32_1 = arith.constant 0 : i32
    return %c0_i32, %c0_i32_0 : i32, i32
  }
  func.func @transform_3(%arg0: i32) -> (i32, i32) {
    %c0_i32 = arith.constant 0 : i32
    %c0_i32_0 = arith.constant 0 : i32
    return %c0_i32, %arg0 : i32, i32
  }
}

module attributes {stable_mosaic.version = 11 : i64} {
  func.func @kernel(%arg0: i32, %arg1: memref<288x8xbf16, #tpu.memory_space<vmem>>, %arg2: memref<8x288xbf16, #tpu.memory_space<vmem>>, %arg3: memref<8x8xbf16, #tpu.memory_space<vmem>>, %arg4: memref<1x8x1xf32, #tpu.memory_space<vmem>>, %arg5: memref<1x8x1xf32, #tpu.memory_space<vmem>>) attributes {dimension_semantics = [#tpu.dimension_semantics<parallel>], iteration_bounds = array<i64: 1>, scalar_prefetch = 0 : i64, scratch_operands = 0 : i64, tpu.core_type = #tpu.core_type<tc>, window_params = [{transform_indices = @transform_0, window_bounds = array<i64: 288, 8>}, {pipeline_mode = #tpu.pipeline_mode<synchronous>, transform_indices = @transform_1, window_bounds = array<i64: 8, 288>}, {transform_indices = @transform_2, window_bounds = array<i64: 8, 8>}, {transform_indices = @transform_3, window_bounds = array<i64: 1, 8, 1>}, {transform_indices = @transform_4, window_bounds = array<i64: 1, 8, 1>}]} {
    %c0 = arith.constant 0 : index
    %c0_0 = arith.constant 0 : index
    %0 = vector.load %arg1[%c0, %c0_0] : memref<288x8xbf16, #tpu.memory_space<vmem>>, vector<288x8xbf16>
    %c0_1 = arith.constant 0 : index
    %c0_2 = arith.constant 0 : index
    %1 = vector.load %arg2[%c0_1, %c0_2] : memref<8x288xbf16, #tpu.memory_space<vmem>>, vector<8x288xbf16>
    %cst = arith.constant dense<0.000000e+00> : vector<8x8xf32>
    %2 = tpu.matmul %1, %0, %cst {dimension_numbers = #tpu.dot_dimension_numbers<[1], [0], [0], [1], [0, 0, 1, 1], [], []>} : vector<8x288xbf16>, vector<288x8xbf16>, vector<8x8xf32> -> vector<8x8xf32>
    %3 = arith.truncf %2 : vector<8x8xf32> to vector<8x8xbf16>
    %c0_3 = arith.constant 0 : index
    %c0_4 = arith.constant 0 : index
    %4 = vector.load %arg3[%c0_3, %c0_4] : memref<8x8xbf16, #tpu.memory_space<vmem>>, vector<8x8xbf16>
    tpu.vector_store %arg3[%c0_3, %c0_4], %3 {strides = array<i32>} : memref<8x8xbf16, #tpu.memory_space<vmem>>, vector<8x8xbf16>,
    %cst_5 = arith.constant dense<0.000000e+00> : vector<8xf32>
    %5 = vector.multi_reduction <add>, %2, %cst_5 [1] : vector<8x8xf32> to vector<8xf32>
    %6 = vector.shape_cast %5 : vector<8xf32> to vector<8x1xf32>
    %c0_6 = arith.constant 0 : index
    %c0_7 = arith.constant 0 : index
    %c0_8 = arith.constant 0 : index
    %7 = vector.load %arg4[%c0_6, %c0_7, %c0_8] : memref<1x8x1xf32, #tpu.memory_space<vmem>>, vector<1x8x1xf32>
    %8 = vector.shape_cast %7 : vector<1x8x1xf32> to vector<8x1xf32>
    %9 = vector.shape_cast %6 : vector<8x1xf32> to vector<1x8x1xf32>
    tpu.vector_store %arg4[%c0_6, %c0_7, %c0_8], %9 {strides = array<i32>} : memref<1x8x1xf32, #tpu.memory_space<vmem>>, vector<1x8x1xf32>,
    %10 = arith.mulf %2, %2 : vector<8x8xf32>
    %cst_9 = arith.constant dense<0.000000e+00> : vector<8xf32>
    %11 = vector.multi_reduction <add>, %10, %cst_9 [1] : vector<8x8xf32> to vector<8xf32>
    %12 = vector.shape_cast %11 : vector<8xf32> to vector<8x1xf32>
    %c0_10 = arith.constant 0 : index
    %c0_11 = arith.constant 0 : index
    %c0_12 = arith.constant 0 : index
    %13 = vector.load %arg5[%c0_10, %c0_11, %c0_12] : memref<1x8x1xf32, #tpu.memory_space<vmem>>, vector<1x8x1xf32>
    %14 = vector.shape_cast %13 : vector<1x8x1xf32> to vector<8x1xf32>
    %15 = vector.shape_cast %12 : vector<8x1xf32> to vector<1x8x1xf32>
    tpu.vector_store %arg5[%c0_10, %c0_11, %c0_12], %15 {strides = array<i32>} : memref<1x8x1xf32, #tpu.memory_space<vmem>>, vector<1x8x1xf32>,
    return
  }
  func.func @transform_0(%arg0: i32) -> (i32, i32) {
    %c0_i32 = arith.constant 0 : i32
    %c0_i32_0 = arith.constant 0 : i32
    return %c0_i32, %arg0 : i32, i32
  }
  func.func @transform_1(%arg0: i32) -> (i32, i32) {
    %c0_i32 = arith.constant 0 : i32
    %c0_i32_0 = arith.constant 0 : i32
    %c0_i32_1 = arith.constant 0 : i32
    return %c0_i32, %c0_i32_0 : i32, i32
  }
  func.func @transform_2(%arg0: i32) -> (i32, i32) {
    %c0_i32 = arith.constant 0 : i32
    %c0_i32_0 = arith.constant 0 : i32
    return %c0_i32, %arg0 : i32, i32
  }
  func.func @transform_3(%arg0: i32) -> (i32, i32, i32) {
    %c0_i32 = arith.constant 0 : i32
    %c0_i32_0 = arith.constant 0 : i32
    %c0_i32_1 = arith.constant 0 : i32
    return %arg0, %c0_i32, %c0_i32_0 : i32, i32, i32
  }
  func.func @transform_4(%arg0: i32) -> (i32, i32, i32) {
    %c0_i32 = arith.constant 0 : i32
    %c0_i32_0 = arith.constant 0 : i32
    %c0_i32_1 = arith.constant 0 : i32
    return %arg0, %c0_i32, %c0_i32_0 : i32, i32, i32
  }
}

module attributes {stable_mosaic.version = 11 : i64} {
  func.func @kernel(%arg0: i32, %arg1: memref<16x8xbf16, #tpu.memory_space<vmem>>, %arg2: memref<8x8xbf16, #tpu.memory_space<vmem>>, %arg3: memref<32x24xbf16, #tpu.memory_space<vmem>>, %arg4: memref<24x1xf32, #tpu.memory_space<vmem>>, %arg5: memref<24x1xf32, #tpu.memory_space<vmem>>, %arg6: memref<32x8xbf16, #tpu.memory_space<vmem>>, %arg7: memref<1x32x1xf32, #tpu.memory_space<vmem>>, %arg8: memref<1x32x1xf32, #tpu.memory_space<vmem>>) attributes {dimension_semantics = [#tpu.dimension_semantics<parallel>], iteration_bounds = array<i64: 1>, scalar_prefetch = 0 : i64, scratch_operands = 0 : i64, tpu.core_type = #tpu.core_type<tc>, window_params = [{transform_indices = @transform_0, window_bounds = array<i64: 16, 8>}, {transform_indices = @transform_1, window_bounds = array<i64: 8, 8>}, {pipeline_mode = #tpu.pipeline_mode<synchronous>, transform_indices = @transform_2, window_bounds = array<i64: 32, 24>}, {pipeline_mode = #tpu.pipeline_mode<synchronous>, transform_indices = @transform_3, window_bounds = array<i64: 24, 1>}, {pipeline_mode = #tpu.pipeline_mode<synchronous>, transform_indices = @transform_4, window_bounds = array<i64: 24, 1>}, {transform_indices = @transform_5, window_bounds = array<i64: 32, 8>}, {transform_indices = @transform_6, window_bounds = array<i64: 1, 32, 1>}, {transform_indices = @transform_7, window_bounds = array<i64: 1, 32, 1>}]} {
    %c0 = arith.constant 0 : index
    %c0_0 = arith.constant 0 : index
    %0 = vector.load %arg1[%c0, %c0_0] : memref<16x8xbf16, #tpu.memory_space<vmem>>, vector<16x8xbf16>
    %1 = arith.extf %0 : vector<16x8xbf16> to vector<16x8xf32>
    %c0_1 = arith.constant 0 : index
    %c0_2 = arith.constant 0 : index
    %2 = vector.load %arg4[%c0_1, %c0_2] : memref<24x1xf32, #tpu.memory_space<vmem>>, vector<16x1xf32>
    %3 = vector.broadcast %2 : vector<16x1xf32> to vector<16x8xf32>
    %4 = arith.mulf %1, %3 : vector<16x8xf32>
    %c0_3 = arith.constant 0 : index
    %c0_4 = arith.constant 0 : index
    %5 = vector.load %arg5[%c0_3, %c0_4] : memref<24x1xf32, #tpu.memory_space<vmem>>, vector<16x1xf32>
    %6 = vector.broadcast %5 : vector<16x1xf32> to vector<16x8xf32>
    %7 = arith.addf %4, %6 : vector<16x8xf32>
    %cst = arith.constant 0.000000e+00 : f32
    %8 = vector.broadcast %cst : f32 to vector<16x8xf32>
    %9 = arith.maximumf %7, %8 : vector<16x8xf32>
    %10 = arith.truncf %9 : vector<16x8xf32> to vector<16x8xbf16>
    %c0_5 = arith.constant 0 : index
    %c0_6 = arith.constant 0 : index
    %11 = vector.load %arg3[%c0_5, %c0_6] : memref<32x24xbf16, #tpu.memory_space<vmem>>, vector<32x16xbf16>
    %cst_7 = arith.constant dense<0.000000e+00> : vector<32x8xf32>
    %12 = tpu.matmul %11, %10, %cst_7 {dimension_numbers = #tpu.dot_dimension_numbers<[1], [0], [0], [1], [0, 0, 1, 1], [], []>} : vector<32x16xbf16>, vector<16x8xbf16>, vector<32x8xf32> -> vector<32x8xf32>
    %c0_8 = arith.constant 0 : index
    %c0_9 = arith.constant 0 : index
    %13 = vector.load %arg2[%c0_8, %c0_9] : memref<8x8xbf16, #tpu.memory_space<vmem>>, vector<8x8xbf16>
    %14 = arith.extf %13 : vector<8x8xbf16> to vector<8x8xf32>
    %c16 = arith.constant 16 : index
    %c0_10 = arith.constant 0 : index
    %15 = vector.load %arg4[%c16, %c0_10] : memref<24x1xf32, #tpu.memory_space<vmem>>, vector<8x1xf32>
    %16 = vector.broadcast %15 : vector<8x1xf32> to vector<8x8xf32>
    %17 = arith.mulf %14, %16 : vector<8x8xf32>
    %c16_11 = arith.constant 16 : index
    %c0_12 = arith.constant 0 : index
    %18 = vector.load %arg5[%c16_11, %c0_12] : memref<24x1xf32, #tpu.memory_space<vmem>>, vector<8x1xf32>
    %19 = vector.broadcast %18 : vector<8x1xf32> to vector<8x8xf32>
    %20 = arith.addf %17, %19 : vector<8x8xf32>
    %cst_13 = arith.constant 0.000000e+00 : f32
    %21 = vector.broadcast %cst_13 : f32 to vector<8x8xf32>
    %22 = arith.maximumf %20, %21 : vector<8x8xf32>
    %23 = arith.truncf %22 : vector<8x8xf32> to vector<8x8xbf16>
    %c0_14 = arith.constant 0 : index
    %c16_15 = arith.constant 16 : index
    %24 = vector.load %arg3[%c0_14, %c16_15] : memref<32x24xbf16, #tpu.memory_space<vmem>>, vector<32x8xbf16>
    %cst_16 = arith.constant dense<0.000000e+00> : vector<32x8xf32>
    %25 = tpu.matmul %24, %23, %cst_16 {dimension_numbers = #tpu.dot_dimension_numbers<[1], [0], [0], [1], [0, 0, 1, 1], [], []>} : vector<32x8xbf16>, vector<8x8xbf16>, vector<32x8xf32> -> vector<32x8xf32>
    %26 = arith.addf %12, %25 : vector<32x8xf32>
    %27 = arith.truncf %26 : vector<32x8xf32> to vector<32x8xbf16>
    %c0_17 = arith.constant 0 : index
    %c0_18 = arith.constant 0 : index
    %28 = vector.load %arg6[%c0_17, %c0_18] : memref<32x8xbf16, #tpu.memory_space<vmem>>, vector<32x8xbf16>
    tpu.vector_store %arg6[%c0_17, %c0_18], %27 {strides = array<i32>} : memref<32x8xbf16, #tpu.memory_space<vmem>>, vector<32x8xbf16>,
    %cst_19 = arith.constant dense<0.000000e+00> : vector<32xf32>
    %29 = vector.multi_reduction <add>, %26, %cst_19 [1] : vector<32x8xf32> to vector<32xf32>
    %30 = vector.shape_cast %29 : vector<32xf32> to vector<32x1xf32>
    %c0_20 = arith.constant 0 : index
    %c0_21 = arith.constant 0 : index
    %c0_22 = arith.constant 0 : index
    %31 = vector.load %arg7[%c0_20, %c0_21, %c0_22] : memref<1x32x1xf32, #tpu.memory_space<vmem>>, vector<1x32x1xf32>
    %32 = vector.shape_cast %31 : vector<1x32x1xf32> to vector<32x1xf32>
    %33 = vector.shape_cast %30 : vector<32x1xf32> to vector<1x32x1xf32>
    tpu.vector_store %arg7[%c0_20, %c0_21, %c0_22], %33 {strides = array<i32>} : memref<1x32x1xf32, #tpu.memory_space<vmem>>, vector<1x32x1xf32>,
    %34 = arith.mulf %26, %26 : vector<32x8xf32>
    %cst_23 = arith.constant dense<0.000000e+00> : vector<32xf32>
    %35 = vector.multi_reduction <add>, %34, %cst_23 [1] : vector<32x8xf32> to vector<32xf32>
    %36 = vector.shape_cast %35 : vector<32xf32> to vector<32x1xf32>
    %c0_24 = arith.constant 0 : index
    %c0_25 = arith.constant 0 : index
    %c0_26 = arith.constant 0 : index
    %37 = vector.load %arg8[%c0_24, %c0_25, %c0_26] : memref<1x32x1xf32, #tpu.memory_space<vmem>>, vector<1x32x1xf32>
    %38 = vector.shape_cast %37 : vector<1x32x1xf32> to vector<32x1xf32>
    %39 = vector.shape_cast %36 : vector<32x1xf32> to vector<1x32x1xf32>
    tpu.vector_store %arg8[%c0_24, %c0_25, %c0_26], %39 {strides = array<i32>} : memref<1x32x1xf32, #tpu.memory_space<vmem>>, vector<1x32x1xf32>,
    return
  }
  func.func @transform_0(%arg0: i32) -> (i32, i32) {
    %c0_i32 = arith.constant 0 : i32
    %c0_i32_0 = arith.constant 0 : i32
    return %c0_i32, %arg0 : i32, i32
  }
  func.func @transform_1(%arg0: i32) -> (i32, i32) {
    %c0_i32 = arith.constant 0 : i32
    %c0_i32_0 = arith.constant 0 : i32
    return %c0_i32, %arg0 : i32, i32
  }
  func.func @transform_2(%arg0: i32) -> (i32, i32) {
    %c0_i32 = arith.constant 0 : i32
    %c0_i32_0 = arith.constant 0 : i32
    %c0_i32_1 = arith.constant 0 : i32
    return %c0_i32, %c0_i32_0 : i32, i32
  }
  func.func @transform_3(%arg0: i32) -> (i32, i32) {
    %c0_i32 = arith.constant 0 : i32
    %c0_i32_0 = arith.constant 0 : i32
    %c0_i32_1 = arith.constant 0 : i32
    return %c0_i32, %c0_i32_0 : i32, i32
  }
  func.func @transform_4(%arg0: i32) -> (i32, i32) {
    %c0_i32 = arith.constant 0 : i32
    %c0_i32_0 = arith.constant 0 : i32
    %c0_i32_1 = arith.constant 0 : i32
    return %c0_i32, %c0_i32_0 : i32, i32
  }
  func.func @transform_5(%arg0: i32) -> (i32, i32) {
    %c0_i32 = arith.constant 0 : i32
    %c0_i32_0 = arith.constant 0 : i32
    return %c0_i32, %arg0 : i32, i32
  }
  func.func @transform_6(%arg0: i32) -> (i32, i32, i32) {
    %c0_i32 = arith.constant 0 : i32
    %c0_i32_0 = arith.constant 0 : i32
    %c0_i32_1 = arith.constant 0 : i32
    return %arg0, %c0_i32, %c0_i32_0 : i32, i32, i32
  }
  func.func @transform_7(%arg0: i32) -> (i32, i32, i32) {
    %c0_i32 = arith.constant 0 : i32
    %c0_i32_0 = arith.constant 0 : i32
    %c0_i32_1 = arith.constant 0 : i32
    return %arg0, %c0_i32, %c0_i32_0 : i32, i32, i32
  }
}

module attributes {stable_mosaic.version = 11 : i64} {
  func.func @_affine_kernel(%arg0: i32, %arg1: memref<32x8xbf16, #tpu.memory_space<vmem>>, %arg2: memref<32x1xf32, #tpu.memory_space<vmem>>, %arg3: memref<32x1xf32, #tpu.memory_space<vmem>>, %arg4: memref<32x8xbf16, #tpu.memory_space<vmem>>) attributes {dimension_semantics = [#tpu.dimension_semantics<parallel>], iteration_bounds = array<i64: 1>, scalar_prefetch = 0 : i64, scratch_operands = 0 : i64, tpu.core_type = #tpu.core_type<tc>, window_params = [{transform_indices = @transform_0, window_bounds = array<i64: 32, 8>}, {pipeline_mode = #tpu.pipeline_mode<synchronous>, transform_indices = @transform_1, window_bounds = array<i64: 32, 1>}, {pipeline_mode = #tpu.pipeline_mode<synchronous>, transform_indices = @transform_2, window_bounds = array<i64: 32, 1>}, {transform_indices = @transform_3, window_bounds = array<i64: 32, 8>}]} {
    %c0 = arith.constant 0 : index
    %c0_0 = arith.constant 0 : index
    %0 = vector.load %arg1[%c0, %c0_0] : memref<32x8xbf16, #tpu.memory_space<vmem>>, vector<32x8xbf16>
    %1 = arith.extf %0 : vector<32x8xbf16> to vector<32x8xf32>
    %c0_1 = arith.constant 0 : index
    %c0_2 = arith.constant 0 : index
    %2 = vector.load %arg2[%c0_1, %c0_2] : memref<32x1xf32, #tpu.memory_space<vmem>>, vector<32x1xf32>
    %3 = vector.broadcast %2 : vector<32x1xf32> to vector<32x8xf32>
    %4 = arith.mulf %1, %3 : vector<32x8xf32>
    %c0_3 = arith.constant 0 : index
    %c0_4 = arith.constant 0 : index
    %5 = vector.load %arg3[%c0_3, %c0_4] : memref<32x1xf32, #tpu.memory_space<vmem>>, vector<32x1xf32>
    %6 = vector.broadcast %5 : vector<32x1xf32> to vector<32x8xf32>
    %7 = arith.addf %4, %6 : vector<32x8xf32>
    %8 = arith.truncf %7 : vector<32x8xf32> to vector<32x8xbf16>
    %c0_5 = arith.constant 0 : index
    %c0_6 = arith.constant 0 : index
    %9 = vector.load %arg4[%c0_5, %c0_6] : memref<32x8xbf16, #tpu.memory_space<vmem>>, vector<32x8xbf16>
    tpu.vector_store %arg4[%c0_5, %c0_6], %8 {strides = array<i32>} : memref<32x8xbf16, #tpu.memory_space<vmem>>, vector<32x8xbf16>,
    return
  }
  func.func @transform_0(%arg0: i32) -> (i32, i32) {
    %c0_i32 = arith.constant 0 : i32
    %c0_i32_0 = arith.constant 0 : i32
    return %c0_i32, %arg0 : i32, i32
  }
  func.func @transform_1(%arg0: i32) -> (i32, i32) {
    %c0_i32 = arith.constant 0 : i32
    %c0_i32_0 = arith.constant 0 : i32
    %c0_i32_1 = arith.constant 0 : i32
    return %c0_i32, %c0_i32_0 : i32, i32
  }
  func.func @transform_2(%arg0: i32) -> (i32, i32) {
    %c0_i32 = arith.constant 0 : i32
    %c0_i32_0 = arith.constant 0 : i32
    %c0_i32_1 = arith.constant 0 : i32
    return %c0_i32, %c0_i32_0 : i32, i32
  }
  func.func @transform_3(%arg0: i32) -> (i32, i32) {
    %c0_i32 = arith.constant 0 : i32
    %c0_i32_0 = arith.constant 0 : i32
    return %c0_i32, %arg0 : i32, i32
  }
}

</mosaic_0001>

<bundles_post_ra>
// kernel: encoder_forward.34
= control target key start
LH: loop header
LB: loop body
LE: loop exit
PB: predicated region body
PF: predicated region fallthrough
CT: control target
= control target key end

     0   :  { %s1548_s15 = smov 0   ;;  %s1550_s16 = smov 0   ;;  %s1904_s0 = inlined_call_operand.vmem [shape: bf16[147,2048], index: 0, kind: input, shape index: {}]   ;;  %s1905_s1 = inlined_call_operand.vmem [shape: bf16[16,147], index: 1, kind: input, shape index: {}]   ;;  %s1906_s2 = inlined_call_operand.vmem [shape: bf16[16,2048], index: 2, kind: output, shape index: {0}]   ;;  %s1907_s3 = inlined_call_operand.vmem [shape: f32[2,16,1], index: 3, kind: output, shape index: {1}]   ;;  %s1908_s4 = inlined_call_operand.vmem [shape: f32[2,16,1], index: 4, kind: output, shape index: {2}]  }
   0x1   :  { %s1552_s17 = smov 0  }
   0x2 LB: > { %s1564_s18 = sadd.s32 4294967295, %s1520_s17   ;;  %s1567_s19 = sadd.s32 1, %s1520_s17   ;;  %s1520_s17 = sphi %s1552_s17, %s1912_s17   ;;  %s1516_s16 = sphi %s1550_s16, %s1911_s16   ;;  %s1512_s15 = sphi %s1548_s15, %s1910_s15  }
   0x3   : > { %s19_s20 = ssub.s32 %s1520_s17, %s1567_s19  ;;  %s22_s21 = sadd.s32 1, %s1516_s16 }
   0x4   : > { %p20_p0 = scmp.eq.s32.totalorder %s19_s20, 0  ;;  %p29_p1 = scmp.ne.s32.totalorder %s1516_s16, %s1512_s15 }
   0x5   : > { %p30_p2 = scmp.eq.s32.totalorder %s1520_s17, 0  ;;  %p80_p3 = scmp.eq.s32.totalorder %s1564_s18, 1 }
   0x6   : > { %s1577_s22 = scalar_select %p20_p0, %s1516_s16, %s22_s21  }
   0x7   : > { %p31_p4 = por %p30_p2, %p29_p1  ;;  %p1579_p5 = por %p80_p3, %p29_p1 }
   0x8   : > { %p1340_p6 = scmp.ge.s32.totalorder %s1520_s17, 2 }
   0xa   : > { %157 = sbr.rel (%p1340_p6) target bundleno = 60 (0x3c), region = 20 }
  0x11   : > { %160 = sbr.rel (!%p31_p4) target bundleno = 60 (0x3c), region = 24  ;;  %s162_s24 = sand.u32 (%p31_p4), 1, %s1516_s16  }
  0x12   : > { %s1448_s25 = sshll.u32 (%p31_p4), %s1520_s17, 5  ;;  %s1460_s26 = smul.u32 (%p31_p4), 608, %s162_s24 }
  0x13   : > { %s1589_s29 = scalar_lea.vmem (%p31_p4), %s1904_s0, %s1448_s25 }
  0x14   : > { %v180_v0 = vld [vmem:[%s1589_s29] sm:$0xff] (%p31_p4)  ;;  %v182_v1 = vld [vmem:[%s1589_s29 + $0x8] sm:$0xff] (%p31_p4)  ;;  %v184_v2 = vld [vmem:[%s1589_s29 + $0x10] sm:$0xff] (%p31_p4)  ;;  %s1597_s30 = scalar_lea.vmem (%p31_p4), [#allocation2], %s1460_s26 }
  0x15   : > { %v186_v3 = vld [vmem:[%s1589_s29 + $0x18] sm:$0xff] (%p31_p4)  ;;  %v188_v4 = vld [vmem:[%s1589_s29 + $0x40] sm:$0xff] (%p31_p4)  ;;  %v190_v5 = vld [vmem:[%s1589_s29 + $0x48] sm:$0xff] (%p31_p4)  ;;  %181 = vst [vmem:[%s1597_s30] sm:$0xff] (%p31_p4), %v180_v0 }
  0x16   : > { %183 = vst [vmem:[%s1597_s30 + $0x8] sm:$0xff] (%p31_p4), %v182_v1  ;;  %185 = vst [vmem:[%s1597_s30 + $0x10] sm:$0xff] (%p31_p4), %v184_v2  ;;  %v192_v6 = vld [vmem:[%s1589_s29 + $0x50] sm:$0xff] (%p31_p4)  ;;  %v194_v7 = vld [vmem:[%s1589_s29 + $0x58] sm:$0xff] (%p31_p4) }
  0x17   : > { %187 = vst [vmem:[%s1597_s30 + $0x18] sm:$0xff] (%p31_p4), %v186_v3  ;;  %189 = vst [vmem:[%s1597_s30 + $0x20] sm:$0xff] (%p31_p4), %v188_v4  ;;  %v196_v8 = vld [vmem:[%s1589_s29 + $0x80] sm:$0xff] (%p31_p4)  ;;  %v198_v9 = vld [vmem:[%s1589_s29 + $0x88] sm:$0xff] (%p31_p4) }
  0x18   : > { %191 = vst [vmem:[%s1597_s30 + $0x28] sm:$0xff] %v190_v5  ;;  %193 = vst [vmem:[%s1597_s30 + $0x30] sm:$0xff] %v192_v6  ;;  %v200_v10 = vld [vmem:[%s1589_s29 + $0x90] sm:$0xff]  ;;  %v202_v11 = vld [vmem:[%s1589_s29 + $0x98] sm:$0xff] }
  0x19   : > { %195 = vst [vmem:[%s1597_s30 + $0x38] sm:$0xff] %v194_v7  ;;  %197 = vst [vmem:[%s1597_s30 + $0x40] sm:$0xff] %v196_v8  ;;  %v204_v12 = vld [vmem:[%s1589_s29 + $0xc0] sm:$0xff]  ;;  %v206_v13 = vld [vmem:[%s1589_s29 + $0xc8] sm:$0xff] }
  0x1a   : > { %199 = vst [vmem:[%s1597_s30 + $0x48] sm:$0xff] %v198_v9  ;;  %201 = vst [vmem:[%s1597_s30 + $0x50] sm:$0xff] %v200_v10  ;;  %v208_v14 = vld [vmem:[%s1589_s29 + $0xd0] sm:$0xff]  ;;  %v210_v15 = vld [vmem:[%s1589_s29 + $0xd8] sm:$0xff] }
  0x1b   : > { %203 = vst [vmem:[%s1597_s30 + $0x58] sm:$0xff] %v202_v11  ;;  %205 = vst [vmem:[%s1597_s30 + $0x60] sm:$0xff] %v204_v12  ;;  %v212_v16 = vld [vmem:[%s1589_s29 + $0x100] sm:$0xff]  ;;  %v214_v17 = vld [vmem:[%s1589_s29 + $0x108] sm:$0xff] }
  0x1c   : > { %207 = vst [vmem:[%s1597_s30 + $0x68] sm:$0xff] %v206_v13  ;;  %209 = vst [vmem:[%s1597_s30 + $0x70] sm:$0xff] %v208_v14  ;;  %v216_v18 = vld [vmem:[%s1589_s29 + $0x110] sm:$0xff]  ;;  %v218_v19 = vld [vmem:[%s1589_s29 + $0x118] sm:$0xff] }
  0x1d   : > { %211 = vst [vmem:[%s1597_s30 + $0x78] sm:$0xff] %v210_v15  ;;  %213 = vst [vmem:[%s1597_s30 + $0x80] sm:$0xff] %v212_v16  ;;  %v220_v20 = vld [vmem:[%s1589_s29 + $0x140] sm:$0xff]  ;;  %v222_v21 = vld [vmem:[%s1589_s29 + $0x148] sm:$0xff] }
  0x1e   : > { %215 = vst [vmem:[%s1597_s30 + $0x88] sm:$0xff] %v214_v17  ;;  %217 = vst [vmem:[%s1597_s30 + $0x90] sm:$0xff] %v216_v18  ;;  %v224_v22 = vld [vmem:[%s1589_s29 + $0x150] sm:$0xff]  ;;  %v226_v23 = vld [vmem:[%s1589_s29 + $0x158] sm:$0xff] }
  0x1f   : > { %219 = vst [vmem:[%s1597_s30 + $0x98] sm:$0xff] %v218_v19  ;;  %221 = vst [vmem:[%s1597_s30 + $0xa0] sm:$0xff] %v220_v20  ;;  %v228_v24 = vld [vmem:[%s1589_s29 + $0x180] sm:$0xff]  ;;  %v230_v25 = vld [vmem:[%s1589_s29 + $0x188] sm:$0xff] }
  0x20   : > { %223 = vst [vmem:[%s1597_s30 + $0xa8] sm:$0xff] %v222_v21  ;;  %225 = vst [vmem:[%s1597_s30 + $0xb0] sm:$0xff] %v224_v22  ;;  %v232_v26 = vld [vmem:[%s1589_s29 + $0x190] sm:$0xff]  ;;  %v234_v27 = vld [vmem:[%s1589_s29 + $0x198] sm:$0xff] }
  0x21   : > { %227 = vst [vmem:[%s1597_s30 + $0xb8] sm:$0xff] %v226_v23  ;;  %229 = vst [vmem:[%s1597_s30 + $0xc0] sm:$0xff] %v228_v24  ;;  %v236_v28 = vld [vmem:[%s1589_s29 + $0x1c0] sm:$0xff]  ;;  %v238_v29 = vld [vmem:[%s1589_s29 + $0x1c8] sm:$0xff] }
  0x22   : > { %231 = vst [vmem:[%s1597_s30 + $0xc8] sm:$0xff] %v230_v25  ;;  %233 = vst [vmem:[%s1597_s30 + $0xd0] sm:$0xff] %v232_v26  ;;  %v240_v30 = vld [vmem:[%s1589_s29 + $0x1d0] sm:$0xff]  ;;  %v242_v31 = vld [vmem:[%s1589_s29 + $0x1d8] sm:$0xff] }
  0x23   : > { %235 = vst [vmem:[%s1597_s30 + $0xd8] sm:$0xff] %v234_v27  ;;  %237 = vst [vmem:[%s1597_s30 + $0xe0] sm:$0xff] %v236_v28  ;;  %v244_v32 = vld [vmem:[%s1589_s29 + $0x200] sm:$0xff]  ;;  %v246_v33 = vld [vmem:[%s1589_s29 + $0x208] sm:$0xff] }
  0x24   : > { %239 = vst [vmem:[%s1597_s30 + $0xe8] sm:$0xff] %v238_v29  ;;  %241 = vst [vmem:[%s1597_s30 + $0xf0] sm:$0xff] %v240_v30  ;;  %v248_v34 = vld [vmem:[%s1589_s29 + $0x210] sm:$0xff]  ;;  %v250_v35 = vld [vmem:[%s1589_s29 + $0x218] sm:$0xff] }
  0x25   : > { %243 = vst [vmem:[%s1597_s30 + $0xf8] sm:$0xff] %v242_v31  ;;  %245 = vst [vmem:[%s1597_s30 + $0x100] sm:$0xff] %v244_v32  ;;  %v252_v36 = vld [vmem:[%s1589_s29 + $0x240] sm:$0xff]  ;;  %v254_v37 = vld [vmem:[%s1589_s29 + $0x248] sm:$0xff] }
  0x26   : > { %247 = vst [vmem:[%s1597_s30 + $0x108] sm:$0xff] %v246_v33  ;;  %249 = vst [vmem:[%s1597_s30 + $0x110] sm:$0xff] %v248_v34  ;;  %v256_v38 = vld [vmem:[%s1589_s29 + $0x250] sm:$0xff]  ;;  %v258_v39 = vld [vmem:[%s1589_s29 + $0x258] sm:$0xff] }
  0x27   : > { %251 = vst [vmem:[%s1597_s30 + $0x118] sm:$0xff] %v250_v35  ;;  %253 = vst [vmem:[%s1597_s30 + $0x120] sm:$0xff] %v252_v36  ;;  %v260_v40 = vld [vmem:[%s1589_s29 + $0x280] sm:$0xff]  ;;  %v262_v41 = vld [vmem:[%s1589_s29 + $0x288] sm:$0xff] }
  0x28   : > { %255 = vst [vmem:[%s1597_s30 + $0x128] sm:$0xff] %v254_v37  ;;  %257 = vst [vmem:[%s1597_s30 + $0x130] sm:$0xff] %v256_v38  ;;  %v264_v42 = vld [vmem:[%s1589_s29 + $0x290] sm:$0xff]  ;;  %v266_v43 = vld [vmem:[%s1589_s29 + $0x298] sm:$0xff] }
  0x29   : > { %259 = vst [vmem:[%s1597_s30 + $0x138] sm:$0xff] %v258_v39  ;;  %261 = vst [vmem:[%s1597_s30 + $0x140] sm:$0xff] %v260_v40  ;;  %v268_v44 = vld [vmem:[%s1589_s29 + $0x2c0] sm:$0xff]  ;;  %v270_v45 = vld [vmem:[%s1589_s29 + $0x2c8] sm:$0xff] }
  0x2a   : > { %263 = vst [vmem:[%s1597_s30 + $0x148] sm:$0xff] %v262_v41  ;;  %265 = vst [vmem:[%s1597_s30 + $0x150] sm:$0xff] %v264_v42  ;;  %v272_v46 = vld [vmem:[%s1589_s29 + $0x2d0] sm:$0xff]  ;;  %v274_v47 = vld [vmem:[%s1589_s29 + $0x2d8] sm:$0xff] }
  0x2b   : > { %267 = vst [vmem:[%s1597_s30 + $0x158] sm:$0xff] %v266_v43  ;;  %269 = vst [vmem:[%s1597_s30 + $0x160] sm:$0xff] %v268_v44  ;;  %v276_v48 = vld [vmem:[%s1589_s29 + $0x300] sm:$0xff]  ;;  %v278_v49 = vld [vmem:[%s1589_s29 + $0x308] sm:$0xff] }
  0x2c   : > { %271 = vst [vmem:[%s1597_s30 + $0x168] sm:$0xff] %v270_v45  ;;  %273 = vst [vmem:[%s1597_s30 + $0x170] sm:$0xff] %v272_v46  ;;  %v280_v50 = vld [vmem:[%s1589_s29 + $0x310] sm:$0xff]  ;;  %v282_v51 = vld [vmem:[%s1589_s29 + $0x318] sm:$0xff] }
  0x2d   : > { %275 = vst [vmem:[%s1597_s30 + $0x178] sm:$0xff] %v274_v47  ;;  %277 = vst [vmem:[%s1597_s30 + $0x180] sm:$0xff] %v276_v48  ;;  %v284_v52 = vld [vmem:[%s1589_s29 + $0x340] sm:$0xff]  ;;  %v286_v53 = vld [vmem:[%s1589_s29 + $0x348] sm:$0xff] }
  0x2e   : > { %279 = vst [vmem:[%s1597_s30 + $0x188] sm:$0xff] %v278_v49  ;;  %281 = vst [vmem:[%s1597_s30 + $0x190] sm:$0xff] %v280_v50  ;;  %v288_v54 = vld [vmem:[%s1589_s29 + $0x350] sm:$0xff]  ;;  %v290_v55 = vld [vmem:[%s1589_s29 + $0x358] sm:$0xff] }
  0x2f   : > { %283 = vst [vmem:[%s1597_s30 + $0x198] sm:$0xff] %v282_v51  ;;  %285 = vst [vmem:[%s1597_s30 + $0x1a0] sm:$0xff] %v284_v52  ;;  %v292_v56 = vld [vmem:[%s1589_s29 + $0x380] sm:$0xff]  ;;  %v294_v57 = vld [vmem:[%s1589_s29 + $0x388] sm:$0xff] }
  0x30   : > { %287 = vst [vmem:[%s1597_s30 + $0x1a8] sm:$0xff] %v286_v53  ;;  %289 = vst [vmem:[%s1597_s30 + $0x1b0] sm:$0xff] %v288_v54  ;;  %v296_v58 = vld [vmem:[%s1589_s29 + $0x390] sm:$0xff]  ;;  %v298_v59 = vld [vmem:[%s1589_s29 + $0x398] sm:$0xff] }
  0x31   : > { %291 = vst [vmem:[%s1597_s30 + $0x1b8] sm:$0xff] %v290_v55  ;;  %293 = vst [vmem:[%s1597_s30 + $0x1c0] sm:$0xff] %v292_v56  ;;  %v300_v60 = vld [vmem:[%s1589_s29 + $0x3c0] sm:$0xff]  ;;  %v302_v61 = vld [vmem:[%s1589_s29 + $0x3c8] sm:$0xff] }
  0x32   : > { %295 = vst [vmem:[%s1597_s30 + $0x1c8] sm:$0xff] %v294_v57  ;;  %297 = vst [vmem:[%s1597_s30 + $0x1d0] sm:$0xff] %v296_v58  ;;  %v304_v62 = vld [vmem:[%s1589_s29 + $0x3d0] sm:$0xff]  ;;  %v306_v63 = vld [vmem:[%s1589_s29 + $0x3d8] sm:$0xff] }
  0x33   : > { %299 = vst [vmem:[%s1597_s30 + $0x1d8] sm:$0xff] %v298_v59  ;;  %301 = vst [vmem:[%s1597_s30 + $0x1e0] sm:$0xff] %v300_v60  ;;  %v308_v0 = vld [vmem:[%s1589_s29 + $0x400] sm:$0xff]  ;;  %v310_v1 = vld [vmem:[%s1589_s29 + $0x408] sm:$0xff] }
  0x34   : > { %303 = vst [vmem:[%s1597_s30 + $0x1e8] sm:$0xff] %v302_v61  ;;  %305 = vst [vmem:[%s1597_s30 + $0x1f0] sm:$0xff] %v304_v62  ;;  %v312_v2 = vld [vmem:[%s1589_s29 + $0x410] sm:$0xff]  ;;  %v314_v3 = vld [vmem:[%s1589_s29 + $0x418] sm:$0xff] }
  0x35   : > { %307 = vst [vmem:[%s1597_s30 + $0x1f8] sm:$0xff] %v306_v63  ;;  %309 = vst [vmem:[%s1597_s30 + $0x200] sm:$0xff] %v308_v0  ;;  %v316_v4 = vld [vmem:[%s1589_s29 + $0x440] sm:$0xff]  ;;  %v318_v5 = vld [vmem:[%s1589_s29 + $0x448] sm:$0xff] }
  0x36   : > { %311 = vst [vmem:[%s1597_s30 + $0x208] sm:$0xff] %v310_v1  ;;  %313 = vst [vmem:[%s1597_s30 + $0x210] sm:$0xff] %v312_v2  ;;  %v320_v6 = vld [vmem:[%s1589_s29 + $0x450] sm:$0xff]  ;;  %v322_v7 = vld [vmem:[%s1589_s29 + $0x458] sm:$0xff] }
  0x37   : > { %315 = vst [vmem:[%s1597_s30 + $0x218] sm:$0xff] %v314_v3  ;;  %317 = vst [vmem:[%s1597_s30 + $0x220] sm:$0xff] %v316_v4  ;;  %v324_v8 = vld [vmem:[%s1589_s29 + $0x480] sm:$0xff]  ;;  %v326_v9 = vld [vmem:[%s1589_s29 + $0x488] sm:$0xff] }
  0x38   : > { %319 = vst [vmem:[%s1597_s30 + $0x228] sm:$0xff] %v318_v5  ;;  %321 = vst [vmem:[%s1597_s30 + $0x230] sm:$0xff] %v320_v6  ;;  %v328_v10 = vld [vmem:[%s1589_s29 + $0x490] sm:$0xff]  ;;  %v330_v11 = vld [vmem:[%s1589_s29 + $0x498] sm:$0xff] }
  0x39   : > { %323 = vst [vmem:[%s1597_s30 + $0x238] sm:$0xff] %v322_v7  ;;  %325 = vst [vmem:[%s1597_s30 + $0x240] sm:$0xff] %v324_v8 }
  0x3a   : > { %327 = vst [vmem:[%s1597_s30 + $0x248] sm:$0xff] %v326_v9  ;;  %329 = vst [vmem:[%s1597_s30 + $0x250] sm:$0xff] %v328_v10 }
  0x3b   : > { %331 = vst [vmem:[%s1597_s30 + $0x258] sm:$0xff] %v330_v11 }
  0x3c PF: > { %p1343_p7 = scmp.ge.s32.totalorder %s1520_s17, 1  ;;  %p336_p8 = scmp.lt.s32.totalorder %s1520_s17, 3 }
  0x3e   : > { %p337_p9 = pnand %p1343_p7, %p336_p8 }
  0x3f   : > { %s343_s5 = sand.u32 (!%p337_p9), 1, %s1512_s15   ;;  %v1753_v12 = vld [vmem:[%s1905_s1 + $0x4] ss:$8 sps:$4 sm:$0xff] (!%p337_p9)   ;;  %vm857_vm0 = vcmask (!%p337_p9), 154624   ;;  %vm861_vm1 = vcmask (!%p337_p9), 1040384   ;;  %vm862_vm2 = vcmask (!%p337_p9), 1041408  }
  0x40   : > { %340 = sbr.rel (%p337_p9) target bundleno = 521 (0x209), region = 47  ;;  %1431 = vmatprep.mubr.msk.bf16.mxu0 (!%p337_p9), %vm857_vm0, %v1753_v12  ;;  %1432 = vmatprep.mubr.msk.bf16.mxu1 (!%p337_p9), %vm857_vm0, %v1753_v12  ;;  %s1344_s12 = sshll.u32 (!%p337_p9), %s343_s5, 6  ;;  %vm1135_vm3 = vcmask (!%p337_p9), 7168  }
  0x41   : > { %s1461_s6 = smul.u32 (!%p337_p9), 608, %s343_s5  ;;  %s1862_s13 = scalar_lea.vmem (!%p337_p9), [#allocation3], %s1344_s12 }
  0x42   : > { %p379_p10 = scmp.lt.s32.totalorder (!%p337_p9), %s1564_s18, 1 }
  0x43   : > { %s1759_s9 = scalar_lea.vmem (!%p337_p9), [#allocation2], %s1461_s6 }
  0x44   : > { %v390_v13 = vld [vmem:[%s1759_s9] sm:$0xff] (!%p337_p9)  ;;  %v391_v15 = vld [vmem:[%s1759_s9 + $0x8] sm:$0xff] (!%p337_p9) }
  0x45   : > { %v394_v14 = vld [vmem:[%s1759_s9 + $0x20] sm:$0xff] (!%p337_p9)  ;;  %v395_v18 = vld [vmem:[%s1759_s9 + $0x28] sm:$0xff] (!%p337_p9) }
  0x46   : > { %v1352_v16 = vcombine.high (!%p337_p9), %v390_v13, %v394_v14  ;;  %v1351_v17 = vcombine.low (!%p337_p9), %v390_v13, %v394_v14  ;;  %v398_v19 = vld [vmem:[%s1759_s9 + $0x40] sm:$0xff] (!%p337_p9)  ;;  %v1354_v21 = vcombine.high (!%p337_p9), %v391_v15, %v395_v18  ;;  %v1353_v22 = vcombine.low (!%p337_p9), %v391_v15, %v395_v18  ;;  %v399_v24 = vld [vmem:[%s1759_s9 + $0x48] sm:$0xff] (!%p337_p9) }
  0x47   : > { %v402_v20 = vld [vmem:[%s1759_s9 + $0x60] sm:$0xff]  ;;  %v403_v25 = vld [vmem:[%s1759_s9 + $0x68] sm:$0xff]  ;;  %s380_s14 = scalar_select %p379_p10, %s1564_s18, 1 }
  0x48   : > { %v1360_v23 = vcombine.high %v398_v19, %v402_v20  ;;  %v406_v26 = vld [vmem:[%s1759_s9 + $0x80] sm:$0xff]  ;;  %889 = vmatprep.subr.bf16.mxu0 %v1352_v16  ;;  %v1362_v27 = vcombine.high %v399_v24, %v403_v25  ;;  %v407_v29 = vld [vmem:[%s1759_s9 + $0x88] sm:$0xff]  ;;  %932 = vmatprep.subr.bf16.mxu1 %v1354_v21  ;;  %v1359_v31 = vcombine.low %v398_v19, %v402_v20  ;;  %s1459_s27 = sshll.u32 (%p1579_p5), %s1564_s18, 5 }
  0x49   : > { %v410_v28 = vld [vmem:[%s1759_s9 + $0xa0] sm:$0xff]  ;;  %v411_v30 = vld [vmem:[%s1759_s9 + $0xa8] sm:$0xff]  ;;  %890 = vmatpush1.bf16.msra.mxu0 %v1351_v17  ;;  %933 = vmatpush1.bf16.msra.mxu1 %v1353_v22  ;;  %v1361_v32 = vcombine.low %v399_v24, %v403_v25  ;;  %v1522_v17 = vmov 65535   ;;  %s1449_s15 = sshll.u32 %s380_s14, 4  ;;  %s1193_s30 = scalar_lea.vmem (%p1579_p5), %s1906_s2, %s1459_s27 }
  0x4a   : > { %891 = vmatprep.subr.bf16.mxu0 %v1360_v23  ;;  %v1368_v33 = vcombine.high %v406_v26, %v410_v28  ;;  %934 = vmatprep.subr.bf16.mxu1 %v1362_v27  ;;  %v1370_v34 = vcombine.high %v407_v29, %v411_v30  ;;  %v414_v35 = vld [vmem:[%s1759_s9 + $0xc0] sm:$0xff]  ;;  %v415_v37 = vld [vmem:[%s1759_s9 + $0xc8] sm:$0xff]  ;;  %v1367_v39 = vcombine.low %v406_v26, %v410_v28  ;;  %v863_v18 = vsel %vm861_vm1, 4294967295, %v1522_v17  ;;  %s383_s21 = scalar_lea.vmem %s1907_s3, %s1449_s15  ;;  %s388_s26 = scalar_lea.vmem %s1908_s4, %s1449_s15 }
  0x4b   : > { %v418_v36 = vld [vmem:[%s1759_s9 + $0xe0] sm:$0xff]  ;;  %v419_v38 = vld [vmem:[%s1759_s9 + $0xe8] sm:$0xff]  ;;  %v1369_v40 = vcombine.low %v407_v29, %v411_v30  ;;  %v1799_v25 = vsel %vm862_vm2, %v863_v18, 0  ;;  %v440_v18 = vld [vmem:[%s1759_s9 + $0x190] sm:$0xff] }
  0x4c   : > { %v1376_v41 = vcombine.high %v414_v35, %v418_v36  ;;  %v1378_v42 = vcombine.high %v415_v37, %v419_v38  ;;  %v422_v43 = vld [vmem:[%s1759_s9 + $0x100] sm:$0xff]  ;;  %v423_v45 = vld [vmem:[%s1759_s9 + $0x108] sm:$0xff]  ;;  %v1375_v47 = vcombine.low %v414_v35, %v418_v36  ;;  %v1377_v48 = vcombine.low %v415_v37, %v419_v38  ;;  %v393_v35 = vld [vmem:[%s1759_s9 + $0x18] sm:$0xff] }
  0x4d   : > { %892 = vmatpush1.bf16.msra.mxu0 %v1359_v31  ;;  %935 = vmatpush1.bf16.msra.mxu1 %v1361_v32  ;;  %v426_v44 = vld [vmem:[%s1759_s9 + $0x120] sm:$0xff]  ;;  %v427_v46 = vld [vmem:[%s1759_s9 + $0x128] sm:$0xff]  ;;  %v397_v36 = vld [vmem:[%s1759_s9 + $0x38] sm:$0xff] }
  0x4e   : > { %893 = vmatprep.subr.bf16.mxu0 %v1368_v33  ;;  %936 = vmatprep.subr.bf16.mxu1 %v1370_v34  ;;  %v1384_v49 = vcombine.high %v422_v43, %v426_v44  ;;  %v1386_v50 = vcombine.high %v423_v45, %v427_v46  ;;  %v430_v51 = vld [vmem:[%s1759_s9 + $0x140] sm:$0xff]  ;;  %v431_v53 = vld [vmem:[%s1759_s9 + $0x148] sm:$0xff]  ;;  %v1383_v55 = vcombine.low %v422_v43, %v426_v44  ;;  %v392_v33 = vld [vmem:[%s1759_s9 + $0x10] sm:$0xff] }
  0x4f   : > { %v434_v52 = vld [vmem:[%s1759_s9 + $0x160] sm:$0xff]  ;;  %v435_v54 = vld [vmem:[%s1759_s9 + $0x168] sm:$0xff]  ;;  %v1385_v56 = vcombine.low %v423_v45, %v427_v46  ;;  %v396_v34 = vld [vmem:[%s1759_s9 + $0x30] sm:$0xff] }
  0x50   : > { %v1392_v57 = vcombine.high %v430_v51, %v434_v52  ;;  %v1394_v58 = vcombine.high %v431_v53, %v435_v54  ;;  %v438_v59 = vld [vmem:[%s1759_s9 + $0x180] sm:$0xff]  ;;  %v439_v61 = vld [vmem:[%s1759_s9 + $0x188] sm:$0xff]  ;;  %v1391_v63 = vcombine.low %v430_v51, %v434_v52  ;;  %v1393_v0 = vcombine.low %v431_v53, %v435_v54  ;;  %v401_v44 = vld [vmem:[%s1759_s9 + $0x58] sm:$0xff] }
  0x51   : > { %894 = vmatpush1.bf16.msra.mxu0 %v1367_v39  ;;  %937 = vmatpush1.bf16.msra.mxu1 %v1369_v40  ;;  %v442_v60 = vld [vmem:[%s1759_s9 + $0x1a0] sm:$0xff]  ;;  %v443_v62 = vld [vmem:[%s1759_s9 + $0x1a8] sm:$0xff]  ;;  %v1356_v39 = vcombine.high %v392_v33, %v396_v34  ;;  %v1358_v40 = vcombine.high %v393_v35, %v397_v36  ;;  %v405_v45 = vld [vmem:[%s1759_s9 + $0x78] sm:$0xff]  ;;  %v1355_v46 = vcombine.low %v392_v33, %v396_v34 }
  0x52   : > { %895 = vmatprep.subr.bf16.mxu0 %v1376_v41  ;;  %938 = vmatprep.subr.bf16.mxu1 %v1378_v42  ;;  %v1400_v1 = vcombine.high %v438_v59, %v442_v60  ;;  %v1402_v2 = vcombine.high %v439_v61, %v443_v62  ;;  %v446_v3 = vld [vmem:[%s1759_s9 + $0x1c0] sm:$0xff]  ;;  %v447_v5 = vld [vmem:[%s1759_s9 + $0x1c8] sm:$0xff]  ;;  %v1399_v7 = vcombine.low %v438_v59, %v442_v60  ;;  %v400_v41 = vld [vmem:[%s1759_s9 + $0x50] sm:$0xff] }
  0x53   : > { %v450_v4 = vld [vmem:[%s1759_s9 + $0x1e0] sm:$0xff]  ;;  %v451_v6 = vld [vmem:[%s1759_s9 + $0x1e8] sm:$0xff]  ;;  %v1401_v8 = vcombine.low %v439_v61, %v443_v62  ;;  %v404_v42 = vld [vmem:[%s1759_s9 + $0x70] sm:$0xff] }
  0x54   : > { %v1408_v9 = vcombine.high %v446_v3, %v450_v4  ;;  %v1410_v10 = vcombine.high %v447_v5, %v451_v6  ;;  %v454_v11 = vld [vmem:[%s1759_s9 + $0x200] sm:$0xff]  ;;  %v455_v15 = vld [vmem:[%s1759_s9 + $0x208] sm:$0xff]  ;;  %v1407_v20 = vcombine.low %v446_v3, %v450_v4  ;;  %v1409_v21 = vcombine.low %v447_v5, %v451_v6  ;;  %v412_v51 = vld [vmem:[%s1759_s9 + $0xb0] sm:$0xff] }
  0x55   : > { %896 = vmatpush1.bf16.msra.mxu0 %v1375_v47  ;;  %939 = vmatpush1.bf16.msra.mxu1 %v1377_v48  ;;  %v458_v13 = vld [vmem:[%s1759_s9 + $0x220] sm:$0xff]  ;;  %v459_v16 = vld [vmem:[%s1759_s9 + $0x228] sm:$0xff]  ;;  %v1357_v47 = vcombine.low %v393_v35, %v397_v36  ;;  %v1364_v48 = vcombine.high %v400_v41, %v404_v42  ;;  %v409_v52 = vld [vmem:[%s1759_s9 + $0x98] sm:$0xff]  ;;  %v1363_v54 = vcombine.low %v400_v41, %v404_v42 }
  0x56   : > { %897 = vmatprep.subr.bf16.mxu0 %v1384_v49  ;;  %940 = vmatprep.subr.bf16.mxu1 %v1386_v50  ;;  %v462_v14 = vld [vmem:[%s1759_s9 + $0x240] sm:$0x33]  ;;  %v463_v19 = vld [vmem:[%s1759_s9 + $0x248] sm:$0x33]  ;;  %v1416_v22 = vcombine.high %v454_v11, %v458_v13  ;;  %v1418_v24 = vcombine.high %v455_v15, %v459_v16  ;;  %v1415_v27 = vcombine.low %v454_v11, %v458_v13  ;;  %v408_v50 = vld [vmem:[%s1759_s9 + $0x90] sm:$0xff] }
  0x57   : > { %v1424_v23 = vcombine.high %v462_v14, %v462_v14  ;;  %v1426_v26 = vcombine.high %v463_v19, %v463_v19  ;;  %v1423_v28 = vcombine.low %v462_v14, %v462_v14  ;;  %v1417_v29 = vcombine.low %v455_v15, %v459_v16  ;;  %v1814_v43 = vld [vmem:[%s1905_s1] ss:$8 sps:$4 sm:$0xff]   ;;  %v413_v53 = vld [vmem:[%s1759_s9 + $0xb8] sm:$0xff]  ;;  %v420_v59 = vld [vmem:[%s1759_s9 + $0xf0] sm:$0xff] }
  0x58   : > { %v1425_v31 = vcombine.low %v463_v19, %v463_v19  ;;  %v1366_v49 = vcombine.high %v401_v44, %v405_v45  ;;  %v417_v60 = vld [vmem:[%s1759_s9 + $0xd8] sm:$0xff]  ;;  %v1371_v62 = vcombine.low %v408_v50, %v412_v51  ;;  %v428_v3 = vld [vmem:[%s1759_s9 + $0x130] sm:$0xff] }
  0x59   : > { %898 = vmatpush1.bf16.msra.mxu0 %v1383_v55  ;;  %941 = vmatpush1.bf16.msra.mxu1 %v1385_v56  ;;  %v869_v30 = vand.u32 %v1424_v23, %v1799_v25  ;;  %v875_v32 = vand.u32 %v1426_v26, %v1799_v25  ;;  %v866_v37 = vand.u32 %v1423_v28, %v1799_v25  ;;  %v421_v61 = vld [vmem:[%s1759_s9 + $0xf8] sm:$0xff]  ;;  %v444_v19 = vld [vmem:[%s1759_s9 + $0x1b0] sm:$0xff] }
  0x5a   : > { %899 = vmatprep.subr.bf16.mxu0 %v1392_v57  ;;  %942 = vmatprep.subr.bf16.mxu1 %v1394_v58  ;;  %v872_v38 = vand.u32 %v1425_v31, %v1799_v25  ;;  %v1365_v55 = vcombine.low %v401_v44, %v405_v45  ;;  %v1372_v56 = vcombine.high %v408_v50, %v412_v51  ;;  %v416_v58 = vld [vmem:[%s1759_s9 + $0xd0] sm:$0xff]  ;;  %v425_v4 = vld [vmem:[%s1759_s9 + $0x118] sm:$0xff] }
  0x5b   : > { %v1374_v57 = vcombine.high %v409_v52, %v413_v53  ;;  %v429_v5 = vld [vmem:[%s1759_s9 + $0x138] sm:$0xff]  ;;  %v1379_v6 = vcombine.low %v416_v58, %v420_v59  ;;  %v452_v28 = vld [vmem:[%s1759_s9 + $0x1f0] sm:$0xff]  ;;  %v1403_v31 = vcombine.low %v440_v18, %v444_v19 }
  0x5c   : > { %v433_v11 = vld [vmem:[%s1759_s9 + $0x158] sm:$0xff]  ;;  %v1389_v15 = vcombine.low %v425_v4, %v429_v5  ;;  %v456_v35 = vld [vmem:[%s1759_s9 + $0x210] sm:$0xff] }
  0x5d   : > { %900 = vmatpush1.bf16.msra.mxu0 %v1391_v63  ;;  %943 = vmatpush1.bf16.msra.mxu1 %v1393_v0  ;;  %v1373_v63 = vcombine.low %v409_v52, %v413_v53  ;;  %v1380_v0 = vcombine.high %v416_v58, %v420_v59  ;;  %v437_v13 = vld [vmem:[%s1759_s9 + $0x178] sm:$0xff]  ;;  %v460_v36 = vld [vmem:[%s1759_s9 + $0x230] sm:$0xff] }
  0x5e   : > { %901 = vmatprep.subr.bf16.mxu0 %v1400_v1  ;;  %944 = vmatprep.subr.bf16.mxu1 %v1402_v2  ;;  %v1382_v1 = vcombine.high %v417_v60, %v421_v61  ;;  %v424_v2 = vld [vmem:[%s1759_s9 + $0x110] sm:$0xff]  ;;  %v1398_v17 = vcombine.high %v433_v11, %v437_v13  ;;  %v1397_v23 = vcombine.low %v433_v11, %v437_v13 }
  0x5f   : > { %v1387_v14 = vcombine.low %v424_v2, %v428_v3  ;;  %v1420_v44 = vcombine.high %v456_v35, %v460_v36 }
  0x61   : > { %902 = vmatpush1.bf16.msra.mxu0 %v1399_v7  ;;  %945 = vmatpush1.bf16.msra.mxu1 %v1401_v8  ;;  %v1388_v7 = vcombine.high %v424_v2, %v428_v3  ;;  %v1390_v8 = vcombine.high %v425_v4, %v429_v5 }
  0x62   : > { %903 = vmatprep.subr.bf16.mxu0 %v1408_v9  ;;  %946 = vmatprep.subr.bf16.mxu1 %v1410_v10  ;;  %v432_v9 = vld [vmem:[%s1759_s9 + $0x150] sm:$0xff] }
  0x63   : > { %v436_v10 = vld [vmem:[%s1759_s9 + $0x170] sm:$0xff] }
  0x64   : > { %v1396_v16 = vcombine.high %v432_v9, %v436_v10 }
  0x65   : > { %904 = vmatpush1.bf16.msra.mxu0 %v1407_v20  ;;  %947 = vmatpush1.bf16.msra.mxu1 %v1409_v21  ;;  %v441_v20 = vld [vmem:[%s1759_s9 + $0x198] sm:$0xff] }
  0x66   : > { %905 = vmatprep.subr.bf16.mxu0 %v1416_v22  ;;  %948 = vmatprep.subr.bf16.mxu1 %v1418_v24  ;;  %v445_v21 = vld [vmem:[%s1759_s9 + $0x1b8] sm:$0xff]  ;;  %v1395_v22 = vcombine.low %v432_v9, %v436_v10  ;;  %v1404_v24 = vcombine.high %v440_v18, %v444_v19 }
  0x67   : > { %v1406_v26 = vcombine.high %v441_v20, %v445_v21 }
  0x69   : > { %906 = vmatpush1.bf16.msra.mxu0 %v1415_v27  ;;  %949 = vmatpush1.bf16.msra.mxu1 %v1417_v29  ;;  %v448_v27 = vld [vmem:[%s1759_s9 + $0x1d0] sm:$0xff]  ;;  %v449_v29 = vld [vmem:[%s1759_s9 + $0x1d8] sm:$0xff] }
  0x6a   : > { %907 = vmatprep.subr.bf16.mxu0 %v869_v30  ;;  %950 = vmatprep.subr.bf16.mxu1 %v875_v32  ;;  %v453_v30 = vld [vmem:[%s1759_s9 + $0x1f8] sm:$0xff]  ;;  %v1405_v32 = vcombine.low %v441_v20, %v445_v21  ;;  %v1412_v33 = vcombine.high %v448_v27, %v452_v28  ;;  %v1411_v41 = vcombine.low %v448_v27, %v452_v28 }
  0x6b   : > { %v1414_v34 = vcombine.high %v449_v29, %v453_v30  ;;  %v1413_v42 = vcombine.low %v449_v29, %v453_v30 }
  0x6d   : > { %908 = vmatpush1.bf16.msra.mxu0 %v866_v37  ;;  %951 = vmatpush1.bf16.msra.mxu1 %v872_v38  ;;  %v464_v37 = vld [vmem:[%s1759_s9 + $0x250] sm:$0x33]  ;;  %v457_v38 = vld [vmem:[%s1759_s9 + $0x218] sm:$0xff] }
  0x6e   : > { %975 = vmatprep.subr.bf16.mxu0 %v1356_v39  ;;  %1018 = vmatprep.subr.bf16.mxu1 %v1358_v40  ;;  %v461_v39 = vld [vmem:[%s1759_s9 + $0x238] sm:$0xff]  ;;  %v1428_v45 = vcombine.high %v464_v37, %v464_v37 }
  0x6f   : > { %v465_v40 = vld [vmem:[%s1759_s9 + $0x258] sm:$0x33]  ;;  %v1421_v50 = vcombine.low %v457_v38, %v461_v39 }
  0x70   : > { %922 = vmatmul.mubr.bf16.vlgmr.msra.gmra.mrb[0].mxu0 %v1814_v43  ;;  %965 = vmatmul.mubr.bf16.vlgmr.msra.gmra.mrb[0].mxu1 %v1814_v43  ;;  %v881_v51 = vand.u32 %v1428_v45, %v1799_v25  ;;  %v1429_v52 = vcombine.low %v465_v40, %v465_v40 }
  0x71   : > { %976 = vmatpush1.bf16.msra.mxu0 %v1355_v46  ;;  %1019 = vmatpush1.bf16.msra.mxu1 %v1357_v47  ;;  %v1422_v46 = vcombine.high %v457_v38, %v461_v39  ;;  %v1430_v47 = vcombine.high %v465_v40, %v465_v40 }
  0x72   : > { %977 = vmatprep.subr.bf16.mxu0 %v1364_v48  ;;  %1020 = vmatprep.subr.bf16.mxu1 %v1366_v49  ;;  %v1419_v48 = vcombine.low %v456_v35, %v460_v36  ;;  %v1427_v49 = vcombine.low %v464_v37, %v464_v37 }
  0x73   : > { %1433 = vmatprep.mubr.msk.bf16.mxu0 %vm857_vm0, %v1753_v12  ;;  %1434 = vmatprep.mubr.msk.bf16.mxu1 %vm857_vm0, %v1753_v12  ;;  %v1381_v12 = vcombine.low %v417_v60, %v421_v61  ;;  %v887_v53 = vand.u32 %v1430_v47, %v1799_v25 }
  0x75   : > { %978 = vmatpush1.bf16.msra.mxu0 %v1363_v54  ;;  %1021 = vmatpush1.bf16.msra.mxu1 %v1365_v55  ;;  %v878_v54 = vand.u32 %v1427_v49, %v1799_v25  ;;  %v884_v55 = vand.u32 %v1429_v52, %v1799_v25 }
  0x76   : > { %979 = vmatprep.subr.bf16.mxu0 %v1372_v56  ;;  %1022 = vmatprep.subr.bf16.mxu1 %v1374_v57 }
  0x79   : > { %980 = vmatpush1.bf16.msra.mxu0 %v1371_v62  ;;  %1023 = vmatpush1.bf16.msra.mxu1 %v1373_v63 }
  0x7a   : > { %981 = vmatprep.subr.bf16.mxu0 %v1380_v0  ;;  %1024 = vmatprep.subr.bf16.mxu1 %v1382_v1 }
  0x7d   : > { %982 = vmatpush1.bf16.msra.mxu0 %v1379_v6  ;;  %1025 = vmatpush1.bf16.msra.mxu1 %v1381_v12 }
  0x7e   : > { %983 = vmatprep.subr.bf16.mxu0 %v1388_v7  ;;  %1026 = vmatprep.subr.bf16.mxu1 %v1390_v8 }
  0x81   : > { %984 = vmatpush1.bf16.msra.mxu0 %v1387_v14  ;;  %1027 = vmatpush1.bf16.msra.mxu1 %v1389_v15 }
  0x82   : > { %985 = vmatprep.subr.bf16.mxu0 %v1396_v16  ;;  %1028 = vmatprep.subr.bf16.mxu1 %v1398_v17 }
  0x85   : > { %986 = vmatpush1.bf16.msra.mxu0 %v1395_v22  ;;  %1029 = vmatpush1.bf16.msra.mxu1 %v1397_v23 }
  0x86   : > { %987 = vmatprep.subr.bf16.mxu0 %v1404_v24  ;;  %1030 = vmatprep.subr.bf16.mxu1 %v1406_v26 }
  0x89   : > { %988 = vmatpush1.bf16.msra.mxu0 %v1403_v31  ;;  %1031 = vmatpush1.bf16.msra.mxu1 %v1405_v32 }
  0x8a   : > { %989 = vmatprep.subr.bf16.mxu0 %v1412_v33  ;;  %1032 = vmatprep.subr.bf16.mxu1 %v1414_v34 }
  0x8d   : > { %990 = vmatpush1.bf16.msra.mxu0 %v1411_v41  ;;  %1033 = vmatpush1.bf16.msra.mxu1 %v1413_v42 }
  0x8e   : > { %991 = vmatprep.subr.bf16.mxu0 %v1420_v44  ;;  %1034 = vmatprep.subr.bf16.mxu1 %v1422_v46 }
  0x91   : > { %992 = vmatpush1.bf16.msra.mxu0 %v1419_v48  ;;  %1035 = vmatpush1.bf16.msra.mxu1 %v1421_v50 }
  0x92   : > { %993 = vmatprep.subr.bf16.mxu0 %v881_v51  ;;  %1036 = vmatprep.subr.bf16.mxu1 %v887_v53 }
  0x95   : > { %994 = vmatpush1.bf16.msra.mxu0 %v878_v54  ;;  %1037 = vmatpush1.bf16.msra.mxu1 %v884_v55 }
  0x98   : > { %1008 = vmatmul.mubr.bf16.vlgmr.msra.gmra.mrb[4].mxu0 %v1814_v43  ;;  %1051 = vmatmul.mubr.bf16.vlgmr.msra.gmra.mrb[4].mxu1 %v1814_v43 }
 0x143   : > { %v923_v56 = vpop.f32.mrb[0].mxu0  ;;  %v966_v59 = vpop.f32.mrb[0].mxu1 }
 0x144   : > { %v1138_v57 = vmul.f32 %v923_v56, %v923_v56  ;;  %v925_v58 = vpop.f32.mrb[1].mxu0  ;;  %v1140_v0 = vmul.f32 %v966_v59, %v966_v59  ;;  %v968_v1 = vpop.f32.mrb[1].mxu1 }
 0x145   : > { %v1451_v60 = vpack.c.bf16 %v925_v58, %v923_v56  ;;  %v1117_v61 = vadd.f32 %v925_v58, %v923_v56  ;;  %v1139_v62 = vmul.f32 %v925_v58, %v925_v58  ;;  %v927_v63 = vpop.f32.mrb[2].mxu0  ;;  %v1452_v3 = vpack.c.bf16 %v968_v1, %v966_v59  ;;  %v970_v5 = vpop.f32.mrb[2].mxu1 }
 0x146   : > { %v1146_v25 = vmul.f32 %v927_v63, %v927_v63  ;;  %v929_v2 = vpop.f32.mrb[3].mxu0  ;;  %v1141_v4 = vmul.f32 %v968_v1, %v968_v1  ;;  %v972_v8 = vpop.f32.mrb[3].mxu1  ;;  %v1148_v10 = vmul.f32 %v970_v5, %v970_v5 }
 0x147   : > { %1109 = vst [vmem:[%s1862_s13] sm:$0xff] %v1451_v60  ;;  %v1154_v43 = vadd.f32 %v1139_v62, %v1138_v57  ;;  %v1118_v6 = vadd.f32 %v1117_v61, %v966_v59  ;;  %v1455_v12 = vpack.c.bf16 %v929_v2, %v927_v63  ;;  %v1126_v7 = vadd.f32 %v929_v2, %v927_v63 }
 0x148   : > { %v1147_v9 = vmul.f32 %v929_v2, %v929_v2  ;;  %1110 = vst [vmem:[%s1862_s13 + $0x8] sm:$0xff] %v1452_v3  ;;  %v1456_v11 = vpack.c.bf16 %v972_v8, %v970_v5  ;;  %v1149_v20 = vmul.f32 %v972_v8, %v972_v8 }
 0x149   : > { %v1155_v13 = vadd.f32 %v1154_v43, %v1140_v0  ;;  %1113 = vst [vmem:[%s1862_s13 + $0x20] sm:$0xff] %v1455_v12  ;;  %v1119_v14 = vadd.f32 %v1118_v6, %v968_v1  ;;  %v1127_v15 = vadd.f32 %v1126_v7, %v970_v5 }
 0x14a   : > { %v1163_v16 = vadd.f32 %v1147_v9, %v1146_v25  ;;  %1114 = vst [vmem:[%s1862_s13 + $0x28] sm:$0xff] %v1456_v11 }
 0x14b   : > { %v1156_v17 = vadd.f32 %v1155_v13, %v1141_v4  ;;  %v1128_v18 = vadd.f32 %v1127_v15, %v972_v8 }
 0x14c   : > { %v1164_v19 = vadd.f32 %v1163_v16, %v1148_v10 }
 0x14e   : > { %v1165_v21 = vadd.f32 %v1164_v19, %v1149_v20  ;;  %v1206_v0 = vld [vmem:[%s1862_s13] sm:$0xff] (%p1579_p5) }
 0x14f   : > { %v1208_v1 = vld [vmem:[%s1862_s13 + $0x8] sm:$0xff] (%p1579_p5)  ;;  %1207 = vst [vmem:[%s1193_s30] sm:$0xff] (%p1579_p5), %v1206_v0 }
 0x150   : > { %v1214_v3 = vld [vmem:[%s1862_s13 + $0x20] sm:$0xff] (%p1579_p5)  ;;  %1209 = vst [vmem:[%s1193_s30 + $0x8] sm:$0xff] (%p1579_p5), %v1208_v1 }
 0x151   : > { %v1216_v4 = vld [vmem:[%s1862_s13 + $0x28] sm:$0xff] (%p1579_p5)  ;;  %1215 = vst [vmem:[%s1193_s30 + $0x40] sm:$0xff] (%p1579_p5), %v1214_v3 }
 0x152   : > { %1217 = vst [vmem:[%s1193_s30 + $0x48] sm:$0xff] (%p1579_p5), %v1216_v4 }
 0x16b   : > { %v1009_v22 = vpop.f32.mrb[4].mxu0  ;;  %v1052_v27 = vpop.f32.mrb[4].mxu1 }
 0x16c   : > { %v1120_v23 = vadd.f32 %v1119_v14, %v1009_v22  ;;  %v1142_v24 = vmul.f32 %v1009_v22, %v1009_v22  ;;  %v1011_v26 = vpop.f32.mrb[5].mxu0  ;;  %v1054_v31 = vpop.f32.mrb[5].mxu1  ;;  %v1144_v38 = vmul.f32 %v1052_v27, %v1052_v27 }
 0x16d   : > { %v1453_v28 = vpack.c.bf16 %v1011_v26, %v1009_v22  ;;  %v1143_v29 = vmul.f32 %v1011_v26, %v1011_v26  ;;  %v1013_v30 = vpop.f32.mrb[6].mxu0  ;;  %v1056_v37 = vpop.f32.mrb[6].mxu1  ;;  %v1454_v39 = vpack.c.bf16 %v1054_v31, %v1052_v27  ;;  %v1145_v53 = vmul.f32 %v1054_v31, %v1054_v31 }
 0x16e   : > { %v1157_v32 = vadd.f32 %v1156_v17, %v1142_v24  ;;  %v1121_v33 = vadd.f32 %v1120_v23, %v1011_v26  ;;  %v1129_v34 = vadd.f32 %v1128_v18, %v1013_v30  ;;  %v1150_v35 = vmul.f32 %v1013_v30, %v1013_v30  ;;  %v1015_v36 = vpop.f32.mrb[7].mxu0  ;;  %v1058_v42 = vpop.f32.mrb[7].mxu1 }
 0x16f   : > { %1111 = vst [vmem:[%s1862_s13 + $0x10] sm:$0xff] %v1453_v28  ;;  %v1457_v40 = vpack.c.bf16 %v1015_v36, %v1013_v30  ;;  %v1151_v41 = vmul.f32 %v1015_v36, %v1015_v36  ;;  %v1458_v46 = vpack.c.bf16 %v1058_v42, %v1056_v37  ;;  %1112 = vst [vmem:[%s1862_s13 + $0x18] sm:$0xff] %v1454_v39 }
 0x170   : > { %v1166_v44 = vadd.f32 %v1165_v21, %v1150_v35  ;;  %v1130_v45 = vadd.f32 %v1129_v34, %v1015_v36  ;;  %v1122_v47 = vadd.f32 %v1121_v33, %v1052_v27  ;;  %v1158_v48 = vadd.f32 %v1157_v32, %v1143_v29 }
 0x171   : > { %1115 = vst [vmem:[%s1862_s13 + $0x30] sm:$0xff] %v1457_v40  ;;  %v1152_v50 = vmul.f32 %v1056_v37, %v1056_v37  ;;  %1116 = vst [vmem:[%s1862_s13 + $0x38] sm:$0xff] %v1458_v46  ;;  %v1153_v55 = vmul.f32 %v1058_v42, %v1058_v42 }
 0x172   : > { %v1167_v49 = vadd.f32 %v1166_v44, %v1151_v41  ;;  %v1131_v51 = vadd.f32 %v1130_v45, %v1056_v37  ;;  %v1123_v52 = vadd.f32 %v1122_v47, %v1054_v31  ;;  %v1159_v54 = vadd.f32 %v1158_v48, %v1144_v38 }
 0x174   : > { %v1132_v56 = vadd.f32 %v1131_v51, %v1058_v42  ;;  %v1168_v57 = vadd.f32 %v1167_v49, %v1152_v50  ;;  %1124 = vadd.xlane.f32.xlu0 %v1123_v52  ;;  %v1160_v58 = vadd.f32 %v1159_v54, %v1145_v53 }
 0x176   : > { %v1169_v59 = vadd.f32 %v1168_v57, %v1153_v55  ;;  %1161 = vadd.xlane.f32.xlu1 %v1160_v58  ;;  %v1210_v25 = vld [vmem:[%s1862_s13 + $0x10] sm:$0xff] (%p1579_p5)  ;;  %v1212_v2 = vld [vmem:[%s1862_s13 + $0x18] sm:$0xff] (%p1579_p5) }
 0x177   : > { %1211 = vst [vmem:[%s1193_s30 + $0x10] sm:$0xff] (%p1579_p5), %v1210_v25  ;;  %1213 = vst [vmem:[%s1193_s30 + $0x18] sm:$0xff] (%p1579_p5), %v1212_v2 }
 0x178   : > { %1133 = vadd.xlane.f32.xlu0 %v1132_v56  ;;  %v1218_v5 = vld [vmem:[%s1862_s13 + $0x30] sm:$0xff] (%p1579_p5)  ;;  %v1220_v43 = vld [vmem:[%s1862_s13 + $0x38] sm:$0xff] (%p1579_p5) }
 0x179   : > { %1219 = vst [vmem:[%s1193_s30 + $0x50] sm:$0xff] (%p1579_p5), %v1218_v5  ;;  %1221 = vst [vmem:[%s1193_s30 + $0x58] sm:$0xff] (%p1579_p5), %v1220_v43 }
 0x17a   : > { %1170 = vadd.xlane.f32.xlu1 %v1169_v59 }
 0x201   : > { %v1125_v60 = vpop.xlane.xlu0 %1124 }
 0x202   : > { %1136 = vst.msk [vmem:[%s383_s21] sm:$0xff] %vm1135_vm3, %v1125_v60  ;;  %1190 = sbr.rel (!%p1579_p5) target bundleno = 521 (0x209), region = 55 }
 0x203   : > { %v1162_v61 = vpop.xlane.xlu1 %1161 }
 0x204   : > { %1172 = vst.msk [vmem:[%s388_s26] sm:$0xff] %vm1135_vm3, %v1162_v61 }
 0x205   : > { %v1134_v62 = vpop.xlane.xlu0 %1133 }
 0x206   : > { %1137 = vst.msk [vmem:[%s383_s21 + $0x8] sm:$0xff] %vm1135_vm3, %v1134_v62 }
 0x207   : > { %v1171_v63 = vpop.xlane.xlu1 %1170 }
 0x208   : > { %1173 = vst.msk [vmem:[%s388_s26 + $0x8] sm:$0xff] %vm1135_vm3, %v1171_v63 }
 0x209 PF: > { %p12_p11 = scmp.ge.s32.totalorder %s1567_s19, 4   ;;  %s1910_s15 = smov %s1516_s16 }
 0x20a   : > { %s1911_s16 = smov %s1577_s22  ;;  %s1912_s17 = smov %s1567_s19 }
 0x20b   :  { %14 = sbr.rel (!%p12_p11) target bundleno = 2 (0x2), region = 133 }

// kernel: encoder_forward.35
= control target key start
LH: loop header
LB: loop body
LE: loop exit
PB: predicated region body
PF: predicated region fallthrough
CT: control target
= control target key end

     0   :  { %s741_s15 = smov 0   ;;  %s743_s16 = smov 0   ;;  %s872_s0 = inlined_call_operand.vmem [shape: bf16[16,2048], index: 0, kind: input, shape index: {}]   ;;  %s873_s1 = inlined_call_operand.vmem [shape: f32[16,1], index: 1, kind: input, shape index: {}]   ;;  %s874_s2 = inlined_call_operand.vmem [shape: f32[16,1], index: 2, kind: input, shape index: {}]   ;;  %s875_s3 = inlined_call_operand.vmem [shape: bf16[16,2048], index: 3, kind: output, shape index: {0}]   ;;  %s876_s4 = inlined_call_operand.vmem [shape: bf16[16,2048], index: 4, kind: output, shape index: {1}]  }
   0x1   :  { %s745_s17 = smov 0  }
   0x2 LB: > { %s757_s18 = sadd.s32 4294967295, %s713_s17   ;;  %s760_s19 = sadd.s32 1, %s713_s17   ;;  %s713_s17 = sphi %s745_s17, %s880_s17   ;;  %s709_s16 = sphi %s743_s16, %s879_s16   ;;  %s705_s15 = sphi %s741_s15, %s878_s15  }
   0x3   : > { %s19_s20 = ssub.s32 %s713_s17, %s760_s19  ;;  %s22_s21 = sadd.s32 1, %s709_s16 }
   0x4   : > { %p20_p0 = scmp.eq.s32.totalorder %s19_s20, 0  ;;  %p29_p1 = scmp.ne.s32.totalorder %s709_s16, %s705_s15 }
   0x5   : > { %p30_p2 = scmp.eq.s32.totalorder %s713_s17, 0  ;;  %p101_p3 = scmp.eq.s32.totalorder %s757_s18, 1 }
   0x6   : > { %s770_s22 = scalar_select %p20_p0, %s709_s16, %s22_s21  }
   0x7   : > { %p31_p4 = por %p30_p2, %p29_p1  ;;  %p772_p5 = por %p101_p3, %p29_p1 }
   0x8   : > { %p613_p6 = scmp.ge.s32.totalorder %s713_s17, 2 }
   0xa   : > { %155 = sbr.rel (%p613_p6) target bundleno = 25 (0x19), region = 24 }
  0x11   : > { %158 = sbr.rel (!%p31_p4) target bundleno = 25 (0x19), region = 28  ;;  %s160_s24 = sand.u32 (%p31_p4), 1, %s709_s16  }
  0x12   : > { %s645_s25 = sshll.u32 (%p31_p4), %s713_s17, 5  ;;  %s614_s26 = sshll.u32 (%p31_p4), %s160_s24, 6 }
  0x13   : > { %s165_s29 = scalar_lea.vmem (%p31_p4), %s872_s0, %s645_s25  ;;  %s162_s30 = scalar_lea.vmem (%p31_p4), [#allocation2], %s614_s26 }
  0x14   : > { %v178_v0 = vld [vmem:[%s165_s29] sm:$0xff] (%p31_p4)  ;;  %v180_v1 = vld [vmem:[%s165_s29 + $0x8] sm:$0xff] (%p31_p4)  ;;  %v182_v2 = vld [vmem:[%s165_s29 + $0x10] sm:$0xff] (%p31_p4) }
  0x15   : > { %179 = vst [vmem:[%s162_s30] sm:$0xff] (%p31_p4), %v178_v0  ;;  %181 = vst [vmem:[%s162_s30 + $0x8] sm:$0xff] (%p31_p4), %v180_v1  ;;  %v184_v3 = vld [vmem:[%s165_s29 + $0x18] sm:$0xff] (%p31_p4)  ;;  %v186_v4 = vld [vmem:[%s165_s29 + $0x40] sm:$0xff] (%p31_p4) }
  0x16   : > { %183 = vst [vmem:[%s162_s30 + $0x10] sm:$0xff] (%p31_p4), %v182_v2  ;;  %v188_v5 = vld [vmem:[%s165_s29 + $0x48] sm:$0xff] (%p31_p4)  ;;  %185 = vst [vmem:[%s162_s30 + $0x18] sm:$0xff] (%p31_p4), %v184_v3  ;;  %v190_v6 = vld [vmem:[%s165_s29 + $0x50] sm:$0xff] (%p31_p4) }
  0x17   : > { %187 = vst [vmem:[%s162_s30 + $0x20] sm:$0xff] (%p31_p4), %v186_v4  ;;  %189 = vst [vmem:[%s162_s30 + $0x28] sm:$0xff] (%p31_p4), %v188_v5  ;;  %v192_v7 = vld [vmem:[%s165_s29 + $0x58] sm:$0xff] (%p31_p4) }
  0x18   : > { %191 = vst [vmem:[%s162_s30 + $0x30] sm:$0xff] %v190_v6  ;;  %193 = vst [vmem:[%s162_s30 + $0x38] sm:$0xff] %v192_v7 }
  0x19 PF: > { %p617_p7 = scmp.ge.s32.totalorder %s713_s17, 1  ;;  %p198_p8 = scmp.lt.s32.totalorder %s713_s17, 3 }
  0x1b   : > { %p199_p9 = pnand %p617_p7, %p198_p8 }
  0x1c   : > { %v288_v8 = vld [vmem:[%s874_s2] sm:$0xff] (!%p199_p9)  ;;  %v715_v10 = vmov (!%p199_p9), 0   ;;  %v289_v11 = vld [vmem:[%s874_s2 + $0x8] sm:$0xff] (!%p199_p9)  ;;  %s205_s13 = sand.u32 (!%p199_p9), 1, %s705_s15  }
  0x1d   : > { %202 = sbr.rel (%p199_p9) target bundleno = 191 (0xbf), region = 51  ;;  %v260_v9 = vld [vmem:[%s873_s1] sm:$0xff] (!%p199_p9)  ;;  %690 = vset.pattern.permute.xlu1 (!%p199_p9), %v715_v10  ;;  %689 = vset.pattern.permute.xlu0 (!%p199_p9), %v715_v10  ;;  %v261_v12 = vld [vmem:[%s873_s1 + $0x8] sm:$0xff] (!%p199_p9)  ;;  %s797_s14 = sshll.u32 (!%p199_p9), %s205_s13, 6 }
  0x1e   : > { %292 = vperm.xlu1 (!%p199_p9), %690, %v288_v8   ;;  %264 = vperm.xlu0 (!%p199_p9), %689, %v260_v9   ;;  %s207_s17 = scalar_lea.vmem (!%p199_p9), [#allocation2], %s797_s14  ;;  %s813_s15 = scalar_lea.vmem (!%p199_p9), [#allocation3], %s797_s14 }
  0x1f   : > { %v236_v13 = vld [vmem:[%s207_s17] sm:$0xff] (!%p199_p9)  ;;  %v237_v14 = vld [vmem:[%s207_s17 + $0x8] sm:$0xff] (!%p199_p9)  ;;  %v238_v15 = vld [vmem:[%s207_s17 + $0x10] sm:$0xff] (!%p199_p9)  ;;  %s820_s20 = scalar_lea.vmem (!%p199_p9), [#allocation4], %s797_s14 }
  0x20   : > { %v239_v16 = vld [vmem:[%s207_s17 + $0x18] sm:$0xff] (!%p199_p9)  ;;  %v240_v17 = vld [vmem:[%s207_s17 + $0x20] sm:$0xff] (!%p199_p9)  ;;  %v800_v18 = vld [vmem:[%s207_s17 + $0x28] sm:$0xff] (!%p199_p9)  ;;  %v244_v19 = vunpack.c.l.bf16 (!%p199_p9), %v236_v13  ;;  %v245_v20 = vunpack.c.h.bf16 (!%p199_p9), %v236_v13  ;;  %v246_v21 = vunpack.c.l.bf16 (!%p199_p9), %v237_v14  ;;  %v247_v22 = vunpack.c.h.bf16 (!%p199_p9), %v237_v14 }
  0x21   : > { %v802_v23 = vld [vmem:[%s207_s17 + $0x30] sm:$0xff] (!%p199_p9)  ;;  %v804_v24 = vld [vmem:[%s207_s17 + $0x38] sm:$0xff] (!%p199_p9)  ;;  %v248_v25 = vunpack.c.l.bf16 (!%p199_p9), %v238_v15  ;;  %v249_v26 = vunpack.c.h.bf16 (!%p199_p9), %v238_v15  ;;  %v250_v27 = vunpack.c.l.bf16 (!%p199_p9), %v239_v16  ;;  %v251_v28 = vunpack.c.h.bf16 (!%p199_p9), %v239_v16 }
  0x22   : > { %297 = vperm.xlu1 (!%p199_p9), %690, %v289_v11   ;;  %269 = vperm.xlu0 (!%p199_p9), %689, %v261_v12   ;;  %v252_v29 = vunpack.c.l.bf16 (!%p199_p9), %v240_v17  ;;  %v253_v30 = vunpack.c.h.bf16 (!%p199_p9), %v240_v17  ;;  %v254_v31 = vunpack.c.l.bf16 (!%p199_p9), %v800_v18  ;;  %v255_v32 = vunpack.c.h.bf16 (!%p199_p9), %v800_v18 }
  0x23   : > { %v256_v34 = vunpack.c.l.bf16 (!%p199_p9), %v802_v23  ;;  %v257_v35 = vunpack.c.h.bf16 (!%p199_p9), %v802_v23  ;;  %v258_v36 = vunpack.c.l.bf16 (!%p199_p9), %v804_v24  ;;  %v259_v37 = vunpack.c.h.bf16 (!%p199_p9), %v804_v24 }
  0x24   : > { %s662_s21 = sshll.u32 (%p772_p5), %s757_s18, 5 }
  0x25   : > { %s457_s26 = scalar_lea.vmem (%p772_p5), %s875_s3, %s662_s21 }
  0x9d   : > { %v265_v33 = vpop.permute.xlu0 %264  ;;  %v293_v42 = vpop.permute.xlu1 %292 }
  0x9e   : > { %v272_v38 = vmul.f32 %v265_v33, %v244_v19  ;;  %v273_v39 = vmul.f32 %v265_v33, %v245_v20  ;;  %v274_v40 = vmul.f32 %v265_v33, %v246_v21  ;;  %v275_v41 = vmul.f32 %v265_v33, %v247_v22 }
  0x9f   : > { %v276_v43 = vmul.f32 %v265_v33, %v248_v25  ;;  %v277_v44 = vmul.f32 %v265_v33, %v249_v26  ;;  %v278_v45 = vmul.f32 %v265_v33, %v250_v27  ;;  %v279_v46 = vmul.f32 %v265_v33, %v251_v28 }
  0xa0   : > { %v300_v47 = vadd.f32 %v293_v42, %v272_v38  ;;  %v301_v48 = vadd.f32 %v293_v42, %v273_v39  ;;  %v302_v49 = vadd.f32 %v293_v42, %v274_v40  ;;  %v303_v50 = vadd.f32 %v293_v42, %v275_v41 }
  0xa1   : > { %v304_v51 = vadd.f32 %v293_v42, %v276_v43  ;;  %v305_v52 = vadd.f32 %v293_v42, %v277_v44  ;;  %v306_v53 = vadd.f32 %v293_v42, %v278_v45  ;;  %v307_v54 = vadd.f32 %v293_v42, %v279_v46  ;;  %v270_v59 = vpop.permute.xlu0 %269  ;;  %v298_v12 = vpop.permute.xlu1 %297 }
  0xa2   : > { %v646_v55 = vpack.c.bf16 %v301_v48, %v300_v47  ;;  %v647_v56 = vpack.c.bf16 %v303_v50, %v302_v49  ;;  %v372_v57 = vmax.f32 %v300_v47, 0.0  ;;  %v373_v58 = vmax.f32 %v301_v48, 0.0 }
  0xa3   : > { %v648_v60 = vpack.c.bf16 %v305_v52, %v304_v51  ;;  %v649_v61 = vpack.c.bf16 %v307_v54, %v306_v53  ;;  %v374_v62 = vmax.f32 %v302_v49, 0.0  ;;  %v375_v63 = vmax.f32 %v303_v50, 0.0 }
  0xa4   : > { %364 = vst [vmem:[%s813_s15] sm:$0xff] %v646_v55  ;;  %365 = vst [vmem:[%s813_s15 + $0x8] sm:$0xff] %v647_v56  ;;  %v376_v0 = vmax.f32 %v304_v51, 0.0  ;;  %v377_v1 = vmax.f32 %v305_v52, 0.0  ;;  %v378_v2 = vmax.f32 %v306_v53, 0.0  ;;  %v379_v3 = vmax.f32 %v307_v54, 0.0 }
  0xa5   : > { %366 = vst [vmem:[%s813_s15 + $0x10] sm:$0xff] %v648_v60  ;;  %367 = vst [vmem:[%s813_s15 + $0x18] sm:$0xff] %v649_v61  ;;  %v654_v4 = vpack.c.bf16 %v373_v58, %v372_v57  ;;  %v655_v5 = vpack.c.bf16 %v375_v63, %v374_v62  ;;  %v280_v6 = vmul.f32 %v270_v59, %v252_v29 }
  0xa6   : > { %v281_v7 = vmul.f32 %v270_v59, %v253_v30  ;;  %v656_v8 = vpack.c.bf16 %v377_v1, %v376_v0  ;;  %v657_v9 = vpack.c.bf16 %v379_v3, %v378_v2  ;;  %v282_v10 = vmul.f32 %v270_v59, %v254_v31 }
  0xa7   : > { %v283_v11 = vmul.f32 %v270_v59, %v255_v32  ;;  %436 = vst [vmem:[%s820_s20] sm:$0xff] %v654_v4  ;;  %437 = vst [vmem:[%s820_s20 + $0x8] sm:$0xff] %v655_v5  ;;  %v284_v13 = vmul.f32 %v270_v59, %v256_v34  ;;  %v285_v14 = vmul.f32 %v270_v59, %v257_v35 }
  0xa8   : > { %v286_v15 = vmul.f32 %v270_v59, %v258_v36  ;;  %v287_v16 = vmul.f32 %v270_v59, %v259_v37  ;;  %438 = vst [vmem:[%s820_s20 + $0x10] sm:$0xff] %v656_v8  ;;  %439 = vst [vmem:[%s820_s20 + $0x18] sm:$0xff] %v657_v9  ;;  %v308_v17 = vadd.f32 %v298_v12, %v280_v6 }
  0xa9   : > { %v309_v18 = vadd.f32 %v298_v12, %v281_v7  ;;  %v310_v19 = vadd.f32 %v298_v12, %v282_v10  ;;  %v311_v20 = vadd.f32 %v298_v12, %v283_v11  ;;  %v312_v21 = vadd.f32 %v298_v12, %v284_v13 }
  0xaa   : > { %v313_v22 = vadd.f32 %v298_v12, %v285_v14  ;;  %v314_v23 = vadd.f32 %v298_v12, %v286_v15  ;;  %v315_v24 = vadd.f32 %v298_v12, %v287_v16  ;;  %v380_v27 = vmax.f32 %v308_v17, 0.0 }
  0xab   : > { %v650_v25 = vpack.c.bf16 %v309_v18, %v308_v17  ;;  %v651_v26 = vpack.c.bf16 %v311_v20, %v310_v19  ;;  %v381_v28 = vmax.f32 %v309_v18, 0.0  ;;  %v382_v31 = vmax.f32 %v310_v19, 0.0  ;;  %454 = sbr.rel (!%p772_p5) target bundleno = 183 (0xb7), region = 59  ;;  %v470_v41 = vld [vmem:[%s813_s15] sm:$0xff] (%p772_p5)  ;;  %v472_v42 = vld [vmem:[%s813_s15 + $0x8] sm:$0xff] (%p772_p5) }
  0xac   : > { %v652_v29 = vpack.c.bf16 %v313_v22, %v312_v21  ;;  %v653_v30 = vpack.c.bf16 %v315_v24, %v314_v23  ;;  %v383_v32 = vmax.f32 %v311_v20, 0.0  ;;  %v384_v33 = vmax.f32 %v312_v21, 0.0  ;;  %v474_v43 = vld [vmem:[%s813_s15 + $0x10] sm:$0xff] (%p772_p5)  ;;  %v476_v44 = vld [vmem:[%s813_s15 + $0x18] sm:$0xff] (%p772_p5)  ;;  %471 = vst [vmem:[%s457_s26] sm:$0xff] (%p772_p5), %v470_v41  ;;  %473 = vst [vmem:[%s457_s26 + $0x8] sm:$0xff] (%p772_p5), %v472_v42 }
  0xad   : > { %368 = vst [vmem:[%s813_s15 + $0x20] sm:$0xff] %v650_v25  ;;  %369 = vst [vmem:[%s813_s15 + $0x28] sm:$0xff] %v651_v26  ;;  %v385_v34 = vmax.f32 %v313_v22, 0.0  ;;  %v386_v35 = vmax.f32 %v314_v23, 0.0  ;;  %v387_v36 = vmax.f32 %v315_v24, 0.0  ;;  %v658_v37 = vpack.c.bf16 %v381_v28, %v380_v27 }
  0xae   : > { %370 = vst [vmem:[%s813_s15 + $0x30] sm:$0xff] %v652_v29  ;;  %371 = vst [vmem:[%s813_s15 + $0x38] sm:$0xff] %v653_v30  ;;  %v659_v38 = vpack.c.bf16 %v383_v32, %v382_v31 }
  0xaf   : > { %v660_v39 = vpack.c.bf16 %v385_v34, %v384_v33  ;;  %v661_v40 = vpack.c.bf16 %v387_v36, %v386_v35  ;;  %440 = vst [vmem:[%s820_s20 + $0x20] sm:$0xff] %v658_v37  ;;  %475 = vst [vmem:[%s457_s26 + $0x10] sm:$0xff] (%p772_p5), %v474_v43 }
  0xb0   : > { %441 = vst [vmem:[%s820_s20 + $0x28] sm:$0xff] %v659_v38  ;;  %477 = vst [vmem:[%s457_s26 + $0x18] sm:$0xff] (%p772_p5), %v476_v44 }
  0xb1   : > { %442 = vst [vmem:[%s820_s20 + $0x30] sm:$0xff] %v660_v39  ;;  %443 = vst [vmem:[%s820_s20 + $0x38] sm:$0xff] %v661_v40 }
  0xb4   : > { %v478_v45 = vld [vmem:[%s813_s15 + $0x20] sm:$0xff]  ;;  %v480_v46 = vld [vmem:[%s813_s15 + $0x28] sm:$0xff] }
  0xb5   : > { %479 = vst [vmem:[%s457_s26 + $0x40] sm:$0xff] %v478_v45  ;;  %481 = vst [vmem:[%s457_s26 + $0x48] sm:$0xff] %v480_v46  ;;  %v482_v47 = vld [vmem:[%s813_s15 + $0x30] sm:$0xff]  ;;  %v484_v48 = vld [vmem:[%s813_s15 + $0x38] sm:$0xff] }
  0xb6   : > { %483 = vst [vmem:[%s457_s26 + $0x50] sm:$0xff] %v482_v47  ;;  %485 = vst [vmem:[%s457_s26 + $0x58] sm:$0xff] %v484_v48 }
  0xb7 PF: > { %491 = sbr.rel (!%p772_p5) target bundleno = 191 (0xbf), region = 82  ;;  %s663_s27 = sshll.u32 (%p772_p5), %s757_s18, 5  ;;  %v507_v49 = vld [vmem:[%s820_s20] sm:$0xff] (%p772_p5)  ;;  %v509_v50 = vld [vmem:[%s820_s20 + $0x8] sm:$0xff] (%p772_p5)  ;;  %v511_v51 = vld [vmem:[%s820_s20 + $0x10] sm:$0xff] (%p772_p5) }
  0xb8   : > { %s494_s30 = scalar_lea.vmem (%p772_p5), %s876_s4, %s663_s27  ;;  %v513_v52 = vld [vmem:[%s820_s20 + $0x18] sm:$0xff] (%p772_p5) }
  0xb9   : > { %508 = vst [vmem:[%s494_s30] sm:$0xff] (%p772_p5), %v507_v49  ;;  %510 = vst [vmem:[%s494_s30 + $0x8] sm:$0xff] (%p772_p5), %v509_v50 }
  0xba   : > { %512 = vst [vmem:[%s494_s30 + $0x10] sm:$0xff] (%p772_p5), %v511_v51  ;;  %514 = vst [vmem:[%s494_s30 + $0x18] sm:$0xff] (%p772_p5), %v513_v52 }
  0xbb   : > { %v515_v53 = vld [vmem:[%s820_s20 + $0x20] sm:$0xff] (%p772_p5) }
  0xbc   : > { %v517_v54 = vld [vmem:[%s820_s20 + $0x28] sm:$0xff] (%p772_p5)  ;;  %516 = vst [vmem:[%s494_s30 + $0x40] sm:$0xff] (%p772_p5), %v515_v53 }
  0xbd   : > { %518 = vst [vmem:[%s494_s30 + $0x48] sm:$0xff] (%p772_p5), %v517_v54  ;;  %v519_v55 = vld [vmem:[%s820_s20 + $0x30] sm:$0xff] (%p772_p5)  ;;  %v521_v56 = vld [vmem:[%s820_s20 + $0x38] sm:$0xff] (%p772_p5) }
  0xbe   : > { %520 = vst [vmem:[%s494_s30 + $0x50] sm:$0xff] %v519_v55  ;;  %522 = vst [vmem:[%s494_s30 + $0x58] sm:$0xff] %v521_v56 }
  0xbf PF: > { %p12_p10 = scmp.ge.s32.totalorder %s760_s19, 4   ;;  %s878_s15 = smov %s709_s16 }
  0xc0   : > { %s879_s16 = smov %s770_s22  ;;  %s880_s17 = smov %s760_s19 }
  0xc1   :  { %14 = sbr.rel (!%p12_p10) target bundleno = 2 (0x2), region = 148 }

// kernel: encoder_forward.36
= control target key start
LH: loop header
LB: loop body
LE: loop exit
PB: predicated region body
PF: predicated region fallthrough
CT: control target
= control target key end

     0   :  { %s679_s12 = smov 0   ;;  %s681_s13 = smov 0   ;;  %s797_s0 = inlined_call_operand.vmem [shape: bf16[9,16,512], index: 0, kind: input, shape index: {}]   ;;  %s798_s1 = inlined_call_operand.vmem [shape: bf16[16,512], index: 1, kind: output, shape index: {0}]   ;;  %s799_s2 = inlined_call_operand.vmem [shape: f32[2,16,1], index: 2, kind: output, shape index: {1}]   ;;  %s800_s3 = inlined_call_operand.vmem [shape: f32[2,16,1], index: 3, kind: output, shape index: {2}]  }
   0x1   :  { %s683_s14 = smov 0  }
   0x2 LB: > { %s695_s15 = sadd.s32 4294967295, %s657_s14   ;;  %s698_s16 = sadd.s32 1, %s657_s14   ;;  %s657_s14 = sphi %s683_s14, %s804_s14   ;;  %s653_s13 = sphi %s681_s13, %s803_s13   ;;  %s649_s12 = sphi %s679_s12, %s802_s12  }
   0x3   : > { %s18_s17 = ssub.s32 %s657_s14, %s698_s16  ;;  %s21_s18 = sadd.s32 1, %s653_s13 }
   0x4   : > { %p19_p0 = scmp.eq.s32.totalorder %s18_s17, 0  ;;  %p28_p1 = scmp.ne.s32.totalorder %s653_s13, %s649_s12 }
   0x5   : > { %p29_p2 = scmp.eq.s32.totalorder %s657_s14, 0  ;;  %p58_p3 = scmp.eq.s32.totalorder %s695_s15, 1 }
   0x6   : > { %s708_s19 = scalar_select %p19_p0, %s653_s13, %s21_s18  }
   0x7   : > { %p30_p4 = por %p29_p2, %p28_p1  ;;  %p710_p5 = por %p58_p3, %p28_p1 }
   0x8   : > { %p587_p6 = scmp.ge.s32.totalorder %s657_s14, 2 }
   0xa   : > { %132 = sbr.rel (%p587_p6) target bundleno = 30 (0x1e), region = 16 }
  0x11   : > { %135 = sbr.rel (!%p30_p4) target bundleno = 30 (0x1e), region = 20  ;;  %s137_s21 = sand.u32 (%p30_p4), 1, %s653_s13  }
  0x12   : > { %s603_s22 = sshll.u32 (%p30_p4), %s657_s14, 3  ;;  %s609_s23 = smul.u32 (%p30_p4), 144, %s137_s21 }
  0x13   : > { %s720_s26 = scalar_lea.vmem (%p30_p4), %s797_s0, %s603_s22 }
  0x14   : > { %v204_v0 = vld [vmem:[%s720_s26] sm:$0xff] (%p30_p4)  ;;  %v206_v1 = vld [vmem:[%s720_s26 + $0x10] sm:$0xff] (%p30_p4)  ;;  %s139_s27 = scalar_lea.vmem (%p30_p4), [#allocation2], %s609_s23 }
  0x15   : > { %v208_v2 = vld [vmem:[%s720_s26 + $0x20] sm:$0xff] (%p30_p4)  ;;  %v210_v3 = vld [vmem:[%s720_s26 + $0x30] sm:$0xff] (%p30_p4)  ;;  %205 = vst [vmem:[%s139_s27] sm:$0xff] (%p30_p4), %v204_v0  ;;  %207 = vst [vmem:[%s139_s27 + $0x8] sm:$0xff] (%p30_p4), %v206_v1 }
  0x16   : > { %v212_v4 = vld [vmem:[%s720_s26 + $0x40] sm:$0xff] (%p30_p4)  ;;  %v214_v5 = vld [vmem:[%s720_s26 + $0x50] sm:$0xff] (%p30_p4)  ;;  %209 = vst [vmem:[%s139_s27 + $0x10] sm:$0xff] (%p30_p4), %v208_v2  ;;  %211 = vst [vmem:[%s139_s27 + $0x18] sm:$0xff] (%p30_p4), %v210_v3 }
  0x17   : > { %213 = vst [vmem:[%s139_s27 + $0x20] sm:$0xff] (%p30_p4), %v212_v4  ;;  %215 = vst [vmem:[%s139_s27 + $0x28] sm:$0xff] (%p30_p4), %v214_v5  ;;  %v216_v6 = vld [vmem:[%s720_s26 + $0x60] sm:$0xff] (%p30_p4)  ;;  %v218_v7 = vld [vmem:[%s720_s26 + $0x70] sm:$0xff] (%p30_p4) }
  0x18   : > { %v220_v8 = vld [vmem:[%s720_s26 + $0x80] sm:$0xff]  ;;  %217 = vst [vmem:[%s139_s27 + $0x30] sm:$0xff] %v216_v6  ;;  %219 = vst [vmem:[%s139_s27 + $0x38] sm:$0xff] %v218_v7  ;;  %v222_v9 = vld [vmem:[%s720_s26 + $0x90] sm:$0xff] }
  0x19   : > { %221 = vst [vmem:[%s139_s27 + $0x40] sm:$0xff] %v220_v8  ;;  %v224_v10 = vld [vmem:[%s720_s26 + $0xa0] sm:$0xff]  ;;  %v226_v11 = vld [vmem:[%s720_s26 + $0xb0] sm:$0xff]  ;;  %223 = vst [vmem:[%s139_s27 + $0x48] sm:$0xff] %v222_v9 }
  0x1a   : > { %225 = vst [vmem:[%s139_s27 + $0x50] sm:$0xff] %v224_v10  ;;  %227 = vst [vmem:[%s139_s27 + $0x58] sm:$0xff] %v226_v11  ;;  %v228_v12 = vld [vmem:[%s720_s26 + $0xc0] sm:$0xff]  ;;  %v230_v13 = vld [vmem:[%s720_s26 + $0xd0] sm:$0xff] }
  0x1b   : > { %v232_v14 = vld [vmem:[%s720_s26 + $0xe0] sm:$0xff]  ;;  %229 = vst [vmem:[%s139_s27 + $0x60] sm:$0xff] %v228_v12  ;;  %231 = vst [vmem:[%s139_s27 + $0x68] sm:$0xff] %v230_v13  ;;  %v234_v15 = vld [vmem:[%s720_s26 + $0xf0] sm:$0xff] }
  0x1c   : > { %233 = vst [vmem:[%s139_s27 + $0x70] sm:$0xff] %v232_v14  ;;  %v236_v16 = vld [vmem:[%s720_s26 + $0x100] sm:$0xff]  ;;  %v238_v17 = vld [vmem:[%s720_s26 + $0x110] sm:$0xff]  ;;  %235 = vst [vmem:[%s139_s27 + $0x78] sm:$0xff] %v234_v15 }
  0x1d   : > { %237 = vst [vmem:[%s139_s27 + $0x80] sm:$0xff] %v236_v16  ;;  %239 = vst [vmem:[%s139_s27 + $0x88] sm:$0xff] %v238_v17 }
  0x1e PF: > { %p590_p7 = scmp.ge.s32.totalorder %s657_s14, 1  ;;  %p244_p8 = scmp.lt.s32.totalorder %s657_s14, 3 }
  0x20   : > { %p245_p9 = pnand %p590_p7, %p244_p8 }
  0x21   : > { %s251_s28 = sand.u32 (!%p245_p9), 1, %s649_s12   ;;  %p285_p10 = scmp.lt.s32.totalorder (!%p245_p9), %s695_s15, 1  ;;  %vm401_vm0 = vcmask (!%p245_p9), 7168  }
  0x22   : > { %248 = sbr.rel (%p245_p9) target bundleno = 209 (0xd1), region = 58  ;;  %s591_s4 = sshll.u32 (!%p245_p9), %s251_s28, 4 }
  0x23   : > { %s610_s29 = smul.u32 (!%p245_p9), 144, %s251_s28  ;;  %s767_s5 = scalar_lea.vmem (!%p245_p9), [#allocation3], %s591_s4 }
  0x25   : > { %s745_s30 = scalar_lea.vmem (!%p245_p9), [#allocation2], %s610_s29 }
  0x26   : > { %v295_v18 = vld [vmem:[%s745_s30] sm:$0xff] (!%p245_p9)  ;;  %v297_v19 = vld [vmem:[%s745_s30 + $0x10] sm:$0xff] (!%p245_p9)  ;;  %v296_v33 = vld [vmem:[%s745_s30 + $0x8] sm:$0xff] (!%p245_p9) }
  0x27   : > { %v299_v20 = vld [vmem:[%s745_s30 + $0x20] sm:$0xff] (!%p245_p9)  ;;  %v313_v21 = vunpack.c.l.bf16 (!%p245_p9), %v295_v18  ;;  %v314_v22 = vunpack.c.h.bf16 (!%p245_p9), %v295_v18  ;;  %v317_v23 = vunpack.c.l.bf16 (!%p245_p9), %v297_v19  ;;  %v318_v24 = vunpack.c.h.bf16 (!%p245_p9), %v297_v19  ;;  %v301_v25 = vld [vmem:[%s745_s30 + $0x30] sm:$0xff] (!%p245_p9)  ;;  %v298_v34 = vld [vmem:[%s745_s30 + $0x18] sm:$0xff] (!%p245_p9) }
  0x28   : > { %v321_v26 = vunpack.c.l.bf16 (!%p245_p9), %v299_v20  ;;  %v322_v27 = vunpack.c.h.bf16 (!%p245_p9), %v299_v20  ;;  %v303_v28 = vld [vmem:[%s745_s30 + $0x40] sm:$0xff] (!%p245_p9)  ;;  %v325_v29 = vunpack.c.l.bf16 (!%p245_p9), %v301_v25  ;;  %v326_v30 = vunpack.c.h.bf16 (!%p245_p9), %v301_v25  ;;  %v305_v35 = vld [vmem:[%s745_s30 + $0x50] sm:$0xff] (!%p245_p9)  ;;  %v300_v40 = vld [vmem:[%s745_s30 + $0x28] sm:$0xff] (!%p245_p9) }
  0x29   : > { %v349_v31 = vmax.f32 %v313_v21, %v317_v23  ;;  %v357_v32 = vmax.f32 %v314_v22, %v318_v24  ;;  %v329_v36 = vunpack.c.l.bf16 %v303_v28  ;;  %v330_v37 = vunpack.c.h.bf16 %v303_v28  ;;  %v307_v41 = vld [vmem:[%s745_s30 + $0x60] sm:$0xff]  ;;  %v302_v50 = vld [vmem:[%s745_s30 + $0x38] sm:$0xff]  ;;  %v309_v51 = vld [vmem:[%s745_s30 + $0x70] sm:$0xff]  ;;  %s286_s6 = scalar_select %p285_p10, %s695_s15, 1 }
  0x2a   : > { %v315_v42 = vunpack.c.l.bf16 %v296_v33  ;;  %v316_v43 = vunpack.c.h.bf16 %v296_v33  ;;  %v319_v44 = vunpack.c.l.bf16 %v298_v34  ;;  %v320_v45 = vunpack.c.h.bf16 %v298_v34  ;;  %v304_v58 = vld [vmem:[%s745_s30 + $0x48] sm:$0xff]  ;;  %v311_v59 = vld [vmem:[%s745_s30 + $0x80] sm:$0xff]  ;;  %v306_v4 = vld [vmem:[%s745_s30 + $0x58] sm:$0xff]  ;;  %s608_s17 = sshll.u32 (%p710_p5), %s695_s15, 3 }
  0x2b   : > { %v350_v38 = vmax.f32 %v349_v31, %v321_v26  ;;  %v358_v39 = vmax.f32 %v357_v32, %v322_v27  ;;  %v333_v46 = vunpack.c.l.bf16 %v305_v35  ;;  %v334_v47 = vunpack.c.h.bf16 %v305_v35  ;;  %v308_v13 = vld [vmem:[%s745_s30 + $0x68] sm:$0xff]  ;;  %v310_v20 = vld [vmem:[%s745_s30 + $0x78] sm:$0xff]  ;;  %s604_s7 = sshll.u32 %s286_s6, 4  ;;  %s435_s22 = scalar_lea.vmem (%p710_p5), %s798_s1, %s608_s17 }
  0x2c   : > { %v323_v52 = vunpack.c.l.bf16 %v300_v40  ;;  %v324_v53 = vunpack.c.h.bf16 %v300_v40  ;;  %v337_v54 = vunpack.c.l.bf16 %v307_v41  ;;  %v338_v55 = vunpack.c.h.bf16 %v307_v41  ;;  %v312_v27 = vld [vmem:[%s745_s30 + $0x88] sm:$0xff]  ;;  %s289_s10 = scalar_lea.vmem %s799_s2, %s604_s7  ;;  %s294_s14 = scalar_lea.vmem %s800_s3, %s604_s7 }
  0x2d   : > { %v351_v48 = vmax.f32 %v350_v38, %v325_v29  ;;  %v359_v49 = vmax.f32 %v358_v39, %v326_v30  ;;  %v327_v60 = vunpack.c.l.bf16 %v302_v50  ;;  %v328_v61 = vunpack.c.h.bf16 %v302_v50 }
  0x2e   : > { %v365_v62 = vmax.f32 %v315_v42, %v319_v44  ;;  %v373_v63 = vmax.f32 %v316_v43, %v320_v45  ;;  %v341_v0 = vunpack.c.l.bf16 %v309_v51  ;;  %v342_v1 = vunpack.c.h.bf16 %v309_v51 }
  0x2f   : > { %v352_v56 = vmax.f32 %v351_v48, %v329_v36  ;;  %v360_v57 = vmax.f32 %v359_v49, %v330_v37  ;;  %v331_v5 = vunpack.c.l.bf16 %v304_v58  ;;  %v332_v6 = vunpack.c.h.bf16 %v304_v58 }
  0x30   : > { %v366_v7 = vmax.f32 %v365_v62, %v323_v52  ;;  %v374_v8 = vmax.f32 %v373_v63, %v324_v53  ;;  %v345_v9 = vunpack.c.l.bf16 %v311_v59  ;;  %v346_v10 = vunpack.c.h.bf16 %v311_v59 }
  0x31   : > { %v353_v2 = vmax.f32 %v352_v56, %v333_v46  ;;  %v361_v3 = vmax.f32 %v360_v57, %v334_v47  ;;  %v335_v14 = vunpack.c.l.bf16 %v306_v4  ;;  %v336_v15 = vunpack.c.h.bf16 %v306_v4 }
  0x32   : > { %v367_v16 = vmax.f32 %v366_v7, %v327_v60  ;;  %v375_v17 = vmax.f32 %v374_v8, %v328_v61  ;;  %v339_v21 = vunpack.c.l.bf16 %v308_v13  ;;  %v340_v22 = vunpack.c.h.bf16 %v308_v13 }
  0x33   : > { %v354_v11 = vmax.f32 %v353_v2, %v337_v54  ;;  %v362_v12 = vmax.f32 %v361_v3, %v338_v55  ;;  %v343_v28 = vunpack.c.l.bf16 %v310_v20  ;;  %v344_v29 = vunpack.c.h.bf16 %v310_v20 }
  0x34   : > { %v368_v23 = vmax.f32 %v367_v16, %v331_v5  ;;  %v376_v24 = vmax.f32 %v375_v17, %v332_v6  ;;  %v347_v36 = vunpack.c.l.bf16 %v312_v27  ;;  %v348_v37 = vunpack.c.h.bf16 %v312_v27 }
  0x35   : > { %v355_v18 = vmax.f32 %v354_v11, %v341_v0  ;;  %v363_v19 = vmax.f32 %v362_v12, %v342_v1 }
  0x36   : > { %v369_v30 = vmax.f32 %v368_v23, %v335_v14  ;;  %v377_v31 = vmax.f32 %v376_v24, %v336_v15 }
  0x37   : > { %v356_v25 = vmax.f32 %v355_v18, %v345_v9  ;;  %v364_v26 = vmax.f32 %v363_v19, %v346_v10 }
  0x38   : > { %v370_v38 = vmax.f32 %v369_v30, %v339_v21  ;;  %v378_v39 = vmax.f32 %v377_v31, %v340_v22 }
  0x39   : > { %v404_v32 = vmul.f32 %v356_v25, %v356_v25  ;;  %v405_v33 = vmul.f32 %v364_v26, %v364_v26  ;;  %v606_v34 = vpack.c.bf16 %v364_v26, %v356_v25  ;;  %v395_v35 = vadd.f32 %v364_v26, %v356_v25 }
  0x3a   : > { %v371_v41 = vmax.f32 %v370_v38, %v343_v28  ;;  %v379_v42 = vmax.f32 %v378_v39, %v344_v29 }
  0x3b   : > { %v408_v40 = vadd.f32 %v405_v33, %v404_v32  ;;  %393 = vst [vmem:[%s767_s5] sm:$0xff] %v606_v34  ;;  %396 = vadd.xlane.f32.xlu0 %v395_v35 }
  0x3c   : > { %v372_v43 = vmax.f32 %v371_v41, %v347_v36  ;;  %v380_v44 = vmax.f32 %v379_v42, %v348_v37 }
  0x3d   : > { %409 = vadd.xlane.f32.xlu1 %v408_v40 }
  0x3e   : > { %v607_v45 = vpack.c.bf16 %v380_v44, %v372_v43  ;;  %v406_v46 = vmul.f32 %v372_v43, %v372_v43  ;;  %v407_v47 = vmul.f32 %v380_v44, %v380_v44  ;;  %v398_v48 = vadd.f32 %v380_v44, %v372_v43 }
  0x40   : > { %394 = vst [vmem:[%s767_s5 + $0x8] sm:$0xff] %v607_v45  ;;  %v411_v49 = vadd.f32 %v407_v47, %v406_v46  ;;  %399 = vadd.xlane.f32.xlu0 %v398_v48 }
  0x42   : > { %412 = vadd.xlane.f32.xlu1 %v411_v49  ;;  %v465_v54 = vld [vmem:[%s767_s5] sm:$0xff] (%p710_p5) }
  0x43   : > { %466 = vst [vmem:[%s435_s22] sm:$0xff] (%p710_p5), %v465_v54 }
  0x47   : > { %v467_v55 = vld [vmem:[%s767_s5 + $0x8] sm:$0xff] (%p710_p5) }
  0x48   : > { %468 = vst [vmem:[%s435_s22 + $0x10] sm:$0xff] (%p710_p5), %v467_v55 }
  0xc8   : > { %v397_v50 = vpop.xlane.xlu0 %396 }
  0xc9   : > { %402 = vst.msk [vmem:[%s289_s10] sm:$0xff] %vm401_vm0, %v397_v50 }
  0xca   : > { %v410_v51 = vpop.xlane.xlu1 %409  ;;  %432 = sbr.rel (!%p710_p5) target bundleno = 209 (0xd1), region = 66 }
  0xcb   : > { %414 = vst.msk [vmem:[%s294_s14] sm:$0xff] %vm401_vm0, %v410_v51 }
  0xcd   : > { %v400_v52 = vpop.xlane.xlu0 %399 }
  0xce   : > { %403 = vst.msk [vmem:[%s289_s10 + $0x8] sm:$0xff] %vm401_vm0, %v400_v52 }
  0xcf   : > { %v413_v53 = vpop.xlane.xlu1 %412 }
  0xd0   : > { %415 = vst.msk [vmem:[%s294_s14 + $0x8] sm:$0xff] %vm401_vm0, %v413_v53 }
  0xd1 PF: > { %p11_p11 = scmp.ge.s32.totalorder %s698_s16, 4   ;;  %s802_s12 = smov %s653_s13 }
  0xd2   : > { %s803_s13 = smov %s708_s19  ;;  %s804_s14 = smov %s698_s16 }
  0xd3   :  { %13 = sbr.rel (!%p11_p11) target bundleno = 2 (0x2), region = 159 }

// kernel: encoder_forward.37
= control target key start
LH: loop header
LB: loop body
LE: loop exit
PB: predicated region body
PF: predicated region fallthrough
CT: control target
= control target key end

     0   :  { %s802_s21 = smov 0   ;;  %s804_s22 = smov 0   ;;  %s900_s0 = inlined_call_operand.vmem [shape: bf16[16,512], index: 0, kind: input, shape index: {}]   ;;  %s901_s1 = inlined_call_operand.vmem [shape: bf16[32,16], index: 1, kind: input, shape index: {}]   ;;  %s902_s2 = inlined_call_operand.vmem [shape: f32[16,1], index: 2, kind: input, shape index: {}]   ;;  %s903_s3 = inlined_call_operand.vmem [shape: f32[16,1], index: 3, kind: input, shape index: {}]   ;;  %s904_s4 = inlined_call_operand.vmem [shape: bf16[32,512], index: 4, kind: output, shape index: {0}]   ;;  %s905_s5 = inlined_call_operand.vmem [shape: f32[2,32,1], index: 5, kind: output, shape index: {1}]   ;;  %s906_s6 = inlined_call_operand.vmem [shape: f32[2,32,1], index: 6, kind: output, shape index: {2}]  }
   0x1   :  { %s806_s23 = smov 0  }
   0x2 LB: > { %s815_s24 = sadd.s32 4294967295, %s764_s23   ;;  %s817_s25 = sadd.s32 1, %s764_s23   ;;  %s764_s23 = sphi %s806_s23, %s910_s23   ;;  %s760_s22 = sphi %s804_s22, %s909_s22   ;;  %s756_s21 = sphi %s802_s21, %s908_s21  }
   0x3   : > { %s21_s26 = ssub.s32 %s764_s23, %s817_s25  ;;  %s24_s27 = sadd.s32 1, %s760_s22 }
   0x4   : > { %p22_p0 = scmp.eq.s32.totalorder %s21_s26, 0  ;;  %p31_p1 = scmp.ne.s32.totalorder %s760_s22, %s756_s21 }
   0x5   : > { %p32_p2 = scmp.eq.s32.totalorder %s764_s23, 0  ;;  %p124_p3 = scmp.eq.s32.totalorder %s815_s24, 1 }
   0x6   : > { %s825_s28 = scalar_select %p22_p0, %s760_s22, %s24_s27  }
   0x7   : > { %p33_p4 = por %p32_p2, %p31_p1  ;;  %p827_p5 = por %p124_p3, %p31_p1 }
   0x8   : > { %p679_p6 = scmp.ge.s32.totalorder %s764_s23, 2 }
   0xa   : > { %207 = sbr.rel (%p679_p6) target bundleno = 24 (0x18), region = 28 }
  0x11   : > { %210 = sbr.rel (!%p33_p4) target bundleno = 24 (0x18), region = 32  ;;  %s212_s30 = sand.u32 (%p33_p4), 1, %s760_s22  }
  0x12   : > { %s703_s7 = sshll.u32 (%p33_p4), %s764_s23, 3  ;;  %s680_s8 = sshll.u32 (%p33_p4), %s212_s30, 4 }
  0x13   : > { %s217_s11 = scalar_lea.vmem (%p33_p4), %s900_s0, %s703_s7  ;;  %s214_s12 = scalar_lea.vmem (%p33_p4), [#allocation2], %s680_s8 }
  0x14   : > { %v247_v0 = vld [vmem:[%s217_s11] sm:$0xff] (%p33_p4)  ;;  %v249_v1 = vld [vmem:[%s217_s11 + $0x10] sm:$0xff] (%p33_p4) }
  0x15   : > { %248 = vst [vmem:[%s214_s12] sm:$0xff] (%p33_p4), %v247_v0  ;;  %250 = vst [vmem:[%s214_s12 + $0x8] sm:$0xff] (%p33_p4), %v249_v1 }
  0x18 PF: > { %p683_p7 = scmp.ge.s32.totalorder %s764_s23, 1  ;;  %p255_p8 = scmp.lt.s32.totalorder %s764_s23, 3 }
  0x1a   : > { %p256_p9 = pnand %p683_p7, %p255_p8 }
  0x1b   : > { %v335_v2 = vld [vmem:[%s903_s3] sm:$0xff] (!%p256_p9)  ;;  %v766_v4 = vmov (!%p256_p9), 0   ;;  %v336_v5 = vld [vmem:[%s903_s3 + $0x8] sm:$0xff] (!%p256_p9)  ;;  %s262_s23 = sand.u32 (!%p256_p9), 1, %s756_s21   ;;  %vm371_vm0 = vcmask (!%p256_p9), 130048   ;;  %p302_p10 = scmp.lt.s32.totalorder (!%p256_p9), %s815_s24, 1 }
  0x1c   : > { %259 = sbr.rel (%p256_p9) target bundleno = 547 (0x223), region = 70  ;;  %v319_v3 = vld [vmem:[%s902_s2] sm:$0xff] (!%p256_p9)  ;;  %739 = vset.pattern.permute.xlu1 (!%p256_p9), %v766_v4  ;;  %738 = vset.pattern.permute.xlu0 (!%p256_p9), %v766_v4  ;;  %v320_v6 = vld [vmem:[%s902_s2 + $0x8] sm:$0xff] (!%p256_p9)  ;;  %s684_s26 = sshll.u32 (!%p256_p9), %s262_s23, 4  ;;  %vm471_vm1 = vcmask (!%p256_p9), 7168  }
  0x1d   : > { %339 = vperm.xlu1 (!%p256_p9), %739, %v335_v2   ;;  %323 = vperm.xlu0 (!%p256_p9), %738, %v319_v3   ;;  %s264_s27 = scalar_lea.vmem (!%p256_p9), [#allocation2], %s684_s26  ;;  %v740_v31 = vld [vmem:[%s901_s1] sm:$0xff] (!%p256_p9)   ;;  %v741_v32 = vld [vmem:[%s901_s1 + $0x8] sm:$0xff] (!%p256_p9)   ;;  %s685_s10 = sshll.u32 (!%p256_p9), %s262_s23, 5 }
  0x1e   : > { %410 = vmatprep.mubr.bf16.mxu0 (!%p256_p9), %v766_v4  ;;  %420 = vmatprep.mubr.bf16.mxu1 (!%p256_p9), %v766_v4  ;;  %v313_v7 = vld [vmem:[%s264_s27] sm:$0xff] (!%p256_p9)  ;;  %v314_v10 = vld [vmem:[%s264_s27 + $0x8] sm:$0xff] (!%p256_p9)  ;;  %s858_s21 = scalar_lea.vmem (!%p256_p9), [#allocation3], %s685_s10 }
  0x1f   : > { %v315_v8 = vunpack.c.l.bf16 (!%p256_p9), %v313_v7  ;;  %v316_v9 = vunpack.c.h.bf16 (!%p256_p9), %v313_v7  ;;  %v317_v15 = vunpack.c.l.bf16 (!%p256_p9), %v314_v10  ;;  %v318_v16 = vunpack.c.h.bf16 (!%p256_p9), %v314_v10 }
  0x21   : > { %344 = vperm.xlu1 (!%p256_p9), %739, %v336_v5   ;;  %328 = vperm.xlu0 (!%p256_p9), %738, %v320_v6  }
  0x23   : > { %s303_s11 = scalar_select %p302_p10, %s815_s24, 1 }
  0x24   : > { %s710_s19 = sshll.u32 (%p827_p5), %s815_s24, 3 }
  0x25   : > { %s704_s12 = sshll.u32 %s303_s11, 5  ;;  %s519_s26 = scalar_lea.vmem (%p827_p5), %s904_s4, %s710_s19 }
  0x26   : > { %s306_s15 = scalar_lea.vmem %s905_s5, %s704_s12  ;;  %s311_s18 = scalar_lea.vmem %s906_s6, %s704_s12 }
  0x9c   : > { %v340_v11 = vpop.permute.xlu1 %339  ;;  %v324_v12 = vpop.permute.xlu0 %323 }
  0x9d   : > { %v331_v13 = vmul.f32 %v324_v12, %v315_v8  ;;  %v332_v14 = vmul.f32 %v324_v12, %v316_v9 }
  0x9f   : > { %v347_v18 = vadd.f32 %v340_v11, %v331_v13  ;;  %v348_v19 = vadd.f32 %v340_v11, %v332_v14 }
  0xa0   : > { %v329_v17 = vpop.permute.xlu0 %328  ;;  %v345_v22 = vpop.permute.xlu1 %344 }
  0xa1   : > { %v333_v20 = vmul.f32 %v329_v17, %v317_v15  ;;  %v334_v21 = vmul.f32 %v329_v17, %v318_v16  ;;  %v352_v25 = vmax.f32 %v348_v19, 0.0  ;;  %v351_v27 = vmax.f32 %v347_v18, 0.0 }
  0xa3   : > { %v349_v23 = vadd.f32 %v345_v22, %v333_v20  ;;  %v350_v24 = vadd.f32 %v345_v22, %v334_v21 }
  0xa5   : > { %v354_v26 = vmax.f32 %v350_v24, 0.0  ;;  %v353_v28 = vmax.f32 %v349_v23, 0.0 }
  0xa7   : > { %v356_v29 = vpack.c.bf16 %v354_v26, %v352_v25  ;;  %v355_v30 = vpack.c.bf16 %v353_v28, %v351_v27 }
  0xa9   : > { %378 = vmatprep.subr.bf16.mxu0 %v356_v29  ;;  %711 = vmatprep.subr.bf16.mxu1 %v356_v29 }
  0xaa   : > { %379 = vmatpush1.bf16.msra.mxu0 %v355_v30  ;;  %712 = vmatpush1.bf16.msra.mxu1 %v355_v30 }
  0xad   : > { %692 = vmatmul.mubr.msk.bf16.vlgmr.msra.gmra.mrb[0].mxu0 %vm371_vm0, %v740_v31  ;;  %693 = vmatmul.mubr.msk.bf16.vlgmr.msra.gmra.mrb[0].mxu1 %vm371_vm0, %v741_v32 }
 0x180   : > { %v412_v33 = vpop.f32.mrb[0].mxu0  ;;  %v422_v34 = vpop.f32.mrb[0].mxu1 }
 0x181   : > { %v414_v35 = vpop.f32.mrb[1].mxu0  ;;  %v424_v36 = vpop.f32.mrb[1].mxu1  ;;  %v476_v37 = vmul.f32 %v412_v33, %v412_v33  ;;  %v480_v38 = vmul.f32 %v422_v34, %v422_v34 }
 0x182   : > { %v706_v39 = vpack.c.bf16 %v414_v35, %v412_v33  ;;  %v416_v40 = vpop.f32.mrb[2].mxu0  ;;  %v708_v41 = vpack.c.bf16 %v424_v36, %v422_v34  ;;  %v426_v42 = vpop.f32.mrb[2].mxu1  ;;  %v459_v43 = vadd.f32 %v414_v35, %v412_v33  ;;  %v465_v44 = vadd.f32 %v424_v36, %v422_v34 }
 0x183   : > { %v418_v45 = vpop.f32.mrb[3].mxu0  ;;  %v428_v46 = vpop.f32.mrb[3].mxu1  ;;  %v477_v47 = vmul.f32 %v414_v35, %v414_v35  ;;  %v481_v48 = vmul.f32 %v424_v36, %v424_v36  ;;  %v478_v49 = vmul.f32 %v416_v40, %v416_v40  ;;  %v482_v50 = vmul.f32 %v426_v42, %v426_v42 }
 0x184   : > { %455 = vst [vmem:[%s858_s21] sm:$0xff] %v706_v39  ;;  %457 = vst [vmem:[%s858_s21 + $0x10] sm:$0xff] %v708_v41  ;;  %v707_v51 = vpack.c.bf16 %v418_v45, %v416_v40  ;;  %v479_v52 = vmul.f32 %v418_v45, %v418_v45  ;;  %v709_v53 = vpack.c.bf16 %v428_v46, %v426_v42  ;;  %460 = vadd.xlane.f32.xlu0 %v459_v43 }
 0x185   : > { %v483_v54 = vmul.f32 %v428_v46, %v428_v46  ;;  %v462_v55 = vadd.f32 %v418_v45, %v416_v40  ;;  %v484_v56 = vadd.f32 %v477_v47, %v476_v37  ;;  %v468_v57 = vadd.f32 %v428_v46, %v426_v42 }
 0x186   : > { %v490_v58 = vadd.f32 %v481_v48, %v480_v38  ;;  %456 = vst [vmem:[%s858_s21 + $0x8] sm:$0xff] %v707_v51  ;;  %458 = vst [vmem:[%s858_s21 + $0x18] sm:$0xff] %v709_v53  ;;  %v487_v59 = vadd.f32 %v479_v52, %v478_v49 }
 0x187   : > { %v493_v60 = vadd.f32 %v483_v54, %v482_v50  ;;  %463 = vadd.xlane.f32.xlu1 %v462_v55 }
 0x188   : > { %466 = vadd.xlane.f32.xlu0 %v465_v44 }
 0x18b   : > { %485 = vadd.xlane.f32.xlu1 %v484_v56  ;;  %v553_v5 = vld [vmem:[%s858_s21] sm:$0xff] (%p827_p5)  ;;  %v557_v7 = vld [vmem:[%s858_s21 + $0x10] sm:$0xff] (%p827_p5) }
 0x18c   : > { %469 = vadd.xlane.f32.xlu0 %v468_v57  ;;  %554 = vst [vmem:[%s519_s26] sm:$0xff] (%p827_p5), %v553_v5  ;;  %558 = vst [vmem:[%s519_s26 + $0x20] sm:$0xff] (%p827_p5), %v557_v7 }
 0x18d   : > { %v555_v6 = vld [vmem:[%s858_s21 + $0x8] sm:$0xff] (%p827_p5)  ;;  %v559_v8 = vld [vmem:[%s858_s21 + $0x18] sm:$0xff] (%p827_p5) }
 0x18e   : > { %556 = vst [vmem:[%s519_s26 + $0x10] sm:$0xff] (%p827_p5), %v555_v6  ;;  %560 = vst [vmem:[%s519_s26 + $0x30] sm:$0xff] (%p827_p5), %v559_v8 }
 0x18f   : > { %491 = vadd.xlane.f32.xlu1 %v490_v58 }
 0x190   : > { %488 = vadd.xlane.f32.xlu0 %v487_v59 }
 0x194   : > { %494 = vadd.xlane.f32.xlu0 %v493_v60 }
 0x211   : > { %v461_v61 = vpop.xlane.xlu0 %460 }
 0x212   : > { %472 = vst.msk [vmem:[%s306_s15] sm:$0xff] %vm471_vm1, %v461_v61 }
 0x214   : > { %v464_v62 = vpop.xlane.xlu1 %463 }
 0x215   : > { %473 = vst.msk [vmem:[%s306_s15 + $0x8] sm:$0xff] %vm471_vm1, %v464_v62  ;;  %v467_v63 = vpop.xlane.xlu0 %466 }
 0x216   : > { %474 = vst.msk [vmem:[%s306_s15 + $0x10] sm:$0xff] %vm471_vm1, %v467_v63 }
 0x218   : > { %v486_v0 = vpop.xlane.xlu1 %485 }
 0x219   : > { %496 = vst.msk [vmem:[%s311_s18] sm:$0xff] %vm471_vm1, %v486_v0  ;;  %v470_v1 = vpop.xlane.xlu0 %469 }
 0x21a   : > { %475 = vst.msk [vmem:[%s306_s15 + $0x18] sm:$0xff] %vm471_vm1, %v470_v1 }
 0x21c   : > { %v492_v2 = vpop.xlane.xlu1 %491  ;;  %516 = sbr.rel (!%p827_p5) target bundleno = 547 (0x223), region = 78 }
 0x21d   : > { %498 = vst.msk [vmem:[%s311_s18 + $0x10] sm:$0xff] %vm471_vm1, %v492_v2  ;;  %v489_v3 = vpop.xlane.xlu0 %488 }
 0x21e   : > { %497 = vst.msk [vmem:[%s311_s18 + $0x8] sm:$0xff] %vm471_vm1, %v489_v3 }
 0x221   : > { %v495_v4 = vpop.xlane.xlu0 %494 }
 0x222   : > { %499 = vst.msk [vmem:[%s311_s18 + $0x18] sm:$0xff] %vm471_vm1, %v495_v4 }
 0x223 PF: > { %p14_p11 = scmp.ge.s32.totalorder %s817_s25, 4   ;;  %s908_s21 = smov %s760_s22 }
 0x224   : > { %s909_s22 = smov %s825_s28  ;;  %s910_s23 = smov %s817_s25 }
 0x225   :  { %16 = sbr.rel (!%p14_p11) target bundleno = 2 (0x2), region = 171 }

// kernel: encoder_forward.38
= control target key start
LH: loop header
LB: loop body
LE: loop exit
PB: predicated region body
PF: predicated region fallthrough
CT: control target
= control target key end

     0   :  { %s533_s12 = smov 0   ;;  %s535_s13 = smov 0   ;;  %s621_s0 = inlined_call_operand.vmem [shape: bf16[32,512], index: 0, kind: input, shape index: {}]   ;;  %s622_s1 = inlined_call_operand.vmem [shape: f32[32,1], index: 1, kind: input, shape index: {}]   ;;  %s623_s2 = inlined_call_operand.vmem [shape: f32[32,1], index: 2, kind: input, shape index: {}]   ;;  %s624_s3 = inlined_call_operand.vmem [shape: bf16[32,512], index: 3, kind: output, shape index: {}]  }
   0x1   :  { %s537_s14 = smov 0  }
   0x2 LB: > { %s436_s15 = sadd.s32 4294967295, %s510_s14   ;;  %s550_s16 = sadd.s32 1, %s510_s14   ;;  %s510_s14 = sphi %s537_s14, %s628_s14   ;;  %s506_s13 = sphi %s535_s13, %s627_s13   ;;  %s502_s12 = sphi %s533_s12, %s626_s12  }
   0x3   : > { %s17_s17 = ssub.s32 %s510_s14, %s550_s16  ;;  %s20_s18 = sadd.s32 1, %s506_s13 }
   0x4   : > { %p18_p0 = scmp.eq.s32.totalorder %s17_s17, 0  ;;  %p27_p1 = scmp.ne.s32.totalorder %s506_s13, %s502_s12 }
   0x5   : > { %p28_p2 = scmp.eq.s32.totalorder %s510_s14, 0  ;;  %p99_p3 = scmp.eq.s32.totalorder %s436_s15, 1 }
   0x6   : > { %s561_s19 = scalar_select %p18_p0, %s506_s13, %s20_s18  }
   0x7   : > { %p29_p4 = por %p28_p2, %p27_p1  ;;  %p563_p5 = por %p99_p3, %p27_p1 }
   0x8   : > { %p439_p6 = scmp.ge.s32.totalorder %s510_s14, 2 }
   0xa   : > { %127 = sbr.rel (%p439_p6) target bundleno = 24 (0x18), region = 24 }
  0x11   : > { %130 = sbr.rel (!%p29_p4) target bundleno = 24 (0x18), region = 28  ;;  %s132_s21 = sand.u32 (%p29_p4), 1, %s506_s13  }
  0x12   : > { %s455_s22 = sshll.u32 (%p29_p4), %s510_s14, 3  ;;  %s440_s23 = sshll.u32 (%p29_p4), %s132_s21, 5 }
  0x13   : > { %s137_s26 = scalar_lea.vmem (%p29_p4), %s621_s0, %s455_s22  ;;  %s134_s27 = scalar_lea.vmem (%p29_p4), [#allocation2], %s440_s23 }
  0x14   : > { %v171_v0 = vld [vmem:[%s137_s26] sm:$0xff] (%p29_p4)  ;;  %v173_v1 = vld [vmem:[%s137_s26 + $0x10] sm:$0xff] (%p29_p4) }
  0x15   : > { %v175_v2 = vld [vmem:[%s137_s26 + $0x20] sm:$0xff] (%p29_p4)  ;;  %172 = vst [vmem:[%s134_s27] sm:$0xff] (%p29_p4), %v171_v0  ;;  %174 = vst [vmem:[%s134_s27 + $0x8] sm:$0xff] (%p29_p4), %v173_v1  ;;  %v177_v3 = vld [vmem:[%s137_s26 + $0x30] sm:$0xff] (%p29_p4) }
  0x16   : > { %176 = vst [vmem:[%s134_s27 + $0x10] sm:$0xff] (%p29_p4), %v175_v2  ;;  %178 = vst [vmem:[%s134_s27 + $0x18] sm:$0xff] (%p29_p4), %v177_v3 }
  0x18 PF: > { %p443_p7 = scmp.ge.s32.totalorder %s510_s14, 1  ;;  %p183_p8 = scmp.lt.s32.totalorder %s510_s14, 3 }
  0x1a   : > { %p184_p9 = pnand %p443_p7, %p183_p8 }
  0x1b   : > { %v228_v4 = vld [vmem:[%s622_s1 + $0x10] sm:$0xff] (!%p184_p9)  ;;  %v226_v5 = vld [vmem:[%s622_s1] sm:$0xff] (!%p184_p9)  ;;  %v512_v6 = vmov (!%p184_p9), 0   ;;  %v229_v7 = vld [vmem:[%s622_s1 + $0x18] sm:$0xff] (!%p184_p9)  ;;  %s190_s24 = sand.u32 (!%p184_p9), 1, %s502_s12  }
  0x1c   : > { %187 = sbr.rel (%p184_p9) target bundleno = 185 (0xb9), region = 66  ;;  %487 = vset.pattern.permute.xlu1 (!%p184_p9), %v512_v6  ;;  %486 = vset.pattern.permute.xlu0 (!%p184_p9), %v512_v6  ;;  %v227_v8 = vld [vmem:[%s622_s1 + $0x8] sm:$0xff] (!%p184_p9)  ;;  %v258_v10 = vld [vmem:[%s623_s2] sm:$0xff] (!%p184_p9)  ;;  %v261_v11 = vld [vmem:[%s623_s2 + $0x18] sm:$0xff] (!%p184_p9)  ;;  %s600_s25 = sshll.u32 (!%p184_p9), %s190_s24, 5 }
  0x1d   : > { %242 = vperm.xlu1 (!%p184_p9), %487, %v228_v4   ;;  %232 = vperm.xlu0 (!%p184_p9), %486, %v226_v5   ;;  %v259_v9 = vld [vmem:[%s623_s2 + $0x8] sm:$0xff] (!%p184_p9)  ;;  %v260_v12 = vld [vmem:[%s623_s2 + $0x10] sm:$0xff] (!%p184_p9)  ;;  %s192_s26 = scalar_lea.vmem (!%p184_p9), [#allocation2], %s600_s25  ;;  %s211_s12 = scalar_lea.vmem (!%p184_p9), [#allocation3], %s600_s25 }
  0x1e   : > { %v214_v15 = vld [vmem:[%s192_s26] sm:$0xff] (!%p184_p9)  ;;  %v215_v16 = vld [vmem:[%s192_s26 + $0x8] sm:$0xff] (!%p184_p9)  ;;  %v217_v19 = vld [vmem:[%s192_s26 + $0x18] sm:$0xff] (!%p184_p9) }
  0x1f   : > { %v218_v17 = vunpack.c.l.bf16 (!%p184_p9), %v214_v15  ;;  %v219_v18 = vunpack.c.h.bf16 (!%p184_p9), %v214_v15  ;;  %v220_v20 = vunpack.c.l.bf16 (!%p184_p9), %v215_v16  ;;  %v221_v21 = vunpack.c.h.bf16 (!%p184_p9), %v215_v16  ;;  %v216_v24 = vld [vmem:[%s192_s26 + $0x10] sm:$0xff] (!%p184_p9) }
  0x20   : > { %v224_v25 = vunpack.c.l.bf16 (!%p184_p9), %v217_v19  ;;  %v225_v26 = vunpack.c.h.bf16 (!%p184_p9), %v217_v19  ;;  %v222_v31 = vunpack.c.l.bf16 (!%p184_p9), %v216_v24  ;;  %v223_v32 = vunpack.c.h.bf16 (!%p184_p9), %v216_v24 }
  0x21   : > { %247 = vperm.xlu1 (!%p184_p9), %487, %v229_v7   ;;  %237 = vperm.xlu0 (!%p184_p9), %486, %v227_v8  }
  0x23   : > { %s460_s27 = sshll.u32 (%p563_p5), %s436_s15, 3 }
  0x24   : > { %s335_s30 = scalar_lea.vmem (%p563_p5), %s624_s3, %s460_s27 }
  0x25   : > { %269 = vperm.xlu1 %487, %v259_v9   ;;  %264 = vperm.xlu0 %486, %v258_v10  }
  0x29   : > { %279 = vperm.xlu1 %487, %v261_v11   ;;  %274 = vperm.xlu0 %486, %v260_v12  }
  0x9c   : > { %v243_v13 = vpop.permute.xlu1 %242  ;;  %v233_v14 = vpop.permute.xlu0 %232 }
  0x9d   : > { %v250_v27 = vmul.f32 %v233_v14, %v218_v17  ;;  %v251_v28 = vmul.f32 %v233_v14, %v219_v18  ;;  %v254_v45 = vmul.f32 %v243_v13, %v222_v31  ;;  %v255_v46 = vmul.f32 %v243_v13, %v223_v32 }
  0xa0   : > { %v248_v22 = vpop.permute.xlu1 %247  ;;  %v238_v23 = vpop.permute.xlu0 %237 }
  0xa1   : > { %v252_v29 = vmul.f32 %v238_v23, %v220_v20  ;;  %v253_v30 = vmul.f32 %v238_v23, %v221_v21  ;;  %v256_v39 = vmul.f32 %v248_v22, %v224_v25  ;;  %v257_v40 = vmul.f32 %v248_v22, %v225_v26 }
  0xa4   : > { %v270_v33 = vpop.permute.xlu1 %269  ;;  %v265_v34 = vpop.permute.xlu0 %264 }
  0xa5   : > { %v284_v35 = vadd.f32 %v270_v33, %v252_v29  ;;  %v285_v36 = vadd.f32 %v270_v33, %v253_v30  ;;  %v282_v37 = vadd.f32 %v265_v34, %v250_v27  ;;  %v283_v38 = vadd.f32 %v265_v34, %v251_v28 }
  0xa7   : > { %v292_v41 = vmax.f32 %v284_v35, 0.0  ;;  %v293_v42 = vmax.f32 %v285_v36, 0.0  ;;  %v290_v43 = vmax.f32 %v282_v37, 0.0  ;;  %v291_v44 = vmax.f32 %v283_v38, 0.0 }
  0xa8   : > { %v280_v47 = vpop.permute.xlu1 %279  ;;  %v275_v48 = vpop.permute.xlu0 %274 }
  0xa9   : > { %v457_v49 = vpack.c.bf16 %v293_v42, %v292_v41  ;;  %v456_v50 = vpack.c.bf16 %v291_v44, %v290_v43  ;;  %v288_v51 = vadd.f32 %v280_v47, %v256_v39  ;;  %v289_v52 = vadd.f32 %v280_v47, %v257_v40 }
  0xaa   : > { %v286_v53 = vadd.f32 %v275_v48, %v254_v45  ;;  %v287_v54 = vadd.f32 %v275_v48, %v255_v46  ;;  %332 = sbr.rel (!%p563_p5) target bundleno = 185 (0xb9), region = 74 }
  0xab   : > { %323 = vst [vmem:[%s211_s12 + $0x8] sm:$0xff] %v457_v49  ;;  %322 = vst [vmem:[%s211_s12] sm:$0xff] %v456_v50  ;;  %v296_v55 = vmax.f32 %v288_v51, 0.0  ;;  %v297_v56 = vmax.f32 %v289_v52, 0.0 }
  0xac   : > { %v294_v57 = vmax.f32 %v286_v53, 0.0  ;;  %v295_v58 = vmax.f32 %v287_v54, 0.0 }
  0xad   : > { %v459_v59 = vpack.c.bf16 %v297_v56, %v296_v55 }
  0xae   : > { %v458_v60 = vpack.c.bf16 %v295_v58, %v294_v57 }
  0xaf   : > { %325 = vst [vmem:[%s211_s12 + $0x18] sm:$0xff] %v459_v59 }
  0xb0   : > { %324 = vst [vmem:[%s211_s12 + $0x10] sm:$0xff] %v458_v60 }
  0xb2   : > { %v369_v61 = vld [vmem:[%s211_s12] sm:$0xff]  ;;  %v371_v62 = vld [vmem:[%s211_s12 + $0x8] sm:$0xff] }
  0xb3   : > { %370 = vst [vmem:[%s335_s30] sm:$0xff] %v369_v61  ;;  %372 = vst [vmem:[%s335_s30 + $0x10] sm:$0xff] %v371_v62 }
  0xb6   : > { %v375_v0 = vld [vmem:[%s211_s12 + $0x18] sm:$0xff] }
  0xb7   : > { %v373_v63 = vld [vmem:[%s211_s12 + $0x10] sm:$0xff]  ;;  %376 = vst [vmem:[%s335_s30 + $0x30] sm:$0xff] %v375_v0 }
  0xb8   : > { %374 = vst [vmem:[%s335_s30 + $0x20] sm:$0xff] %v373_v63 }
  0xb9 PF: > { %p10_p10 = scmp.ge.s32.totalorder %s550_s16, 4   ;;  %s626_s12 = smov %s506_s13 }
  0xba   : > { %s627_s13 = smov %s561_s19  ;;  %s628_s14 = smov %s550_s16 }
  0xbb   :  { %12 = sbr.rel (!%p10_p10) target bundleno = 2 (0x2), region = 143 }

// kernel: encoder_forward.39
= control target key start
LH: loop header
LB: loop body
LE: loop exit
PB: predicated region body
PF: predicated region fallthrough
CT: control target
= control target key end

     0   :  { %s1047_s15 = smov 0   ;;  %s1049_s16 = smov 0   ;;  %s1234_s0 = inlined_call_operand.vmem [shape: bf16[288,512], index: 0, kind: input, shape index: {}]   ;;  %s1235_s1 = inlined_call_operand.vmem [shape: bf16[8,288], index: 1, kind: input, shape index: {}]   ;;  %s1236_s2 = inlined_call_operand.vmem [shape: bf16[8,512], index: 2, kind: output, shape index: {0}]   ;;  %s1237_s3 = inlined_call_operand.vmem [shape: f32[2,8,1], index: 3, kind: output, shape index: {1}]   ;;  %s1238_s4 = inlined_call_operand.vmem [shape: f32[2,8,1], index: 4, kind: output, shape index: {2}]  }
   0x1   :  { %s1051_s17 = smov 0  }
   0x2 LB: > { %s1063_s18 = sadd.s32 4294967295, %s1019_s17   ;;  %s1066_s19 = sadd.s32 1, %s1019_s17   ;;  %s1019_s17 = sphi %s1051_s17, %s1241_s17   ;;  %s1015_s16 = sphi %s1049_s16, %s1240_s16   ;;  %s1011_s15 = sphi %s1047_s15, %s1239_s15  }
   0x3   : > { %s19_s20 = ssub.s32 %s1019_s17, %s1066_s19  ;;  %s22_s21 = sadd.s32 1, %s1015_s16 }
   0x4   : > { %p20_p0 = scmp.eq.s32.totalorder %s19_s20, 0  ;;  %p29_p1 = scmp.ne.s32.totalorder %s1015_s16, %s1011_s15 }
   0x5   : > { %p30_p2 = scmp.eq.s32.totalorder %s1019_s17, 0  ;;  %p858_p4 = scmp.ge.s32.totalorder %s1019_s17, 2 }
   0x6   : > { %s1075_s22 = scalar_select %p20_p0, %s1015_s16, %s22_s21  }
   0x7   : > { %p31_p3 = por %p30_p2, %p29_p1  ;;  %157 = sbr.rel (%p858_p4) target bundleno = 36 (0x24), region = 20 }
   0xe   : > { %160 = sbr.rel (!%p31_p3) target bundleno = 36 (0x24), region = 24  ;;  %s162_s23 = sand.u32 (%p31_p3), 1, %s1015_s16  }
   0xf   : > { %s909_s24 = sshll.u32 (%p31_p3), %s1019_s17, 3  ;;  %s913_s25 = smul.u32 (%p31_p3), 288, %s162_s23 }
  0x10   : > { %s1083_s28 = scalar_lea.vmem (%p31_p3), %s1234_s0, %s909_s24 }
  0x11   : > { %v265_v0 = vld [vmem:[%s1083_s28] sm:$0xff] (%p31_p3)  ;;  %v267_v1 = vld [vmem:[%s1083_s28 + $0x10] sm:$0xff] (%p31_p3)  ;;  %s1091_s29 = scalar_lea.vmem (%p31_p3), [#allocation2], %s913_s25 }
  0x12   : > { %v269_v2 = vld [vmem:[%s1083_s28 + $0x20] sm:$0xff] (%p31_p3)  ;;  %v271_v3 = vld [vmem:[%s1083_s28 + $0x30] sm:$0xff] (%p31_p3)  ;;  %266 = vst [vmem:[%s1091_s29] sm:$0xff] (%p31_p3), %v265_v0  ;;  %268 = vst [vmem:[%s1091_s29 + $0x8] sm:$0xff] (%p31_p3), %v267_v1 }
  0x13   : > { %v273_v4 = vld [vmem:[%s1083_s28 + $0x40] sm:$0xff] (%p31_p3)  ;;  %v275_v5 = vld [vmem:[%s1083_s28 + $0x50] sm:$0xff] (%p31_p3)  ;;  %270 = vst [vmem:[%s1091_s29 + $0x10] sm:$0xff] (%p31_p3), %v269_v2  ;;  %272 = vst [vmem:[%s1091_s29 + $0x18] sm:$0xff] (%p31_p3), %v271_v3 }
  0x14   : > { %274 = vst [vmem:[%s1091_s29 + $0x20] sm:$0xff] (%p31_p3), %v273_v4  ;;  %276 = vst [vmem:[%s1091_s29 + $0x28] sm:$0xff] (%p31_p3), %v275_v5  ;;  %v277_v6 = vld [vmem:[%s1083_s28 + $0x60] sm:$0xff] (%p31_p3)  ;;  %v279_v7 = vld [vmem:[%s1083_s28 + $0x70] sm:$0xff] (%p31_p3) }
  0x15   : > { %v281_v8 = vld [vmem:[%s1083_s28 + $0x80] sm:$0xff]  ;;  %278 = vst [vmem:[%s1091_s29 + $0x30] sm:$0xff] %v277_v6  ;;  %280 = vst [vmem:[%s1091_s29 + $0x38] sm:$0xff] %v279_v7  ;;  %v283_v9 = vld [vmem:[%s1083_s28 + $0x90] sm:$0xff] }
  0x16   : > { %282 = vst [vmem:[%s1091_s29 + $0x40] sm:$0xff] %v281_v8  ;;  %v285_v10 = vld [vmem:[%s1083_s28 + $0xa0] sm:$0xff]  ;;  %v287_v11 = vld [vmem:[%s1083_s28 + $0xb0] sm:$0xff]  ;;  %284 = vst [vmem:[%s1091_s29 + $0x48] sm:$0xff] %v283_v9 }
  0x17   : > { %286 = vst [vmem:[%s1091_s29 + $0x50] sm:$0xff] %v285_v10  ;;  %288 = vst [vmem:[%s1091_s29 + $0x58] sm:$0xff] %v287_v11  ;;  %v289_v12 = vld [vmem:[%s1083_s28 + $0xc0] sm:$0xff]  ;;  %v291_v13 = vld [vmem:[%s1083_s28 + $0xd0] sm:$0xff] }
  0x18   : > { %v293_v14 = vld [vmem:[%s1083_s28 + $0xe0] sm:$0xff]  ;;  %290 = vst [vmem:[%s1091_s29 + $0x60] sm:$0xff] %v289_v12  ;;  %292 = vst [vmem:[%s1091_s29 + $0x68] sm:$0xff] %v291_v13  ;;  %v295_v15 = vld [vmem:[%s1083_s28 + $0xf0] sm:$0xff] }
  0x19   : > { %294 = vst [vmem:[%s1091_s29 + $0x70] sm:$0xff] %v293_v14  ;;  %v297_v16 = vld [vmem:[%s1083_s28 + $0x100] sm:$0xff]  ;;  %v299_v17 = vld [vmem:[%s1083_s28 + $0x110] sm:$0xff]  ;;  %296 = vst [vmem:[%s1091_s29 + $0x78] sm:$0xff] %v295_v15 }
  0x1a   : > { %298 = vst [vmem:[%s1091_s29 + $0x80] sm:$0xff] %v297_v16  ;;  %300 = vst [vmem:[%s1091_s29 + $0x88] sm:$0xff] %v299_v17  ;;  %v301_v18 = vld [vmem:[%s1083_s28 + $0x120] sm:$0xff]  ;;  %v303_v19 = vld [vmem:[%s1083_s28 + $0x130] sm:$0xff] }
  0x1b   : > { %v305_v20 = vld [vmem:[%s1083_s28 + $0x140] sm:$0xff]  ;;  %302 = vst [vmem:[%s1091_s29 + $0x90] sm:$0xff] %v301_v18  ;;  %304 = vst [vmem:[%s1091_s29 + $0x98] sm:$0xff] %v303_v19  ;;  %v307_v21 = vld [vmem:[%s1083_s28 + $0x150] sm:$0xff] }
  0x1c   : > { %306 = vst [vmem:[%s1091_s29 + $0xa0] sm:$0xff] %v305_v20  ;;  %v309_v22 = vld [vmem:[%s1083_s28 + $0x160] sm:$0xff]  ;;  %v311_v23 = vld [vmem:[%s1083_s28 + $0x170] sm:$0xff]  ;;  %308 = vst [vmem:[%s1091_s29 + $0xa8] sm:$0xff] %v307_v21 }
  0x1d   : > { %310 = vst [vmem:[%s1091_s29 + $0xb0] sm:$0xff] %v309_v22  ;;  %312 = vst [vmem:[%s1091_s29 + $0xb8] sm:$0xff] %v311_v23  ;;  %v313_v24 = vld [vmem:[%s1083_s28 + $0x180] sm:$0xff]  ;;  %v315_v25 = vld [vmem:[%s1083_s28 + $0x190] sm:$0xff] }
  0x1e   : > { %v317_v26 = vld [vmem:[%s1083_s28 + $0x1a0] sm:$0xff]  ;;  %314 = vst [vmem:[%s1091_s29 + $0xc0] sm:$0xff] %v313_v24  ;;  %316 = vst [vmem:[%s1091_s29 + $0xc8] sm:$0xff] %v315_v25  ;;  %v319_v27 = vld [vmem:[%s1083_s28 + $0x1b0] sm:$0xff] }
  0x1f   : > { %318 = vst [vmem:[%s1091_s29 + $0xd0] sm:$0xff] %v317_v26  ;;  %v321_v28 = vld [vmem:[%s1083_s28 + $0x1c0] sm:$0xff]  ;;  %v323_v29 = vld [vmem:[%s1083_s28 + $0x1d0] sm:$0xff]  ;;  %320 = vst [vmem:[%s1091_s29 + $0xd8] sm:$0xff] %v319_v27 }
  0x20   : > { %322 = vst [vmem:[%s1091_s29 + $0xe0] sm:$0xff] %v321_v28  ;;  %324 = vst [vmem:[%s1091_s29 + $0xe8] sm:$0xff] %v323_v29  ;;  %v325_v30 = vld [vmem:[%s1083_s28 + $0x1e0] sm:$0xff]  ;;  %v327_v31 = vld [vmem:[%s1083_s28 + $0x1f0] sm:$0xff] }
  0x21   : > { %v329_v32 = vld [vmem:[%s1083_s28 + $0x200] sm:$0xff]  ;;  %326 = vst [vmem:[%s1091_s29 + $0xf0] sm:$0xff] %v325_v30  ;;  %328 = vst [vmem:[%s1091_s29 + $0xf8] sm:$0xff] %v327_v31  ;;  %v331_v33 = vld [vmem:[%s1083_s28 + $0x210] sm:$0xff] }
  0x22   : > { %330 = vst [vmem:[%s1091_s29 + $0x100] sm:$0xff] %v329_v32  ;;  %v333_v34 = vld [vmem:[%s1083_s28 + $0x220] sm:$0xff]  ;;  %v335_v35 = vld [vmem:[%s1083_s28 + $0x230] sm:$0xff]  ;;  %332 = vst [vmem:[%s1091_s29 + $0x108] sm:$0xff] %v331_v33 }
  0x23   : > { %334 = vst [vmem:[%s1091_s29 + $0x110] sm:$0xff] %v333_v34  ;;  %336 = vst [vmem:[%s1091_s29 + $0x118] sm:$0xff] %v335_v35 }
  0x24 PF: > { %p861_p5 = scmp.ge.s32.totalorder %s1019_s17, 1  ;;  %p341_p6 = scmp.lt.s32.totalorder %s1019_s17, 3 }
  0x26   : > { %p342_p7 = pnand %p861_p5, %p341_p6 }
  0x27   : > { %s348_s30 = sand.u32 (!%p342_p7), 1, %s1011_s15   ;;  %v1021_v36 = vmov (!%p342_p7), 0   ;;  %v1165_v37 = vld [vmem:[%s1235_s1] sm:$0xff] (!%p342_p7)  ;;  %v994_v58 = vld [vmem:[%s1235_s1 + $0x8] ss:$0 sps:$4 sm:$0xff] (!%p342_p7)   ;;  %vm625_vm0 = vcmask (!%p342_p7), 261120  }
  0x28   : > { %345 = sbr.rel (%p342_p7) target bundleno = 473 (0x1d9), region = 62  ;;  %702 = vmatprep.mubr.bf16.mxu0 (!%p342_p7), %v1021_v36  ;;  %v867_v38 = vcombine.high (!%p342_p7), %v1165_v37, %v1165_v37  ;;  %v866_v12 = vcombine.low (!%p342_p7), %v1165_v37, %v1165_v37  ;;  %s862_s11 = sshll.u32 (!%p342_p7), %s1063_s18, 1  ;;  %vm723_vm1 = vcmask (!%p342_p7), 7168  }
  0x29   : > { %s914_s5 = smul.u32 (!%p342_p7), 288, %s348_s30  ;;  %p383_p8 = scmp.lt.s32.totalorder (!%p342_p7), %s862_s11, 3 }
  0x2a   : > { %661 = vmatprep.mubr.bf16.mxu1 (!%p342_p7), %v867_v38  ;;  %p388_p9 = scmp.lt.s32.totalorder (!%p342_p7), %s1063_s18, 1 }
  0x2b   : > { %s1169_s8 = scalar_lea.vmem (!%p342_p7), [#allocation2], %s914_s5 }
  0x2c   : > { %v940_v39 = vld [vmem:[%s1169_s8 + $0x4] ss:$8 sps:$4 sm:$0xff] (!%p342_p7)   ;;  %v942_v40 = vld [vmem:[%s1169_s8] ss:$8 sps:$4 sm:$0xff] (!%p342_p7)   ;;  %v943_v41 = vld [vmem:[%s1169_s8 + $0x14] ss:$8 sps:$4 sm:$0xff] (!%p342_p7)  }
  0x2d   : > { %629 = vmatprep.subr.bf16.mxu1 (!%p342_p7), %v940_v39  ;;  %v945_v42 = vld [vmem:[%s1169_s8 + $0x10] ss:$8 sps:$4 sm:$0xff] (!%p342_p7)   ;;  %v946_v43 = vld [vmem:[%s1169_s8 + $0x24] ss:$8 sps:$4 sm:$0xff] (!%p342_p7)   ;;  %v948_v44 = vld [vmem:[%s1169_s8 + $0x20] ss:$8 sps:$4 sm:$0xff] (!%p342_p7)  }
  0x2e   : > { %630 = vmatpush1.bf16.msra.mxu1 (!%p342_p7), %v942_v40  ;;  %v949_v45 = vld [vmem:[%s1169_s8 + $0x34] ss:$8 sps:$4 sm:$0xff] (!%p342_p7)   ;;  %v951_v46 = vld [vmem:[%s1169_s8 + $0x30] ss:$8 sps:$4 sm:$0xff] (!%p342_p7)   ;;  %v952_v47 = vld [vmem:[%s1169_s8 + $0x44] ss:$8 sps:$4 sm:$0xff] (!%p342_p7)  }
  0x2f   : > { %631 = vmatprep.subr.bf16.mxu1 %v943_v41  ;;  %v954_v48 = vld [vmem:[%s1169_s8 + $0x40] ss:$8 sps:$4 sm:$0xff]   ;;  %v955_v49 = vld [vmem:[%s1169_s8 + $0x54] ss:$8 sps:$4 sm:$0xff]   ;;  %v957_v50 = vld [vmem:[%s1169_s8 + $0x50] ss:$8 sps:$4 sm:$0xff]  }
  0x30   : > { %v982_v51 = vld [vmem:[%s1169_s8 + $0x104] ss:$8 sps:$4 sm:$0xff]   ;;  %v984_v52 = vld [vmem:[%s1169_s8 + $0x100] ss:$8 sps:$4 sm:$0xff]   ;;  %v988_v54 = vld [vmem:[%s1169_s8 + $0x114] ss:$8 sps:$4 sm:$0xff]  }
  0x31   : > { %v958_v53 = vld [vmem:[%s1169_s8 + $0x64] ss:$8 sps:$4 sm:$0xff]   ;;  %670 = vmatprep.subr.bf16.mxu0 %v982_v51  ;;  %v990_v55 = vld [vmem:[%s1169_s8 + $0x110] ss:$8 sps:$4 sm:$0xff]   ;;  %v960_v56 = vld [vmem:[%s1169_s8 + $0x60] ss:$8 sps:$4 sm:$0xff]  }
  0x32   : > { %632 = vmatpush1.bf16.msra.mxu1 %v945_v42  ;;  %671 = vmatpush1.bf16.msra.mxu0 %v984_v52  ;;  %v961_v57 = vld [vmem:[%s1169_s8 + $0x74] ss:$8 sps:$4 sm:$0xff]   ;;  %v963_v59 = vld [vmem:[%s1169_s8 + $0x70] ss:$8 sps:$4 sm:$0xff]   ;;  %v964_v60 = vld [vmem:[%s1169_s8 + $0x84] ss:$8 sps:$4 sm:$0xff]  }
  0x33   : > { %633 = vmatprep.subr.bf16.mxu1 %v946_v43  ;;  %672 = vmatprep.subr.bf16.mxu0 %v988_v54  ;;  %v966_v61 = vld [vmem:[%s1169_s8 + $0x80] ss:$8 sps:$4 sm:$0xff]   ;;  %v967_v62 = vld [vmem:[%s1169_s8 + $0x94] ss:$8 sps:$4 sm:$0xff]   ;;  %v969_v63 = vld [vmem:[%s1169_s8 + $0x90] ss:$8 sps:$4 sm:$0xff]  }
  0x34   : > { %v970_v0 = vld [vmem:[%s1169_s8 + $0xa4] ss:$8 sps:$4 sm:$0xff]   ;;  %v972_v1 = vld [vmem:[%s1169_s8 + $0xa0] ss:$8 sps:$4 sm:$0xff]   ;;  %v973_v2 = vld [vmem:[%s1169_s8 + $0xb4] ss:$8 sps:$4 sm:$0xff]  }
  0x35   : > { %v975_v3 = vld [vmem:[%s1169_s8 + $0xb0] ss:$8 sps:$4 sm:$0xff]   ;;  %v976_v4 = vld [vmem:[%s1169_s8 + $0xc4] ss:$8 sps:$4 sm:$0xff]   ;;  %v978_v5 = vld [vmem:[%s1169_s8 + $0xc0] ss:$8 sps:$4 sm:$0xff]  }
  0x36   : > { %634 = vmatpush1.bf16.msra.mxu1 %v948_v44  ;;  %673 = vmatpush1.bf16.msra.mxu0 %v990_v55  ;;  %v979_v6 = vld [vmem:[%s1169_s8 + $0xd4] ss:$8 sps:$4 sm:$0xff]   ;;  %v981_v7 = vld [vmem:[%s1169_s8 + $0xd0] ss:$8 sps:$4 sm:$0xff]   ;;  %v985_v8 = vld [vmem:[%s1169_s8 + $0xe4] ss:$8 sps:$4 sm:$0xff]  }
  0x37   : > { %635 = vmatprep.subr.bf16.mxu1 %v949_v45  ;;  %v987_v9 = vld [vmem:[%s1169_s8 + $0xe0] ss:$8 sps:$4 sm:$0xff]   ;;  %v991_v10 = vld [vmem:[%s1169_s8 + $0xf4] ss:$8 sps:$4 sm:$0xff]   ;;  %v993_v11 = vld [vmem:[%s1169_s8 + $0xf0] ss:$8 sps:$4 sm:$0xff]  }
  0x38   : > { %s1243_s11 = smov (!%p383_p8, %s862_s11), 3  ;;  %s1245_s18 = smov (!%p388_p9, %s1063_s18), 1 }
  0x39   : > { %905 = vmatmul.mubr.msk.bf16.vlgmr.msra.gmra.mrb[0].mxu0 %vm625_vm0, %v994_v58  ;;  %s863_s12 = sshll.u32 %s1243_s11, 2  ;;  %s864_s17 = sshll.u32 %s1245_s18, 3 }
  0x3a   : > { %636 = vmatpush1.bf16.msra.mxu1 %v951_v46  ;;  %s386_s15 = scalar_lea.vmem %s1236_s2, %s863_s12  ;;  %s391_s23 = scalar_lea.vmem %s1237_s3, %s864_s17 }
  0x3b   : > { %637 = vmatprep.subr.bf16.mxu1 %v952_v47  ;;  %s395_s26 = scalar_lea.vmem %s1238_s4, %s864_s17 }
  0x3e   : > { %638 = vmatpush1.bf16.msra.mxu1 %v954_v48 }
  0x3f   : > { %639 = vmatprep.subr.bf16.mxu1 %v955_v49 }
  0x42   : > { %640 = vmatpush1.bf16.msra.mxu1 %v957_v50 }
  0x43   : > { %641 = vmatprep.subr.bf16.mxu1 %v958_v53 }
  0x46   : > { %642 = vmatpush1.bf16.msra.mxu1 %v960_v56 }
  0x47   : > { %643 = vmatprep.subr.bf16.mxu1 %v961_v57 }
  0x4a   : > { %644 = vmatpush1.bf16.msra.mxu1 %v963_v59 }
  0x4b   : > { %645 = vmatprep.subr.bf16.mxu1 %v964_v60 }
  0x4e   : > { %646 = vmatpush1.bf16.msra.mxu1 %v966_v61 }
  0x4f   : > { %647 = vmatprep.subr.bf16.mxu1 %v967_v62 }
  0x52   : > { %648 = vmatpush1.bf16.msra.mxu1 %v969_v63 }
  0x53   : > { %649 = vmatprep.subr.bf16.mxu1 %v970_v0 }
  0x56   : > { %650 = vmatpush1.bf16.msra.mxu1 %v972_v1 }
  0x57   : > { %651 = vmatprep.subr.bf16.mxu1 %v973_v2 }
  0x5a   : > { %652 = vmatpush1.bf16.msra.mxu1 %v975_v3 }
  0x5b   : > { %653 = vmatprep.subr.bf16.mxu1 %v976_v4 }
  0x5e   : > { %654 = vmatpush1.bf16.msra.mxu1 %v978_v5 }
  0x5f   : > { %655 = vmatprep.subr.bf16.mxu1 %v979_v6 }
  0x62   : > { %656 = vmatpush1.bf16.msra.mxu1 %v981_v7 }
  0x63   : > { %657 = vmatprep.subr.bf16.mxu1 %v985_v8 }
  0x66   : > { %658 = vmatpush1.bf16.msra.mxu1 %v987_v9 }
  0x67   : > { %659 = vmatprep.subr.bf16.mxu1 %v991_v10 }
  0x6a   : > { %660 = vmatpush1.bf16.msra.mxu1 %v993_v11 }
  0x6d   : > { %662 = vmatmul.mubr.bf16.vlgmr.msra.gmra.mrb[0].mxu1 %v866_v12 }
 0x10c   : > { %v704_v13 = vpop.f32.mrb[0].mxu0 }
 0x10d   : > { %v706_v14 = vpop.f32.mrb[1].mxu0 }
 0x10e   : > { %v708_v15 = vpop.f32.mrb[2].mxu0 }
 0x10f   : > { %v709_v16 = vpop.f32.mrb[3].mxu0 }
 0x140   : > { %v663_v17 = vpop.f32.mrb[0].mxu1 }
 0x141   : > { %v705_v18 = vadd.f32 %v704_v13, %v663_v17  ;;  %v665_v19 = vpop.f32.mrb[1].mxu1 }
 0x142   : > { %v707_v20 = vadd.f32 %v706_v14, %v665_v19  ;;  %v667_v21 = vpop.f32.mrb[2].mxu1 }
 0x143   : > { %v668_v22 = vpop.f32.mrb[3].mxu1  ;;  %v725_v23 = vmul.f32 %v705_v18, %v705_v18 }
 0x144   : > { %v910_v24 = vpack.c.bf16 %v707_v20, %v705_v18  ;;  %v720_v25 = vadd.f32 %v707_v20, %v705_v18  ;;  %v726_v26 = vmul.f32 %v707_v20, %v707_v20 }
 0x146   : > { %719 = vst [vmem:[%s386_s15] sm:$0xff] %v910_v24  ;;  %721 = vadd.xlane.f32.xlu0 %v720_v25  ;;  %v727_v27 = vadd.f32 %v726_v26, %v725_v23 }
 0x14a   : > { %728 = vadd.xlane.f32.xlu0 %v727_v27 }
 0x1d3   : > { %v722_v28 = vpop.xlane.xlu0 %721 }
 0x1d4   : > { %724 = vst.msk [vmem:[%s391_s23] sm:$0xff] %vm723_vm1, %v722_v28 }
 0x1d7   : > { %v729_v29 = vpop.xlane.xlu0 %728 }
 0x1d8   : > { %730 = vst.msk [vmem:[%s395_s26] sm:$0xff] %vm723_vm1, %v729_v29 }
 0x1d9 PF: > { %p12_p10 = scmp.ge.s32.totalorder %s1066_s19, 4   ;;  %s1239_s15 = smov %s1015_s16 }
 0x1da   : > { %s1240_s16 = smov %s1075_s22  ;;  %s1241_s17 = smov %s1066_s19 }
 0x1db   :  { %14 = sbr.rel (!%p12_p10) target bundleno = 2 (0x2), region = 125 }

// kernel: encoder_forward.40
= control target key start
LH: loop header
LB: loop body
LE: loop exit
PB: predicated region body
PF: predicated region fallthrough
CT: control target
= control target key end

     0   :  { %s975_s24 = smov 0   ;;  %s977_s25 = smov 0   ;;  %s1093_s0 = inlined_call_operand.vmem [shape: bf16[16,512], index: 0, kind: input, shape index: {}]   ;;  %s1094_s1 = inlined_call_operand.vmem [shape: bf16[8,512], index: 1, kind: input, shape index: {}]   ;;  %s1095_s2 = inlined_call_operand.vmem [shape: bf16[32,24], index: 2, kind: input, shape index: {}]   ;;  %s1096_s3 = inlined_call_operand.vmem [shape: f32[24,1], index: 3, kind: input, shape index: {}]   ;;  %s1097_s4 = inlined_call_operand.vmem [shape: f32[24,1], index: 4, kind: input, shape index: {}]   ;;  %s1098_s5 = inlined_call_operand.vmem [shape: bf16[32,512], index: 5, kind: output, shape index: {0}]   ;;  %s1099_s6 = inlined_call_operand.vmem [shape: f32[2,32,1], index: 6, kind: output, shape index: {1}]   ;;  %s1100_s7 = inlined_call_operand.vmem [shape: f32[2,32,1], index: 7, kind: output, shape index: {2}]  }
   0x1   :  { %s979_s26 = smov 0  }
   0x2 LB: > { %s988_s27 = sadd.s32 4294967295, %s931_s26   ;;  %s990_s28 = sadd.s32 1, %s931_s26   ;;  %s931_s26 = sphi %s979_s26, %s1104_s26   ;;  %s927_s25 = sphi %s977_s25, %s1103_s25   ;;  %s923_s24 = sphi %s975_s24, %s1102_s24  }
   0x3   : > { %s22_s29 = ssub.s32 %s931_s26, %s990_s28  ;;  %s25_s30 = sadd.s32 1, %s927_s25 }
   0x4   : > { %p23_p0 = scmp.eq.s32.totalorder %s22_s29, 0  ;;  %p32_p1 = scmp.ne.s32.totalorder %s927_s25, %s923_s24 }
   0x5   : > { %p33_p2 = scmp.eq.s32.totalorder %s931_s26, 0  ;;  %p151_p3 = scmp.eq.s32.totalorder %s988_s27, 1 }
   0x6   : > { %s998_s8 = scalar_select %p23_p0, %s927_s25, %s25_s30  }
   0x7   : > { %p34_p4 = por %p33_p2, %p32_p1  ;;  %p1000_p5 = por %p151_p3, %p32_p1 }
   0x8   : > { %p834_p6 = scmp.ge.s32.totalorder %s931_s26, 2 }
   0xa   : > { %234 = sbr.rel (%p834_p6) target bundleno = 24 (0x18), region = 28 }
  0x11   : > { %237 = sbr.rel (!%p34_p4) target bundleno = 24 (0x18), region = 32  ;;  %s239_s10 = sand.u32 (%p34_p4), 1, %s927_s25  }
  0x12   : > { %s863_s11 = sshll.u32 (%p34_p4), %s931_s26, 3  ;;  %s835_s12 = sshll.u32 (%p34_p4), %s239_s10, 4 }
  0x13   : > { %s244_s15 = scalar_lea.vmem (%p34_p4), %s1093_s0, %s863_s11  ;;  %s241_s16 = scalar_lea.vmem (%p34_p4), [#allocation2], %s835_s12 }
  0x14   : > { %v274_v0 = vld [vmem:[%s244_s15] sm:$0xff] (%p34_p4)  ;;  %v276_v1 = vld [vmem:[%s244_s15 + $0x10] sm:$0xff] (%p34_p4) }
  0x15   : > { %275 = vst [vmem:[%s241_s16] sm:$0xff] (%p34_p4), %v274_v0  ;;  %277 = vst [vmem:[%s241_s16 + $0x8] sm:$0xff] (%p34_p4), %v276_v1 }
  0x18 PF: > { %p838_p7 = scmp.ge.s32.totalorder %s931_s26, 1  ;;  %p291_p8 = scmp.lt.s32.totalorder %s931_s26, 3 }
  0x1a   : > { %p292_p9 = pnand %p838_p7, %p291_p8 }
  0x1b   : > { %v413_v2 = vld [vmem:[%s1096_s3 + $0x10] sm:$0xff] (!%p292_p9)  ;;  %v368_v3 = vld [vmem:[%s1096_s3] sm:$0xff] (!%p292_p9)  ;;  %v933_v4 = vmov (!%p292_p9), 0   ;;  %v369_v6 = vld [vmem:[%s1096_s3 + $0x8] sm:$0xff] (!%p292_p9)  ;;  %s934_s16 = smov (!%p292_p9), 112   ;;  %s841_s17 = sshll.u32 (!%p292_p9), %s988_s27, 1 }
  0x1c   : > { %295 = sbr.rel (%p292_p9) target bundleno = 551 (0x227), region = 74  ;;  %906 = vset.pattern.permute.xlu1 (!%p292_p9), %v933_v4  ;;  %905 = vset.pattern.permute.xlu0 (!%p292_p9), %v933_v4  ;;  %v384_v5 = vld [vmem:[%s1097_s4] sm:$0xff] (!%p292_p9)  ;;  %v421_v7 = vld [vmem:[%s1097_s4 + $0x10] sm:$0xff] (!%p292_p9)  ;;  %v385_v8 = vld [vmem:[%s1097_s4 + $0x8] sm:$0xff] (!%p292_p9)  ;;  %p345_p10 = scmp.lt.s32.totalorder (!%p292_p9), %s841_s17, 3  ;;  %vm454_vm0 = vcmask (!%p292_p9), 1043456  }
  0x1d   : > { %416 = vperm.xlu1 (!%p292_p9), %906, %v413_v2   ;;  %372 = vperm.xlu0 (!%p292_p9), %905, %v368_v3   ;;  %v907_v9 = vld [vmem:[%s1095_s2] sm:$0xff] (!%p292_p9)   ;;  %v1036_v10 = vld [vmem:[%s1095_s2 + $0x8] sm:$0xff] (!%p292_p9)   ;;  %s298_s18 = sand.u32 (!%p292_p9), 1, %s923_s24   ;;  %vm447_vm1 = vcmask (!%p292_p9), 64512   ;;  %vm514_vm2 = vcmask (!%p292_p9), 130048   ;;  %p351_p11 = scmp.lt.s32.totalorder (!%p292_p9), %s988_s27, 1 }
  0x1e   : > { %493 = vmatprep.mubr.bf16.mxu1 (!%p292_p9), %v933_v4  ;;  %553 = vmatprep.mubr.bf16.mxu0 (!%p292_p9), %v933_v4  ;;  %s839_s19 = sshll.u32 (!%p292_p9), %s298_s18, 4  ;;  %s840_s29 = sshll.u32 (!%p292_p9), %s298_s18, 5  ;;  %vm614_vm3 = vcmask (!%p292_p9), 7168  }
  0x1f   : > { %s300_s26 = scalar_lea.vmem (!%p292_p9), [#allocation2], %s839_s19  ;;  %s1051_s30 = scalar_lea.vmem (!%p292_p9), [#allocation3], %s840_s29 }
  0x20   : > { %v362_v11 = vld [vmem:[%s300_s26] sm:$0xff] (!%p292_p9)  ;;  %v363_v17 = vld [vmem:[%s300_s26 + $0x8] sm:$0xff] (!%p292_p9) }
  0x21   : > { %388 = vperm.xlu1 (!%p292_p9), %906, %v384_v5   ;;  %377 = vperm.xlu0 (!%p292_p9), %905, %v369_v6   ;;  %v364_v15 = vunpack.c.l.bf16 (!%p292_p9), %v362_v11  ;;  %v365_v16 = vunpack.c.h.bf16 (!%p292_p9), %v362_v11  ;;  %v366_v20 = vunpack.c.l.bf16 (!%p292_p9), %v363_v17  ;;  %v367_v21 = vunpack.c.h.bf16 (!%p292_p9), %v363_v17 }
  0x23   : > { %s1106_s17 = smov (!%p345_p10, %s841_s17), 3 }
  0x24   : > { %s842_s20 = sshll.u32 %s1106_s17, 2  ;;  %s870_s17 = sshll.u32 (%p1000_p5), %s988_s27, 3 }
  0x25   : > { %424 = vperm.xlu1 %906, %v421_v7   ;;  %393 = vperm.xlu0 %905, %v385_v8   ;;  %s348_s23 = scalar_lea.vmem %s1094_s1, %s842_s20  ;;  %s662_s20 = scalar_lea.vmem (%p1000_p5), %s1098_s5, %s870_s17 }
  0x26   : > { %v410_v13 = vld [vmem:[%s348_s23] sm:$0xff]  ;;  %s352_s24 = scalar_select %p351_p11, %s988_s27, 1 }
  0x27   : > { %v411_v18 = vunpack.c.l.bf16 %v410_v13  ;;  %v412_v19 = vunpack.c.h.bf16 %v410_v13 }
  0x28   : > { %s864_s10 = sshll.u32 %s352_s24, 5 }
  0x29   : > { %443 = vrot.lane.b32.xlu0 %v907_v9, %s934_s16  ;;  %445 = vrot.lane.b32.xlu1 %v1036_v10, %s934_s16  ;;  %s355_s13 = scalar_lea.vmem %s1099_s6, %s864_s10  ;;  %s360_s16 = scalar_lea.vmem %s1100_s7, %s864_s10 }
  0x9c   : > { %v417_v12 = vpop.permute.xlu1 %416  ;;  %v373_v14 = vpop.permute.xlu0 %372 }
  0x9d   : > { %v380_v22 = vmul.f32 %v373_v14, %v364_v15  ;;  %v381_v23 = vmul.f32 %v373_v14, %v365_v16  ;;  %v419_v28 = vmul.f32 %v417_v12, %v411_v18  ;;  %v420_v29 = vmul.f32 %v417_v12, %v412_v19 }
  0xa0   : > { %v389_v24 = vpop.permute.xlu1 %388  ;;  %v378_v25 = vpop.permute.xlu0 %377 }
  0xa1   : > { %v396_v26 = vadd.f32 %v389_v24, %v380_v22  ;;  %v397_v27 = vadd.f32 %v389_v24, %v381_v23  ;;  %v382_v30 = vmul.f32 %v378_v25, %v366_v20  ;;  %v383_v31 = vmul.f32 %v378_v25, %v367_v21 }
  0xa3   : > { %v400_v38 = vmax.f32 %v396_v26, 0.0  ;;  %v401_v39 = vmax.f32 %v397_v27, 0.0 }
  0xa4   : > { %v425_v32 = vpop.permute.xlu1 %424  ;;  %v394_v33 = vpop.permute.xlu0 %393 }
  0xa5   : > { %v427_v34 = vadd.f32 %v425_v32, %v419_v28  ;;  %v428_v35 = vadd.f32 %v425_v32, %v420_v29  ;;  %v398_v36 = vadd.f32 %v394_v33, %v382_v30  ;;  %v399_v37 = vadd.f32 %v394_v33, %v383_v31 }
  0xa7   : > { %v429_v40 = vmax.f32 %v427_v34, 0.0  ;;  %v402_v41 = vmax.f32 %v398_v36, 0.0  ;;  %v430_v42 = vmax.f32 %v428_v35, 0.0  ;;  %v403_v43 = vmax.f32 %v399_v37, 0.0 }
  0xa8   : > { %v444_v49 = vpop.permute.xlu0 %443  ;;  %v446_v50 = vpop.permute.xlu1 %445 }
  0xa9   : > { %v432_v44 = vpack.c.bf16 %v430_v42, %v430_v42  ;;  %v405_v45 = vpack.c.bf16 %v403_v43, %v401_v39  ;;  %v431_v46 = vpack.c.bf16 %v429_v40, %v429_v40  ;;  %v404_v47 = vpack.c.bf16 %v402_v41, %v400_v38 }
  0xab   : > { %849 = vmatprep.subr.msk.bf16.mxu1 %vm454_vm0, %v432_v44  ;;  %521 = vmatprep.subr.bf16.mxu0 %v405_v45  ;;  %v456_v48 = vsel %vm454_vm0, %v431_v46, 0 }
  0xac   : > { %462 = vmatpush1.bf16.msra.mxu1 %v456_v48  ;;  %522 = vmatpush1.bf16.msra.mxu0 %v404_v47 }
  0xaf   : > { %850 = vmatmul.mubr.msk.bf16.vlgmr.msra.gmra.mrb[0].mxu1 %vm447_vm1, %v444_v49  ;;  %852 = vmatmul.mubr.msk.bf16.vlgmr.msra.gmra.mrb[0].mxu0 %vm514_vm2, %v907_v9 }
  0xb0   : > { %503 = vmatprep.mubr.bf16.mxu1 %v933_v4  ;;  %563 = vmatprep.mubr.bf16.mxu0 %v933_v4 }
  0xb7   : > { %851 = vmatmul.mubr.msk.bf16.gmra.mrb[4].mxu1 %vm447_vm1, %v446_v50  ;;  %853 = vmatmul.mubr.msk.bf16.gmra.mrb[4].mxu0 %vm514_vm2, %v1036_v10 }
 0x182   : > { %v495_v51 = vpop.f32.mrb[0].mxu1  ;;  %v555_v52 = vpop.f32.mrb[0].mxu0 }
 0x183   : > { %v556_v53 = vadd.f32 %v555_v52, %v495_v51  ;;  %v497_v54 = vpop.f32.mrb[1].mxu1  ;;  %v557_v55 = vpop.f32.mrb[1].mxu0 }
 0x184   : > { %v558_v56 = vadd.f32 %v557_v55, %v497_v54  ;;  %v499_v57 = vpop.f32.mrb[2].mxu1  ;;  %v559_v58 = vpop.f32.mrb[2].mxu0 }
 0x185   : > { %v560_v59 = vadd.f32 %v559_v58, %v499_v57  ;;  %v501_v60 = vpop.f32.mrb[3].mxu1  ;;  %v561_v61 = vpop.f32.mrb[3].mxu0  ;;  %v619_v62 = vmul.f32 %v556_v53, %v556_v53 }
 0x186   : > { %v866_v63 = vpack.c.bf16 %v558_v56, %v556_v53  ;;  %v562_v0 = vadd.f32 %v561_v61, %v501_v60  ;;  %v602_v1 = vadd.f32 %v558_v56, %v556_v53  ;;  %v620_v2 = vmul.f32 %v558_v56, %v558_v56 }
 0x187   : > { %v621_v3 = vmul.f32 %v560_v59, %v560_v59 }
 0x188   : > { %598 = vst [vmem:[%s1051_s30] sm:$0xff] %v866_v63  ;;  %v867_v4 = vpack.c.bf16 %v562_v0, %v560_v59  ;;  %603 = vadd.xlane.f32.xlu0 %v602_v1  ;;  %v605_v5 = vadd.f32 %v562_v0, %v560_v59  ;;  %v622_v6 = vmul.f32 %v562_v0, %v562_v0 }
 0x189   : > { %v627_v7 = vadd.f32 %v620_v2, %v619_v62 }
 0x18a   : > { %599 = vst [vmem:[%s1051_s30 + $0x8] sm:$0xff] %v867_v4  ;;  %v505_v8 = vpop.f32.mrb[4].mxu1  ;;  %v565_v9 = vpop.f32.mrb[4].mxu0  ;;  %606 = vadd.xlane.f32.xlu1 %v605_v5  ;;  %v630_v10 = vadd.f32 %v622_v6, %v621_v3 }
 0x18b   : > { %v566_v11 = vadd.f32 %v565_v9, %v505_v8  ;;  %v507_v12 = vpop.f32.mrb[5].mxu1  ;;  %v567_v13 = vpop.f32.mrb[5].mxu0 }
 0x18c   : > { %v568_v14 = vadd.f32 %v567_v13, %v507_v12  ;;  %v509_v15 = vpop.f32.mrb[6].mxu1  ;;  %v569_v16 = vpop.f32.mrb[6].mxu0  ;;  %631 = vadd.xlane.f32.xlu0 %v630_v10 }
 0x18d   : > { %v570_v17 = vadd.f32 %v569_v16, %v509_v15  ;;  %v511_v18 = vpop.f32.mrb[7].mxu1  ;;  %v571_v19 = vpop.f32.mrb[7].mxu0  ;;  %v623_v20 = vmul.f32 %v566_v11, %v566_v11 }
 0x18e   : > { %v868_v21 = vpack.c.bf16 %v568_v14, %v566_v11  ;;  %v572_v22 = vadd.f32 %v571_v19, %v511_v18  ;;  %628 = vadd.xlane.f32.xlu1 %v627_v7  ;;  %v608_v23 = vadd.f32 %v568_v14, %v566_v11  ;;  %v624_v24 = vmul.f32 %v568_v14, %v568_v14 }
 0x18f   : > { %v625_v25 = vmul.f32 %v570_v17, %v570_v17  ;;  %v696_v39 = vld [vmem:[%s1051_s30] sm:$0xff] (%p1000_p5) }
 0x190   : > { %600 = vst [vmem:[%s1051_s30 + $0x10] sm:$0xff] %v868_v21  ;;  %v869_v26 = vpack.c.bf16 %v572_v22, %v570_v17  ;;  %609 = vadd.xlane.f32.xlu0 %v608_v23  ;;  %v633_v27 = vadd.f32 %v624_v24, %v623_v20  ;;  %v611_v28 = vadd.f32 %v572_v22, %v570_v17  ;;  %697 = vst [vmem:[%s662_s20] sm:$0xff] (%p1000_p5), %v696_v39 }
 0x191   : > { %v626_v29 = vmul.f32 %v572_v22, %v572_v22  ;;  %v698_v40 = vld [vmem:[%s1051_s30 + $0x8] sm:$0xff] (%p1000_p5) }
 0x192   : > { %601 = vst [vmem:[%s1051_s30 + $0x18] sm:$0xff] %v869_v26  ;;  %634 = vadd.xlane.f32.xlu1 %v633_v27  ;;  %699 = vst [vmem:[%s662_s20 + $0x10] sm:$0xff] (%p1000_p5), %v698_v40 }
 0x193   : > { %v636_v30 = vadd.f32 %v626_v29, %v625_v25 }
 0x194   : > { %612 = vadd.xlane.f32.xlu0 %v611_v28 }
 0x197   : > { %v700_v41 = vld [vmem:[%s1051_s30 + $0x10] sm:$0xff] (%p1000_p5) }
 0x198   : > { %637 = vadd.xlane.f32.xlu0 %v636_v30  ;;  %701 = vst [vmem:[%s662_s20 + $0x20] sm:$0xff] (%p1000_p5), %v700_v41 }
 0x199   : > { %v702_v42 = vld [vmem:[%s1051_s30 + $0x18] sm:$0xff] (%p1000_p5) }
 0x19a   : > { %703 = vst [vmem:[%s662_s20 + $0x30] sm:$0xff] (%p1000_p5), %v702_v42 }
 0x215   : > { %v604_v31 = vpop.xlane.xlu0 %603 }
 0x216   : > { %615 = vst.msk [vmem:[%s355_s13] sm:$0xff] %vm614_vm3, %v604_v31 }
 0x217   : > { %v607_v32 = vpop.xlane.xlu1 %606 }
 0x218   : > { %616 = vst.msk [vmem:[%s355_s13 + $0x8] sm:$0xff] %vm614_vm3, %v607_v32 }
 0x219   : > { %v632_v33 = vpop.xlane.xlu0 %631 }
 0x21a   : > { %640 = vst.msk [vmem:[%s360_s16 + $0x8] sm:$0xff] %vm614_vm3, %v632_v33 }
 0x21b   : > { %v629_v34 = vpop.xlane.xlu1 %628 }
 0x21c   : > { %639 = vst.msk [vmem:[%s360_s16] sm:$0xff] %vm614_vm3, %v629_v34 }
 0x21d   : > { %v610_v35 = vpop.xlane.xlu0 %609 }
 0x21e   : > { %617 = vst.msk [vmem:[%s355_s13 + $0x10] sm:$0xff] %vm614_vm3, %v610_v35 }
 0x21f   : > { %v635_v36 = vpop.xlane.xlu1 %634 }
 0x220   : > { %641 = vst.msk [vmem:[%s360_s16 + $0x10] sm:$0xff] %vm614_vm3, %v635_v36  ;;  %659 = sbr.rel (!%p1000_p5) target bundleno = 551 (0x227), region = 82 }
 0x221   : > { %v613_v37 = vpop.xlane.xlu0 %612 }
 0x222   : > { %618 = vst.msk [vmem:[%s355_s13 + $0x18] sm:$0xff] %vm614_vm3, %v613_v37 }
 0x225   : > { %v638_v38 = vpop.xlane.xlu0 %637 }
 0x226   : > { %642 = vst.msk [vmem:[%s360_s16 + $0x18] sm:$0xff] %vm614_vm3, %v638_v38 }
 0x227 PF: > { %p15_p12 = scmp.ge.s32.totalorder %s990_s28, 4   ;;  %s1102_s24 = smov %s927_s25 }
 0x228   : > { %s1103_s25 = smov %s998_s8  ;;  %s1104_s26 = smov %s990_s28 }
 0x229   :  { %17 = sbr.rel (!%p15_p12) target bundleno = 2 (0x2), region = 178 }

// kernel: encoder_forward.43
= control target key start
LH: loop header
LB: loop body
LE: loop exit
PB: predicated region body
PF: predicated region fallthrough
CT: control target
= control target key end

     0   :  { %s1394_s0 = inlined_call_operand.vmem [shape: bf16[16,512], index: 0, kind: input, shape index: {}]   ;;  %s1395_s1 = inlined_call_operand.vmem [shape: bf16[8,512], index: 1, kind: input, shape index: {}]   ;;  %s1396_s2 = inlined_call_operand.vmem [shape: bf16[8,512], index: 2, kind: input, shape index: {}]   ;;  %s1397_s3 = inlined_call_operand.vmem [shape: bf16[16,32], index: 3, kind: input, shape index: {}]   ;;  %s1398_s4 = inlined_call_operand.vmem [shape: f32[32,1], index: 4, kind: input, shape index: {}]   ;;  %s1399_s5 = inlined_call_operand.vmem [shape: f32[32,1], index: 5, kind: input, shape index: {}]   ;;  %s1400_s6 = inlined_call_operand.vmem [shape: bf16[16,512], index: 6, kind: output, shape index: {0}]   ;;  %s1401_s7 = inlined_call_operand.hbm [shape: f32[2,16,1], index: 7, kind: output, shape index: {1}]   ;;  %s1402_s8 = inlined_call_operand.hbm [shape: f32[2,16,1], index: 8, kind: output, shape index: {2}]  }
   0x1   :  { %1403 = sst [smem:[#allocation10_spill]] %s1394_s0 }
   0x2   :  { %1404 = sst [smem:[#allocation11_spill]] %s1395_s1 }
   0x3   :  { %14 = vsyncpa [#allocation5], 0 }
   0x4   :  { %16 = vsyncpa [#allocation5 + $0x1], 0 }
   0x5   :  { %17 = vsyncpa [#allocation7], 0 }
   0x6   :  { %19 = vsyncpa [#allocation7 + $0x1], 0  ;;  %s1181_s27 = smov 0   ;;  %s1183_s28 = smov 0  }
   0x7   :  { %s1185_s29 = smov 0   ;;  %s1187_s30 = smov 0  }
   0x8 LB: > { %s1202_s9 = sadd.s32 4294967295, %s1127_s30   ;;  %s933_s10 = sadd.s32 4294967294, %s1127_s30   ;;  %s1127_s30 = sphi %s1187_s30, %s1414_s30   ;;  %s1123_s29 = sphi %s1185_s29, %s1413_s29   ;;  %s1119_s28 = sphi %s1183_s28, %s1412_s28   ;;  %s1115_s27 = sphi %s1181_s27, %s1411_s27  }
   0x9   : > { %s1206_s11 = sadd.s32 1, %s1127_s30   ;;  %s32_s12 = sadd.s32 1, %s1123_s29 }
   0xa   : > { %s29_s13 = ssub.s32 %s1127_s30, %s1206_s11  ;;  %p39_p0 = scmp.ne.s32.totalorder %s1123_s29, %s1119_s28 }
   0xb   : > { %p30_p1 = scmp.eq.s32.totalorder %s29_s13, 0  ;;  %p40_p2 = scmp.eq.s32.totalorder %s1127_s30, 0 }
   0xc   : > { %p184_p3 = scmp.eq.s32.totalorder %s1202_s9, 1  ;;  %p215_p4 = scmp.ne.s32.totalorder %s1119_s28, %s1115_s27 }
   0xd   : > { %s1218_s14 = scalar_select %p30_p1, %s1123_s29, %s32_s12  }
   0xe   : > { %p41_p5 = por %p40_p2, %p39_p0  ;;  %p1220_p6 = por %p184_p3, %p39_p0 }
   0xf   : > { %p216_p7 = scmp.eq.s32.totalorder %s933_s10, 1  ;;  %p935_p9 = scmp.ge.s32.totalorder %s1127_s30, 2 }
  0x11   : > { %p1224_p8 = por %p216_p7, %p215_p4  ;;  %267 = sbr.rel (%p935_p9) target bundleno = 35 (0x23), region = 28 }
  0x18   : > { %270 = sbr.rel (!%p41_p5) target bundleno = 35 (0x23), region = 32  ;;  %s272_s17 = sand.u32 (%p41_p5), 1, %s1123_s29  }
  0x19   : > { %s967_s18 = sshll.u32 (%p41_p5), %s1127_s30, 3  ;;  %s936_s19 = sshll.u32 (%p41_p5), %s272_s17, 4 }
  0x1a   : > { %s1407_s0 = sld [smem:[#allocation10_spill]] (%p41_p5)  ;;  %s274_s23 = scalar_lea.vmem (%p41_p5), [#allocation2], %s936_s19 }
  0x20   : > { %s277_s22 = scalar_lea.vmem %s1407_s0, %s967_s18 }
  0x21   : > { %v307_v0 = vld [vmem:[%s277_s22] sm:$0xff]  ;;  %v309_v1 = vld [vmem:[%s277_s22 + $0x10] sm:$0xff] }
  0x22   : > { %308 = vst [vmem:[%s274_s23] sm:$0xff] %v307_v0  ;;  %310 = vst [vmem:[%s274_s23 + $0x8] sm:$0xff] %v309_v1 }
  0x23 PF: > { %p939_p10 = scmp.ge.s32.totalorder %s1127_s30, 1  ;;  %p333_p11 = scmp.lt.s32.totalorder %s1127_s30, 3 }
  0x25   : > { %p334_p12 = pnand %p939_p10, %p333_p11 }
  0x26   : > { %v429_v2 = vld [vmem:[%s1399_s5] sm:$0xff] (!%p334_p12)  ;;  %v1129_v4 = vmov (!%p334_p12), 0   ;;  %v430_v5 = vld [vmem:[%s1399_s5 + $0x8] sm:$0xff] (!%p334_p12)  ;;  %s1253_s19 = sand.u32 (!%p334_p12), 1, %s1119_s28   ;;  %v587_v7 = vld [vmem:[%s1398_s4 + $0x18] sm:$0xff] (!%p334_p12)  ;;  %s1130_s17 = smov (!%p334_p12), 104  }
  0x27   : > { %337 = sbr.rel (%p334_p12) target bundleno = 614 (0x266), region = 78  ;;  %v413_v3 = vld [vmem:[%s1398_s4] sm:$0xff] (!%p334_p12)  ;;  %1031 = vset.pattern.permute.xlu1 (!%p334_p12), %v1129_v4  ;;  %1030 = vset.pattern.permute.xlu0 (!%p334_p12), %v1129_v4  ;;  %v414_v6 = vld [vmem:[%s1398_s4 + $0x8] sm:$0xff] (!%p334_p12)  ;;  %v456_v8 = vld [vmem:[%s1398_s4 + $0x10] sm:$0xff] (!%p334_p12)  ;;  %s1131_s18 = smov (!%p334_p12), 112   ;;  %vm537_vm0 = vcmask (!%p334_p12), 130048  }
  0x28   : > { %433 = vperm.xlu1 (!%p334_p12), %1031, %v429_v2   ;;  %417 = vperm.xlu0 (!%p334_p12), %1030, %v413_v3   ;;  %v595_v9 = vld [vmem:[%s1399_s5 + $0x18] sm:$0xff] (!%p334_p12)  ;;  %v464_v10 = vld [vmem:[%s1399_s5 + $0x10] sm:$0xff] (!%p334_p12)  ;;  %v1272_v11 = vld [vmem:[%s1397_s3] sm:$0xff] (!%p334_p12)   ;;  %s944_s20 = sshll.u32 (!%p334_p12), %s1202_s9, 1  ;;  %s1278_s21 = sshll.u32 (!%p334_p12), %s1253_s19, 4  ;;  %vm487_vm1 = vcmask (!%p334_p12), 1043456  }
  0x29   : > { %573 = vmatprep.mubr.bf16.mxu0 (!%p334_p12), %v1129_v4  ;;  %526 = vmatprep.mubr.bf16.mxu1 (!%p334_p12), %v1129_v4  ;;  %p394_p13 = scmp.lt.s32.totalorder (!%p334_p12), %s944_s20, 3  ;;  %s342_s22 = scalar_lea.vmem (!%p334_p12), [#allocation2], %s1278_s21  ;;  %vm483_vm2 = vcmask (!%p334_p12), 64512   ;;  %vm685_vm3 = vcmask (!%p334_p12), 7168  }
  0x2a   : > { %v407_v12 = vld [vmem:[%s342_s22] sm:$0xff] (!%p334_p12)  ;;  %v408_v15 = vld [vmem:[%s342_s22 + $0x8] sm:$0xff] (!%p334_p12)  ;;  %s1408_s1 = sld [smem:[#allocation11_spill]] (!%p334_p12) }
  0x2b   : > { %v409_v13 = vunpack.c.l.bf16 (!%p334_p12), %v407_v12  ;;  %v410_v14 = vunpack.c.h.bf16 (!%p334_p12), %v407_v12  ;;  %v411_v18 = vunpack.c.l.bf16 (!%p334_p12), %v408_v15  ;;  %v412_v19 = vunpack.c.h.bf16 (!%p334_p12), %v408_v15 }
  0x2c   : > { %438 = vperm.xlu1 (!%p334_p12), %1031, %v430_v5   ;;  %422 = vperm.xlu0 (!%p334_p12), %1030, %v414_v6  }
  0x2e   : > { %s1416_s20 = smov (!%p394_p13, %s944_s20), 3  ;;  %s970_s24 = sshll.u32 (%p1220_p6), %s1202_s9, 3 }
  0x2f   : > { %s945_s23 = sshll.u32 %s1416_s20, 2  ;;  %s1292_s20 = scalar_lea.vmem [#allocation6], %s1278_s21 }
  0x30   : > { %590 = vperm.xlu1 %1031, %v587_v7   ;;  %459 = vperm.xlu0 %1030, %v456_v8   ;;  %s403_s26 = scalar_lea.vmem %s1396_s2, %s945_s23  ;;  %s397_s13 = scalar_lea.vmem %s1408_s1, %s945_s23 }
  0x31   : > { %v584_v22 = vld [vmem:[%s403_s26] sm:$0xff]  ;;  %s719_s10 = scalar_lea.vmem (%p1220_p6), %s1400_s6, %s970_s24 }
  0x32   : > { %v453_v25 = vld [vmem:[%s397_s13] sm:$0xff]  ;;  %v585_v29 = vunpack.c.l.bf16 %v584_v22  ;;  %v586_v30 = vunpack.c.h.bf16 %v584_v22 }
  0x33   : > { %v454_v33 = vunpack.c.l.bf16 %v453_v25  ;;  %v455_v34 = vunpack.c.h.bf16 %v453_v25 }
  0x34   : > { %598 = vperm.xlu1 %1031, %v595_v9   ;;  %467 = vperm.xlu0 %1030, %v464_v10  }
  0x38   : > { %607 = vrot.lane.b32.xlu1 %v1272_v11, %s1130_s17  ;;  %481 = vrot.lane.b32.xlu0 %v1272_v11, %s1131_s18  ;;  %s377_s17 = scalar_lea.vmem [#allocation3], %s1278_s21  ;;  %s384_s18 = scalar_lea.vmem [#allocation4], %s1278_s21 }
  0xa7   : > { %v434_v16 = vpop.permute.xlu1 %433  ;;  %v418_v17 = vpop.permute.xlu0 %417 }
  0xa8   : > { %v425_v20 = vmul.f32 %v418_v17, %v409_v13  ;;  %v426_v21 = vmul.f32 %v418_v17, %v410_v14 }
  0xaa   : > { %v441_v28 = vadd.f32 %v434_v16, %v425_v20  ;;  %v442_v31 = vadd.f32 %v434_v16, %v426_v21 }
  0xab   : > { %v439_v23 = vpop.permute.xlu1 %438  ;;  %v423_v24 = vpop.permute.xlu0 %422 }
  0xac   : > { %v427_v26 = vmul.f32 %v423_v24, %v411_v18  ;;  %v428_v27 = vmul.f32 %v423_v24, %v412_v19  ;;  %v446_v38 = vmax.f32 %v442_v31, 0.0  ;;  %v445_v40 = vmax.f32 %v441_v28, 0.0 }
  0xae   : > { %v443_v32 = vadd.f32 %v439_v23, %v427_v26  ;;  %v444_v35 = vadd.f32 %v439_v23, %v428_v27 }
  0xaf   : > { %v591_v36 = vpop.permute.xlu1 %590  ;;  %v460_v37 = vpop.permute.xlu0 %459 }
  0xb0   : > { %v448_v39 = vmax.f32 %v444_v35, 0.0  ;;  %v447_v41 = vmax.f32 %v443_v32, 0.0  ;;  %v593_v42 = vmul.f32 %v591_v36, %v585_v29  ;;  %v594_v43 = vmul.f32 %v591_v36, %v586_v30 }
  0xb1   : > { %v462_v44 = vmul.f32 %v460_v37, %v454_v33  ;;  %v463_v45 = vmul.f32 %v460_v37, %v455_v34 }
  0xb2   : > { %v450_v48 = vpack.c.bf16 %v448_v39, %v446_v38  ;;  %v449_v49 = vpack.c.bf16 %v447_v41, %v445_v40 }
  0xb3   : > { %v599_v46 = vpop.permute.xlu1 %598  ;;  %v468_v47 = vpop.permute.xlu0 %467 }
  0xb4   : > { %v601_v50 = vadd.f32 %v599_v46, %v593_v42  ;;  %v602_v51 = vadd.f32 %v599_v46, %v594_v43  ;;  %v470_v52 = vadd.f32 %v468_v47, %v462_v44  ;;  %v471_v53 = vadd.f32 %v468_v47, %v463_v45  ;;  %541 = vmatprep.subr.bf16.mxu0 %v450_v48 }
  0xb5   : > { %542 = vmatpush1.bf16.msra.mxu0 %v449_v49 }
  0xb6   : > { %v603_v54 = vmax.f32 %v601_v50, 0.0  ;;  %v604_v55 = vmax.f32 %v602_v51, 0.0  ;;  %v472_v56 = vmax.f32 %v470_v52, 0.0  ;;  %v473_v57 = vmax.f32 %v471_v53, 0.0 }
  0xb7   : > { %v482_v0 = vpop.permute.xlu0 %481  ;;  %v608_v1 = vpop.permute.xlu1 %607 }
  0xb8   : > { %v605_v58 = vpack.c.bf16 %v603_v54, %v603_v54  ;;  %v606_v59 = vpack.c.bf16 %v604_v55, %v604_v55  ;;  %v475_v60 = vpack.c.bf16 %v473_v57, %v473_v57  ;;  %v474_v61 = vpack.c.bf16 %v472_v56, %v472_v56  ;;  %951 = vmatmul.mubr.msk.bf16.vlgmr.msra.gmra.mrb[0].mxu0 %vm537_vm0, %v1272_v11 }
  0xb9   : > { %650 = vmatprep.mubr.bf16.mxu0 %v1129_v4 }
  0xba   : > { %949 = vmatprep.subr.msk.bf16.mxu1 %vm487_vm1, %v475_v60  ;;  %952 = vmatprep.subr.msk.bf16.mxu0 %vm487_vm1, %v606_v59  ;;  %v489_v62 = vsel %vm487_vm1, %v474_v61, 0  ;;  %v613_v63 = vsel %vm487_vm1, %v605_v58, 0 }
  0xbb   : > { %495 = vmatpush1.bf16.msra.mxu1 %v489_v62  ;;  %619 = vmatpush1.bf16.msra.mxu0 %v613_v63 }
  0xbe   : > { %950 = vmatmul.mubr.msk.bf16.vlgmr.msra.gmra.mrb[0].mxu1 %vm483_vm2, %v482_v0 }
  0xc4   : > { %953 = vmatmul.mubr.msk.bf16.vlgmr.msra.gmra.mrb[0].mxu0 %vm483_vm2, %v608_v1 }
 0x191   : > { %v528_v2 = vpop.f32.mrb[0].mxu1 }
 0x192   : > { %v530_v3 = vpop.f32.mrb[1].mxu1 }
 0x193   : > { %v532_v5 = vpop.f32.mrb[2].mxu1 }
 0x194   : > { %v534_v6 = vpop.f32.mrb[3].mxu1 }
 0x197   : > { %v652_v7 = vpop.f32.mrb[0].mxu0 }
 0x198   : > { %v973_v8 = vadd.f32 %v652_v7, %v528_v2  ;;  %v654_v9 = vpop.f32.mrb[1].mxu0 }
 0x199   : > { %v974_v10 = vadd.f32 %v654_v9, %v530_v3  ;;  %v656_v11 = vpop.f32.mrb[2].mxu0 }
 0x19a   : > { %v975_v12 = vadd.f32 %v656_v11, %v532_v5  ;;  %v658_v13 = vpop.f32.mrb[3].mxu0  ;;  %v688_v14 = vmul.f32 %v973_v8, %v973_v8 }
 0x19b   : > { %v968_v15 = vpack.c.bf16 %v974_v10, %v973_v8  ;;  %v976_v16 = vadd.f32 %v658_v13, %v534_v6  ;;  %v679_v17 = vadd.f32 %v974_v10, %v973_v8  ;;  %v689_v4 = vmul.f32 %v974_v10, %v974_v10 }
 0x19c   : > { %v690_v18 = vmul.f32 %v975_v12, %v975_v12 }
 0x19d   : > { %677 = vst [vmem:[%s377_s17] sm:$0xff] %v968_v15  ;;  %v969_v19 = vpack.c.bf16 %v976_v16, %v975_v12  ;;  %680 = vadd.xlane.f32.xlu0 %v679_v17  ;;  %v682_v20 = vadd.f32 %v976_v16, %v975_v12  ;;  %v692_v21 = vadd.f32 %v689_v4, %v688_v14 }
 0x19e   : > { %v691_v22 = vmul.f32 %v976_v16, %v976_v16 }
 0x19f   : > { %678 = vst [vmem:[%s377_s17 + $0x8] sm:$0xff] %v969_v19  ;;  %683 = vadd.xlane.f32.xlu1 %v682_v20 }
 0x1a0   : > { %v695_v23 = vadd.f32 %v691_v22, %v690_v18 }
 0x1a1   : > { %693 = vadd.xlane.f32.xlu0 %v692_v21 }
 0x1a4   : > { %v749_v28 = vld [vmem:[%s377_s17] sm:$0xff] (%p1220_p6) }
 0x1a5   : > { %696 = vadd.xlane.f32.xlu0 %v695_v23  ;;  %750 = vst [vmem:[%s719_s10] sm:$0xff] (%p1220_p6), %v749_v28 }
 0x1a6   : > { %v751_v29 = vld [vmem:[%s377_s17 + $0x8] sm:$0xff] (%p1220_p6) }
 0x1a7   : > { %752 = vst [vmem:[%s719_s10 + $0x10] sm:$0xff] (%p1220_p6), %v751_v29 }
 0x22a   : > { %v681_v24 = vpop.xlane.xlu0 %680 }
 0x22b   : > { %686 = vst.msk [vmem:[%s384_s18] sm:$0xff] %vm685_vm3, %v681_v24 }
 0x22c   : > { %v684_v25 = vpop.xlane.xlu1 %683 }
 0x22d   : > { %687 = vst.msk [vmem:[%s384_s18 + $0x8] sm:$0xff] %vm685_vm3, %v684_v25  ;;  %716 = sbr.rel (!%p1220_p6) target bundleno = 564 (0x234), region = 86 }
 0x22e   : > { %v694_v26 = vpop.xlane.xlu0 %693 }
 0x22f   : > { %698 = vst.msk [vmem:[%s1292_s20] sm:$0xff] %vm685_vm3, %v694_v26 }
 0x232   : > { %v697_v27 = vpop.xlane.xlu0 %696 }
 0x233   : > { %699 = vst.msk [vmem:[%s1292_s20 + $0x8] sm:$0xff] %vm685_vm3, %v697_v27 }
 0x234 PF: > { %s971_s21 = sshll.u32 %s1202_s9, 8  ;;  %s765_s12 = sshll.u32 %s384_s18, 4  ;;  %s1312_s12 = int_to_ptr.vmem [resolvable:$true] %s765_s12 }
 0x235   : > { %s1310_s22 = scalar_lea.hbm %s1401_s7, %s971_s21  ;;  %s1033_s17 = scalar_lea.vmem %s1312_s12, 256 }
 0x236   : > { %p1034_p0 = scmp.ne.s32.totalorder %s1312_s12, %s1033_s17  ;;  %s1132_s24 = smov [#allocation4]  }
 0x237   : > { %s1037_s25 = sshll.u32 %s1132_s24, 4  ;;  %s1038_s25 = int_to_ptr.vmem [resolvable:$false] %s1037_s25 }
 0x238   : > { %p1035_p1 = pnand %p1034_p0, %p1220_p6  ;;  %s1039_s18 = scalar_lea.vmem %s1038_s25, 512 }
 0x239   : > { %p1040_p3 = scmp.lt.s32.totalorder %s1312_s12, %s1038_s25  ;;  %p1041_p4 = scmp.lt.s32.totalorder %s1039_s18, %s1033_s17 }
 0x23a   : > { %p1036_p2 = pneg %p1035_p1 }
 0x23b   : > { %p1042_p5 = por %p1041_p4, %p1040_p3 }
 0x23d   : > { %p1043_p7 = pnand %p1042_p5, %p1036_p2 }
 0x23f   : > { %1046 = shalt.err (!%p1043_p7)
}
 0x240   : > { %s1047_s23 = scalar_lea.hbm %s1310_s22, 256  ;;  %s1051_s13 = scalar_lea.hbm %s1401_s7, 512 }
 0x241   : > { %p1048_p10 = scmp.ne.s32.totalorder %s1310_s22, %s1047_s23  ;;  %p1052_p13 = scmp.lt.u32.totalorder %s1310_s22, %s1401_s7 }
 0x242   : > { %p1053_p0 = scmp.lt.u32.totalorder %s1051_s13, %s1047_s23  ;;  %p1055_p2 = scmp.lt.u32.totalorder %s1047_s23, %s1310_s22 }
 0x243   : > { %p1049_p11 = pnand %p1048_p10, %p1220_p6 }
 0x244   : > { %p1054_p1 = por %p1053_p0, %p1052_p13 }
 0x245   : > { %p1050_p12 = pneg %p1049_p11 }
 0x246   : > { %p1056_p3 = por %p1055_p2, %p1054_p1 }
 0x248   : > { %p1057_p4 = pnand %p1056_p3, %p1050_p12 }
 0x24a   : > { %1060 = shalt.err (!%p1057_p4)
}
 0x24b   : > { %s1133_s17 = smov 128   ;;  %s1134_s18 = smov 8  }
 0x24c   : > { %s1409_s26 = scalar_lea.sflag [#allocation5], %s1253_s19  ;;  %s1345_s13 = scalar_lea.hbm %s1402_s8, %s971_s21 }
 0x24d   : > { %981 = dma.vmem_to_hbm [thread:$0]  (%p1220_p6), %s1312_s12, 256, %s1310_s22, %s1409_s26, %s1133_s17, %s1133_s17, %s1134_s18  }
 0x24e   : > { %s781_s24 = sshll.u32 %s1292_s20, 4  ;;  %s1135_s0 = smov [#allocation6]   ;;  %s1348_s24 = int_to_ptr.vmem [resolvable:$true] %s781_s24 }
 0x24f   : > { %s1061_s25 = scalar_lea.vmem %s1348_s24, 256  ;;  %s1065_s1 = sshll.u32 %s1135_s0, 4  ;;  %s1066_s1 = int_to_ptr.vmem [resolvable:$false] %s1065_s1 }
 0x250   : > { %p1062_p5 = scmp.ne.s32.totalorder %s1348_s24, %s1061_s25  ;;  %s1067_s9 = scalar_lea.vmem %s1066_s1, 512 }
 0x251   : > { %p1068_p11 = scmp.lt.s32.totalorder %s1348_s24, %s1066_s1  ;;  %p1069_p12 = scmp.lt.s32.totalorder %s1067_s9, %s1061_s25 }
 0x252   : > { %p1063_p7 = pnand %p1062_p5, %p1220_p6 }
 0x253   : > { %p1070_p13 = por %p1069_p12, %p1068_p11 }
 0x254   : > { %p1064_p10 = pneg %p1063_p7 }
 0x256   : > { %p1071_p0 = pnand %p1070_p13, %p1064_p10 }
 0x258   : > { %1074 = shalt.err (!%p1071_p0)
}
 0x259   : > { %s1075_s20 = scalar_lea.hbm %s1345_s13, 256  ;;  %s1079_s0 = scalar_lea.hbm %s1402_s8, 512 }
 0x25a   : > { %p1076_p1 = scmp.ne.s32.totalorder %s1345_s13, %s1075_s20  ;;  %p1080_p4 = scmp.lt.u32.totalorder %s1345_s13, %s1402_s8 }
 0x25b   : > { %p1081_p5 = scmp.lt.u32.totalorder %s1079_s0, %s1075_s20  ;;  %p1083_p10 = scmp.lt.u32.totalorder %s1075_s20, %s1345_s13 }
 0x25c   : > { %p1077_p2 = pnand %p1076_p1, %p1220_p6 }
 0x25d   : > { %p1082_p7 = por %p1081_p5, %p1080_p4 }
 0x25e   : > { %p1078_p3 = pneg %p1077_p2 }
 0x25f   : > { %p1084_p11 = por %p1083_p10, %p1082_p7 }
 0x261   : > { %p1085_p12 = pnand %p1084_p11, %p1078_p3 }
 0x263   : > { %1088 = shalt.err (!%p1085_p12)
}
 0x264   : > { %s1410_s26 = scalar_lea.sflag [#allocation7], %s1253_s19 }
 0x265   : > { %982 = dma.vmem_to_hbm [thread:$0]  (%p1220_p6), %s1348_s24, 256, %s1345_s13, %s1410_s26, %s1133_s17, %s1133_s17, %s1134_s18  }
 0x266 PF: > { %s803_s23 = sand.u32 1, %s1115_s27   ;;  %p986_p13 = pnand %p935_p9, %p1224_p8 }
 0x267   : > { %s804_s10 = scalar_lea.sflag [#allocation5], %s803_s23 }
 0x268   : > { %1106 = dma.done.wait (!%p986_p13), %s804_s10, 256  }
 0x269   : > { %1108 = vsyncadd (!%p986_p13), %s804_s10, 4294967040  ;;  %s813_s15 = scalar_lea.sflag [#allocation7], %s803_s23 }
 0x26a   : > { %1110 = dma.done.wait (!%p986_p13), %s813_s15, 256  }
 0x26b   : > { %1112 = vsyncadd (!%p986_p13), %s813_s15, 4294967040  ;;  %p22_p6 = scmp.ge.s32.totalorder %s1206_s11, 4   ;;  %s1411_s27 = smov %s1119_s28 }
 0x26c   : > { %s1412_s28 = smov %s1123_s29  ;;  %s1413_s29 = smov %s1218_s14 }
 0x26d   : > { %s1414_s30 = smov %s1206_s11  ;;  %24 = sbr.rel (!%p22_p6) target bundleno = 8 (0x8), region = 195 }
 0x274   :  { %818 = vsyncpa [#allocation5], 1 }
 0x275   :  { %820 = vsyncpa [#allocation5 + $0x1], 1 }
 0x276   :  { %821 = vsyncpa [#allocation7], 1 }
 0x277   :  { %823 = vsyncpa [#allocation7 + $0x1], 1 }

// kernel: encoder_forward.44
= control target key start
LH: loop header
LB: loop body
LE: loop exit
PB: predicated region body
PF: predicated region fallthrough
CT: control target
= control target key end

     0   :  { %vm49_vm0 = vcmask 7168   ;;  %s147_s0 = inlined_call_operand.vmem [shape: bf16[4,16,128], index: 0, kind: input, shape index: {}]   ;;  %s148_s1 = inlined_call_operand.vmem [shape: bf16[16,128], index: 1, kind: output, shape index: {0}]   ;;  %s149_s2 = inlined_call_operand.vmem [shape: f32[1,16,1], index: 2, kind: output, shape index: {1}]   ;;  %s150_s3 = inlined_call_operand.vmem [shape: f32[1,16,1], index: 3, kind: output, shape index: {2}]  }
   0x1   :  { %v77_v0 = vld [vmem:[%s147_s0] sm:$0xff]   ;;  %v97_v1 = vld [vmem:[%s147_s0 + $0x8] sm:$0xff]   ;;  %v98_v2 = vld [vmem:[%s147_s0 + $0x10] sm:$0xff]  }
   0x2   :  { %v78_v3 = vunpack.c.l.bf16 %v77_v0  ;;  %v82_v4 = vunpack.c.l.bf16 %v97_v1  ;;  %v86_v5 = vunpack.c.l.bf16 %v98_v2  ;;  %v99_v6 = vld [vmem:[%s147_s0 + $0x18] sm:$0xff]   ;;  %v79_v7 = vunpack.c.h.bf16 %v77_v0 }
   0x3   :  { %v83_v8 = vunpack.c.h.bf16 %v97_v1  ;;  %v87_v9 = vunpack.c.h.bf16 %v98_v2  ;;  %v90_v10 = vunpack.c.l.bf16 %v99_v6  ;;  %v91_v12 = vunpack.c.h.bf16 %v99_v6 }
   0x4   :  { %v27_v11 = vadd.f32 %v82_v4, %v78_v3 }
   0x5   :  { %v30_v13 = vadd.f32 %v83_v8, %v79_v7 }
   0x6   :  { %v28_v14 = vadd.f32 %v86_v5, %v27_v11 }
   0x7   :  { %v31_v15 = vadd.f32 %v87_v9, %v30_v13 }
   0x8   :  { %v29_v16 = vadd.f32 %v90_v10, %v28_v14 }
   0x9   :  { %v32_v17 = vadd.f32 %v91_v12, %v31_v15 }
   0xa   :  { %v33_v18 = vmul.f32 0.25, %v29_v16 }
   0xb   :  { %v34_v19 = vmul.f32 0.25, %v32_v17 }
   0xc   :  { %45 = vadd.xlane.f32.xlu0 %v33_v18  ;;  %v52_v20 = vmul.f32 %v33_v18, %v33_v18 }
   0xd   :  { %v95_v21 = vpack.c.bf16 %v34_v19, %v33_v18  ;;  %v53_v22 = vmul.f32 %v34_v19, %v34_v19 }
   0xe   :  { %54 = vadd.xlane.f32.xlu1 %v52_v20 }
   0xf   :  { %96 = vst [vmem:[%s148_s1] sm:$0xff] %v95_v21  }
  0x10   :  { %47 = vadd.xlane.f32.xlu0 %v34_v19 }
  0x12   :  { %56 = vadd.xlane.f32.xlu1 %v53_v22 }
  0x99   :  { %v46_v23 = vpop.xlane.xlu0 %45 }
  0x9a   :  { %50 = vst.msk [vmem:[%s149_s2] sm:$0xff] %vm49_vm0, %v46_v23 }
  0x9b   :  { %v55_v24 = vpop.xlane.xlu1 %54 }
  0x9c   :  { %58 = vst.msk [vmem:[%s150_s3] sm:$0xff] %vm49_vm0, %v55_v24 }
  0x9d   :  { %v48_v25 = vpop.xlane.xlu0 %47 }
  0x9e   :  { %51 = vst.msk [vmem:[%s149_s2 + $0x8] sm:$0xff] %vm49_vm0, %v48_v25 }
  0x9f   :  { %v57_v26 = vpop.xlane.xlu1 %56 }
  0xa0   :  { %59 = vst.msk [vmem:[%s150_s3 + $0x8] sm:$0xff] %vm49_vm0, %v57_v26 }

// kernel: encoder_forward.45
= control target key start
LH: loop header
LB: loop body
LE: loop exit
PB: predicated region body
PF: predicated region fallthrough
CT: control target
= control target key end

     0   :  { %v228_v0 = vmov 0   ;;  %vm70_vm0 = vcmask 130048   ;;  %vm154_vm1 = vcmask 7168   ;;  %s325_s3 = inlined_call_operand.vmem [shape: f32[16,1], index: 3, kind: input, shape index: {}]   ;;  %s326_s2 = inlined_call_operand.vmem [shape: f32[16,1], index: 2, kind: input, shape index: {}]   ;;  %s327_s1 = inlined_call_operand.vmem [shape: bf16[32,16], index: 1, kind: input, shape index: {}]   ;;  %s328_s0 = inlined_call_operand.vmem [shape: bf16[16,128], index: 0, kind: input, shape index: {}]   ;;  %s329_s4 = inlined_call_operand.vmem [shape: bf16[32,128], index: 4, kind: output, shape index: {0}]   ;;  %s330_s5 = inlined_call_operand.vmem [shape: f32[1,32,1], index: 5, kind: output, shape index: {1}]   ;;  %s331_s6 = inlined_call_operand.vmem [shape: f32[1,32,1], index: 6, kind: output, shape index: {2}]  }
   0x1   :  { %225 = vset.pattern.permute.xlu1 %v228_v0  ;;  %224 = vset.pattern.permute.xlu0 %v228_v0  ;;  %v39_v1 = vld [vmem:[%s325_s3] sm:$0xff]  ;;  %v40_v3 = vld [vmem:[%s325_s3 + $0x8] sm:$0xff] }
   0x2   :  { %v25_v2 = vld [vmem:[%s326_s2] sm:$0xff]  ;;  %43 = vperm.xlu1 %225, %v39_v1   ;;  %v26_v4 = vld [vmem:[%s326_s2 + $0x8] sm:$0xff] }
   0x3   :  { %29 = vperm.xlu0 %224, %v25_v2   ;;  %v226_v5 = vld [vmem:[%s327_s1] sm:$0xff]   ;;  %v227_v20 = vld [vmem:[%s327_s1 + $0x8] sm:$0xff]  }
   0x4   :  { %219 = vmatprep.mubr.msk.bf16.mxu0 %vm70_vm0, %v226_v5  ;;  %v200_v6 = vld [vmem:[%s328_s0] sm:$0xff]  }
   0x5   :  { %v201_v7 = vunpack.c.l.bf16 %v200_v6  ;;  %v202_v11 = vunpack.c.h.bf16 %v200_v6 }
   0x6   :  { %48 = vperm.xlu1 %225, %v40_v3  }
   0x7   :  { %34 = vperm.xlu0 %224, %v26_v4  }
  0x81   :  { %v44_v8 = vpop.permute.xlu1 %43 }
  0x82   :  { %v30_v9 = vpop.permute.xlu0 %29 }
  0x83   :  { %v37_v10 = vmul.f32 %v201_v7, %v30_v9 }
  0x85   :  { %v51_v13 = vadd.f32 %v44_v8, %v37_v10  ;;  %v49_v15 = vpop.permute.xlu1 %48 }
  0x86   :  { %v35_v12 = vpop.permute.xlu0 %34 }
  0x87   :  { %v38_v14 = vmul.f32 %v202_v11, %v35_v12  ;;  %v53_v17 = vmax.f32 %v51_v13, 0.0 }
  0x89   :  { %v52_v16 = vadd.f32 %v49_v15, %v38_v14 }
  0x8b   :  { %v54_v18 = vmax.f32 %v52_v16, 0.0 }
  0x8d   :  { %v55_v19 = vpack.c.bf16 %v54_v18, %v53_v17 }
  0x8f   :  { %217 = vmatprep.subr.bf16.mxu0 %v55_v19 }
  0x90   :  { %218 = vmatpush3.bf16.msra.mxu0 %v55_v19 }
  0x93   :  { %220 = vmatmul.mubr.msk.bf16.vlgmr.msra.gmra.mrb[0].mxu0 %vm70_vm0, %v227_v20 }
 0x166   :  { %v221_v21 = vpop.f32.mrb[0].mxu0 }
 0x167   :  { %150 = vadd.xlane.f32.xlu0 %v221_v21  ;;  %v111_v22 = vpop.f32.mrb[1].mxu0  ;;  %v161_v28 = vmul.f32 %v221_v21, %v221_v21 }
 0x168   :  { %v222_v23 = vpop.f32.mrb[2].mxu0  ;;  %v159_v27 = vmul.f32 %v111_v22, %v111_v22 }
 0x169   :  { %v211_v24 = vpack.c.bf16 %v222_v23, %v221_v21  ;;  %v114_v25 = vpop.f32.mrb[3].mxu0  ;;  %v162_v30 = vmul.f32 %v222_v23, %v222_v23 }
 0x16a   :  { %v206_v26 = vpack.c.bf16 %v114_v25, %v111_v22  ;;  %148 = vadd.xlane.f32.xlu1 %v114_v25  ;;  %v160_v29 = vmul.f32 %v114_v25, %v114_v25 }
 0x16b   :  { %213 = vst [vmem:[%s329_s4 + $0x8] sm:$0xff] %v211_v24   ;;  %146 = vadd.xlane.f32.xlu0 %v111_v22 }
 0x16c   :  { %207 = vst [vmem:[%s329_s4] sm:$0xff] %v206_v26  }
 0x16e   :  { %163 = vadd.xlane.f32.xlu1 %v159_v27 }
 0x16f   :  { %152 = vadd.xlane.f32.xlu0 %v222_v23 }
 0x172   :  { %167 = vadd.xlane.f32.xlu1 %v161_v28 }
 0x173   :  { %165 = vadd.xlane.f32.xlu0 %v160_v29 }
 0x177   :  { %169 = vadd.xlane.f32.xlu0 %v162_v30 }
 0x1f4   :  { %v151_v31 = vpop.xlane.xlu0 %150 }
 0x1f5   :  { %157 = vst.msk [vmem:[%s330_s5 + $0x10] sm:$0xff] %vm154_vm1, %v151_v31 }
 0x1f7   :  { %v149_v32 = vpop.xlane.xlu1 %148 }
 0x1f8   :  { %156 = vst.msk [vmem:[%s330_s5 + $0x8] sm:$0xff] %vm154_vm1, %v149_v32  ;;  %v147_v33 = vpop.xlane.xlu0 %146 }
 0x1f9   :  { %155 = vst.msk [vmem:[%s330_s5] sm:$0xff] %vm154_vm1, %v147_v33 }
 0x1fb   :  { %v164_v34 = vpop.xlane.xlu1 %163 }
 0x1fc   :  { %171 = vst.msk [vmem:[%s331_s6] sm:$0xff] %vm154_vm1, %v164_v34  ;;  %v153_v35 = vpop.xlane.xlu0 %152 }
 0x1fd   :  { %158 = vst.msk [vmem:[%s330_s5 + $0x18] sm:$0xff] %vm154_vm1, %v153_v35 }
 0x1ff   :  { %v168_v36 = vpop.xlane.xlu1 %167 }
 0x200   :  { %173 = vst.msk [vmem:[%s331_s6 + $0x10] sm:$0xff] %vm154_vm1, %v168_v36  ;;  %v166_v37 = vpop.xlane.xlu0 %165 }
 0x201   :  { %172 = vst.msk [vmem:[%s331_s6 + $0x8] sm:$0xff] %vm154_vm1, %v166_v37 }
 0x204   :  { %v170_v38 = vpop.xlane.xlu0 %169 }
 0x205   :  { %174 = vst.msk [vmem:[%s331_s6 + $0x18] sm:$0xff] %vm154_vm1, %v170_v38 }

// kernel: encoder_forward.46
= control target key start
LH: loop header
LB: loop body
LE: loop exit
PB: predicated region body
PF: predicated region fallthrough
CT: control target
= control target key end

     0   :  { %v137_v0 = vmov 0   ;;  %s194_s1 = inlined_call_operand.vmem [shape: f32[32,1], index: 1, kind: input, shape index: {}]   ;;  %s195_s2 = inlined_call_operand.vmem [shape: f32[32,1], index: 2, kind: input, shape index: {}]   ;;  %s196_s0 = inlined_call_operand.vmem [shape: bf16[32,128], index: 0, kind: input, shape index: {}]   ;;  %s197_s3 = inlined_call_operand.vmem [shape: bf16[32,128], index: 3, kind: output, shape index: {}]  }
   0x1   :  { %136 = vset.pattern.permute.xlu1 %v137_v0  ;;  %135 = vset.pattern.permute.xlu0 %v137_v0  ;;  %v24_v1 = vld [vmem:[%s194_s1 + $0x10] sm:$0xff]  ;;  %v22_v2 = vld [vmem:[%s194_s1] sm:$0xff]  ;;  %v25_v3 = vld [vmem:[%s194_s1 + $0x18] sm:$0xff] }
   0x2   :  { %38 = vperm.xlu1 %136, %v24_v1   ;;  %28 = vperm.xlu0 %135, %v22_v2   ;;  %v23_v4 = vld [vmem:[%s194_s1 + $0x8] sm:$0xff]  ;;  %v50_v6 = vld [vmem:[%s195_s2] sm:$0xff]  ;;  %v53_v7 = vld [vmem:[%s195_s2 + $0x18] sm:$0xff] }
   0x3   :  { %v51_v5 = vld [vmem:[%s195_s2 + $0x8] sm:$0xff]  ;;  %v52_v8 = vld [vmem:[%s195_s2 + $0x10] sm:$0xff]  ;;  %v115_v11 = vld [vmem:[%s196_s0] sm:$0xff]  }
   0x4   :  { %v116_v12 = vunpack.c.l.bf16 %v115_v11  ;;  %v117_v13 = vunpack.c.h.bf16 %v115_v11  ;;  %v132_v14 = vld [vmem:[%s196_s0 + $0x8] sm:$0xff]  }
   0x5   :  { %v120_v17 = vunpack.c.l.bf16 %v132_v14  ;;  %v121_v19 = vunpack.c.h.bf16 %v132_v14 }
   0x6   :  { %43 = vperm.xlu1 %136, %v25_v3   ;;  %33 = vperm.xlu0 %135, %v23_v4  }
   0xa   :  { %61 = vperm.xlu1 %136, %v51_v5   ;;  %56 = vperm.xlu0 %135, %v50_v6  }
   0xe   :  { %71 = vperm.xlu1 %136, %v53_v7   ;;  %66 = vperm.xlu0 %135, %v52_v8  }
  0x81   :  { %v39_v9 = vpop.permute.xlu1 %38  ;;  %v29_v10 = vpop.permute.xlu0 %28 }
  0x82   :  { %v46_v18 = vmul.f32 %v116_v12, %v29_v10  ;;  %v48_v25 = vmul.f32 %v120_v17, %v39_v9 }
  0x85   :  { %v44_v15 = vpop.permute.xlu1 %43  ;;  %v34_v16 = vpop.permute.xlu0 %33 }
  0x86   :  { %v47_v20 = vmul.f32 %v117_v13, %v34_v16  ;;  %v49_v26 = vmul.f32 %v121_v19, %v44_v15 }
  0x89   :  { %v62_v21 = vpop.permute.xlu1 %61  ;;  %v57_v22 = vpop.permute.xlu0 %56 }
  0x8a   :  { %v75_v23 = vadd.f32 %v62_v21, %v47_v20  ;;  %v74_v24 = vadd.f32 %v57_v22, %v46_v18 }
  0x8c   :  { %v79_v27 = vmax.f32 %v75_v23, 0.0  ;;  %v78_v28 = vmax.f32 %v74_v24, 0.0 }
  0x8d   :  { %v72_v29 = vpop.permute.xlu1 %71  ;;  %v67_v30 = vpop.permute.xlu0 %66 }
  0x8e   :  { %v125_v31 = vpack.c.bf16 %v79_v27, %v78_v28  ;;  %v77_v32 = vadd.f32 %v72_v29, %v49_v26  ;;  %v76_v33 = vadd.f32 %v67_v30, %v48_v25 }
  0x90   :  { %126 = vst [vmem:[%s197_s3] sm:$0xff] %v125_v31   ;;  %v81_v34 = vmax.f32 %v77_v32, 0.0  ;;  %v80_v35 = vmax.f32 %v76_v33, 0.0 }
  0x92   :  { %v130_v36 = vpack.c.bf16 %v81_v34, %v80_v35 }
  0x94   :  { %133 = vst [vmem:[%s197_s3 + $0x8] sm:$0xff] %v130_v36  }

// kernel: encoder_forward.47
= control target key start
LH: loop header
LB: loop body
LE: loop exit
PB: predicated region body
PF: predicated region fallthrough
CT: control target
= control target key end

     0   :  { %v355_v1 = vmov 0.0   ;;  %vm356_vm0 = vmmov 0   ;;  %vm171_vm1 = vcmask 261120   ;;  %vm259_vm2 = vcmask 7168   ;;  %s451_s0 = inlined_call_operand.vmem [shape: bf16[288,128], index: 0, kind: input, shape index: {}]   ;;  %s452_s1 = inlined_call_operand.vmem [shape: bf16[8,288], index: 1, kind: input, shape index: {}]   ;;  %s453_s2 = inlined_call_operand.vmem [shape: bf16[8,128], index: 2, kind: output, shape index: {0}]   ;;  %s454_s3 = inlined_call_operand.vmem [shape: f32[1,8,1], index: 3, kind: output, shape index: {1}]   ;;  %s455_s4 = inlined_call_operand.vmem [shape: f32[1,8,1], index: 4, kind: output, shape index: {2}]  }
   0x1   :  { %v334_v0 = vld [vmem:[%s451_s0 + $0x40] sm:$0xff]   ;;  %324 = vmatprep.subr.bf16.mxu1 %v355_v1  ;;  %328 = vmatprep.mubr.msk.bf16.mxu1 %vm356_vm0, %v355_v1  ;;  %v336_v3 = vld [vmem:[%s451_s0 + $0x48] sm:$0xff]   ;;  %v338_v5 = vld [vmem:[%s451_s0 + $0x50] sm:$0xff]  }
   0x2   :  { %v335_v2 = vld [vmem:[%s451_s0] sm:$0xff]   ;;  %299 = vmatprep.subr.bf16.mxu0 %v334_v0  ;;  %v337_v4 = vld [vmem:[%s451_s0 + $0x8] sm:$0xff]   ;;  %v339_v6 = vld [vmem:[%s451_s0 + $0x10] sm:$0xff]  }
   0x3   :  { %300 = vmatpush3.bf16.msra.mxu0 %v335_v2  ;;  %v340_v7 = vld [vmem:[%s451_s0 + $0x58] sm:$0xff]   ;;  %v342_v9 = vld [vmem:[%s451_s0 + $0x60] sm:$0xff]   ;;  %v344_v12 = vld [vmem:[%s451_s0 + $0x68] sm:$0xff]  }
   0x4   :  { %301 = vmatprep.subr.bf16.mxu0 %v336_v3  ;;  %v341_v8 = vld [vmem:[%s451_s0 + $0x18] sm:$0xff]   ;;  %v348_v10 = vld [vmem:[%s451_s0 + $0x80] sm:$0xff]   ;;  %v351_v13 = vld [vmem:[%s451_s0 + $0x88] sm:$0xff]  }
   0x5   :  { %v343_v11 = vld [vmem:[%s451_s0 + $0x20] sm:$0xff]   ;;  %325 = vmatpush3.bf16.msra.mxu1 %v348_v10  ;;  %v345_v15 = vld [vmem:[%s451_s0 + $0x28] sm:$0xff]   ;;  %v346_v18 = vld [vmem:[%s451_s0 + $0x70] sm:$0xff]  }
   0x6   :  { %326 = vmatprep.subr.bf16.mxu1 %v355_v1  ;;  %v51_v14 = vld [vmem:[%s452_s1] sm:$0xff]  ;;  %v354_v17 = vld [vmem:[%s452_s1 + $0x8] ss:$0 sps:$4 sm:$0xff]   ;;  %v347_v19 = vld [vmem:[%s451_s0 + $0x30] sm:$0xff]  }
   0x7   :  { %302 = vmatpush3.bf16.msra.mxu0 %v337_v4  ;;  %v278_v16 = vcombine.high %v51_v14, %v51_v14  ;;  %v349_v20 = vld [vmem:[%s451_s0 + $0x78] sm:$0xff]   ;;  %v277_v22 = vcombine.low %v51_v14, %v51_v14 }
   0x8   :  { %303 = vmatprep.subr.bf16.mxu0 %v338_v5  ;;  %v350_v21 = vld [vmem:[%s451_s0 + $0x38] sm:$0xff]  }
   0x9   :  { %327 = vmatpush3.bf16.msra.mxu1 %v351_v13  ;;  %207 = vmatprep.mubr.bf16.mxu0 %v278_v16 }
   0xb   :  { %304 = vmatpush3.bf16.msra.mxu0 %v339_v6 }
   0xc   :  { %305 = vmatprep.subr.bf16.mxu0 %v340_v7  ;;  %329 = vmatmul.mubr.msk.bf16.vlgmr.msra.gmra.mrb[0].mxu1 %vm171_vm1, %v354_v17 }
   0xf   :  { %306 = vmatpush3.bf16.msra.mxu0 %v341_v8 }
  0x10   :  { %307 = vmatprep.subr.bf16.mxu0 %v342_v9 }
  0x13   :  { %308 = vmatpush3.bf16.msra.mxu0 %v343_v11 }
  0x14   :  { %309 = vmatprep.subr.bf16.mxu0 %v344_v12 }
  0x17   :  { %310 = vmatpush3.bf16.msra.mxu0 %v345_v15 }
  0x18   :  { %311 = vmatprep.subr.bf16.mxu0 %v346_v18 }
  0x1b   :  { %312 = vmatpush3.bf16.msra.mxu0 %v347_v19 }
  0x1c   :  { %313 = vmatprep.subr.bf16.mxu0 %v349_v20 }
  0x1f   :  { %314 = vmatpush3.bf16.msra.mxu0 %v350_v21 }
  0x22   :  { %208 = vmatmul.mubr.bf16.vlgmr.msra.gmra.mrb[0].mxu0 %v277_v22 }
  0xdf   :  { %v249_v23 = vpop.f32.mrb[0].mxu1 }
  0xe0   :  { %v330_v24 = vpop.f32.mrb[1].mxu1 }
  0xe1   :  { %v252_v25 = vpop.f32.mrb[2].mxu1 }
  0xe2   :  { %v331_v26 = vpop.f32.mrb[3].mxu1 }
  0xf5   :  { %v315_v27 = vpop.f32.mrb[0].mxu0 }
  0xf6   :  { %v316_v28 = vpop.f32.mrb[1].mxu0 }
  0xf7   :  { %v317_v29 = vadd.f32 %v316_v28, %v315_v27  ;;  %v318_v30 = vpop.f32.mrb[2].mxu0 }
  0xf8   :  { %v319_v31 = vpop.f32.mrb[3].mxu0 }
  0xf9   :  { %v250_v32 = vadd.f32 %v317_v29, %v249_v23 }
  0xfb   :  { %v255_v33 = vpack.c.bf16 %v250_v32, %v250_v32  ;;  %257 = vadd.xlane.f32.xlu0 %v250_v32  ;;  %v261_v34 = vmul.f32 %v250_v32, %v250_v32 }
  0xfd   :  { %256 = vst [vmem:[%s453_s2] sm:$0xf] %v255_v33 }
  0xff   :  { %262 = vadd.xlane.f32.xlu0 %v261_v34 }
 0x188   :  { %v258_v35 = vpop.xlane.xlu0 %257 }
 0x189   :  { %260 = vst.msk [vmem:[%s454_s3] sm:$0xff] %vm259_vm2, %v258_v35 }
 0x18c   :  { %v263_v36 = vpop.xlane.xlu0 %262 }
 0x18d   :  { %264 = vst.msk [vmem:[%s455_s4] sm:$0xff] %vm259_vm2, %v263_v36 }

// kernel: encoder_forward.48
= control target key start
LH: loop header
LB: loop body
LE: loop exit
PB: predicated region body
PF: predicated region fallthrough
CT: control target
= control target key end

     0   :  { %v330_v0 = vmov 0   ;;  %vm155_vm0 = vcmask 130048   ;;  %vm95_vm1 = vcmask 64512   ;;  %vm102_vm2 = vcmask 1043456   ;;  %s442_s3 = inlined_call_operand.vmem [shape: f32[24,1], index: 3, kind: input, shape index: {}]   ;;  %s443_s4 = inlined_call_operand.vmem [shape: f32[24,1], index: 4, kind: input, shape index: {}]   ;;  %s444_s2 = inlined_call_operand.vmem [shape: bf16[32,24], index: 2, kind: input, shape index: {}]   ;;  %s445_s0 = inlined_call_operand.vmem [shape: bf16[16,128], index: 0, kind: input, shape index: {}]   ;;  %s446_s1 = inlined_call_operand.vmem [shape: bf16[8,128], index: 1, kind: input, shape index: {}]   ;;  %s447_s5 = inlined_call_operand.vmem [shape: bf16[32,128], index: 5, kind: output, shape index: {0}]   ;;  %s448_s6 = inlined_call_operand.vmem [shape: f32[1,32,1], index: 6, kind: output, shape index: {1}]   ;;  %s449_s7 = inlined_call_operand.vmem [shape: f32[1,32,1], index: 7, kind: output, shape index: {2}]  }
   0x1   :  { %327 = vset.pattern.permute.xlu1 %v330_v0  ;;  %326 = vset.pattern.permute.xlu0 %v330_v0  ;;  %v65_v1 = vld [vmem:[%s442_s3 + $0x10] sm:$0xff]  ;;  %v28_v2 = vld [vmem:[%s442_s3] sm:$0xff]  ;;  %v29_v4 = vld [vmem:[%s442_s3 + $0x8] sm:$0xff]  ;;  %s331_s3 = smov 112   ;;  %vm239_vm3 = vcmask 7168  }
   0x2   :  { %68 = vperm.xlu1 %327, %v65_v1   ;;  %32 = vperm.xlu0 %326, %v28_v2   ;;  %v42_v3 = vld [vmem:[%s443_s4] sm:$0xff]  ;;  %v72_v5 = vld [vmem:[%s443_s4 + $0x10] sm:$0xff]  ;;  %v43_v6 = vld [vmem:[%s443_s4 + $0x8] sm:$0xff] }
   0x3   :  { %v328_v7 = vld [vmem:[%s444_s2] sm:$0xff]   ;;  %v329_v8 = vld [vmem:[%s444_s2 + $0x8] sm:$0xff]  }
   0x4   :  { %315 = vmatprep.mubr.msk.bf16.mxu0 %vm155_vm0, %v328_v7  ;;  %v287_v9 = vld [vmem:[%s445_s0] sm:$0xff]  }
   0x5   :  { %v63_v11 = vld [vmem:[%s446_s1] sm:$0xf]  ;;  %v288_v13 = vunpack.c.l.bf16 %v287_v9  ;;  %v289_v15 = vunpack.c.h.bf16 %v287_v9 }
   0x6   :  { %46 = vperm.xlu1 %327, %v42_v3   ;;  %37 = vperm.xlu0 %326, %v29_v4   ;;  %v64_v14 = vunpack.c.l.bf16 %v63_v11 }
   0xa   :  { %75 = vperm.xlu1 %327, %v72_v5   ;;  %51 = vperm.xlu0 %326, %v43_v6  }
   0xe   :  { %91 = vrot.lane.b32.xlu0 %v328_v7, %s331_s3  ;;  %93 = vrot.lane.b32.xlu1 %v329_v8, %s331_s3 }
  0x81   :  { %v69_v10 = vpop.permute.xlu1 %68  ;;  %v33_v12 = vpop.permute.xlu0 %32 }
  0x82   :  { %v40_v18 = vmul.f32 %v288_v13, %v33_v12  ;;  %v71_v19 = vmul.f32 %v69_v10, %v64_v14 }
  0x85   :  { %v47_v16 = vpop.permute.xlu1 %46  ;;  %v38_v17 = vpop.permute.xlu0 %37 }
  0x86   :  { %v54_v20 = vadd.f32 %v47_v16, %v40_v18  ;;  %v41_v21 = vmul.f32 %v289_v15, %v38_v17 }
  0x88   :  { %v56_v26 = vmax.f32 %v54_v20, 0.0 }
  0x89   :  { %v76_v22 = vpop.permute.xlu1 %75  ;;  %v52_v23 = vpop.permute.xlu0 %51 }
  0x8a   :  { %v78_v24 = vadd.f32 %v76_v22, %v71_v19  ;;  %v55_v25 = vadd.f32 %v52_v23, %v41_v21 }
  0x8c   :  { %v79_v27 = vmax.f32 %v78_v24, 0.0  ;;  %v57_v28 = vmax.f32 %v55_v25, 0.0 }
  0x8d   :  { %v92_v29 = vpop.permute.xlu0 %91  ;;  %v94_v33 = vpop.permute.xlu1 %93 }
  0x8e   :  { %v80_v30 = vpack.c.bf16 %v79_v27, %v79_v27  ;;  %v58_v31 = vpack.c.bf16 %v57_v28, %v56_v26  ;;  %309 = vmatprep.mubr.msk.bf16.mxu1 %vm95_vm1, %v92_v29 }
  0x90   :  { %323 = vmatprep.subr.msk.bf16.mxu1 %vm102_vm2, %v80_v30  ;;  %313 = vmatprep.subr.bf16.mxu0 %v58_v31  ;;  %v104_v32 = vsel %vm102_vm2, %v80_v30, 0 }
  0x91   :  { %308 = vmatpush3.bf16.msra.mxu1 %v104_v32  ;;  %314 = vmatpush3.bf16.msra.mxu0 %v58_v31 }
  0x94   :  { %310 = vmatmul.mubr.msk.bf16.vlgmr.msra.gmra.mrb[0].mxu1 %vm95_vm1, %v94_v33  ;;  %316 = vmatmul.mubr.msk.bf16.vlgmr.msra.gmra.mrb[0].mxu0 %vm155_vm0, %v329_v8 }
 0x167   :  { %v311_v34 = vpop.f32.mrb[0].mxu1  ;;  %v317_v35 = vpop.f32.mrb[0].mxu0 }
 0x168   :  { %v205_v36 = vadd.f32 %v317_v35, %v311_v34  ;;  %v140_v37 = vpop.f32.mrb[1].mxu1  ;;  %v196_v38 = vpop.f32.mrb[1].mxu0 }
 0x169   :  { %v197_v39 = vadd.f32 %v196_v38, %v140_v37  ;;  %v312_v40 = vpop.f32.mrb[2].mxu1  ;;  %v318_v41 = vpop.f32.mrb[2].mxu0 }
 0x16a   :  { %v208_v42 = vadd.f32 %v318_v41, %v312_v40  ;;  %v143_v43 = vpop.f32.mrb[3].mxu1  ;;  %235 = vadd.xlane.f32.xlu0 %v205_v36  ;;  %v199_v44 = vpop.f32.mrb[3].mxu0  ;;  %v246_v49 = vmul.f32 %v205_v36, %v205_v36 }
 0x16b   :  { %v200_v45 = vadd.f32 %v199_v44, %v143_v43  ;;  %v244_v48 = vmul.f32 %v197_v39, %v197_v39 }
 0x16c   :  { %v298_v46 = vpack.c.bf16 %v208_v42, %v205_v36  ;;  %v247_v51 = vmul.f32 %v208_v42, %v208_v42 }
 0x16d   :  { %v293_v47 = vpack.c.bf16 %v200_v45, %v197_v39  ;;  %233 = vadd.xlane.f32.xlu1 %v200_v45  ;;  %v245_v50 = vmul.f32 %v200_v45, %v200_v45 }
 0x16e   :  { %300 = vst [vmem:[%s447_s5 + $0x8] sm:$0xff] %v298_v46   ;;  %231 = vadd.xlane.f32.xlu0 %v197_v39 }
 0x16f   :  { %294 = vst [vmem:[%s447_s5] sm:$0xff] %v293_v47  }
 0x171   :  { %248 = vadd.xlane.f32.xlu1 %v244_v48 }
 0x172   :  { %237 = vadd.xlane.f32.xlu0 %v208_v42 }
 0x175   :  { %252 = vadd.xlane.f32.xlu1 %v246_v49 }
 0x176   :  { %250 = vadd.xlane.f32.xlu0 %v245_v50 }
 0x17a   :  { %254 = vadd.xlane.f32.xlu0 %v247_v51 }
 0x1f7   :  { %v236_v52 = vpop.xlane.xlu0 %235 }
 0x1f8   :  { %242 = vst.msk [vmem:[%s448_s6 + $0x10] sm:$0xff] %vm239_vm3, %v236_v52 }
 0x1fa   :  { %v234_v53 = vpop.xlane.xlu1 %233 }
 0x1fb   :  { %241 = vst.msk [vmem:[%s448_s6 + $0x8] sm:$0xff] %vm239_vm3, %v234_v53  ;;  %v232_v54 = vpop.xlane.xlu0 %231 }
 0x1fc   :  { %240 = vst.msk [vmem:[%s448_s6] sm:$0xff] %vm239_vm3, %v232_v54 }
 0x1fe   :  { %v249_v55 = vpop.xlane.xlu1 %248 }
 0x1ff   :  { %256 = vst.msk [vmem:[%s449_s7] sm:$0xff] %vm239_vm3, %v249_v55  ;;  %v238_v56 = vpop.xlane.xlu0 %237 }
 0x200   :  { %243 = vst.msk [vmem:[%s448_s6 + $0x18] sm:$0xff] %vm239_vm3, %v238_v56 }
 0x202   :  { %v253_v57 = vpop.xlane.xlu1 %252 }
 0x203   :  { %258 = vst.msk [vmem:[%s449_s7 + $0x10] sm:$0xff] %vm239_vm3, %v253_v57  ;;  %v251_v58 = vpop.xlane.xlu0 %250 }
 0x204   :  { %257 = vst.msk [vmem:[%s449_s7 + $0x8] sm:$0xff] %vm239_vm3, %v251_v58 }
 0x207   :  { %v255_v59 = vpop.xlane.xlu0 %254 }
 0x208   :  { %259 = vst.msk [vmem:[%s449_s7 + $0x18] sm:$0xff] %vm239_vm3, %v255_v59 }

// kernel: encoder_forward.51
= control target key start
LH: loop header
LB: loop body
LE: loop exit
PB: predicated region body
PF: predicated region fallthrough
CT: control target
= control target key end

     0   :  { %14 = vsyncpa [#allocation3], 0  ;;  %v422_v2 = vmov 0   ;;  %s546_s0 = inlined_call_operand.vmem [shape: bf16[16,128], index: 0, kind: input, shape index: {}]   ;;  %s547_s1 = inlined_call_operand.vmem [shape: bf16[8,128], index: 1, kind: input, shape index: {}]   ;;  %s548_s2 = inlined_call_operand.vmem [shape: bf16[8,128], index: 2, kind: input, shape index: {}]   ;;  %s549_s3 = inlined_call_operand.vmem [shape: bf16[16,32], index: 3, kind: input, shape index: {}]   ;;  %s550_s4 = inlined_call_operand.vmem [shape: f32[32,1], index: 4, kind: input, shape index: {}]   ;;  %s551_s5 = inlined_call_operand.vmem [shape: f32[32,1], index: 5, kind: input, shape index: {}]   ;;  %s552_s6 = inlined_call_operand.vmem [shape: bf16[16,128], index: 6, kind: output, shape index: {0}]   ;;  %s553_s7 = inlined_call_operand.hbm [shape: f32[1,16,1], index: 7, kind: output, shape index: {1}]   ;;  %s554_s8 = inlined_call_operand.hbm [shape: f32[1,16,1], index: 8, kind: output, shape index: {2}]  }
   0x1   :  { %v47_v0 = vld [vmem:[%s551_s5] sm:$0xff]  ;;  %372 = vset.pattern.permute.xlu1 %v422_v2  ;;  %371 = vset.pattern.permute.xlu0 %v422_v2  ;;  %v48_v3 = vld [vmem:[%s551_s5 + $0x8] sm:$0xff] }
   0x2   :  { %v33_v1 = vld [vmem:[%s550_s4] sm:$0xff]  ;;  %51 = vperm.xlu1 %372, %v47_v0   ;;  %v34_v4 = vld [vmem:[%s550_s4 + $0x8] sm:$0xff] }
   0x3   :  { %37 = vperm.xlu0 %371, %v33_v1  }
   0x4   :  { %15 = vsyncpa [#allocation5], 0  ;;  %v187_v5 = vld [vmem:[%s550_s4 + $0x18] sm:$0xff]  ;;  %v68_v6 = vld [vmem:[%s550_s4 + $0x10] sm:$0xff]  ;;  %v423_v9 = vmov 0.0   ;;  %vm424_vm0 = vmmov 0  }
   0x5   :  { %v194_v7 = vld [vmem:[%s551_s5 + $0x18] sm:$0xff]  ;;  %v75_v8 = vld [vmem:[%s551_s5 + $0x10] sm:$0xff]  ;;  %344 = vmatprep.subr.bf16.mxu0 %v423_v9  ;;  %338 = vmatprep.subr.bf16.mxu1 %v423_v9  ;;  %v373_v10 = vld [vmem:[%s549_s3] sm:$0xff]   ;;  %s425_s4 = smov 104   ;;  %s426_s23 = smov 112   ;;  %vm140_vm1 = vcmask 130048  }
   0x6   :  { %56 = vperm.xlu1 %372, %v48_v3   ;;  %346 = vmatprep.mubr.msk.bf16.mxu0 %vm424_vm0, %v423_v9  ;;  %v324_v11 = vld [vmem:[%s546_s0] sm:$0xff]   ;;  %vm95_vm2 = vcmask 1043456   ;;  %vm91_vm3 = vcmask 64512   ;;  %vm268_vm4 = vcmask 7168   ;;  %s428_s29 = smov [#allocation4]  }
   0x7   :  { %42 = vperm.xlu0 %371, %v34_v4   ;;  %340 = vmatprep.mubr.msk.bf16.mxu1 %vm424_vm0, %v423_v9  ;;  %v325_v12 = vunpack.c.l.bf16 %v324_v11  ;;  %v326_v16 = vunpack.c.h.bf16 %v324_v11  ;;  %v185_v19 = vld [vmem:[%s548_s2] sm:$0xf]  ;;  %s427_s2 = smov [#allocation2]   ;;  %s298_s30 = sshll.u32 %s428_s29, 4  ;;  %s299_s30 = int_to_ptr.vmem [resolvable:$true] %s298_s30 }
   0x8   :  { %v66_v20 = vld [vmem:[%s547_s1] sm:$0xf]  ;;  %v186_v24 = vunpack.c.l.bf16 %v185_v19  ;;  %s286_s28 = sshll.u32 %s427_s2, 4  ;;  %s287_s28 = int_to_ptr.vmem [resolvable:$true] %s286_s28 }
   0x9   :  { %v67_v25 = vunpack.c.l.bf16 %v66_v20  ;;  %s374_s9 = scalar_lea.vmem %s287_s28, 256  ;;  %p379_p1 = scmp.lt.s32.totalorder %s287_s28, %s287_s28 }
   0xa   :  { %190 = vperm.xlu1 %372, %v187_v5   ;;  %p375_p0 = scmp.ne.s32.totalorder %s287_s28, %s374_s9  ;;  %p380_p2 = scmp.lt.s32.totalorder %s374_s9, %s374_s9 }
   0xb   :  { %71 = vperm.xlu0 %371, %v68_v6  }
   0xc   :  { %p381_p3 = por %p380_p2, %p379_p1 }
   0xe   :  { %197 = vperm.xlu1 %372, %v194_v7   ;;  %p382_p4 = pnand %p381_p3, %p375_p0 }
   0xf   :  { %78 = vperm.xlu0 %371, %v75_v8  }
  0x12   :  { %203 = vrot.lane.b32.xlu1 %v373_v10, %s425_s4 }
  0x13   :  { %89 = vrot.lane.b32.xlu0 %v373_v10, %s426_s23 }
  0x81   :  { %v52_v13 = vpop.permute.xlu1 %51 }
  0x82   :  { %v38_v14 = vpop.permute.xlu0 %37 }
  0x83   :  { %v45_v15 = vmul.f32 %v325_v12, %v38_v14 }
  0x85   :  { %v57_v17 = vpop.permute.xlu1 %56  ;;  %v59_v21 = vadd.f32 %v52_v13, %v45_v15 }
  0x86   :  { %v43_v18 = vpop.permute.xlu0 %42 }
  0x87   :  { %v46_v22 = vmul.f32 %v326_v16, %v43_v18  ;;  %v61_v28 = vmax.f32 %v59_v21, 0.0 }
  0x89   :  { %v60_v23 = vadd.f32 %v57_v17, %v46_v22  ;;  %v191_v26 = vpop.permute.xlu1 %190 }
  0x8a   :  { %v72_v27 = vpop.permute.xlu0 %71  ;;  %v193_v30 = vmul.f32 %v191_v26, %v186_v24 }
  0x8b   :  { %v62_v29 = vmax.f32 %v60_v23, 0.0  ;;  %v74_v31 = vmul.f32 %v72_v27, %v67_v25 }
  0x8d   :  { %v63_v32 = vpack.c.bf16 %v62_v29, %v61_v28  ;;  %v198_v33 = vpop.permute.xlu1 %197 }
  0x8e   :  { %v79_v34 = vpop.permute.xlu0 %78  ;;  %v200_v35 = vadd.f32 %v198_v33, %v193_v30 }
  0x8f   :  { %v81_v36 = vadd.f32 %v79_v34, %v74_v31  ;;  %345 = vmatpush3.bf16.msra.mxu0 %v63_v32 }
  0x90   :  { %350 = vmatprep.subr.bf16.mxu0 %v423_v9  ;;  %v201_v37 = vmax.f32 %v200_v35, 0.0 }
  0x91   :  { %v82_v38 = vmax.f32 %v81_v36, 0.0  ;;  %v204_v44 = vpop.permute.xlu1 %203 }
  0x92   :  { %347 = vmatmul.mubr.msk.bf16.vlgmr.msra.gmra.mrb[0].mxu0 %vm140_vm1, %v373_v10  ;;  %v202_v39 = vpack.c.bf16 %v201_v37, %v201_v37  ;;  %v90_v43 = vpop.permute.xlu0 %89 }
  0x93   :  { %v83_v40 = vpack.c.bf16 %v82_v38, %v82_v38  ;;  %352 = vmatprep.mubr.msk.bf16.mxu0 %vm424_vm0, %v423_v9 }
  0x94   :  { %v209_v42 = vsel %vm95_vm2, %v202_v39, 0 }
  0x95   :  { %v97_v41 = vsel %vm95_vm2, %v83_v40, 0  ;;  %351 = vmatpush3.bf16.msra.mxu0 %v209_v42 }
  0x96   :  { %339 = vmatpush3.bf16.msra.mxu1 %v97_v41 }
  0x99   :  { %341 = vmatmul.mubr.msk.bf16.vlgmr.msra.gmra.mrb[0].mxu1 %vm91_vm3, %v90_v43 }
  0x9e   :  { %353 = vmatmul.mubr.msk.bf16.vlgmr.msra.gmra.mrb[0].mxu0 %vm91_vm3, %v204_v44 }
 0x16c   :  { %v133_v45 = vpop.f32.mrb[0].mxu1 }
 0x16d   :  { %v342_v46 = vpop.f32.mrb[1].mxu1 }
 0x16e   :  { %v136_v47 = vpop.f32.mrb[2].mxu1 }
 0x16f   :  { %v343_v48 = vpop.f32.mrb[3].mxu1 }
 0x171   :  { %v245_v49 = vpop.f32.mrb[0].mxu0 }
 0x172   :  { %v356_v50 = vadd.f32 %v245_v49, %v133_v45  ;;  %v354_v51 = vpop.f32.mrb[1].mxu0 }
 0x173   :  { %v248_v52 = vpop.f32.mrb[2].mxu0 }
 0x174   :  { %v357_v53 = vadd.f32 %v248_v52, %v136_v47  ;;  %264 = vadd.xlane.f32.xlu0 %v356_v50  ;;  %v355_v54 = vpop.f32.mrb[3].mxu0  ;;  %v271_v56 = vmul.f32 %v356_v50, %v356_v50 }
 0x176   :  { %v330_v55 = vpack.c.bf16 %v357_v53, %v356_v50  ;;  %266 = vadd.xlane.f32.xlu1 %v357_v53  ;;  %v272_v57 = vmul.f32 %v357_v53, %v357_v53 }
 0x178   :  { %331 = vst [vmem:[%s552_s6] sm:$0xff] %v330_v55   ;;  %273 = vadd.xlane.f32.xlu0 %v271_v56 }
 0x17c   :  { %275 = vadd.xlane.f32.xlu0 %v272_v57 }
 0x201   :  { %v265_v58 = vpop.xlane.xlu0 %264 }
 0x202   :  { %269 = vst.msk [vmem:[#allocation2] sm:$0xff] %vm268_vm4, %v265_v58 }
 0x203   :  { %v267_v59 = vpop.xlane.xlu1 %266 }
 0x204   :  { %270 = vst.msk [vmem:[#allocation2 + $0x8] sm:$0xff] %vm268_vm4, %v267_v59 }
 0x205   :  { %v274_v60 = vpop.xlane.xlu0 %273 }
 0x206   :  { %385 = shalt.err (!%p382_p4)
}
 0x207   :  { %s386_s11 = scalar_lea.hbm %s553_s7, 256 }
 0x208   :  { %p387_p5 = scmp.ne.s32.totalorder %s553_s7, %s386_s11  ;;  %p390_p6 = scmp.lt.u32.totalorder %s386_s11, %s553_s7 }
 0x20a   :  { %p392_p7 = pnand %p390_p6, %p387_p5 }
 0x20c   :  { %395 = shalt.err (!%p392_p7)
}
 0x20d   :  { %s429_s16 = smov 128   ;;  %s430_s17 = smov 8   ;;  %277 = vst.msk [vmem:[#allocation4] sm:$0xff] %vm268_vm4, %v274_v60  ;;  %v276_v61 = vpop.xlane.xlu0 %275 }
 0x20e   :  { %292 = dma.vmem_to_hbm [thread:$0]  %s287_s28, 256, %s553_s7, [#allocation3], %s429_s16, %s429_s16, %s430_s17   ;;  %278 = vst.msk [vmem:[#allocation4 + $0x8] sm:$0xff] %vm268_vm4, %v276_v61 }
 0x20f   :  { %s396_s20 = scalar_lea.vmem %s299_s30, 256  ;;  %p401_p9 = scmp.lt.s32.totalorder %s299_s30, %s299_s30 }
 0x210   :  { %p397_p8 = scmp.ne.s32.totalorder %s299_s30, %s396_s20  ;;  %p402_p10 = scmp.lt.s32.totalorder %s396_s20, %s396_s20 }
 0x212   :  { %p403_p11 = por %p402_p10, %p401_p9 }
 0x214   :  { %p404_p12 = pnand %p403_p11, %p397_p8 }
 0x216   :  { %407 = shalt.err (!%p404_p12)
}
 0x217   :  { %s408_s4 = scalar_lea.hbm %s554_s8, 256 }
 0x218   :  { %p409_p13 = scmp.ne.s32.totalorder %s554_s8, %s408_s4  ;;  %p412_p0 = scmp.lt.u32.totalorder %s408_s4, %s554_s8 }
 0x21a   :  { %p414_p1 = pnand %p412_p0, %p409_p13 }
 0x21c   :  { %417 = shalt.err (!%p414_p1)
}
 0x21d   :  { %304 = dma.vmem_to_hbm [thread:$0]  %s299_s30, 256, %s554_s8, [#allocation5], %s429_s16, %s429_s16, %s430_s17  }
 0x21e   :  { %418 = dma.done.wait [#allocation3], 256  }
 0x21f   :  { %419 = vsyncadd [#allocation3], 4294967040 }
 0x220   :  { %420 = dma.done.wait [#allocation5], 256  }
 0x221   :  { %421 = vsyncadd [#allocation5], 4294967040 }
 0x222   :  { %313 = vsyncpa [#allocation3], 1 }
 0x223   :  { %314 = vsyncpa [#allocation5], 1 }

// kernel: encoder_forward.52
= control target key start
LH: loop header
LB: loop body
LE: loop exit
PB: predicated region body
PF: predicated region fallthrough
CT: control target
= control target key end

     0   :  { %vm27_vm0 = vcmask 261120   ;;  %vm52_vm1 = vcmask 257024   ;;  %vm61_vm2 = vcmask 7168   ;;  %s171_s0 = inlined_call_operand.vmem [shape: bf16[4,16,32], index: 0, kind: input, shape index: {}]   ;;  %s172_s1 = inlined_call_operand.vmem [shape: bf16[16,32], index: 1, kind: output, shape index: {0}]   ;;  %s173_s2 = inlined_call_operand.vmem [shape: f32[1,16,1], index: 2, kind: output, shape index: {1}]   ;;  %s174_s3 = inlined_call_operand.vmem [shape: f32[1,16,1], index: 3, kind: output, shape index: {2}]  }
   0x1   :  { %v91_v0 = vld [vmem:[%s171_s0] sm:$0xff]   ;;  %v106_v1 = vld [vmem:[%s171_s0 + $0x8] sm:$0xff]   ;;  %v107_v2 = vld [vmem:[%s171_s0 + $0x10] sm:$0xff]  }
   0x2   :  { %v92_v3 = vunpack.c.l.bf16 %v91_v0  ;;  %v96_v4 = vunpack.c.l.bf16 %v106_v1  ;;  %v100_v5 = vunpack.c.l.bf16 %v107_v2  ;;  %v108_v6 = vld [vmem:[%s171_s0 + $0x18] sm:$0xff]   ;;  %v93_v7 = vunpack.c.h.bf16 %v91_v0 }
   0x3   :  { %v104_v8 = vunpack.c.l.bf16 %v108_v6  ;;  %v97_v9 = vunpack.c.h.bf16 %v106_v1  ;;  %v101_v10 = vunpack.c.h.bf16 %v107_v2  ;;  %v105_v11 = vunpack.c.h.bf16 %v108_v6 }
   0x4   :  { %v28_v12 = vsel %vm27_vm0, %v92_v3, 0.0  ;;  %v29_v13 = vsel %vm27_vm0, %v96_v4, 0.0  ;;  %v31_v14 = vsel %vm27_vm0, %v100_v5, 0.0  ;;  %v35_v15 = vsel %vm27_vm0, %v93_v7, 0.0 }
   0x5   :  { %v30_v16 = vadd.f32 %v29_v13, %v28_v12  ;;  %v36_v17 = vsel %vm27_vm0, %v97_v9, 0.0  ;;  %v38_v18 = vsel %vm27_vm0, %v101_v10, 0.0  ;;  %v33_v19 = vsel %vm27_vm0, %v104_v8, 0.0 }
   0x6   :  { %v37_v20 = vadd.f32 %v36_v17, %v35_v15  ;;  %v40_v22 = vsel %vm27_vm0, %v105_v11, 0.0 }
   0x7   :  { %v32_v21 = vadd.f32 %v31_v14, %v30_v16 }
   0x8   :  { %v39_v23 = vadd.f32 %v38_v18, %v37_v20 }
   0x9   :  { %v34_v24 = vadd.f32 %v33_v19, %v32_v21 }
   0xa   :  { %v41_v25 = vadd.f32 %v40_v22, %v39_v23 }
   0xb   :  { %v42_v26 = vmul.f32 0.25, %v34_v24 }
   0xc   :  { %v43_v27 = vmul.f32 0.25, %v41_v25 }
   0xd   :  { %v64_v28 = vmul.f32 %v42_v26, %v42_v26  ;;  %v88_v29 = vpack.c.bf16 %v42_v26, %v42_v26  ;;  %v55_v30 = vsel %vm27_vm0, %v42_v26, 0.0 }
   0xe   :  { %56 = vadd.xlane.f32.xlu0 %v55_v30  ;;  %v89_v31 = vpack.c.bf16 %v43_v27, %v43_v27  ;;  %v65_v32 = vmul.f32 %v43_v27, %v43_v27  ;;  %v58_v34 = vsel %vm27_vm0, %v43_v27, 0.0 }
   0xf   :  { %v66_v33 = vsel %vm27_vm0, %v64_v28, 0.0  ;;  %53 = vst.msk [vmem:[%s172_s1] sm:$0xf] %vm52_vm1, %v88_v29 }
  0x10   :  { %67 = vadd.xlane.f32.xlu1 %v66_v33  ;;  %54 = vst.msk [vmem:[%s172_s1 + $0x4] sm:$0xf] %vm52_vm1, %v89_v31  ;;  %v69_v35 = vsel %vm27_vm0, %v65_v32, 0.0 }
  0x12   :  { %59 = vadd.xlane.f32.xlu0 %v58_v34 }
  0x14   :  { %70 = vadd.xlane.f32.xlu1 %v69_v35 }
  0x9b   :  { %v57_v36 = vpop.xlane.xlu0 %56 }
  0x9c   :  { %62 = vst.msk [vmem:[%s173_s2] sm:$0xff] %vm61_vm2, %v57_v36 }
  0x9d   :  { %v68_v37 = vpop.xlane.xlu1 %67 }
  0x9e   :  { %72 = vst.msk [vmem:[%s174_s3] sm:$0xff] %vm61_vm2, %v68_v37 }
  0x9f   :  { %v60_v38 = vpop.xlane.xlu0 %59 }
  0xa0   :  { %63 = vst.msk [vmem:[%s173_s2 + $0x8] sm:$0xff] %vm61_vm2, %v60_v38 }
  0xa1   :  { %v71_v39 = vpop.xlane.xlu1 %70 }
  0xa2   :  { %73 = vst.msk [vmem:[%s174_s3 + $0x8] sm:$0xff] %vm61_vm2, %v71_v39 }

// kernel: encoder_forward.53
= control target key start
LH: loop header
LB: loop body
LE: loop exit
PB: predicated region body
PF: predicated region fallthrough
CT: control target
= control target key end

     0   :  { %v227_v0 = vmov 0   ;;  %vm70_vm0 = vcmask 130048   ;;  %vm147_vm1 = vcmask 261120   ;;  %vm142_vm2 = vcmask 257024   ;;  %s342_s3 = inlined_call_operand.vmem [shape: f32[16,1], index: 3, kind: input, shape index: {}]   ;;  %s343_s2 = inlined_call_operand.vmem [shape: f32[16,1], index: 2, kind: input, shape index: {}]   ;;  %s344_s1 = inlined_call_operand.vmem [shape: bf16[32,16], index: 1, kind: input, shape index: {}]   ;;  %s345_s0 = inlined_call_operand.vmem [shape: bf16[16,32], index: 0, kind: input, shape index: {}]   ;;  %s346_s4 = inlined_call_operand.vmem [shape: bf16[32,32], index: 4, kind: output, shape index: {0}]   ;;  %s347_s5 = inlined_call_operand.vmem [shape: f32[1,32,1], index: 5, kind: output, shape index: {1}]   ;;  %s348_s6 = inlined_call_operand.vmem [shape: f32[1,32,1], index: 6, kind: output, shape index: {2}]  }
   0x1   :  { %224 = vset.pattern.permute.xlu1 %v227_v0  ;;  %223 = vset.pattern.permute.xlu0 %v227_v0  ;;  %v39_v1 = vld [vmem:[%s342_s3] sm:$0xff]  ;;  %v40_v3 = vld [vmem:[%s342_s3 + $0x8] sm:$0xff]  ;;  %vm160_vm3 = vcmask 7168  }
   0x2   :  { %v25_v2 = vld [vmem:[%s343_s2] sm:$0xff]  ;;  %43 = vperm.xlu1 %224, %v39_v1   ;;  %v26_v4 = vld [vmem:[%s343_s2 + $0x8] sm:$0xff] }
   0x3   :  { %29 = vperm.xlu0 %223, %v25_v2   ;;  %v225_v5 = vld [vmem:[%s344_s1] sm:$0xff]   ;;  %v226_v20 = vld [vmem:[%s344_s1 + $0x8] sm:$0xff]  }
   0x4   :  { %218 = vmatprep.mubr.msk.bf16.mxu0 %vm70_vm0, %v225_v5  ;;  %v210_v6 = vld [vmem:[%s345_s0] sm:$0xff]  }
   0x5   :  { %v211_v7 = vunpack.c.l.bf16 %v210_v6  ;;  %v212_v11 = vunpack.c.h.bf16 %v210_v6 }
   0x6   :  { %48 = vperm.xlu1 %224, %v40_v3  }
   0x7   :  { %34 = vperm.xlu0 %223, %v26_v4  }
  0x81   :  { %v44_v8 = vpop.permute.xlu1 %43 }
  0x82   :  { %v30_v9 = vpop.permute.xlu0 %29 }
  0x83   :  { %v37_v10 = vmul.f32 %v211_v7, %v30_v9 }
  0x85   :  { %v51_v13 = vadd.f32 %v44_v8, %v37_v10  ;;  %v49_v15 = vpop.permute.xlu1 %48 }
  0x86   :  { %v35_v12 = vpop.permute.xlu0 %34 }
  0x87   :  { %v38_v14 = vmul.f32 %v212_v11, %v35_v12  ;;  %v53_v17 = vmax.f32 %v51_v13, 0.0 }
  0x89   :  { %v52_v16 = vadd.f32 %v49_v15, %v38_v14 }
  0x8b   :  { %v54_v18 = vmax.f32 %v52_v16, 0.0 }
  0x8d   :  { %v55_v19 = vpack.c.bf16 %v54_v18, %v53_v17 }
  0x8f   :  { %216 = vmatprep.subr.bf16.mxu0 %v55_v19 }
  0x90   :  { %217 = vmatpush3.bf16.msra.mxu0 %v55_v19 }
  0x93   :  { %219 = vmatmul.mubr.msk.bf16.vlgmr.msra.gmra.mrb[0].mxu0 %vm70_vm0, %v226_v20 }
 0x166   :  { %v220_v21 = vpop.f32.mrb[0].mxu0 }
 0x167   :  { %v207_v22 = vpack.c.bf16 %v220_v21, %v220_v21  ;;  %v111_v23 = vpop.f32.mrb[1].mxu0  ;;  %v154_v24 = vsel %vm147_vm1, %v220_v21, 0.0  ;;  %v167_v34 = vmul.f32 %v220_v21, %v220_v21 }
 0x168   :  { %v205_v25 = vpack.c.bf16 %v111_v23, %v111_v23  ;;  %155 = vadd.xlane.f32.xlu0 %v154_v24  ;;  %v221_v26 = vpop.f32.mrb[2].mxu0  ;;  %v165_v31 = vmul.f32 %v111_v23, %v111_v23  ;;  %v148_v32 = vsel %vm147_vm1, %v111_v23, 0.0 }
 0x169   :  { %145 = vst.msk [vmem:[%s346_s4 + $0x8] sm:$0xf] %vm142_vm2, %v207_v22  ;;  %v208_v27 = vpack.c.bf16 %v221_v26, %v221_v26  ;;  %v114_v28 = vpop.f32.mrb[3].mxu0  ;;  %v157_v36 = vsel %vm147_vm1, %v221_v26, 0.0  ;;  %v175_v37 = vsel %vm147_vm1, %v167_v34, 0.0  ;;  %v168_v39 = vmul.f32 %v221_v26, %v221_v26 }
 0x16a   :  { %143 = vst.msk [vmem:[%s346_s4] sm:$0xf] %vm142_vm2, %v205_v25  ;;  %v206_v29 = vpack.c.bf16 %v114_v28, %v114_v28  ;;  %v151_v30 = vsel %vm147_vm1, %v114_v28, 0.0  ;;  %v169_v33 = vsel %vm147_vm1, %v165_v31, 0.0  ;;  %v166_v35 = vmul.f32 %v114_v28, %v114_v28 }
 0x16b   :  { %146 = vst.msk [vmem:[%s346_s4 + $0xc] sm:$0xf] %vm142_vm2, %v208_v27  ;;  %152 = vadd.xlane.f32.xlu1 %v151_v30  ;;  %v178_v40 = vsel %vm147_vm1, %v168_v39, 0.0 }
 0x16c   :  { %144 = vst.msk [vmem:[%s346_s4 + $0x4] sm:$0xf] %vm142_vm2, %v206_v29  ;;  %149 = vadd.xlane.f32.xlu0 %v148_v32  ;;  %v172_v38 = vsel %vm147_vm1, %v166_v35, 0.0 }
 0x16f   :  { %170 = vadd.xlane.f32.xlu1 %v169_v33 }
 0x170   :  { %158 = vadd.xlane.f32.xlu0 %v157_v36 }
 0x173   :  { %176 = vadd.xlane.f32.xlu1 %v175_v37 }
 0x174   :  { %173 = vadd.xlane.f32.xlu0 %v172_v38 }
 0x178   :  { %179 = vadd.xlane.f32.xlu0 %v178_v40 }
 0x1f5   :  { %v156_v41 = vpop.xlane.xlu0 %155 }
 0x1f6   :  { %163 = vst.msk [vmem:[%s347_s5 + $0x10] sm:$0xff] %vm160_vm3, %v156_v41 }
 0x1f8   :  { %v153_v42 = vpop.xlane.xlu1 %152 }
 0x1f9   :  { %162 = vst.msk [vmem:[%s347_s5 + $0x8] sm:$0xff] %vm160_vm3, %v153_v42  ;;  %v150_v43 = vpop.xlane.xlu0 %149 }
 0x1fa   :  { %161 = vst.msk [vmem:[%s347_s5] sm:$0xff] %vm160_vm3, %v150_v43 }
 0x1fc   :  { %v171_v44 = vpop.xlane.xlu1 %170 }
 0x1fd   :  { %181 = vst.msk [vmem:[%s348_s6] sm:$0xff] %vm160_vm3, %v171_v44  ;;  %v159_v45 = vpop.xlane.xlu0 %158 }
 0x1fe   :  { %164 = vst.msk [vmem:[%s347_s5 + $0x18] sm:$0xff] %vm160_vm3, %v159_v45 }
 0x200   :  { %v177_v46 = vpop.xlane.xlu1 %176 }
 0x201   :  { %183 = vst.msk [vmem:[%s348_s6 + $0x10] sm:$0xff] %vm160_vm3, %v177_v46  ;;  %v174_v47 = vpop.xlane.xlu0 %173 }
 0x202   :  { %182 = vst.msk [vmem:[%s348_s6 + $0x8] sm:$0xff] %vm160_vm3, %v174_v47 }
 0x205   :  { %v180_v48 = vpop.xlane.xlu0 %179 }
 0x206   :  { %184 = vst.msk [vmem:[%s348_s6 + $0x18] sm:$0xff] %vm160_vm3, %v180_v48 }

// kernel: encoder_forward.54
= control target key start
LH: loop header
LB: loop body
LE: loop exit
PB: predicated region body
PF: predicated region fallthrough
CT: control target
= control target key end

     0   :  { %v127_v0 = vmov 0   ;;  %vm98_vm0 = vcmask 257024   ;;  %s190_s1 = inlined_call_operand.vmem [shape: f32[32,1], index: 1, kind: input, shape index: {}]   ;;  %s191_s2 = inlined_call_operand.vmem [shape: f32[32,1], index: 2, kind: input, shape index: {}]   ;;  %s192_s0 = inlined_call_operand.vmem [shape: bf16[32,32], index: 0, kind: input, shape index: {}]   ;;  %s193_s3 = inlined_call_operand.vmem [shape: bf16[32,32], index: 3, kind: output, shape index: {}]  }
   0x1   :  { %126 = vset.pattern.permute.xlu1 %v127_v0  ;;  %125 = vset.pattern.permute.xlu0 %v127_v0  ;;  %v24_v1 = vld [vmem:[%s190_s1 + $0x10] sm:$0xff]  ;;  %v22_v2 = vld [vmem:[%s190_s1] sm:$0xff]  ;;  %v25_v3 = vld [vmem:[%s190_s1 + $0x18] sm:$0xff] }
   0x2   :  { %38 = vperm.xlu1 %126, %v24_v1   ;;  %28 = vperm.xlu0 %125, %v22_v2   ;;  %v23_v4 = vld [vmem:[%s190_s1 + $0x8] sm:$0xff]  ;;  %v50_v6 = vld [vmem:[%s191_s2] sm:$0xff]  ;;  %v53_v7 = vld [vmem:[%s191_s2 + $0x18] sm:$0xff] }
   0x3   :  { %v51_v5 = vld [vmem:[%s191_s2 + $0x8] sm:$0xff]  ;;  %v52_v8 = vld [vmem:[%s191_s2 + $0x10] sm:$0xff]  ;;  %v116_v11 = vld [vmem:[%s192_s0] sm:$0xff]  }
   0x4   :  { %v117_v12 = vunpack.c.l.bf16 %v116_v11  ;;  %v118_v13 = vunpack.c.h.bf16 %v116_v11  ;;  %v123_v14 = vld [vmem:[%s192_s0 + $0x8] sm:$0xff]  }
   0x5   :  { %v121_v17 = vunpack.c.l.bf16 %v123_v14  ;;  %v122_v19 = vunpack.c.h.bf16 %v123_v14 }
   0x6   :  { %43 = vperm.xlu1 %126, %v25_v3   ;;  %33 = vperm.xlu0 %125, %v23_v4  }
   0xa   :  { %61 = vperm.xlu1 %126, %v51_v5   ;;  %56 = vperm.xlu0 %125, %v50_v6  }
   0xe   :  { %71 = vperm.xlu1 %126, %v53_v7   ;;  %66 = vperm.xlu0 %125, %v52_v8  }
  0x81   :  { %v39_v9 = vpop.permute.xlu1 %38  ;;  %v29_v10 = vpop.permute.xlu0 %28 }
  0x82   :  { %v46_v18 = vmul.f32 %v117_v12, %v29_v10  ;;  %v48_v25 = vmul.f32 %v121_v17, %v39_v9 }
  0x85   :  { %v44_v15 = vpop.permute.xlu1 %43  ;;  %v34_v16 = vpop.permute.xlu0 %33 }
  0x86   :  { %v47_v20 = vmul.f32 %v118_v13, %v34_v16  ;;  %v49_v26 = vmul.f32 %v122_v19, %v44_v15 }
  0x89   :  { %v62_v21 = vpop.permute.xlu1 %61  ;;  %v57_v22 = vpop.permute.xlu0 %56 }
  0x8a   :  { %v75_v23 = vadd.f32 %v62_v21, %v47_v20  ;;  %v74_v24 = vadd.f32 %v57_v22, %v46_v18 }
  0x8c   :  { %v79_v27 = vmax.f32 %v75_v23, 0.0  ;;  %v78_v28 = vmax.f32 %v74_v24, 0.0 }
  0x8d   :  { %v72_v29 = vpop.permute.xlu1 %71  ;;  %v67_v30 = vpop.permute.xlu0 %66 }
  0x8e   :  { %v112_v31 = vpack.c.bf16 %v79_v27, %v79_v27  ;;  %v111_v32 = vpack.c.bf16 %v78_v28, %v78_v28  ;;  %v77_v33 = vadd.f32 %v72_v29, %v49_v26  ;;  %v76_v34 = vadd.f32 %v67_v30, %v48_v25 }
  0x90   :  { %100 = vst.msk [vmem:[%s193_s3 + $0x4] sm:$0xf] %vm98_vm0, %v112_v31  ;;  %99 = vst.msk [vmem:[%s193_s3] sm:$0xf] %vm98_vm0, %v111_v32  ;;  %v81_v35 = vmax.f32 %v77_v33, 0.0  ;;  %v80_v36 = vmax.f32 %v76_v34, 0.0 }
  0x92   :  { %v114_v37 = vpack.c.bf16 %v81_v35, %v81_v35  ;;  %v113_v38 = vpack.c.bf16 %v80_v36, %v80_v36 }
  0x94   :  { %102 = vst.msk [vmem:[%s193_s3 + $0xc] sm:$0xf] %vm98_vm0, %v114_v37  ;;  %101 = vst.msk [vmem:[%s193_s3 + $0x8] sm:$0xf] %vm98_vm0, %v113_v38 }

// kernel: encoder_forward.55
= control target key start
LH: loop header
LB: loop body
LE: loop exit
PB: predicated region body
PF: predicated region fallthrough
CT: control target
= control target key end

     0   :  { %v358_v1 = vmov 0.0   ;;  %vm359_vm0 = vmmov 0   ;;  %vm171_vm1 = vcmask 261120   ;;  %vm256_vm2 = vcmask 257024   ;;  %s457_s0 = inlined_call_operand.vmem [shape: bf16[288,32], index: 0, kind: input, shape index: {}]   ;;  %s458_s1 = inlined_call_operand.vmem [shape: bf16[8,288], index: 1, kind: input, shape index: {}]   ;;  %s459_s2 = inlined_call_operand.vmem [shape: bf16[8,32], index: 2, kind: output, shape index: {0}]   ;;  %s460_s3 = inlined_call_operand.vmem [shape: f32[1,8,1], index: 3, kind: output, shape index: {1}]   ;;  %s461_s4 = inlined_call_operand.vmem [shape: f32[1,8,1], index: 4, kind: output, shape index: {2}]  }
   0x1   :  { %v337_v0 = vld [vmem:[%s457_s0 + $0x40] sm:$0xff]   ;;  %327 = vmatprep.subr.bf16.mxu1 %v358_v1  ;;  %331 = vmatprep.mubr.msk.bf16.mxu1 %vm359_vm0, %v358_v1  ;;  %v339_v3 = vld [vmem:[%s457_s0 + $0x48] sm:$0xff]   ;;  %v341_v5 = vld [vmem:[%s457_s0 + $0x50] sm:$0xff]   ;;  %vm261_vm3 = vcmask 7168  }
   0x2   :  { %v338_v2 = vld [vmem:[%s457_s0] sm:$0xff]   ;;  %302 = vmatprep.subr.bf16.mxu0 %v337_v0  ;;  %v340_v4 = vld [vmem:[%s457_s0 + $0x8] sm:$0xff]   ;;  %v342_v6 = vld [vmem:[%s457_s0 + $0x10] sm:$0xff]  }
   0x3   :  { %303 = vmatpush3.bf16.msra.mxu0 %v338_v2  ;;  %v343_v7 = vld [vmem:[%s457_s0 + $0x58] sm:$0xff]   ;;  %v345_v9 = vld [vmem:[%s457_s0 + $0x60] sm:$0xff]   ;;  %v347_v12 = vld [vmem:[%s457_s0 + $0x68] sm:$0xff]  }
   0x4   :  { %304 = vmatprep.subr.bf16.mxu0 %v339_v3  ;;  %v344_v8 = vld [vmem:[%s457_s0 + $0x18] sm:$0xff]   ;;  %v351_v10 = vld [vmem:[%s457_s0 + $0x80] sm:$0xff]   ;;  %v354_v13 = vld [vmem:[%s457_s0 + $0x88] sm:$0xff]  }
   0x5   :  { %v346_v11 = vld [vmem:[%s457_s0 + $0x20] sm:$0xff]   ;;  %328 = vmatpush3.bf16.msra.mxu1 %v351_v10  ;;  %v348_v15 = vld [vmem:[%s457_s0 + $0x28] sm:$0xff]   ;;  %v349_v18 = vld [vmem:[%s457_s0 + $0x70] sm:$0xff]  }
   0x6   :  { %329 = vmatprep.subr.bf16.mxu1 %v358_v1  ;;  %v51_v14 = vld [vmem:[%s458_s1] sm:$0xff]  ;;  %v357_v17 = vld [vmem:[%s458_s1 + $0x8] ss:$0 sps:$4 sm:$0xff]   ;;  %v350_v19 = vld [vmem:[%s457_s0 + $0x30] sm:$0xff]  }
   0x7   :  { %305 = vmatpush3.bf16.msra.mxu0 %v340_v4  ;;  %v281_v16 = vcombine.high %v51_v14, %v51_v14  ;;  %v352_v20 = vld [vmem:[%s457_s0 + $0x78] sm:$0xff]   ;;  %v280_v22 = vcombine.low %v51_v14, %v51_v14 }
   0x8   :  { %306 = vmatprep.subr.bf16.mxu0 %v341_v5  ;;  %v353_v21 = vld [vmem:[%s457_s0 + $0x38] sm:$0xff]  }
   0x9   :  { %330 = vmatpush3.bf16.msra.mxu1 %v354_v13  ;;  %207 = vmatprep.mubr.bf16.mxu0 %v281_v16 }
   0xb   :  { %307 = vmatpush3.bf16.msra.mxu0 %v342_v6 }
   0xc   :  { %308 = vmatprep.subr.bf16.mxu0 %v343_v7  ;;  %332 = vmatmul.mubr.msk.bf16.vlgmr.msra.gmra.mrb[0].mxu1 %vm171_vm1, %v357_v17 }
   0xf   :  { %309 = vmatpush3.bf16.msra.mxu0 %v344_v8 }
  0x10   :  { %310 = vmatprep.subr.bf16.mxu0 %v345_v9 }
  0x13   :  { %311 = vmatpush3.bf16.msra.mxu0 %v346_v11 }
  0x14   :  { %312 = vmatprep.subr.bf16.mxu0 %v347_v12 }
  0x17   :  { %313 = vmatpush3.bf16.msra.mxu0 %v348_v15 }
  0x18   :  { %314 = vmatprep.subr.bf16.mxu0 %v349_v18 }
  0x1b   :  { %315 = vmatpush3.bf16.msra.mxu0 %v350_v19 }
  0x1c   :  { %316 = vmatprep.subr.bf16.mxu0 %v352_v20 }
  0x1f   :  { %317 = vmatpush3.bf16.msra.mxu0 %v353_v21 }
  0x22   :  { %208 = vmatmul.mubr.bf16.vlgmr.msra.gmra.mrb[0].mxu0 %v280_v22 }
  0xdf   :  { %v249_v23 = vpop.f32.mrb[0].mxu1 }
  0xe0   :  { %v333_v24 = vpop.f32.mrb[1].mxu1 }
  0xe1   :  { %v252_v25 = vpop.f32.mrb[2].mxu1 }
  0xe2   :  { %v334_v26 = vpop.f32.mrb[3].mxu1 }
  0xf5   :  { %v318_v27 = vpop.f32.mrb[0].mxu0 }
  0xf6   :  { %v319_v28 = vpop.f32.mrb[1].mxu0 }
  0xf7   :  { %v320_v29 = vadd.f32 %v319_v28, %v318_v27  ;;  %v321_v30 = vpop.f32.mrb[2].mxu0 }
  0xf8   :  { %v322_v31 = vpop.f32.mrb[3].mxu0 }
  0xf9   :  { %v250_v32 = vadd.f32 %v320_v29, %v249_v23 }
  0xfb   :  { %v255_v33 = vpack.c.bf16 %v250_v32, %v250_v32  ;;  %v258_v34 = vsel %vm171_vm1, %v250_v32, 0.0  ;;  %v263_v35 = vmul.f32 %v250_v32, %v250_v32 }
  0xfc   :  { %259 = vadd.xlane.f32.xlu0 %v258_v34 }
  0xfd   :  { %257 = vst.msk [vmem:[%s459_s2] sm:$0xf] %vm256_vm2, %v255_v33  ;;  %v264_v36 = vsel %vm171_vm1, %v263_v35, 0.0 }
 0x100   :  { %265 = vadd.xlane.f32.xlu0 %v264_v36 }
 0x189   :  { %v260_v37 = vpop.xlane.xlu0 %259 }
 0x18a   :  { %262 = vst.msk [vmem:[%s460_s3] sm:$0xff] %vm261_vm3, %v260_v37 }
 0x18d   :  { %v266_v38 = vpop.xlane.xlu0 %265 }
 0x18e   :  { %267 = vst.msk [vmem:[%s461_s4] sm:$0xff] %vm261_vm3, %v266_v38 }

// kernel: encoder_forward.56
= control target key start
LH: loop header
LB: loop body
LE: loop exit
PB: predicated region body
PF: predicated region fallthrough
CT: control target
= control target key end

     0   :  { %v329_v0 = vmov 0   ;;  %vm155_vm0 = vcmask 130048   ;;  %vm95_vm1 = vcmask 64512   ;;  %vm102_vm2 = vcmask 1043456   ;;  %s459_s3 = inlined_call_operand.vmem [shape: f32[24,1], index: 3, kind: input, shape index: {}]   ;;  %s460_s4 = inlined_call_operand.vmem [shape: f32[24,1], index: 4, kind: input, shape index: {}]   ;;  %s461_s2 = inlined_call_operand.vmem [shape: bf16[32,24], index: 2, kind: input, shape index: {}]   ;;  %s462_s0 = inlined_call_operand.vmem [shape: bf16[16,32], index: 0, kind: input, shape index: {}]   ;;  %s463_s1 = inlined_call_operand.vmem [shape: bf16[8,32], index: 1, kind: input, shape index: {}]   ;;  %s464_s5 = inlined_call_operand.vmem [shape: bf16[32,32], index: 5, kind: output, shape index: {0}]   ;;  %s465_s6 = inlined_call_operand.vmem [shape: f32[1,32,1], index: 6, kind: output, shape index: {1}]   ;;  %s466_s7 = inlined_call_operand.vmem [shape: f32[1,32,1], index: 7, kind: output, shape index: {2}]  }
   0x1   :  { %326 = vset.pattern.permute.xlu1 %v329_v0  ;;  %325 = vset.pattern.permute.xlu0 %v329_v0  ;;  %v65_v1 = vld [vmem:[%s459_s3 + $0x10] sm:$0xff]  ;;  %v28_v2 = vld [vmem:[%s459_s3] sm:$0xff]  ;;  %v29_v4 = vld [vmem:[%s459_s3 + $0x8] sm:$0xff]  ;;  %s330_s3 = smov 112   ;;  %vm232_vm3 = vcmask 261120   ;;  %vm227_vm4 = vcmask 257024  }
   0x2   :  { %68 = vperm.xlu1 %326, %v65_v1   ;;  %32 = vperm.xlu0 %325, %v28_v2   ;;  %v42_v3 = vld [vmem:[%s460_s4] sm:$0xff]  ;;  %v72_v5 = vld [vmem:[%s460_s4 + $0x10] sm:$0xff]  ;;  %v43_v6 = vld [vmem:[%s460_s4 + $0x8] sm:$0xff]  ;;  %vm245_vm5 = vcmask 7168  }
   0x3   :  { %v327_v7 = vld [vmem:[%s461_s2] sm:$0xff]   ;;  %v328_v8 = vld [vmem:[%s461_s2 + $0x8] sm:$0xff]  }
   0x4   :  { %314 = vmatprep.mubr.msk.bf16.mxu0 %vm155_vm0, %v327_v7  ;;  %v297_v9 = vld [vmem:[%s462_s0] sm:$0xff]  }
   0x5   :  { %v63_v11 = vld [vmem:[%s463_s1] sm:$0xf]  ;;  %v298_v13 = vunpack.c.l.bf16 %v297_v9  ;;  %v299_v15 = vunpack.c.h.bf16 %v297_v9 }
   0x6   :  { %46 = vperm.xlu1 %326, %v42_v3   ;;  %37 = vperm.xlu0 %325, %v29_v4   ;;  %v64_v14 = vunpack.c.l.bf16 %v63_v11 }
   0xa   :  { %75 = vperm.xlu1 %326, %v72_v5   ;;  %51 = vperm.xlu0 %325, %v43_v6  }
   0xe   :  { %91 = vrot.lane.b32.xlu0 %v327_v7, %s330_s3  ;;  %93 = vrot.lane.b32.xlu1 %v328_v8, %s330_s3 }
  0x81   :  { %v69_v10 = vpop.permute.xlu1 %68  ;;  %v33_v12 = vpop.permute.xlu0 %32 }
  0x82   :  { %v40_v18 = vmul.f32 %v298_v13, %v33_v12  ;;  %v71_v19 = vmul.f32 %v69_v10, %v64_v14 }
  0x85   :  { %v47_v16 = vpop.permute.xlu1 %46  ;;  %v38_v17 = vpop.permute.xlu0 %37 }
  0x86   :  { %v54_v20 = vadd.f32 %v47_v16, %v40_v18  ;;  %v41_v21 = vmul.f32 %v299_v15, %v38_v17 }
  0x88   :  { %v56_v26 = vmax.f32 %v54_v20, 0.0 }
  0x89   :  { %v76_v22 = vpop.permute.xlu1 %75  ;;  %v52_v23 = vpop.permute.xlu0 %51 }
  0x8a   :  { %v78_v24 = vadd.f32 %v76_v22, %v71_v19  ;;  %v55_v25 = vadd.f32 %v52_v23, %v41_v21 }
  0x8c   :  { %v79_v27 = vmax.f32 %v78_v24, 0.0  ;;  %v57_v28 = vmax.f32 %v55_v25, 0.0 }
  0x8d   :  { %v92_v29 = vpop.permute.xlu0 %91  ;;  %v94_v33 = vpop.permute.xlu1 %93 }
  0x8e   :  { %v80_v30 = vpack.c.bf16 %v79_v27, %v79_v27  ;;  %v58_v31 = vpack.c.bf16 %v57_v28, %v56_v26  ;;  %308 = vmatprep.mubr.msk.bf16.mxu1 %vm95_vm1, %v92_v29 }
  0x90   :  { %322 = vmatprep.subr.msk.bf16.mxu1 %vm102_vm2, %v80_v30  ;;  %312 = vmatprep.subr.bf16.mxu0 %v58_v31  ;;  %v104_v32 = vsel %vm102_vm2, %v80_v30, 0 }
  0x91   :  { %307 = vmatpush3.bf16.msra.mxu1 %v104_v32  ;;  %313 = vmatpush3.bf16.msra.mxu0 %v58_v31 }
  0x94   :  { %309 = vmatmul.mubr.msk.bf16.vlgmr.msra.gmra.mrb[0].mxu1 %vm95_vm1, %v94_v33  ;;  %315 = vmatmul.mubr.msk.bf16.vlgmr.msra.gmra.mrb[0].mxu0 %vm155_vm0, %v328_v8 }
 0x167   :  { %v310_v34 = vpop.f32.mrb[0].mxu1  ;;  %v316_v35 = vpop.f32.mrb[0].mxu0 }
 0x168   :  { %v205_v36 = vadd.f32 %v316_v35, %v310_v34  ;;  %v140_v37 = vpop.f32.mrb[1].mxu1  ;;  %v196_v38 = vpop.f32.mrb[1].mxu0 }
 0x169   :  { %v197_v39 = vadd.f32 %v196_v38, %v140_v37  ;;  %v311_v40 = vpop.f32.mrb[2].mxu1  ;;  %v317_v41 = vpop.f32.mrb[2].mxu0 }
 0x16a   :  { %v294_v42 = vpack.c.bf16 %v205_v36, %v205_v36  ;;  %v208_v43 = vadd.f32 %v317_v41, %v311_v40  ;;  %v143_v44 = vpop.f32.mrb[3].mxu1  ;;  %v199_v45 = vpop.f32.mrb[3].mxu0  ;;  %v239_v46 = vsel %vm232_vm3, %v205_v36, 0.0  ;;  %v252_v55 = vmul.f32 %v205_v36, %v205_v36 }
 0x16b   :  { %v292_v47 = vpack.c.bf16 %v197_v39, %v197_v39  ;;  %v200_v48 = vadd.f32 %v199_v45, %v143_v44  ;;  %240 = vadd.xlane.f32.xlu0 %v239_v46  ;;  %v250_v52 = vmul.f32 %v197_v39, %v197_v39  ;;  %v233_v53 = vsel %vm232_vm3, %v197_v39, 0.0 }
 0x16c   :  { %230 = vst.msk [vmem:[%s464_s5 + $0x8] sm:$0xf] %vm227_vm4, %v294_v42  ;;  %v295_v49 = vpack.c.bf16 %v208_v43, %v208_v43  ;;  %v242_v56 = vsel %vm232_vm3, %v208_v43, 0.0  ;;  %v260_v58 = vsel %vm232_vm3, %v252_v55, 0.0  ;;  %v253_v60 = vmul.f32 %v208_v43, %v208_v43 }
 0x16d   :  { %228 = vst.msk [vmem:[%s464_s5] sm:$0xf] %vm227_vm4, %v292_v47  ;;  %v293_v50 = vpack.c.bf16 %v200_v48, %v200_v48  ;;  %v236_v51 = vsel %vm232_vm3, %v200_v48, 0.0  ;;  %v254_v54 = vsel %vm232_vm3, %v250_v52, 0.0  ;;  %v251_v57 = vmul.f32 %v200_v48, %v200_v48 }
 0x16e   :  { %231 = vst.msk [vmem:[%s464_s5 + $0xc] sm:$0xf] %vm227_vm4, %v295_v49  ;;  %237 = vadd.xlane.f32.xlu1 %v236_v51  ;;  %v263_v61 = vsel %vm232_vm3, %v253_v60, 0.0 }
 0x16f   :  { %229 = vst.msk [vmem:[%s464_s5 + $0x4] sm:$0xf] %vm227_vm4, %v293_v50  ;;  %234 = vadd.xlane.f32.xlu0 %v233_v53  ;;  %v257_v59 = vsel %vm232_vm3, %v251_v57, 0.0 }
 0x172   :  { %255 = vadd.xlane.f32.xlu1 %v254_v54 }
 0x173   :  { %243 = vadd.xlane.f32.xlu0 %v242_v56 }
 0x176   :  { %261 = vadd.xlane.f32.xlu1 %v260_v58 }
 0x177   :  { %258 = vadd.xlane.f32.xlu0 %v257_v59 }
 0x17b   :  { %264 = vadd.xlane.f32.xlu0 %v263_v61 }
 0x1f8   :  { %v241_v62 = vpop.xlane.xlu0 %240 }
 0x1f9   :  { %248 = vst.msk [vmem:[%s465_s6 + $0x10] sm:$0xff] %vm245_vm5, %v241_v62 }
 0x1fb   :  { %v238_v63 = vpop.xlane.xlu1 %237 }
 0x1fc   :  { %247 = vst.msk [vmem:[%s465_s6 + $0x8] sm:$0xff] %vm245_vm5, %v238_v63  ;;  %v235_v0 = vpop.xlane.xlu0 %234 }
 0x1fd   :  { %246 = vst.msk [vmem:[%s465_s6] sm:$0xff] %vm245_vm5, %v235_v0 }
 0x1ff   :  { %v256_v1 = vpop.xlane.xlu1 %255 }
 0x200   :  { %266 = vst.msk [vmem:[%s466_s7] sm:$0xff] %vm245_vm5, %v256_v1  ;;  %v244_v2 = vpop.xlane.xlu0 %243 }
 0x201   :  { %249 = vst.msk [vmem:[%s465_s6 + $0x18] sm:$0xff] %vm245_vm5, %v244_v2 }
 0x203   :  { %v262_v3 = vpop.xlane.xlu1 %261 }
 0x204   :  { %268 = vst.msk [vmem:[%s466_s7 + $0x10] sm:$0xff] %vm245_vm5, %v262_v3  ;;  %v259_v4 = vpop.xlane.xlu0 %258 }
 0x205   :  { %267 = vst.msk [vmem:[%s466_s7 + $0x8] sm:$0xff] %vm245_vm5, %v259_v4 }
 0x208   :  { %v265_v5 = vpop.xlane.xlu0 %264 }
 0x209   :  { %269 = vst.msk [vmem:[%s466_s7 + $0x18] sm:$0xff] %vm245_vm5, %v265_v5 }

// kernel: encoder_forward.59
= control target key start
LH: loop header
LB: loop body
LE: loop exit
PB: predicated region body
PF: predicated region fallthrough
CT: control target
= control target key end

     0   :  { %14 = vsyncpa [#allocation3], 0  ;;  %v423_v2 = vmov 0   ;;  %s554_s0 = inlined_call_operand.vmem [shape: bf16[16,32], index: 0, kind: input, shape index: {}]   ;;  %s555_s1 = inlined_call_operand.vmem [shape: bf16[8,32], index: 1, kind: input, shape index: {}]   ;;  %s556_s2 = inlined_call_operand.vmem [shape: bf16[8,32], index: 2, kind: input, shape index: {}]   ;;  %s557_s3 = inlined_call_operand.vmem [shape: bf16[16,32], index: 3, kind: input, shape index: {}]   ;;  %s558_s4 = inlined_call_operand.vmem [shape: f32[32,1], index: 4, kind: input, shape index: {}]   ;;  %s559_s5 = inlined_call_operand.vmem [shape: f32[32,1], index: 5, kind: input, shape index: {}]   ;;  %s560_s6 = inlined_call_operand.vmem [shape: bf16[16,32], index: 6, kind: output, shape index: {0}]   ;;  %s561_s7 = inlined_call_operand.hbm [shape: f32[1,16,1], index: 7, kind: output, shape index: {1}]   ;;  %s562_s8 = inlined_call_operand.hbm [shape: f32[1,16,1], index: 8, kind: output, shape index: {2}]  }
   0x1   :  { %v47_v0 = vld [vmem:[%s559_s5] sm:$0xff]  ;;  %373 = vset.pattern.permute.xlu1 %v423_v2  ;;  %372 = vset.pattern.permute.xlu0 %v423_v2  ;;  %v48_v3 = vld [vmem:[%s559_s5 + $0x8] sm:$0xff] }
   0x2   :  { %v33_v1 = vld [vmem:[%s558_s4] sm:$0xff]  ;;  %51 = vperm.xlu1 %373, %v47_v0   ;;  %v34_v4 = vld [vmem:[%s558_s4 + $0x8] sm:$0xff] }
   0x3   :  { %37 = vperm.xlu0 %372, %v33_v1  }
   0x4   :  { %15 = vsyncpa [#allocation5], 0  ;;  %v187_v5 = vld [vmem:[%s558_s4 + $0x18] sm:$0xff]  ;;  %v68_v6 = vld [vmem:[%s558_s4 + $0x10] sm:$0xff]  ;;  %v424_v9 = vmov 0.0   ;;  %vm425_vm0 = vmmov 0  }
   0x5   :  { %v194_v7 = vld [vmem:[%s559_s5 + $0x18] sm:$0xff]  ;;  %v75_v8 = vld [vmem:[%s559_s5 + $0x10] sm:$0xff]  ;;  %345 = vmatprep.subr.bf16.mxu0 %v424_v9  ;;  %339 = vmatprep.subr.bf16.mxu1 %v424_v9  ;;  %v374_v10 = vld [vmem:[%s557_s3] sm:$0xff]   ;;  %s426_s4 = smov 104   ;;  %s427_s23 = smov 112   ;;  %vm140_vm1 = vcmask 130048  }
   0x6   :  { %56 = vperm.xlu1 %373, %v48_v3   ;;  %347 = vmatprep.mubr.msk.bf16.mxu0 %vm425_vm0, %v424_v9  ;;  %v330_v11 = vld [vmem:[%s554_s0] sm:$0xff]   ;;  %vm95_vm2 = vcmask 1043456   ;;  %vm91_vm3 = vcmask 64512   ;;  %vm265_vm4 = vcmask 261120   ;;  %vm262_vm5 = vcmask 257024   ;;  %s428_s29 = smov [#allocation2]  }
   0x7   :  { %42 = vperm.xlu0 %372, %v34_v4   ;;  %341 = vmatprep.mubr.msk.bf16.mxu1 %vm425_vm0, %v424_v9  ;;  %v331_v12 = vunpack.c.l.bf16 %v330_v11  ;;  %v332_v16 = vunpack.c.h.bf16 %v330_v11  ;;  %v185_v19 = vld [vmem:[%s556_s2] sm:$0xf]  ;;  %s292_s30 = sshll.u32 %s428_s29, 4  ;;  %vm272_vm6 = vcmask 7168   ;;  %s429_s9 = smov [#allocation4]   ;;  %s293_s30 = int_to_ptr.vmem [resolvable:$true] %s292_s30 }
   0x8   :  { %v66_v20 = vld [vmem:[%s555_s1] sm:$0xf]  ;;  %v186_v24 = vunpack.c.l.bf16 %v185_v19  ;;  %s304_s10 = sshll.u32 %s429_s9, 4  ;;  %p380_p1 = scmp.lt.s32.totalorder %s293_s30, %s293_s30  ;;  %s305_s10 = int_to_ptr.vmem [resolvable:$true] %s304_s10 }
   0x9   :  { %v67_v25 = vunpack.c.l.bf16 %v66_v20 }
   0xa   :  { %190 = vperm.xlu1 %373, %v187_v5  }
   0xb   :  { %71 = vperm.xlu0 %372, %v68_v6  }
   0xe   :  { %197 = vperm.xlu1 %373, %v194_v7  }
   0xf   :  { %78 = vperm.xlu0 %372, %v75_v8  }
  0x12   :  { %203 = vrot.lane.b32.xlu1 %v374_v10, %s426_s4 }
  0x13   :  { %89 = vrot.lane.b32.xlu0 %v374_v10, %s427_s23 }
  0x81   :  { %v52_v13 = vpop.permute.xlu1 %51 }
  0x82   :  { %v38_v14 = vpop.permute.xlu0 %37 }
  0x83   :  { %v45_v15 = vmul.f32 %v331_v12, %v38_v14 }
  0x85   :  { %v57_v17 = vpop.permute.xlu1 %56  ;;  %v59_v21 = vadd.f32 %v52_v13, %v45_v15 }
  0x86   :  { %v43_v18 = vpop.permute.xlu0 %42 }
  0x87   :  { %v46_v22 = vmul.f32 %v332_v16, %v43_v18  ;;  %v61_v28 = vmax.f32 %v59_v21, 0.0 }
  0x89   :  { %v60_v23 = vadd.f32 %v57_v17, %v46_v22  ;;  %v191_v26 = vpop.permute.xlu1 %190 }
  0x8a   :  { %v72_v27 = vpop.permute.xlu0 %71  ;;  %v193_v30 = vmul.f32 %v191_v26, %v186_v24 }
  0x8b   :  { %v62_v29 = vmax.f32 %v60_v23, 0.0  ;;  %v74_v31 = vmul.f32 %v72_v27, %v67_v25 }
  0x8d   :  { %v63_v32 = vpack.c.bf16 %v62_v29, %v61_v28  ;;  %v198_v33 = vpop.permute.xlu1 %197 }
  0x8e   :  { %v79_v34 = vpop.permute.xlu0 %78  ;;  %v200_v35 = vadd.f32 %v198_v33, %v193_v30 }
  0x8f   :  { %v81_v36 = vadd.f32 %v79_v34, %v74_v31  ;;  %346 = vmatpush3.bf16.msra.mxu0 %v63_v32 }
  0x90   :  { %351 = vmatprep.subr.bf16.mxu0 %v424_v9  ;;  %v201_v37 = vmax.f32 %v200_v35, 0.0 }
  0x91   :  { %v82_v38 = vmax.f32 %v81_v36, 0.0  ;;  %v204_v44 = vpop.permute.xlu1 %203 }
  0x92   :  { %348 = vmatmul.mubr.msk.bf16.vlgmr.msra.gmra.mrb[0].mxu0 %vm140_vm1, %v374_v10  ;;  %v202_v39 = vpack.c.bf16 %v201_v37, %v201_v37  ;;  %v90_v43 = vpop.permute.xlu0 %89 }
  0x93   :  { %v83_v40 = vpack.c.bf16 %v82_v38, %v82_v38  ;;  %353 = vmatprep.mubr.msk.bf16.mxu0 %vm425_vm0, %v424_v9 }
  0x94   :  { %v209_v42 = vsel %vm95_vm2, %v202_v39, 0 }
  0x95   :  { %v97_v41 = vsel %vm95_vm2, %v83_v40, 0  ;;  %352 = vmatpush3.bf16.msra.mxu0 %v209_v42 }
  0x96   :  { %340 = vmatpush3.bf16.msra.mxu1 %v97_v41 }
  0x99   :  { %342 = vmatmul.mubr.msk.bf16.vlgmr.msra.gmra.mrb[0].mxu1 %vm91_vm3, %v90_v43 }
  0x9e   :  { %354 = vmatmul.mubr.msk.bf16.vlgmr.msra.gmra.mrb[0].mxu0 %vm91_vm3, %v204_v44 }
 0x16c   :  { %v133_v45 = vpop.f32.mrb[0].mxu1 }
 0x16d   :  { %v343_v46 = vpop.f32.mrb[1].mxu1 }
 0x16e   :  { %v136_v47 = vpop.f32.mrb[2].mxu1 }
 0x16f   :  { %v344_v48 = vpop.f32.mrb[3].mxu1 }
 0x171   :  { %v245_v49 = vpop.f32.mrb[0].mxu0 }
 0x172   :  { %v357_v50 = vadd.f32 %v245_v49, %v133_v45  ;;  %v355_v51 = vpop.f32.mrb[1].mxu0 }
 0x173   :  { %v248_v52 = vpop.f32.mrb[2].mxu0 }
 0x174   :  { %v327_v53 = vpack.c.bf16 %v357_v50, %v357_v50  ;;  %v358_v54 = vadd.f32 %v248_v52, %v136_v47  ;;  %v356_v55 = vpop.f32.mrb[3].mxu0  ;;  %v266_v56 = vsel %vm265_vm4, %v357_v50, 0.0  ;;  %v275_v57 = vmul.f32 %v357_v50, %v357_v50 }
 0x175   :  { %267 = vadd.xlane.f32.xlu0 %v266_v56 }
 0x176   :  { %263 = vst.msk [vmem:[%s560_s6] sm:$0xf] %vm262_vm5, %v327_v53  ;;  %v328_v58 = vpack.c.bf16 %v358_v54, %v358_v54  ;;  %v269_v59 = vsel %vm265_vm4, %v358_v54, 0.0  ;;  %v277_v60 = vsel %vm265_vm4, %v275_v57, 0.0  ;;  %v276_v61 = vmul.f32 %v358_v54, %v358_v54 }
 0x177   :  { %270 = vadd.xlane.f32.xlu1 %v269_v59 }
 0x178   :  { %264 = vst.msk [vmem:[%s560_s6 + $0x4] sm:$0xf] %vm262_vm5, %v328_v58  ;;  %v280_v62 = vsel %vm265_vm4, %v276_v61, 0.0  ;;  %s375_s6 = scalar_lea.vmem %s293_s30, 256 }
 0x179   :  { %278 = vadd.xlane.f32.xlu0 %v277_v60  ;;  %p376_p0 = scmp.ne.s32.totalorder %s293_s30, %s375_s6  ;;  %p381_p2 = scmp.lt.s32.totalorder %s375_s6, %s375_s6 }
 0x17b   :  { %p382_p3 = por %p381_p2, %p380_p1 }
 0x17d   :  { %281 = vadd.xlane.f32.xlu0 %v280_v62  ;;  %p383_p4 = pnand %p382_p3, %p376_p0 }
 0x202   :  { %v268_v63 = vpop.xlane.xlu0 %267 }
 0x203   :  { %273 = vst.msk [vmem:[#allocation2] sm:$0xff] %vm272_vm6, %v268_v63 }
 0x204   :  { %v271_v0 = vpop.xlane.xlu1 %270 }
 0x205   :  { %274 = vst.msk [vmem:[#allocation2 + $0x8] sm:$0xff] %vm272_vm6, %v271_v0 }
 0x206   :  { %v279_v1 = vpop.xlane.xlu0 %278 }
 0x207   :  { %386 = shalt.err (!%p383_p4)
}
 0x208   :  { %s387_s13 = scalar_lea.hbm %s561_s7, 256 }
 0x209   :  { %p388_p5 = scmp.ne.s32.totalorder %s561_s7, %s387_s13  ;;  %p391_p6 = scmp.lt.u32.totalorder %s387_s13, %s561_s7 }
 0x20b   :  { %p393_p7 = pnand %p391_p6, %p388_p5 }
 0x20d   :  { %396 = shalt.err (!%p393_p7)
}
 0x20e   :  { %s430_s18 = smov 128   ;;  %s431_s19 = smov 8   ;;  %283 = vst.msk [vmem:[#allocation4] sm:$0xff] %vm272_vm6, %v279_v1  ;;  %v282_v2 = vpop.xlane.xlu0 %281 }
 0x20f   :  { %298 = dma.vmem_to_hbm [thread:$0]  %s293_s30, 256, %s561_s7, [#allocation3], %s430_s18, %s430_s18, %s431_s19   ;;  %284 = vst.msk [vmem:[#allocation4 + $0x8] sm:$0xff] %vm272_vm6, %v282_v2 }
 0x210   :  { %s397_s22 = scalar_lea.vmem %s305_s10, 256  ;;  %p402_p9 = scmp.lt.s32.totalorder %s305_s10, %s305_s10 }
 0x211   :  { %p398_p8 = scmp.ne.s32.totalorder %s305_s10, %s397_s22  ;;  %p403_p10 = scmp.lt.s32.totalorder %s397_s22, %s397_s22 }
 0x213   :  { %p404_p11 = por %p403_p10, %p402_p9 }
 0x215   :  { %p405_p12 = pnand %p404_p11, %p398_p8 }
 0x217   :  { %408 = shalt.err (!%p405_p12)
}
 0x218   :  { %s409_s24 = scalar_lea.hbm %s562_s8, 256 }
 0x219   :  { %p410_p13 = scmp.ne.s32.totalorder %s562_s8, %s409_s24  ;;  %p413_p0 = scmp.lt.u32.totalorder %s409_s24, %s562_s8 }
 0x21b   :  { %p415_p1 = pnand %p413_p0, %p410_p13 }
 0x21d   :  { %418 = shalt.err (!%p415_p1)
}
 0x21e   :  { %310 = dma.vmem_to_hbm [thread:$0]  %s305_s10, 256, %s562_s8, [#allocation5], %s430_s18, %s430_s18, %s431_s19  }
 0x21f   :  { %419 = dma.done.wait [#allocation3], 256  }
 0x220   :  { %420 = vsyncadd [#allocation3], 4294967040 }
 0x221   :  { %421 = dma.done.wait [#allocation5], 256  }
 0x222   :  { %422 = vsyncadd [#allocation5], 4294967040 }
 0x223   :  { %319 = vsyncpa [#allocation3], 1 }
 0x224   :  { %320 = vsyncpa [#allocation5], 1 }

// kernel: encoder_forward.60
= control target key start
LH: loop header
LB: loop body
LE: loop exit
PB: predicated region body
PF: predicated region fallthrough
CT: control target
= control target key end

     0   :  { %vm27_vm0 = vcmask 64512   ;;  %vm52_vm1 = vcmask 60416   ;;  %vm61_vm2 = vcmask 7168   ;;  %s171_s0 = inlined_call_operand.vmem [shape: bf16[4,16,8], index: 0, kind: input, shape index: {}]   ;;  %s172_s1 = inlined_call_operand.vmem [shape: bf16[16,8], index: 1, kind: output, shape index: {0}]   ;;  %s173_s2 = inlined_call_operand.vmem [shape: f32[1,16,1], index: 2, kind: output, shape index: {1}]   ;;  %s174_s3 = inlined_call_operand.vmem [shape: f32[1,16,1], index: 3, kind: output, shape index: {2}]  }
   0x1   :  { %v91_v0 = vld [vmem:[%s171_s0] sm:$0xff]   ;;  %v106_v1 = vld [vmem:[%s171_s0 + $0x8] sm:$0xff]   ;;  %v107_v2 = vld [vmem:[%s171_s0 + $0x10] sm:$0xff]  }
   0x2   :  { %v92_v3 = vunpack.c.l.bf16 %v91_v0  ;;  %v96_v4 = vunpack.c.l.bf16 %v106_v1  ;;  %v100_v5 = vunpack.c.l.bf16 %v107_v2  ;;  %v108_v6 = vld [vmem:[%s171_s0 + $0x18] sm:$0xff]   ;;  %v93_v7 = vunpack.c.h.bf16 %v91_v0 }
   0x3   :  { %v104_v8 = vunpack.c.l.bf16 %v108_v6  ;;  %v97_v9 = vunpack.c.h.bf16 %v106_v1  ;;  %v101_v10 = vunpack.c.h.bf16 %v107_v2  ;;  %v105_v11 = vunpack.c.h.bf16 %v108_v6 }
   0x4   :  { %v28_v12 = vsel %vm27_vm0, %v92_v3, 0.0  ;;  %v29_v13 = vsel %vm27_vm0, %v96_v4, 0.0  ;;  %v31_v14 = vsel %vm27_vm0, %v100_v5, 0.0  ;;  %v35_v15 = vsel %vm27_vm0, %v93_v7, 0.0 }
   0x5   :  { %v30_v16 = vadd.f32 %v29_v13, %v28_v12  ;;  %v36_v17 = vsel %vm27_vm0, %v97_v9, 0.0  ;;  %v38_v18 = vsel %vm27_vm0, %v101_v10, 0.0  ;;  %v33_v19 = vsel %vm27_vm0, %v104_v8, 0.0 }
   0x6   :  { %v37_v20 = vadd.f32 %v36_v17, %v35_v15  ;;  %v40_v22 = vsel %vm27_vm0, %v105_v11, 0.0 }
   0x7   :  { %v32_v21 = vadd.f32 %v31_v14, %v30_v16 }
   0x8   :  { %v39_v23 = vadd.f32 %v38_v18, %v37_v20 }
   0x9   :  { %v34_v24 = vadd.f32 %v33_v19, %v32_v21 }
   0xa   :  { %v41_v25 = vadd.f32 %v40_v22, %v39_v23 }
   0xb   :  { %v42_v26 = vmul.f32 0.25, %v34_v24 }
   0xc   :  { %v43_v27 = vmul.f32 0.25, %v41_v25 }
   0xd   :  { %v64_v28 = vmul.f32 %v42_v26, %v42_v26  ;;  %v88_v29 = vpack.c.bf16 %v42_v26, %v42_v26  ;;  %v55_v30 = vsel %vm27_vm0, %v42_v26, 0.0 }
   0xe   :  { %56 = vadd.xlane.f32.xlu0 %v55_v30  ;;  %v89_v31 = vpack.c.bf16 %v43_v27, %v43_v27  ;;  %v65_v32 = vmul.f32 %v43_v27, %v43_v27  ;;  %v58_v34 = vsel %vm27_vm0, %v43_v27, 0.0 }
   0xf   :  { %v66_v33 = vsel %vm27_vm0, %v64_v28, 0.0  ;;  %53 = vst.msk [vmem:[%s172_s1] sm:$0xf] %vm52_vm1, %v88_v29 }
  0x10   :  { %67 = vadd.xlane.f32.xlu1 %v66_v33  ;;  %54 = vst.msk [vmem:[%s172_s1 + $0x4] sm:$0xf] %vm52_vm1, %v89_v31  ;;  %v69_v35 = vsel %vm27_vm0, %v65_v32, 0.0 }
  0x12   :  { %59 = vadd.xlane.f32.xlu0 %v58_v34 }
  0x14   :  { %70 = vadd.xlane.f32.xlu1 %v69_v35 }
  0x9b   :  { %v57_v36 = vpop.xlane.xlu0 %56 }
  0x9c   :  { %62 = vst.msk [vmem:[%s173_s2] sm:$0xff] %vm61_vm2, %v57_v36 }
  0x9d   :  { %v68_v37 = vpop.xlane.xlu1 %67 }
  0x9e   :  { %72 = vst.msk [vmem:[%s174_s3] sm:$0xff] %vm61_vm2, %v68_v37 }
  0x9f   :  { %v60_v38 = vpop.xlane.xlu0 %59 }
  0xa0   :  { %63 = vst.msk [vmem:[%s173_s2 + $0x8] sm:$0xff] %vm61_vm2, %v60_v38 }
  0xa1   :  { %v71_v39 = vpop.xlane.xlu1 %70 }
  0xa2   :  { %73 = vst.msk [vmem:[%s174_s3 + $0x8] sm:$0xff] %vm61_vm2, %v71_v39 }

// kernel: encoder_forward.61
= control target key start
LH: loop header
LB: loop body
LE: loop exit
PB: predicated region body
PF: predicated region fallthrough
CT: control target
= control target key end

     0   :  { %v227_v0 = vmov 0   ;;  %vm70_vm0 = vcmask 130048   ;;  %vm147_vm1 = vcmask 64512   ;;  %vm142_vm2 = vcmask 60416   ;;  %s342_s3 = inlined_call_operand.vmem [shape: f32[16,1], index: 3, kind: input, shape index: {}]   ;;  %s343_s2 = inlined_call_operand.vmem [shape: f32[16,1], index: 2, kind: input, shape index: {}]   ;;  %s344_s1 = inlined_call_operand.vmem [shape: bf16[32,16], index: 1, kind: input, shape index: {}]   ;;  %s345_s0 = inlined_call_operand.vmem [shape: bf16[16,8], index: 0, kind: input, shape index: {}]   ;;  %s346_s4 = inlined_call_operand.vmem [shape: bf16[32,8], index: 4, kind: output, shape index: {0}]   ;;  %s347_s5 = inlined_call_operand.vmem [shape: f32[1,32,1], index: 5, kind: output, shape index: {1}]   ;;  %s348_s6 = inlined_call_operand.vmem [shape: f32[1,32,1], index: 6, kind: output, shape index: {2}]  }
   0x1   :  { %224 = vset.pattern.permute.xlu1 %v227_v0  ;;  %223 = vset.pattern.permute.xlu0 %v227_v0  ;;  %v39_v1 = vld [vmem:[%s342_s3] sm:$0xff]  ;;  %v40_v3 = vld [vmem:[%s342_s3 + $0x8] sm:$0xff]  ;;  %vm160_vm3 = vcmask 7168  }
   0x2   :  { %v25_v2 = vld [vmem:[%s343_s2] sm:$0xff]  ;;  %43 = vperm.xlu1 %224, %v39_v1   ;;  %v26_v4 = vld [vmem:[%s343_s2 + $0x8] sm:$0xff] }
   0x3   :  { %29 = vperm.xlu0 %223, %v25_v2   ;;  %v225_v5 = vld [vmem:[%s344_s1] sm:$0xff]   ;;  %v226_v20 = vld [vmem:[%s344_s1 + $0x8] sm:$0xff]  }
   0x4   :  { %218 = vmatprep.mubr.msk.bf16.mxu0 %vm70_vm0, %v225_v5  ;;  %v210_v6 = vld [vmem:[%s345_s0] sm:$0xff]  }
   0x5   :  { %v211_v7 = vunpack.c.l.bf16 %v210_v6  ;;  %v212_v11 = vunpack.c.h.bf16 %v210_v6 }
   0x6   :  { %48 = vperm.xlu1 %224, %v40_v3  }
   0x7   :  { %34 = vperm.xlu0 %223, %v26_v4  }
  0x81   :  { %v44_v8 = vpop.permute.xlu1 %43 }
  0x82   :  { %v30_v9 = vpop.permute.xlu0 %29 }
  0x83   :  { %v37_v10 = vmul.f32 %v211_v7, %v30_v9 }
  0x85   :  { %v51_v13 = vadd.f32 %v44_v8, %v37_v10  ;;  %v49_v15 = vpop.permute.xlu1 %48 }
  0x86   :  { %v35_v12 = vpop.permute.xlu0 %34 }
  0x87   :  { %v38_v14 = vmul.f32 %v212_v11, %v35_v12  ;;  %v53_v17 = vmax.f32 %v51_v13, 0.0 }
  0x89   :  { %v52_v16 = vadd.f32 %v49_v15, %v38_v14 }
  0x8b   :  { %v54_v18 = vmax.f32 %v52_v16, 0.0 }
  0x8d   :  { %v55_v19 = vpack.c.bf16 %v54_v18, %v53_v17 }
  0x8f   :  { %216 = vmatprep.subr.bf16.mxu0 %v55_v19 }
  0x90   :  { %217 = vmatpush3.bf16.msra.mxu0 %v55_v19 }
  0x93   :  { %219 = vmatmul.mubr.msk.bf16.vlgmr.msra.gmra.mrb[0].mxu0 %vm70_vm0, %v226_v20 }
 0x166   :  { %v220_v21 = vpop.f32.mrb[0].mxu0 }
 0x167   :  { %v207_v22 = vpack.c.bf16 %v220_v21, %v220_v21  ;;  %v111_v23 = vpop.f32.mrb[1].mxu0  ;;  %v154_v24 = vsel %vm147_vm1, %v220_v21, 0.0  ;;  %v167_v34 = vmul.f32 %v220_v21, %v220_v21 }
 0x168   :  { %v205_v25 = vpack.c.bf16 %v111_v23, %v111_v23  ;;  %155 = vadd.xlane.f32.xlu0 %v154_v24  ;;  %v221_v26 = vpop.f32.mrb[2].mxu0  ;;  %v165_v31 = vmul.f32 %v111_v23, %v111_v23  ;;  %v148_v32 = vsel %vm147_vm1, %v111_v23, 0.0 }
 0x169   :  { %145 = vst.msk [vmem:[%s346_s4 + $0x8] sm:$0xf] %vm142_vm2, %v207_v22  ;;  %v208_v27 = vpack.c.bf16 %v221_v26, %v221_v26  ;;  %v114_v28 = vpop.f32.mrb[3].mxu0  ;;  %v157_v36 = vsel %vm147_vm1, %v221_v26, 0.0  ;;  %v175_v37 = vsel %vm147_vm1, %v167_v34, 0.0  ;;  %v168_v39 = vmul.f32 %v221_v26, %v221_v26 }
 0x16a   :  { %143 = vst.msk [vmem:[%s346_s4] sm:$0xf] %vm142_vm2, %v205_v25  ;;  %v206_v29 = vpack.c.bf16 %v114_v28, %v114_v28  ;;  %v151_v30 = vsel %vm147_vm1, %v114_v28, 0.0  ;;  %v169_v33 = vsel %vm147_vm1, %v165_v31, 0.0  ;;  %v166_v35 = vmul.f32 %v114_v28, %v114_v28 }
 0x16b   :  { %146 = vst.msk [vmem:[%s346_s4 + $0xc] sm:$0xf] %vm142_vm2, %v208_v27  ;;  %152 = vadd.xlane.f32.xlu1 %v151_v30  ;;  %v178_v40 = vsel %vm147_vm1, %v168_v39, 0.0 }
 0x16c   :  { %144 = vst.msk [vmem:[%s346_s4 + $0x4] sm:$0xf] %vm142_vm2, %v206_v29  ;;  %149 = vadd.xlane.f32.xlu0 %v148_v32  ;;  %v172_v38 = vsel %vm147_vm1, %v166_v35, 0.0 }
 0x16f   :  { %170 = vadd.xlane.f32.xlu1 %v169_v33 }
 0x170   :  { %158 = vadd.xlane.f32.xlu0 %v157_v36 }
 0x173   :  { %176 = vadd.xlane.f32.xlu1 %v175_v37 }
 0x174   :  { %173 = vadd.xlane.f32.xlu0 %v172_v38 }
 0x178   :  { %179 = vadd.xlane.f32.xlu0 %v178_v40 }
 0x1f5   :  { %v156_v41 = vpop.xlane.xlu0 %155 }
 0x1f6   :  { %163 = vst.msk [vmem:[%s347_s5 + $0x10] sm:$0xff] %vm160_vm3, %v156_v41 }
 0x1f8   :  { %v153_v42 = vpop.xlane.xlu1 %152 }
 0x1f9   :  { %162 = vst.msk [vmem:[%s347_s5 + $0x8] sm:$0xff] %vm160_vm3, %v153_v42  ;;  %v150_v43 = vpop.xlane.xlu0 %149 }
 0x1fa   :  { %161 = vst.msk [vmem:[%s347_s5] sm:$0xff] %vm160_vm3, %v150_v43 }
 0x1fc   :  { %v171_v44 = vpop.xlane.xlu1 %170 }
 0x1fd   :  { %181 = vst.msk [vmem:[%s348_s6] sm:$0xff] %vm160_vm3, %v171_v44  ;;  %v159_v45 = vpop.xlane.xlu0 %158 }
 0x1fe   :  { %164 = vst.msk [vmem:[%s347_s5 + $0x18] sm:$0xff] %vm160_vm3, %v159_v45 }
 0x200   :  { %v177_v46 = vpop.xlane.xlu1 %176 }
 0x201   :  { %183 = vst.msk [vmem:[%s348_s6 + $0x10] sm:$0xff] %vm160_vm3, %v177_v46  ;;  %v174_v47 = vpop.xlane.xlu0 %173 }
 0x202   :  { %182 = vst.msk [vmem:[%s348_s6 + $0x8] sm:$0xff] %vm160_vm3, %v174_v47 }
 0x205   :  { %v180_v48 = vpop.xlane.xlu0 %179 }
 0x206   :  { %184 = vst.msk [vmem:[%s348_s6 + $0x18] sm:$0xff] %vm160_vm3, %v180_v48 }

// kernel: encoder_forward.62
= control target key start
LH: loop header
LB: loop body
LE: loop exit
PB: predicated region body
PF: predicated region fallthrough
CT: control target
= control target key end

     0   :  { %v127_v0 = vmov 0   ;;  %vm98_vm0 = vcmask 60416   ;;  %s190_s1 = inlined_call_operand.vmem [shape: f32[32,1], index: 1, kind: input, shape index: {}]   ;;  %s191_s2 = inlined_call_operand.vmem [shape: f32[32,1], index: 2, kind: input, shape index: {}]   ;;  %s192_s0 = inlined_call_operand.vmem [shape: bf16[32,8], index: 0, kind: input, shape index: {}]   ;;  %s193_s3 = inlined_call_operand.vmem [shape: bf16[32,8], index: 3, kind: output, shape index: {}]  }
   0x1   :  { %126 = vset.pattern.permute.xlu1 %v127_v0  ;;  %125 = vset.pattern.permute.xlu0 %v127_v0  ;;  %v24_v1 = vld [vmem:[%s190_s1 + $0x10] sm:$0xff]  ;;  %v22_v2 = vld [vmem:[%s190_s1] sm:$0xff]  ;;  %v25_v3 = vld [vmem:[%s190_s1 + $0x18] sm:$0xff] }
   0x2   :  { %38 = vperm.xlu1 %126, %v24_v1   ;;  %28 = vperm.xlu0 %125, %v22_v2   ;;  %v23_v4 = vld [vmem:[%s190_s1 + $0x8] sm:$0xff]  ;;  %v50_v6 = vld [vmem:[%s191_s2] sm:$0xff]  ;;  %v53_v7 = vld [vmem:[%s191_s2 + $0x18] sm:$0xff] }
   0x3   :  { %v51_v5 = vld [vmem:[%s191_s2 + $0x8] sm:$0xff]  ;;  %v52_v8 = vld [vmem:[%s191_s2 + $0x10] sm:$0xff]  ;;  %v116_v11 = vld [vmem:[%s192_s0] sm:$0xff]  }
   0x4   :  { %v117_v12 = vunpack.c.l.bf16 %v116_v11  ;;  %v118_v13 = vunpack.c.h.bf16 %v116_v11  ;;  %v123_v14 = vld [vmem:[%s192_s0 + $0x8] sm:$0xff]  }
   0x5   :  { %v121_v17 = vunpack.c.l.bf16 %v123_v14  ;;  %v122_v19 = vunpack.c.h.bf16 %v123_v14 }
   0x6   :  { %43 = vperm.xlu1 %126, %v25_v3   ;;  %33 = vperm.xlu0 %125, %v23_v4  }
   0xa   :  { %61 = vperm.xlu1 %126, %v51_v5   ;;  %56 = vperm.xlu0 %125, %v50_v6  }
   0xe   :  { %71 = vperm.xlu1 %126, %v53_v7   ;;  %66 = vperm.xlu0 %125, %v52_v8  }
  0x81   :  { %v39_v9 = vpop.permute.xlu1 %38  ;;  %v29_v10 = vpop.permute.xlu0 %28 }
  0x82   :  { %v46_v18 = vmul.f32 %v117_v12, %v29_v10  ;;  %v48_v25 = vmul.f32 %v121_v17, %v39_v9 }
  0x85   :  { %v44_v15 = vpop.permute.xlu1 %43  ;;  %v34_v16 = vpop.permute.xlu0 %33 }
  0x86   :  { %v47_v20 = vmul.f32 %v118_v13, %v34_v16  ;;  %v49_v26 = vmul.f32 %v122_v19, %v44_v15 }
  0x89   :  { %v62_v21 = vpop.permute.xlu1 %61  ;;  %v57_v22 = vpop.permute.xlu0 %56 }
  0x8a   :  { %v75_v23 = vadd.f32 %v62_v21, %v47_v20  ;;  %v74_v24 = vadd.f32 %v57_v22, %v46_v18 }
  0x8c   :  { %v79_v27 = vmax.f32 %v75_v23, 0.0  ;;  %v78_v28 = vmax.f32 %v74_v24, 0.0 }
  0x8d   :  { %v72_v29 = vpop.permute.xlu1 %71  ;;  %v67_v30 = vpop.permute.xlu0 %66 }
  0x8e   :  { %v112_v31 = vpack.c.bf16 %v79_v27, %v79_v27  ;;  %v111_v32 = vpack.c.bf16 %v78_v28, %v78_v28  ;;  %v77_v33 = vadd.f32 %v72_v29, %v49_v26  ;;  %v76_v34 = vadd.f32 %v67_v30, %v48_v25 }
  0x90   :  { %100 = vst.msk [vmem:[%s193_s3 + $0x4] sm:$0xf] %vm98_vm0, %v112_v31  ;;  %99 = vst.msk [vmem:[%s193_s3] sm:$0xf] %vm98_vm0, %v111_v32  ;;  %v81_v35 = vmax.f32 %v77_v33, 0.0  ;;  %v80_v36 = vmax.f32 %v76_v34, 0.0 }
  0x92   :  { %v114_v37 = vpack.c.bf16 %v81_v35, %v81_v35  ;;  %v113_v38 = vpack.c.bf16 %v80_v36, %v80_v36 }
  0x94   :  { %102 = vst.msk [vmem:[%s193_s3 + $0xc] sm:$0xf] %vm98_vm0, %v114_v37  ;;  %101 = vst.msk [vmem:[%s193_s3 + $0x8] sm:$0xf] %vm98_vm0, %v113_v38 }

// kernel: encoder_forward.63
= control target key start
LH: loop header
LB: loop body
LE: loop exit
PB: predicated region body
PF: predicated region fallthrough
CT: control target
= control target key end

     0   :  { %v359_v1 = vmov 0.0   ;;  %vm360_vm0 = vmmov 0   ;;  %vm171_vm1 = vcmask 261120   ;;  %vm258_vm2 = vcmask 64512   ;;  %s455_s0 = inlined_call_operand.vmem [shape: bf16[288,8], index: 0, kind: input, shape index: {}]   ;;  %s456_s1 = inlined_call_operand.vmem [shape: bf16[8,288], index: 1, kind: input, shape index: {}]   ;;  %s457_s2 = inlined_call_operand.vmem [shape: bf16[8,8], index: 2, kind: output, shape index: {0}]   ;;  %s458_s3 = inlined_call_operand.vmem [shape: f32[1,8,1], index: 3, kind: output, shape index: {1}]   ;;  %s459_s4 = inlined_call_operand.vmem [shape: f32[1,8,1], index: 4, kind: output, shape index: {2}]  }
   0x1   :  { %v338_v0 = vld [vmem:[%s455_s0 + $0x40] sm:$0xff]   ;;  %328 = vmatprep.subr.bf16.mxu1 %v359_v1  ;;  %332 = vmatprep.mubr.msk.bf16.mxu1 %vm360_vm0, %v359_v1  ;;  %v340_v3 = vld [vmem:[%s455_s0 + $0x48] sm:$0xff]   ;;  %v342_v5 = vld [vmem:[%s455_s0 + $0x50] sm:$0xff]   ;;  %vm256_vm3 = vcmask 60416   ;;  %vm262_vm4 = vcmask 7168  }
   0x2   :  { %v339_v2 = vld [vmem:[%s455_s0] sm:$0xff]   ;;  %303 = vmatprep.subr.bf16.mxu0 %v338_v0  ;;  %v341_v4 = vld [vmem:[%s455_s0 + $0x8] sm:$0xff]   ;;  %v343_v6 = vld [vmem:[%s455_s0 + $0x10] sm:$0xff]  }
   0x3   :  { %304 = vmatpush3.bf16.msra.mxu0 %v339_v2  ;;  %v344_v7 = vld [vmem:[%s455_s0 + $0x58] sm:$0xff]   ;;  %v346_v9 = vld [vmem:[%s455_s0 + $0x60] sm:$0xff]   ;;  %v348_v12 = vld [vmem:[%s455_s0 + $0x68] sm:$0xff]  }
   0x4   :  { %305 = vmatprep.subr.bf16.mxu0 %v340_v3  ;;  %v345_v8 = vld [vmem:[%s455_s0 + $0x18] sm:$0xff]   ;;  %v352_v10 = vld [vmem:[%s455_s0 + $0x80] sm:$0xff]   ;;  %v355_v13 = vld [vmem:[%s455_s0 + $0x88] sm:$0xff]  }
   0x5   :  { %v347_v11 = vld [vmem:[%s455_s0 + $0x20] sm:$0xff]   ;;  %329 = vmatpush3.bf16.msra.mxu1 %v352_v10  ;;  %v349_v15 = vld [vmem:[%s455_s0 + $0x28] sm:$0xff]   ;;  %v350_v18 = vld [vmem:[%s455_s0 + $0x70] sm:$0xff]  }
   0x6   :  { %330 = vmatprep.subr.bf16.mxu1 %v359_v1  ;;  %v51_v14 = vld [vmem:[%s456_s1] sm:$0xff]  ;;  %v358_v17 = vld [vmem:[%s456_s1 + $0x8] ss:$0 sps:$4 sm:$0xff]   ;;  %v351_v19 = vld [vmem:[%s455_s0 + $0x30] sm:$0xff]  }
   0x7   :  { %306 = vmatpush3.bf16.msra.mxu0 %v341_v4  ;;  %v282_v16 = vcombine.high %v51_v14, %v51_v14  ;;  %v353_v20 = vld [vmem:[%s455_s0 + $0x78] sm:$0xff]   ;;  %v281_v22 = vcombine.low %v51_v14, %v51_v14 }
   0x8   :  { %307 = vmatprep.subr.bf16.mxu0 %v342_v5  ;;  %v354_v21 = vld [vmem:[%s455_s0 + $0x38] sm:$0xff]  }
   0x9   :  { %331 = vmatpush3.bf16.msra.mxu1 %v355_v13  ;;  %207 = vmatprep.mubr.bf16.mxu0 %v282_v16 }
   0xb   :  { %308 = vmatpush3.bf16.msra.mxu0 %v343_v6 }
   0xc   :  { %309 = vmatprep.subr.bf16.mxu0 %v344_v7  ;;  %333 = vmatmul.mubr.msk.bf16.vlgmr.msra.gmra.mrb[0].mxu1 %vm171_vm1, %v358_v17 }
   0xf   :  { %310 = vmatpush3.bf16.msra.mxu0 %v345_v8 }
  0x10   :  { %311 = vmatprep.subr.bf16.mxu0 %v346_v9 }
  0x13   :  { %312 = vmatpush3.bf16.msra.mxu0 %v347_v11 }
  0x14   :  { %313 = vmatprep.subr.bf16.mxu0 %v348_v12 }
  0x17   :  { %314 = vmatpush3.bf16.msra.mxu0 %v349_v15 }
  0x18   :  { %315 = vmatprep.subr.bf16.mxu0 %v350_v18 }
  0x1b   :  { %316 = vmatpush3.bf16.msra.mxu0 %v351_v19 }
  0x1c   :  { %317 = vmatprep.subr.bf16.mxu0 %v353_v20 }
  0x1f   :  { %318 = vmatpush3.bf16.msra.mxu0 %v354_v21 }
  0x22   :  { %208 = vmatmul.mubr.bf16.vlgmr.msra.gmra.mrb[0].mxu0 %v281_v22 }
  0xdf   :  { %v249_v23 = vpop.f32.mrb[0].mxu1 }
  0xe0   :  { %v334_v24 = vpop.f32.mrb[1].mxu1 }
  0xe1   :  { %v252_v25 = vpop.f32.mrb[2].mxu1 }
  0xe2   :  { %v335_v26 = vpop.f32.mrb[3].mxu1 }
  0xf5   :  { %v319_v27 = vpop.f32.mrb[0].mxu0 }
  0xf6   :  { %v320_v28 = vpop.f32.mrb[1].mxu0 }
  0xf7   :  { %v321_v29 = vadd.f32 %v320_v28, %v319_v27  ;;  %v322_v30 = vpop.f32.mrb[2].mxu0 }
  0xf8   :  { %v323_v31 = vpop.f32.mrb[3].mxu0 }
  0xf9   :  { %v250_v32 = vadd.f32 %v321_v29, %v249_v23 }
  0xfb   :  { %v255_v33 = vpack.c.bf16 %v250_v32, %v250_v32  ;;  %v259_v34 = vsel %vm258_vm2, %v250_v32, 0.0  ;;  %v264_v35 = vmul.f32 %v250_v32, %v250_v32 }
  0xfc   :  { %260 = vadd.xlane.f32.xlu0 %v259_v34 }
  0xfd   :  { %257 = vst.msk [vmem:[%s457_s2] sm:$0xf] %vm256_vm3, %v255_v33  ;;  %v265_v36 = vsel %vm258_vm2, %v264_v35, 0.0 }
 0x100   :  { %266 = vadd.xlane.f32.xlu0 %v265_v36 }
 0x189   :  { %v261_v37 = vpop.xlane.xlu0 %260 }
 0x18a   :  { %263 = vst.msk [vmem:[%s458_s3] sm:$0xff] %vm262_vm4, %v261_v37 }
 0x18d   :  { %v267_v38 = vpop.xlane.xlu0 %266 }
 0x18e   :  { %268 = vst.msk [vmem:[%s459_s4] sm:$0xff] %vm262_vm4, %v267_v38 }

// kernel: encoder_forward.67
= control target key start
LH: loop header
LB: loop body
LE: loop exit
PB: predicated region body
PF: predicated region fallthrough
CT: control target
= control target key end

     0   :  { %v123_v0 = vmov 0   ;;  %vm94_vm0 = vcmask 60416   ;;  %s186_s1 = inlined_call_operand.vmem [shape: f32[32,1], index: 1, kind: input, shape index: {}]   ;;  %s187_s2 = inlined_call_operand.vmem [shape: f32[32,1], index: 2, kind: input, shape index: {}]   ;;  %s188_s0 = inlined_call_operand.vmem [shape: bf16[32,8], index: 0, kind: input, shape index: {}]   ;;  %s189_s3 = inlined_call_operand.vmem [shape: bf16[32,8], index: 3, kind: output, shape index: {}]  }
   0x1   :  { %122 = vset.pattern.permute.xlu1 %v123_v0  ;;  %121 = vset.pattern.permute.xlu0 %v123_v0  ;;  %v24_v1 = vld [vmem:[%s186_s1 + $0x10] sm:$0xff]  ;;  %v22_v2 = vld [vmem:[%s186_s1] sm:$0xff]  ;;  %v25_v3 = vld [vmem:[%s186_s1 + $0x18] sm:$0xff] }
   0x2   :  { %38 = vperm.xlu1 %122, %v24_v1   ;;  %28 = vperm.xlu0 %121, %v22_v2   ;;  %v23_v4 = vld [vmem:[%s186_s1 + $0x8] sm:$0xff]  ;;  %v50_v6 = vld [vmem:[%s187_s2] sm:$0xff]  ;;  %v53_v7 = vld [vmem:[%s187_s2 + $0x18] sm:$0xff] }
   0x3   :  { %v51_v5 = vld [vmem:[%s187_s2 + $0x8] sm:$0xff]  ;;  %v52_v8 = vld [vmem:[%s187_s2 + $0x10] sm:$0xff]  ;;  %v112_v11 = vld [vmem:[%s188_s0] sm:$0xff]  }
   0x4   :  { %v113_v12 = vunpack.c.l.bf16 %v112_v11  ;;  %v114_v13 = vunpack.c.h.bf16 %v112_v11  ;;  %v119_v14 = vld [vmem:[%s188_s0 + $0x8] sm:$0xff]  }
   0x5   :  { %v117_v17 = vunpack.c.l.bf16 %v119_v14  ;;  %v118_v19 = vunpack.c.h.bf16 %v119_v14 }
   0x6   :  { %43 = vperm.xlu1 %122, %v25_v3   ;;  %33 = vperm.xlu0 %121, %v23_v4  }
   0xa   :  { %61 = vperm.xlu1 %122, %v51_v5   ;;  %56 = vperm.xlu0 %121, %v50_v6  }
   0xe   :  { %71 = vperm.xlu1 %122, %v53_v7   ;;  %66 = vperm.xlu0 %121, %v52_v8  }
  0x81   :  { %v39_v9 = vpop.permute.xlu1 %38  ;;  %v29_v10 = vpop.permute.xlu0 %28 }
  0x82   :  { %v46_v18 = vmul.f32 %v113_v12, %v29_v10  ;;  %v48_v25 = vmul.f32 %v117_v17, %v39_v9 }
  0x85   :  { %v44_v15 = vpop.permute.xlu1 %43  ;;  %v34_v16 = vpop.permute.xlu0 %33 }
  0x86   :  { %v47_v20 = vmul.f32 %v114_v13, %v34_v16  ;;  %v49_v26 = vmul.f32 %v118_v19, %v44_v15 }
  0x89   :  { %v62_v21 = vpop.permute.xlu1 %61  ;;  %v57_v22 = vpop.permute.xlu0 %56 }
  0x8a   :  { %v75_v23 = vadd.f32 %v62_v21, %v47_v20  ;;  %v74_v24 = vadd.f32 %v57_v22, %v46_v18 }
  0x8c   :  { %v108_v27 = vpack.c.bf16 %v75_v23, %v75_v23  ;;  %v107_v28 = vpack.c.bf16 %v74_v24, %v74_v24 }
  0x8d   :  { %v72_v29 = vpop.permute.xlu1 %71  ;;  %v67_v30 = vpop.permute.xlu0 %66 }
  0x8e   :  { %96 = vst.msk [vmem:[%s189_s3 + $0x4] sm:$0xf] %vm94_vm0, %v108_v27  ;;  %95 = vst.msk [vmem:[%s189_s3] sm:$0xf] %vm94_vm0, %v107_v28  ;;  %v77_v31 = vadd.f32 %v72_v29, %v49_v26  ;;  %v76_v32 = vadd.f32 %v67_v30, %v48_v25 }
  0x90   :  { %v110_v33 = vpack.c.bf16 %v77_v31, %v77_v31  ;;  %v109_v34 = vpack.c.bf16 %v76_v32, %v76_v32 }
  0x92   :  { %98 = vst.msk [vmem:[%s189_s3 + $0xc] sm:$0xf] %vm94_vm0, %v110_v33  ;;  %97 = vst.msk [vmem:[%s189_s3 + $0x8] sm:$0xf] %vm94_vm0, %v109_v34 }

// kernel: encoder_forward.64
= control target key start
LH: loop header
LB: loop body
LE: loop exit
PB: predicated region body
PF: predicated region fallthrough
CT: control target
= control target key end

     0   :  { %v328_v0 = vmov 0   ;;  %vm155_vm0 = vcmask 130048   ;;  %vm95_vm1 = vcmask 64512   ;;  %vm102_vm2 = vcmask 1043456   ;;  %s460_s3 = inlined_call_operand.vmem [shape: f32[24,1], index: 3, kind: input, shape index: {}]   ;;  %s461_s4 = inlined_call_operand.vmem [shape: f32[24,1], index: 4, kind: input, shape index: {}]   ;;  %s462_s2 = inlined_call_operand.vmem [shape: bf16[32,24], index: 2, kind: input, shape index: {}]   ;;  %s463_s0 = inlined_call_operand.vmem [shape: bf16[16,8], index: 0, kind: input, shape index: {}]   ;;  %s464_s1 = inlined_call_operand.vmem [shape: bf16[8,8], index: 1, kind: input, shape index: {}]   ;;  %s465_s5 = inlined_call_operand.vmem [shape: bf16[32,8], index: 5, kind: output, shape index: {0}]   ;;  %s466_s6 = inlined_call_operand.vmem [shape: f32[1,32,1], index: 6, kind: output, shape index: {1}]   ;;  %s467_s7 = inlined_call_operand.vmem [shape: f32[1,32,1], index: 7, kind: output, shape index: {2}]  }
   0x1   :  { %325 = vset.pattern.permute.xlu1 %v328_v0  ;;  %324 = vset.pattern.permute.xlu0 %v328_v0  ;;  %v65_v1 = vld [vmem:[%s460_s3 + $0x10] sm:$0xff]  ;;  %v28_v2 = vld [vmem:[%s460_s3] sm:$0xff]  ;;  %v29_v4 = vld [vmem:[%s460_s3 + $0x8] sm:$0xff]  ;;  %s329_s3 = smov 112   ;;  %vm227_vm3 = vcmask 60416   ;;  %vm244_vm4 = vcmask 7168  }
   0x2   :  { %68 = vperm.xlu1 %325, %v65_v1   ;;  %32 = vperm.xlu0 %324, %v28_v2   ;;  %v42_v3 = vld [vmem:[%s461_s4] sm:$0xff]  ;;  %v72_v5 = vld [vmem:[%s461_s4 + $0x10] sm:$0xff]  ;;  %v43_v6 = vld [vmem:[%s461_s4 + $0x8] sm:$0xff] }
   0x3   :  { %v326_v7 = vld [vmem:[%s462_s2] sm:$0xff]   ;;  %v327_v8 = vld [vmem:[%s462_s2 + $0x8] sm:$0xff]  }
   0x4   :  { %313 = vmatprep.mubr.msk.bf16.mxu0 %vm155_vm0, %v326_v7  ;;  %v296_v9 = vld [vmem:[%s463_s0] sm:$0xff]  }
   0x5   :  { %v63_v11 = vld [vmem:[%s464_s1] sm:$0xf]  ;;  %v297_v13 = vunpack.c.l.bf16 %v296_v9  ;;  %v298_v15 = vunpack.c.h.bf16 %v296_v9 }
   0x6   :  { %46 = vperm.xlu1 %325, %v42_v3   ;;  %37 = vperm.xlu0 %324, %v29_v4   ;;  %v64_v14 = vunpack.c.l.bf16 %v63_v11 }
   0xa   :  { %75 = vperm.xlu1 %325, %v72_v5   ;;  %51 = vperm.xlu0 %324, %v43_v6  }
   0xe   :  { %91 = vrot.lane.b32.xlu0 %v326_v7, %s329_s3  ;;  %93 = vrot.lane.b32.xlu1 %v327_v8, %s329_s3 }
  0x81   :  { %v69_v10 = vpop.permute.xlu1 %68  ;;  %v33_v12 = vpop.permute.xlu0 %32 }
  0x82   :  { %v40_v18 = vmul.f32 %v297_v13, %v33_v12  ;;  %v71_v19 = vmul.f32 %v69_v10, %v64_v14 }
  0x85   :  { %v47_v16 = vpop.permute.xlu1 %46  ;;  %v38_v17 = vpop.permute.xlu0 %37 }
  0x86   :  { %v54_v20 = vadd.f32 %v47_v16, %v40_v18  ;;  %v41_v21 = vmul.f32 %v298_v15, %v38_v17 }
  0x88   :  { %v56_v26 = vmax.f32 %v54_v20, 0.0 }
  0x89   :  { %v76_v22 = vpop.permute.xlu1 %75  ;;  %v52_v23 = vpop.permute.xlu0 %51 }
  0x8a   :  { %v78_v24 = vadd.f32 %v76_v22, %v71_v19  ;;  %v55_v25 = vadd.f32 %v52_v23, %v41_v21 }
  0x8c   :  { %v79_v27 = vmax.f32 %v78_v24, 0.0  ;;  %v57_v28 = vmax.f32 %v55_v25, 0.0 }
  0x8d   :  { %v92_v29 = vpop.permute.xlu0 %91  ;;  %v94_v33 = vpop.permute.xlu1 %93 }
  0x8e   :  { %v80_v30 = vpack.c.bf16 %v79_v27, %v79_v27  ;;  %v58_v31 = vpack.c.bf16 %v57_v28, %v56_v26  ;;  %307 = vmatprep.mubr.msk.bf16.mxu1 %vm95_vm1, %v92_v29 }
  0x90   :  { %321 = vmatprep.subr.msk.bf16.mxu1 %vm102_vm2, %v80_v30  ;;  %311 = vmatprep.subr.bf16.mxu0 %v58_v31  ;;  %v104_v32 = vsel %vm102_vm2, %v80_v30, 0 }
  0x91   :  { %306 = vmatpush3.bf16.msra.mxu1 %v104_v32  ;;  %312 = vmatpush3.bf16.msra.mxu0 %v58_v31 }
  0x94   :  { %308 = vmatmul.mubr.msk.bf16.vlgmr.msra.gmra.mrb[0].mxu1 %vm95_vm1, %v94_v33  ;;  %314 = vmatmul.mubr.msk.bf16.vlgmr.msra.gmra.mrb[0].mxu0 %vm155_vm0, %v327_v8 }
 0x167   :  { %v309_v34 = vpop.f32.mrb[0].mxu1  ;;  %v315_v35 = vpop.f32.mrb[0].mxu0 }
 0x168   :  { %v205_v36 = vadd.f32 %v315_v35, %v309_v34  ;;  %v140_v37 = vpop.f32.mrb[1].mxu1  ;;  %v196_v38 = vpop.f32.mrb[1].mxu0 }
 0x169   :  { %v197_v39 = vadd.f32 %v196_v38, %v140_v37  ;;  %v310_v40 = vpop.f32.mrb[2].mxu1  ;;  %v316_v41 = vpop.f32.mrb[2].mxu0 }
 0x16a   :  { %v293_v42 = vpack.c.bf16 %v205_v36, %v205_v36  ;;  %v208_v43 = vadd.f32 %v316_v41, %v310_v40  ;;  %v143_v44 = vpop.f32.mrb[3].mxu1  ;;  %v199_v45 = vpop.f32.mrb[3].mxu0  ;;  %v238_v46 = vsel %vm95_vm1, %v205_v36, 0.0  ;;  %v251_v55 = vmul.f32 %v205_v36, %v205_v36 }
 0x16b   :  { %v291_v47 = vpack.c.bf16 %v197_v39, %v197_v39  ;;  %v200_v48 = vadd.f32 %v199_v45, %v143_v44  ;;  %239 = vadd.xlane.f32.xlu0 %v238_v46  ;;  %v249_v52 = vmul.f32 %v197_v39, %v197_v39  ;;  %v232_v53 = vsel %vm95_vm1, %v197_v39, 0.0 }
 0x16c   :  { %230 = vst.msk [vmem:[%s465_s5 + $0x8] sm:$0xf] %vm227_vm3, %v293_v42  ;;  %v294_v49 = vpack.c.bf16 %v208_v43, %v208_v43  ;;  %v241_v56 = vsel %vm95_vm1, %v208_v43, 0.0  ;;  %v259_v58 = vsel %vm95_vm1, %v251_v55, 0.0  ;;  %v252_v60 = vmul.f32 %v208_v43, %v208_v43 }
 0x16d   :  { %228 = vst.msk [vmem:[%s465_s5] sm:$0xf] %vm227_vm3, %v291_v47  ;;  %v292_v50 = vpack.c.bf16 %v200_v48, %v200_v48  ;;  %v235_v51 = vsel %vm95_vm1, %v200_v48, 0.0  ;;  %v253_v54 = vsel %vm95_vm1, %v249_v52, 0.0  ;;  %v250_v57 = vmul.f32 %v200_v48, %v200_v48 }
 0x16e   :  { %231 = vst.msk [vmem:[%s465_s5 + $0xc] sm:$0xf] %vm227_vm3, %v294_v49  ;;  %236 = vadd.xlane.f32.xlu1 %v235_v51  ;;  %v262_v61 = vsel %vm95_vm1, %v252_v60, 0.0 }
 0x16f   :  { %229 = vst.msk [vmem:[%s465_s5 + $0x4] sm:$0xf] %vm227_vm3, %v292_v50  ;;  %233 = vadd.xlane.f32.xlu0 %v232_v53  ;;  %v256_v59 = vsel %vm95_vm1, %v250_v57, 0.0 }
 0x172   :  { %254 = vadd.xlane.f32.xlu1 %v253_v54 }
 0x173   :  { %242 = vadd.xlane.f32.xlu0 %v241_v56 }
 0x176   :  { %260 = vadd.xlane.f32.xlu1 %v259_v58 }
 0x177   :  { %257 = vadd.xlane.f32.xlu0 %v256_v59 }
 0x17b   :  { %263 = vadd.xlane.f32.xlu0 %v262_v61 }
 0x1f8   :  { %v240_v62 = vpop.xlane.xlu0 %239 }
 0x1f9   :  { %247 = vst.msk [vmem:[%s466_s6 + $0x10] sm:$0xff] %vm244_vm4, %v240_v62 }
 0x1fb   :  { %v237_v63 = vpop.xlane.xlu1 %236 }
 0x1fc   :  { %246 = vst.msk [vmem:[%s466_s6 + $0x8] sm:$0xff] %vm244_vm4, %v237_v63  ;;  %v234_v0 = vpop.xlane.xlu0 %233 }
 0x1fd   :  { %245 = vst.msk [vmem:[%s466_s6] sm:$0xff] %vm244_vm4, %v234_v0 }
 0x1ff   :  { %v255_v1 = vpop.xlane.xlu1 %254 }
 0x200   :  { %265 = vst.msk [vmem:[%s467_s7] sm:$0xff] %vm244_vm4, %v255_v1  ;;  %v243_v2 = vpop.xlane.xlu0 %242 }
 0x201   :  { %248 = vst.msk [vmem:[%s466_s6 + $0x18] sm:$0xff] %vm244_vm4, %v243_v2 }
 0x203   :  { %v261_v3 = vpop.xlane.xlu1 %260 }
 0x204   :  { %267 = vst.msk [vmem:[%s467_s7 + $0x10] sm:$0xff] %vm244_vm4, %v261_v3  ;;  %v258_v4 = vpop.xlane.xlu0 %257 }
 0x205   :  { %266 = vst.msk [vmem:[%s467_s7 + $0x8] sm:$0xff] %vm244_vm4, %v258_v4 }
 0x208   :  { %v264_v5 = vpop.xlane.xlu0 %263 }
 0x209   :  { %268 = vst.msk [vmem:[%s467_s7 + $0x18] sm:$0xff] %vm244_vm4, %v264_v5 }

</bundles_post_ra>
